<compile_context>
chip_gen: v7x
topology: tpu7x:2x2x1
jax: 0.10.0
libtpu: 0.0.40
codegen_flags: <defaults>
</compile_context>

<pallas_src>
import jax
import jax.numpy as jnp
from jax.experimental import pallas as pl
from jax.experimental.pallas import tpu as pltpu

NUM_CLASSES = 10
BN_EPS = 1e-5


def _pool_windows(ref, b, stride, width):
    """Max over the 2x2 window {p, p+1, p+stride, p+stride+1} at every flat
    position p of sample b (activations stored row-major with `stride`)."""
    return jnp.maximum(
        jnp.maximum(ref[b, :, pl.ds(0, width)], ref[b, :, pl.ds(1, width)]),
        jnp.maximum(ref[b, :, pl.ds(stride, width)],
                    ref[b, :, pl.ds(stride + 1, width)]))


def lenet_kernel(x_ref,
                 w1_ref, b1_ref, g1_ref, be1_ref, m1_ref, sel1_ref,
                 w2_ref, b2_ref, g2_ref, be2_ref, m2_ref, sel2_ref,
                 f1w_ref, f1b_ref, f2w_ref, f2b_ref, f3w_ref, f3b_ref,
                 out_ref,
                 col1, a1, p1s, col2, a2, p2s, feat):
    B = x_ref.shape[0]
    f32 = jnp.float32

    # Zero the K-padding rows of the im2col scratches once (weight pad rows
    # then multiply defined zeros, never uninitialized VMEM).
    col1[pl.ds(25, 7), :] = jnp.zeros((7, 896), f32)
    col2[pl.ds(150, 10), :] = jnp.zeros((10, 160), f32)

    w1 = w1_ref[...]          # (8, 32)
    b1 = b1_ref[...]          # (8, 1)
    w2 = w2_ref[...]          # (16, 160)
    b2 = b2_ref[...]          # (16, 1)
    mask1 = m1_ref[...]       # (1, 896): 1.0 where the flat column is a real pixel
    mask2 = m2_ref[...]       # (1, 160)

    # ---- pass 1: conv1 (lane-dense im2col + one MXU matmul per sample),
    #              accumulate BN1 batch statistics ---------------------------
    s1 = jnp.zeros((8, 1), f32)
    ss1 = jnp.zeros((8, 1), f32)
    for b in range(B):
        for di in range(5):
            for dj in range(5):
                # Each tap is ONE full-width (1, 896) row store.
                col1[pl.ds(di * 5 + dj, 1), :] = \
                    x_ref[pl.ds(b, 1), pl.ds(di * 32 + dj, 896)]
        # (Cout, K) @ (K, M): (8, 32) @ (32, 896) -> lane-dense (8, 896)
        h1 = jnp.dot(w1, col1[...], preferred_element_type=f32) + b1
        a1[b] = h1
        hm = h1 * mask1
        s1 = s1 + jnp.sum(hm, axis=1, keepdims=True)
        ss1 = ss1 + jnp.sum(hm * h1, axis=1, keepdims=True)

    inv_n1 = 1.0 / float(B * 28 * 28)
    mu1 = s1 * inv_n1
    var1 = ss1 * inv_n1 - mu1 * mu1                        # biased train-mode var
    scale1 = g1_ref[...] * jax.lax.rsqrt(var1 + BN_EPS)    # (8, 1)
    shift1 = be1_ref[...] - mu1 * scale1

    # ---- pass 2: BN1 + ReLU, maxpool1 (pair-max + selection matmul),
    #              conv2 im2col + matmul, accumulate BN2 statistics ----------
    s2 = jnp.zeros((16, 1), f32)
    ss2 = jnp.zeros((16, 1), f32)
    for b in range(B):
        a1[b] = jnp.maximum(a1[b] * scale1 + shift1, 0.0)        # lane-dense BN+ReLU
        m = _pool_windows(a1, b, 32, 863)                        # (8, 863)
        # Compact the 14x14 even anchors into a (8, 256) flat layout (stride 16)
        # with a 0/1 selection matmul (keeps pooling off any lane-strided path).
        p1s[...] = jnp.dot(m, sel1_ref[...], preferred_element_type=f32)
        for di in range(5):
            for dj in range(5):
                # One (6, 160) lane-dense block store per tap.
                col2[pl.ds((di * 5 + dj) * 6, 6), :] = \
                    p1s[pl.ds(0, 6), pl.ds(di * 16 + dj, 160)]
        # (16, 160) @ (160, 160) -> (16, 160)
        h2 = jnp.dot(w2, col2[...], preferred_element_type=f32) + b2
        a2[b] = h2
        hm = h2 * mask2
        s2 = s2 + jnp.sum(hm, axis=1, keepdims=True)
        ss2 = ss2 + jnp.sum(hm * h2, axis=1, keepdims=True)

    inv_n2 = 1.0 / float(B * 10 * 10)
    mu2 = s2 * inv_n2
    var2 = ss2 * inv_n2 - mu2 * mu2
    scale2 = g2_ref[...] * jax.lax.rsqrt(var2 + BN_EPS)     # (16, 1)
    shift2 = be2_ref[...] - mu2 * scale2

    # ---- pass 3: BN2 + ReLU, maxpool2, flatten into (B, 512) ----------------
    for b in range(B):
        a2[b] = jnp.maximum(a2[b] * scale2 + shift2, 0.0)
        m = _pool_windows(a2, b, 16, 143)                        # (16, 143)
        p2s[...] = jnp.dot(m, sel2_ref[...], preferred_element_type=f32)  # (16, 32)
        for c in range(16):   # route channel c to lanes [c*32, c*32 + 32)
            feat[pl.ds(b, 1), pl.ds(c * 32, 32)] = p2s[pl.ds(c, 1), :]

    # ---- fc1 / fc2 / fc3: zero-padded, lane-dense 128-wide matmuls ----------
    h3 = jnp.dot(feat[...], f1w_ref[...], preferred_element_type=f32) + f1b_ref[...]
    h4 = jnp.dot(h3, f2w_ref[...], preferred_element_type=f32) + f2b_ref[...]
    out_ref[...] = jnp.dot(h4, f3w_ref[...], preferred_element_type=f32) + f3b_ref[...]


def init_params(key):
    """Deterministic synthetic parameters, PyTorch-convention shapes."""
    ks = jax.random.split(key, 10)

    def unif(k, shape, fan_in):
        bound = 1.0 / (fan_in ** 0.5)
        return jax.random.uniform(k, shape, jnp.float32, -bound, bound)

    return {
        "conv1_w": unif(ks[0], (6, 1, 5, 5), 25),
        "conv1_b": unif(ks[1], (6,), 25),
        "conv2_w": unif(ks[2], (16, 6, 5, 5), 150),
        "conv2_b": unif(ks[3], (16,), 150),
        "fc1_w": unif(ks[4], (120, 400), 400),
        "fc1_b": unif(ks[5], (120,), 400),
        "fc2_w": unif(ks[6], (84, 120), 120),
        "fc2_b": unif(ks[7], (84,), 120),
        "fc3_w": unif(ks[8], (NUM_CLASSES, 84), 84),
        "fc3_b": unif(ks[9], (NUM_CLASSES,), 84),
        "bn1_g": jnp.ones((6,), jnp.float32),
        "bn1_b": jnp.zeros((6,), jnp.float32),
        "bn2_g": jnp.ones((16,), jnp.float32),
        "bn2_b": jnp.zeros((16,), jnp.float32),
    }


def make_kernel_params(p):
    """Host-side layout plumbing: pad/permute PyTorch params to the kernel's
    lane-dense (Cout, K) layouts and build the pooling-selection / BN-mask
    constants."""
    f32 = jnp.float32
    # conv1: (6,1,5,5) -> (Cout 6->8, K 25->32), K index = di*5 + dj.
    w1p = jnp.zeros((8, 32), f32).at[:6, :25].set(p["conv1_w"].reshape(6, 25))
    b1p = jnp.zeros((8, 1), f32).at[:6, 0].set(p["conv1_b"])
    g1p = jnp.ones((8, 1), f32).at[:6, 0].set(p["bn1_g"])
    be1p = jnp.zeros((8, 1), f32).at[:6, 0].set(p["bn1_b"])
    # conv2: (16,6,5,5) -> (16, K 150->160), K index = (di*5+dj)*6 + cin.
    w2p = jnp.zeros((16, 160), f32).at[:, :150].set(
        jnp.transpose(p["conv2_w"], (0, 2, 3, 1)).reshape(16, 150))
    b2p = p["conv2_b"].reshape(16, 1).astype(f32)
    g2p = p["bn2_g"].reshape(16, 1).astype(f32)
    be2p = p["bn2_b"].reshape(16, 1).astype(f32)
    # BN-stat masks over the flat conv-output rows (row strides 32 / 16).
    mask1 = (jnp.arange(896) % 32 < 28).astype(f32).reshape(1, 896)
    mask2 = (jnp.arange(160) % 16 < 10).astype(f32).reshape(1, 160)
    # Pool selection matrices: pick the 2x2-window max anchored at even (y, x)
    # and place it at the next stage's flat position.
    yy, xx = jnp.meshgrid(jnp.arange(14), jnp.arange(14), indexing="ij")
    sel1 = jnp.zeros((863, 256), f32).at[
        (64 * yy + 2 * xx).reshape(-1), (16 * yy + xx).reshape(-1)].set(1.0)
    yy, xx = jnp.meshgrid(jnp.arange(5), jnp.arange(5), indexing="ij")
    sel2 = jnp.zeros((143, 32), f32).at[
        (32 * yy + 2 * xx).reshape(-1), (5 * yy + xx).reshape(-1)].set(1.0)
    # fc1: PyTorch flattens (c, h, w); kernel feat layout is c*32 + (h*5 + w).
    f1 = p["fc1_w"].T.reshape(16, 25, 120)                     # [c, hw, n]
    f1wp = jnp.zeros((512, 128), f32).at[:, :120].set(
        jnp.pad(f1, ((0, 0), (0, 7), (0, 0))).reshape(512, 120))
    f1bp = jnp.zeros((1, 128), f32).at[0, :120].set(p["fc1_b"])
    f2wp = jnp.zeros((128, 128), f32).at[:120, :84].set(p["fc2_w"].T)
    f2bp = jnp.zeros((1, 128), f32).at[0, :84].set(p["fc2_b"])
    f3wp = jnp.zeros((128, 128), f32).at[:84, :NUM_CLASSES].set(p["fc3_w"].T)
    f3bp = jnp.zeros((1, 128), f32).at[0, :NUM_CLASSES].set(p["fc3_b"])
    return (w1p, b1p, g1p, be1p, mask1, sel1,
            w2p, b2p, g2p, be2p, mask2, sel2,
            f1wp, f1bp, f2wp, f2bp, f3wp, f3bp)


@jax.jit
def lenet_forward(x_nchw, kparams):
    B = x_nchw.shape[0]
    # Squeeze the C=1 dim and flatten spatial onto the lane axis; pad the row
    # so every im2col tap window (offset up to 132, width 896) stays in bounds.
    x = jnp.pad(x_nchw.reshape(B, 32 * 32).astype(jnp.float32), ((0, 0), (0, 128)))
    vmem = pl.BlockSpec(memory_space=pltpu.MemorySpace.VMEM)
    args = (x,) + tuple(kparams)
    # TODO(synk): for batches that exceed VMEM, move x/a1/a2 to pl.ANY and
    # double-buffer DMA batch chunks (the two-pass BN is already structured for
    # it); on v7x, split the batch over the two TensorCores with a core-parallel
    # grid and combine BN partial sums through a shared buffer.
    out = pl.pallas_call(
        lenet_kernel,
        out_shape=jax.ShapeDtypeStruct((B, 128), jnp.float32),
        in_specs=[vmem] * len(args),
        out_specs=vmem,
        scratch_shapes=[
            pltpu.VMEM((32, 896), jnp.float32),     # col1: conv1 im2col (reused per sample)
            pltpu.VMEM((B, 8, 896), jnp.float32),   # a1:   conv1 pre/post-BN activations
            pltpu.VMEM((8, 256), jnp.float32),      # p1s:  pooled conv1 activations
            pltpu.VMEM((160, 160), jnp.float32),    # col2: conv2 im2col (reused per sample)
            pltpu.VMEM((B, 16, 160), jnp.float32),  # a2:   conv2 pre/post-BN activations
            pltpu.VMEM((16, 32), jnp.float32),      # p2s:  pooled conv2 activations
            pltpu.VMEM((B, 512), jnp.float32),      # feat: flattened fc1 input
        ],
        compiler_params=pltpu.CompilerParams(vmem_limit_bytes=32 * 1024 * 1024),
    )(*args)
    return out[:, :NUM_CLASSES]


def lenet_reference(x_nchw, p):
    """Pure-JAX reference mirroring the PyTorch module (train-mode BN)."""
    hi = jax.lax.Precision.HIGHEST
    x = jnp.transpose(x_nchw, (0, 2, 3, 1)).astype(jnp.float32)      # NHWC

    def conv(h, w_oihw, b):
        w = jnp.transpose(w_oihw, (2, 3, 1, 0))                      # HWIO
        return jax.lax.conv_general_dilated(
            h, w, (1, 1), "VALID",
            dimension_numbers=("NHWC", "HWIO", "NHWC"), precision=hi) + b

    def bn(h, g, b):
        mu = jnp.mean(h, axis=(0, 1, 2), keepdims=True)
        var = jnp.mean((h - mu) ** 2, axis=(0, 1, 2), keepdims=True)
        return (h - mu) * jax.lax.rsqrt(var + BN_EPS) * g + b

    def pool(h):
        return jax.lax.reduce_window(h, -jnp.inf, jax.lax.max,
                                     (1, 2, 2, 1), (1, 2, 2, 1), "VALID")

    h = pool(jnp.maximum(bn(conv(x, p["conv1_w"], p["conv1_b"]),
                            p["bn1_g"], p["bn1_b"]), 0.0))
    h = pool(jnp.maximum(bn(conv(h, p["conv2_w"], p["conv2_b"]),
                            p["bn2_g"], p["bn2_b"]), 0.0))
    feat = jnp.transpose(h, (0, 3, 1, 2)).reshape(h.shape[0], -1)    # (c,h,w) flatten
    h = jnp.dot(feat, p["fc1_w"].T, precision=hi) + p["fc1_b"]
    h = jnp.dot(h, p["fc2_w"].T, precision=hi) + p["fc2_b"]
    return jnp.dot(h, p["fc3_w"].T, precision=hi) + p["fc3_b"]


if __name__ == "__main__":
    key = jax.random.PRNGKey(0)
    k_x, k_p = jax.random.split(key)

    B = 2
    # LeNet-5 geometry requires 1x32x32 input (fc1 expects 16*5*5 features).
    x = jax.random.normal(k_x, (B, 1, 32, 32), jnp.float32)          # NCHW like PyTorch

    params = init_params(k_p)
    kparams = make_kernel_params(params)

    out = jax.block_until_ready(lenet_forward(x, kparams))
    assert out.shape == (B, NUM_CLASSES)

    ref = lenet_reference(x, params)
    # 5x tighter than before; margin left for MXU f32 pass decomposition.
    assert bool(jnp.allclose(out, ref, rtol=2e-3, atol=2e-3)), "mismatch vs JAX reference"

    print("KERNEL_OK")
</pallas_src>

<mosaic_0001>
module attributes {stable_mosaic.version = 11 : i64} {
  func.func @lenet_kernel(%arg0: memref<2x1152xf32, #tpu.memory_space<vmem>>, %arg1: memref<8x32xf32, #tpu.memory_space<vmem>>, %arg2: memref<8x1xf32, #tpu.memory_space<vmem>>, %arg3: memref<8x1xf32, #tpu.memory_space<vmem>>, %arg4: memref<8x1xf32, #tpu.memory_space<vmem>>, %arg5: memref<1x896xf32, #tpu.memory_space<vmem>>, %arg6: memref<863x256xf32, #tpu.memory_space<vmem>>, %arg7: memref<16x160xf32, #tpu.memory_space<vmem>>, %arg8: memref<16x1xf32, #tpu.memory_space<vmem>>, %arg9: memref<16x1xf32, #tpu.memory_space<vmem>>, %arg10: memref<16x1xf32, #tpu.memory_space<vmem>>, %arg11: memref<1x160xf32, #tpu.memory_space<vmem>>, %arg12: memref<143x32xf32, #tpu.memory_space<vmem>>, %arg13: memref<512x128xf32, #tpu.memory_space<vmem>>, %arg14: memref<1x128xf32, #tpu.memory_space<vmem>>, %arg15: memref<128x128xf32, #tpu.memory_space<vmem>>, %arg16: memref<1x128xf32, #tpu.memory_space<vmem>>, %arg17: memref<128x128xf32, #tpu.memory_space<vmem>>, %arg18: memref<1x128xf32, #tpu.memory_space<vmem>>, %arg19: memref<2x128xf32, #tpu.memory_space<vmem>>, %arg20: memref<32x896xf32, #tpu.memory_space<vmem>>, %arg21: memref<2x8x896xf32, #tpu.memory_space<vmem>>, %arg22: memref<8x256xf32, #tpu.memory_space<vmem>>, %arg23: memref<160x160xf32, #tpu.memory_space<vmem>>, %arg24: memref<2x16x160xf32, #tpu.memory_space<vmem>>, %arg25: memref<16x32xf32, #tpu.memory_space<vmem>>, %arg26: memref<2x512xf32, #tpu.memory_space<vmem>>) attributes {dimension_semantics = [], scalar_prefetch = 0 : i64, scratch_operands = 7 : i64, tpu.core_type = #tpu.core_type<tc>} {
    %cst = arith.constant 0.000000e+00 : f32
    %0 = vector.broadcast %cst : f32 to vector<7x896xf32>
    %c25 = arith.constant 25 : index
    %c0 = arith.constant 0 : index
    %1 = vector.load %arg20[%c25, %c0] : memref<32x896xf32, #tpu.memory_space<vmem>>, vector<7x896xf32>
    tpu.vector_store %arg20[%c25, %c0], %0 {strides = array<i32>} : memref<32x896xf32, #tpu.memory_space<vmem>>, vector<7x896xf32>,
    %cst_0 = arith.constant 0.000000e+00 : f32
    %2 = vector.broadcast %cst_0 : f32 to vector<10x160xf32>
    %c150 = arith.constant 150 : index
    %c0_1 = arith.constant 0 : index
    %3 = vector.load %arg23[%c150, %c0_1] : memref<160x160xf32, #tpu.memory_space<vmem>>, vector<10x160xf32>
    tpu.vector_store %arg23[%c150, %c0_1], %2 {strides = array<i32>} : memref<160x160xf32, #tpu.memory_space<vmem>>, vector<10x160xf32>,
    %c0_2 = arith.constant 0 : index
    %c0_3 = arith.constant 0 : index
    %4 = vector.load %arg1[%c0_2, %c0_3] : memref<8x32xf32, #tpu.memory_space<vmem>>, vector<8x32xf32>
    %c0_4 = arith.constant 0 : index
    %c0_5 = arith.constant 0 : index
    %5 = vector.load %arg2[%c0_4, %c0_5] : memref<8x1xf32, #tpu.memory_space<vmem>>, vector<8x1xf32>
    %c0_6 = arith.constant 0 : index
    %c0_7 = arith.constant 0 : index
    %6 = vector.load %arg7[%c0_6, %c0_7] : memref<16x160xf32, #tpu.memory_space<vmem>>, vector<16x160xf32>
    %c0_8 = arith.constant 0 : index
    %c0_9 = arith.constant 0 : index
    %7 = vector.load %arg8[%c0_8, %c0_9] : memref<16x1xf32, #tpu.memory_space<vmem>>, vector<16x1xf32>
    %c0_10 = arith.constant 0 : index
    %c0_11 = arith.constant 0 : index
    %8 = vector.load %arg5[%c0_10, %c0_11] : memref<1x896xf32, #tpu.memory_space<vmem>>, vector<1x896xf32>
    %c0_12 = arith.constant 0 : index
    %c0_13 = arith.constant 0 : index
    %9 = vector.load %arg11[%c0_12, %c0_13] : memref<1x160xf32, #tpu.memory_space<vmem>>, vector<1x160xf32>
    %cst_14 = arith.constant 0.000000e+00 : f32
    %10 = vector.broadcast %cst_14 : f32 to vector<8x1xf32>
    %cst_15 = arith.constant 0.000000e+00 : f32
    %11 = vector.broadcast %cst_15 : f32 to vector<8x1xf32>
    %c0_16 = arith.constant 0 : index
    %c0_17 = arith.constant 0 : index
    %12 = vector.load %arg0[%c0_16, %c0_17] : memref<2x1152xf32, #tpu.memory_space<vmem>>, vector<1x896xf32>
    %c0_18 = arith.constant 0 : index
    %c0_19 = arith.constant 0 : index
    %13 = vector.load %arg20[%c0_18, %c0_19] : memref<32x896xf32, #tpu.memory_space<vmem>>, vector<1x896xf32>
    tpu.vector_store %arg20[%c0_18, %c0_19], %12 {strides = array<i32>} : memref<32x896xf32, #tpu.memory_space<vmem>>, vector<1x896xf32>,
    %c0_20 = arith.constant 0 : index
    %c1 = arith.constant 1 : index
    %14 = vector.load %arg0[%c0_20, %c1] : memref<2x1152xf32, #tpu.memory_space<vmem>>, vector<1x896xf32>
    %c1_21 = arith.constant 1 : index
    %c0_22 = arith.constant 0 : index
    %15 = vector.load %arg20[%c1_21, %c0_22] : memref<32x896xf32, #tpu.memory_space<vmem>>, vector<1x896xf32>
    tpu.vector_store %arg20[%c1_21, %c0_22], %14 {strides = array<i32>} : memref<32x896xf32, #tpu.memory_space<vmem>>, vector<1x896xf32>,
    %c0_23 = arith.constant 0 : index
    %c2 = arith.constant 2 : index
    %16 = vector.load %arg0[%c0_23, %c2] : memref<2x1152xf32, #tpu.memory_space<vmem>>, vector<1x896xf32>
    %c2_24 = arith.constant 2 : index
    %c0_25 = arith.constant 0 : index
    %17 = vector.load %arg20[%c2_24, %c0_25] : memref<32x896xf32, #tpu.memory_space<vmem>>, vector<1x896xf32>
    tpu.vector_store %arg20[%c2_24, %c0_25], %16 {strides = array<i32>} : memref<32x896xf32, #tpu.memory_space<vmem>>, vector<1x896xf32>,
    %c0_26 = arith.constant 0 : index
    %c3 = arith.constant 3 : index
    %18 = vector.load %arg0[%c0_26, %c3] : memref<2x1152xf32, #tpu.memory_space<vmem>>, vector<1x896xf32>
    %c3_27 = arith.constant 3 : index
    %c0_28 = arith.constant 0 : index
    %19 = vector.load %arg20[%c3_27, %c0_28] : memref<32x896xf32, #tpu.memory_space<vmem>>, vector<1x896xf32>
    tpu.vector_store %arg20[%c3_27, %c0_28], %18 {strides = array<i32>} : memref<32x896xf32, #tpu.memory_space<vmem>>, vector<1x896xf32>,
    %c0_29 = arith.constant 0 : index
    %c4 = arith.constant 4 : index
    %20 = vector.load %arg0[%c0_29, %c4] : memref<2x1152xf32, #tpu.memory_space<vmem>>, vector<1x896xf32>
    %c4_30 = arith.constant 4 : index
    %c0_31 = arith.constant 0 : index
    %21 = vector.load %arg20[%c4_30, %c0_31] : memref<32x896xf32, #tpu.memory_space<vmem>>, vector<1x896xf32>
    tpu.vector_store %arg20[%c4_30, %c0_31], %20 {strides = array<i32>} : memref<32x896xf32, #tpu.memory_space<vmem>>, vector<1x896xf32>,
    %c0_32 = arith.constant 0 : index
    %c32 = arith.constant 32 : index
    %22 = vector.load %arg0[%c0_32, %c32] : memref<2x1152xf32, #tpu.memory_space<vmem>>, vector<1x896xf32>
    %c5 = arith.constant 5 : index
    %c0_33 = arith.constant 0 : index
    %23 = vector.load %arg20[%c5, %c0_33] : memref<32x896xf32, #tpu.memory_space<vmem>>, vector<1x896xf32>
    tpu.vector_store %arg20[%c5, %c0_33], %22 {strides = array<i32>} : memref<32x896xf32, #tpu.memory_space<vmem>>, vector<1x896xf32>,
    %c0_34 = arith.constant 0 : index
    %c33 = arith.constant 33 : index
    %24 = vector.load %arg0[%c0_34, %c33] : memref<2x1152xf32, #tpu.memory_space<vmem>>, vector<1x896xf32>
    %c6 = arith.constant 6 : index
    %c0_35 = arith.constant 0 : index
    %25 = vector.load %arg20[%c6, %c0_35] : memref<32x896xf32, #tpu.memory_space<vmem>>, vector<1x896xf32>
    tpu.vector_store %arg20[%c6, %c0_35], %24 {strides = array<i32>} : memref<32x896xf32, #tpu.memory_space<vmem>>, vector<1x896xf32>,
    %c0_36 = arith.constant 0 : index
    %c34 = arith.constant 34 : index
    %26 = vector.load %arg0[%c0_36, %c34] : memref<2x1152xf32, #tpu.memory_space<vmem>>, vector<1x896xf32>
    %c7 = arith.constant 7 : index
    %c0_37 = arith.constant 0 : index
    %27 = vector.load %arg20[%c7, %c0_37] : memref<32x896xf32, #tpu.memory_space<vmem>>, vector<1x896xf32>
    tpu.vector_store %arg20[%c7, %c0_37], %26 {strides = array<i32>} : memref<32x896xf32, #tpu.memory_space<vmem>>, vector<1x896xf32>,
    %c0_38 = arith.constant 0 : index
    %c35 = arith.constant 35 : index
    %28 = vector.load %arg0[%c0_38, %c35] : memref<2x1152xf32, #tpu.memory_space<vmem>>, vector<1x896xf32>
    %c8 = arith.constant 8 : index
    %c0_39 = arith.constant 0 : index
    %29 = vector.load %arg20[%c8, %c0_39] : memref<32x896xf32, #tpu.memory_space<vmem>>, vector<1x896xf32>
    tpu.vector_store %arg20[%c8, %c0_39], %28 {strides = array<i32>} : memref<32x896xf32, #tpu.memory_space<vmem>>, vector<1x896xf32>,
    %c0_40 = arith.constant 0 : index
    %c36 = arith.constant 36 : index
    %30 = vector.load %arg0[%c0_40, %c36] : memref<2x1152xf32, #tpu.memory_space<vmem>>, vector<1x896xf32>
    %c9 = arith.constant 9 : index
    %c0_41 = arith.constant 0 : index
    %31 = vector.load %arg20[%c9, %c0_41] : memref<32x896xf32, #tpu.memory_space<vmem>>, vector<1x896xf32>
    tpu.vector_store %arg20[%c9, %c0_41], %30 {strides = array<i32>} : memref<32x896xf32, #tpu.memory_space<vmem>>, vector<1x896xf32>,
    %c0_42 = arith.constant 0 : index
    %c64 = arith.constant 64 : index
    %32 = vector.load %arg0[%c0_42, %c64] : memref<2x1152xf32, #tpu.memory_space<vmem>>, vector<1x896xf32>
    %c10 = arith.constant 10 : index
    %c0_43 = arith.constant 0 : index
    %33 = vector.load %arg20[%c10, %c0_43] : memref<32x896xf32, #tpu.memory_space<vmem>>, vector<1x896xf32>
    tpu.vector_store %arg20[%c10, %c0_43], %32 {strides = array<i32>} : memref<32x896xf32, #tpu.memory_space<vmem>>, vector<1x896xf32>,
    %c0_44 = arith.constant 0 : index
    %c65 = arith.constant 65 : index
    %34 = vector.load %arg0[%c0_44, %c65] : memref<2x1152xf32, #tpu.memory_space<vmem>>, vector<1x896xf32>
    %c11 = arith.constant 11 : index
    %c0_45 = arith.constant 0 : index
    %35 = vector.load %arg20[%c11, %c0_45] : memref<32x896xf32, #tpu.memory_space<vmem>>, vector<1x896xf32>
    tpu.vector_store %arg20[%c11, %c0_45], %34 {strides = array<i32>} : memref<32x896xf32, #tpu.memory_space<vmem>>, vector<1x896xf32>,
    %c0_46 = arith.constant 0 : index
    %c66 = arith.constant 66 : index
    %36 = vector.load %arg0[%c0_46, %c66] : memref<2x1152xf32, #tpu.memory_space<vmem>>, vector<1x896xf32>
    %c12 = arith.constant 12 : index
    %c0_47 = arith.constant 0 : index
    %37 = vector.load %arg20[%c12, %c0_47] : memref<32x896xf32, #tpu.memory_space<vmem>>, vector<1x896xf32>
    tpu.vector_store %arg20[%c12, %c0_47], %36 {strides = array<i32>} : memref<32x896xf32, #tpu.memory_space<vmem>>, vector<1x896xf32>,
    %c0_48 = arith.constant 0 : index
    %c67 = arith.constant 67 : index
    %38 = vector.load %arg0[%c0_48, %c67] : memref<2x1152xf32, #tpu.memory_space<vmem>>, vector<1x896xf32>
    %c13 = arith.constant 13 : index
    %c0_49 = arith.constant 0 : index
    %39 = vector.load %arg20[%c13, %c0_49] : memref<32x896xf32, #tpu.memory_space<vmem>>, vector<1x896xf32>
    tpu.vector_store %arg20[%c13, %c0_49], %38 {strides = array<i32>} : memref<32x896xf32, #tpu.memory_space<vmem>>, vector<1x896xf32>,
    %c0_50 = arith.constant 0 : index
    %c68 = arith.constant 68 : index
    %40 = vector.load %arg0[%c0_50, %c68] : memref<2x1152xf32, #tpu.memory_space<vmem>>, vector<1x896xf32>
    %c14 = arith.constant 14 : index
    %c0_51 = arith.constant 0 : index
    %41 = vector.load %arg20[%c14, %c0_51] : memref<32x896xf32, #tpu.memory_space<vmem>>, vector<1x896xf32>
    tpu.vector_store %arg20[%c14, %c0_51], %40 {strides = array<i32>} : memref<32x896xf32, #tpu.memory_space<vmem>>, vector<1x896xf32>,
    %c0_52 = arith.constant 0 : index
    %c96 = arith.constant 96 : index
    %42 = vector.load %arg0[%c0_52, %c96] : memref<2x1152xf32, #tpu.memory_space<vmem>>, vector<1x896xf32>
    %c15 = arith.constant 15 : index
    %c0_53 = arith.constant 0 : index
    %43 = vector.load %arg20[%c15, %c0_53] : memref<32x896xf32, #tpu.memory_space<vmem>>, vector<1x896xf32>
    tpu.vector_store %arg20[%c15, %c0_53], %42 {strides = array<i32>} : memref<32x896xf32, #tpu.memory_space<vmem>>, vector<1x896xf32>,
    %c0_54 = arith.constant 0 : index
    %c97 = arith.constant 97 : index
    %44 = vector.load %arg0[%c0_54, %c97] : memref<2x1152xf32, #tpu.memory_space<vmem>>, vector<1x896xf32>
    %c16 = arith.constant 16 : index
    %c0_55 = arith.constant 0 : index
    %45 = vector.load %arg20[%c16, %c0_55] : memref<32x896xf32, #tpu.memory_space<vmem>>, vector<1x896xf32>
    tpu.vector_store %arg20[%c16, %c0_55], %44 {strides = array<i32>} : memref<32x896xf32, #tpu.memory_space<vmem>>, vector<1x896xf32>,
    %c0_56 = arith.constant 0 : index
    %c98 = arith.constant 98 : index
    %46 = vector.load %arg0[%c0_56, %c98] : memref<2x1152xf32, #tpu.memory_space<vmem>>, vector<1x896xf32>
    %c17 = arith.constant 17 : index
    %c0_57 = arith.constant 0 : index
    %47 = vector.load %arg20[%c17, %c0_57] : memref<32x896xf32, #tpu.memory_space<vmem>>, vector<1x896xf32>
    tpu.vector_store %arg20[%c17, %c0_57], %46 {strides = array<i32>} : memref<32x896xf32, #tpu.memory_space<vmem>>, vector<1x896xf32>,
    %c0_58 = arith.constant 0 : index
    %c99 = arith.constant 99 : index
    %48 = vector.load %arg0[%c0_58, %c99] : memref<2x1152xf32, #tpu.memory_space<vmem>>, vector<1x896xf32>
    %c18 = arith.constant 18 : index
    %c0_59 = arith.constant 0 : index
    %49 = vector.load %arg20[%c18, %c0_59] : memref<32x896xf32, #tpu.memory_space<vmem>>, vector<1x896xf32>
    tpu.vector_store %arg20[%c18, %c0_59], %48 {strides = array<i32>} : memref<32x896xf32, #tpu.memory_space<vmem>>, vector<1x896xf32>,
    %c0_60 = arith.constant 0 : index
    %c100 = arith.constant 100 : index
    %50 = vector.load %arg0[%c0_60, %c100] : memref<2x1152xf32, #tpu.memory_space<vmem>>, vector<1x896xf32>
    %c19 = arith.constant 19 : index
    %c0_61 = arith.constant 0 : index
    %51 = vector.load %arg20[%c19, %c0_61] : memref<32x896xf32, #tpu.memory_space<vmem>>, vector<1x896xf32>
    tpu.vector_store %arg20[%c19, %c0_61], %50 {strides = array<i32>} : memref<32x896xf32, #tpu.memory_space<vmem>>, vector<1x896xf32>,
    %c0_62 = arith.constant 0 : index
    %c128 = arith.constant 128 : index
    %52 = vector.load %arg0[%c0_62, %c128] : memref<2x1152xf32, #tpu.memory_space<vmem>>, vector<1x896xf32>
    %c20 = arith.constant 20 : index
    %c0_63 = arith.constant 0 : index
    %53 = vector.load %arg20[%c20, %c0_63] : memref<32x896xf32, #tpu.memory_space<vmem>>, vector<1x896xf32>
    tpu.vector_store %arg20[%c20, %c0_63], %52 {strides = array<i32>} : memref<32x896xf32, #tpu.memory_space<vmem>>, vector<1x896xf32>,
    %c0_64 = arith.constant 0 : index
    %c129 = arith.constant 129 : index
    %54 = vector.load %arg0[%c0_64, %c129] : memref<2x1152xf32, #tpu.memory_space<vmem>>, vector<1x896xf32>
    %c21 = arith.constant 21 : index
    %c0_65 = arith.constant 0 : index
    %55 = vector.load %arg20[%c21, %c0_65] : memref<32x896xf32, #tpu.memory_space<vmem>>, vector<1x896xf32>
    tpu.vector_store %arg20[%c21, %c0_65], %54 {strides = array<i32>} : memref<32x896xf32, #tpu.memory_space<vmem>>, vector<1x896xf32>,
    %c0_66 = arith.constant 0 : index
    %c130 = arith.constant 130 : index
    %56 = vector.load %arg0[%c0_66, %c130] : memref<2x1152xf32, #tpu.memory_space<vmem>>, vector<1x896xf32>
    %c22 = arith.constant 22 : index
    %c0_67 = arith.constant 0 : index
    %57 = vector.load %arg20[%c22, %c0_67] : memref<32x896xf32, #tpu.memory_space<vmem>>, vector<1x896xf32>
    tpu.vector_store %arg20[%c22, %c0_67], %56 {strides = array<i32>} : memref<32x896xf32, #tpu.memory_space<vmem>>, vector<1x896xf32>,
    %c0_68 = arith.constant 0 : index
    %c131 = arith.constant 131 : index
    %58 = vector.load %arg0[%c0_68, %c131] : memref<2x1152xf32, #tpu.memory_space<vmem>>, vector<1x896xf32>
    %c23 = arith.constant 23 : index
    %c0_69 = arith.constant 0 : index
    %59 = vector.load %arg20[%c23, %c0_69] : memref<32x896xf32, #tpu.memory_space<vmem>>, vector<1x896xf32>
    tpu.vector_store %arg20[%c23, %c0_69], %58 {strides = array<i32>} : memref<32x896xf32, #tpu.memory_space<vmem>>, vector<1x896xf32>,
    %c0_70 = arith.constant 0 : index
    %c132 = arith.constant 132 : index
    %60 = vector.load %arg0[%c0_70, %c132] : memref<2x1152xf32, #tpu.memory_space<vmem>>, vector<1x896xf32>
    %c24 = arith.constant 24 : index
    %c0_71 = arith.constant 0 : index
    %61 = vector.load %arg20[%c24, %c0_71] : memref<32x896xf32, #tpu.memory_space<vmem>>, vector<1x896xf32>
    tpu.vector_store %arg20[%c24, %c0_71], %60 {strides = array<i32>} : memref<32x896xf32, #tpu.memory_space<vmem>>, vector<1x896xf32>,
    %c0_72 = arith.constant 0 : index
    %c0_73 = arith.constant 0 : index
    %62 = vector.load %arg20[%c0_72, %c0_73] : memref<32x896xf32, #tpu.memory_space<vmem>>, vector<32x896xf32>
    %cst_74 = arith.constant dense<0.000000e+00> : vector<8x896xf32>
    %63 = tpu.matmul %4, %62, %cst_74 {dimension_numbers = #tpu.dot_dimension_numbers<[1], [0], [0], [1], [0, 0, 1, 1], [], []>} : vector<8x32xf32>, vector<32x896xf32>, vector<8x896xf32> -> vector<8x896xf32>
    %64 = vector.broadcast %5 : vector<8x1xf32> to vector<8x896xf32>
    %65 = arith.addf %63, %64 : vector<8x896xf32>
    %c0_75 = arith.constant 0 : index
    %c0_76 = arith.constant 0 : index
    %c0_77 = arith.constant 0 : index
    %66 = vector.load %arg21[%c0_75, %c0_76, %c0_77] : memref<2x8x896xf32, #tpu.memory_space<vmem>>, vector<1x8x896xf32>
    %67 = vector.shape_cast %66 : vector<1x8x896xf32> to vector<8x896xf32>
    %68 = vector.shape_cast %65 : vector<8x896xf32> to vector<1x8x896xf32>
    tpu.vector_store %arg21[%c0_75, %c0_76, %c0_77], %68 {strides = array<i32>} : memref<2x8x896xf32, #tpu.memory_space<vmem>>, vector<1x8x896xf32>,
    %69 = vector.broadcast %8 : vector<1x896xf32> to vector<8x896xf32>
    %70 = arith.mulf %65, %69 : vector<8x896xf32>
    %cst_78 = arith.constant dense<0.000000e+00> : vector<8xf32>
    %71 = vector.multi_reduction <add>, %70, %cst_78 [1] : vector<8x896xf32> to vector<8xf32>
    %72 = vector.shape_cast %71 : vector<8xf32> to vector<8x1xf32>
    %73 = arith.addf %10, %72 : vector<8x1xf32>
    %74 = arith.mulf %70, %65 : vector<8x896xf32>
    %cst_79 = arith.constant dense<0.000000e+00> : vector<8xf32>
    %75 = vector.multi_reduction <add>, %74, %cst_79 [1] : vector<8x896xf32> to vector<8xf32>
    %76 = vector.shape_cast %75 : vector<8xf32> to vector<8x1xf32>
    %77 = arith.addf %11, %76 : vector<8x1xf32>
    %c1_80 = arith.constant 1 : index
    %c0_81 = arith.constant 0 : index
    %78 = vector.load %arg0[%c1_80, %c0_81] : memref<2x1152xf32, #tpu.memory_space<vmem>>, vector<1x896xf32>
    %c0_82 = arith.constant 0 : index
    %c0_83 = arith.constant 0 : index
    %79 = vector.load %arg20[%c0_82, %c0_83] : memref<32x896xf32, #tpu.memory_space<vmem>>, vector<1x896xf32>
    tpu.vector_store %arg20[%c0_82, %c0_83], %78 {strides = array<i32>} : memref<32x896xf32, #tpu.memory_space<vmem>>, vector<1x896xf32>,
    %c1_84 = arith.constant 1 : index
    %c1_85 = arith.constant 1 : index
    %80 = vector.load %arg0[%c1_84, %c1_85] : memref<2x1152xf32, #tpu.memory_space<vmem>>, vector<1x896xf32>
    %c1_86 = arith.constant 1 : index
    %c0_87 = arith.constant 0 : index
    %81 = vector.load %arg20[%c1_86, %c0_87] : memref<32x896xf32, #tpu.memory_space<vmem>>, vector<1x896xf32>
    tpu.vector_store %arg20[%c1_86, %c0_87], %80 {strides = array<i32>} : memref<32x896xf32, #tpu.memory_space<vmem>>, vector<1x896xf32>,
    %c1_88 = arith.constant 1 : index
    %c2_89 = arith.constant 2 : index
    %82 = vector.load %arg0[%c1_88, %c2_89] : memref<2x1152xf32, #tpu.memory_space<vmem>>, vector<1x896xf32>
    %c2_90 = arith.constant 2 : index
    %c0_91 = arith.constant 0 : index
    %83 = vector.load %arg20[%c2_90, %c0_91] : memref<32x896xf32, #tpu.memory_space<vmem>>, vector<1x896xf32>
    tpu.vector_store %arg20[%c2_90, %c0_91], %82 {strides = array<i32>} : memref<32x896xf32, #tpu.memory_space<vmem>>, vector<1x896xf32>,
    %c1_92 = arith.constant 1 : index
    %c3_93 = arith.constant 3 : index
    %84 = vector.load %arg0[%c1_92, %c3_93] : memref<2x1152xf32, #tpu.memory_space<vmem>>, vector<1x896xf32>
    %c3_94 = arith.constant 3 : index
    %c0_95 = arith.constant 0 : index
    %85 = vector.load %arg20[%c3_94, %c0_95] : memref<32x896xf32, #tpu.memory_space<vmem>>, vector<1x896xf32>
    tpu.vector_store %arg20[%c3_94, %c0_95], %84 {strides = array<i32>} : memref<32x896xf32, #tpu.memory_space<vmem>>, vector<1x896xf32>,
    %c1_96 = arith.constant 1 : index
    %c4_97 = arith.constant 4 : index
    %86 = vector.load %arg0[%c1_96, %c4_97] : memref<2x1152xf32, #tpu.memory_space<vmem>>, vector<1x896xf32>
    %c4_98 = arith.constant 4 : index
    %c0_99 = arith.constant 0 : index
    %87 = vector.load %arg20[%c4_98, %c0_99] : memref<32x896xf32, #tpu.memory_space<vmem>>, vector<1x896xf32>
    tpu.vector_store %arg20[%c4_98, %c0_99], %86 {strides = array<i32>} : memref<32x896xf32, #tpu.memory_space<vmem>>, vector<1x896xf32>,
    %c1_100 = arith.constant 1 : index
    %c32_101 = arith.constant 32 : index
    %88 = vector.load %arg0[%c1_100, %c32_101] : memref<2x1152xf32, #tpu.memory_space<vmem>>, vector<1x896xf32>
    %c5_102 = arith.constant 5 : index
    %c0_103 = arith.constant 0 : index
    %89 = vector.load %arg20[%c5_102, %c0_103] : memref<32x896xf32, #tpu.memory_space<vmem>>, vector<1x896xf32>
    tpu.vector_store %arg20[%c5_102, %c0_103], %88 {strides = array<i32>} : memref<32x896xf32, #tpu.memory_space<vmem>>, vector<1x896xf32>,
    %c1_104 = arith.constant 1 : index
    %c33_105 = arith.constant 33 : index
    %90 = vector.load %arg0[%c1_104, %c33_105] : memref<2x1152xf32, #tpu.memory_space<vmem>>, vector<1x896xf32>
    %c6_106 = arith.constant 6 : index
    %c0_107 = arith.constant 0 : index
    %91 = vector.load %arg20[%c6_106, %c0_107] : memref<32x896xf32, #tpu.memory_space<vmem>>, vector<1x896xf32>
    tpu.vector_store %arg20[%c6_106, %c0_107], %90 {strides = array<i32>} : memref<32x896xf32, #tpu.memory_space<vmem>>, vector<1x896xf32>,
    %c1_108 = arith.constant 1 : index
    %c34_109 = arith.constant 34 : index
    %92 = vector.load %arg0[%c1_108, %c34_109] : memref<2x1152xf32, #tpu.memory_space<vmem>>, vector<1x896xf32>
    %c7_110 = arith.constant 7 : index
    %c0_111 = arith.constant 0 : index
    %93 = vector.load %arg20[%c7_110, %c0_111] : memref<32x896xf32, #tpu.memory_space<vmem>>, vector<1x896xf32>
    tpu.vector_store %arg20[%c7_110, %c0_111], %92 {strides = array<i32>} : memref<32x896xf32, #tpu.memory_space<vmem>>, vector<1x896xf32>,
    %c1_112 = arith.constant 1 : index
    %c35_113 = arith.constant 35 : index
    %94 = vector.load %arg0[%c1_112, %c35_113] : memref<2x1152xf32, #tpu.memory_space<vmem>>, vector<1x896xf32>
    %c8_114 = arith.constant 8 : index
    %c0_115 = arith.constant 0 : index
    %95 = vector.load %arg20[%c8_114, %c0_115] : memref<32x896xf32, #tpu.memory_space<vmem>>, vector<1x896xf32>
    tpu.vector_store %arg20[%c8_114, %c0_115], %94 {strides = array<i32>} : memref<32x896xf32, #tpu.memory_space<vmem>>, vector<1x896xf32>,
    %c1_116 = arith.constant 1 : index
    %c36_117 = arith.constant 36 : index
    %96 = vector.load %arg0[%c1_116, %c36_117] : memref<2x1152xf32, #tpu.memory_space<vmem>>, vector<1x896xf32>
    %c9_118 = arith.constant 9 : index
    %c0_119 = arith.constant 0 : index
    %97 = vector.load %arg20[%c9_118, %c0_119] : memref<32x896xf32, #tpu.memory_space<vmem>>, vector<1x896xf32>
    tpu.vector_store %arg20[%c9_118, %c0_119], %96 {strides = array<i32>} : memref<32x896xf32, #tpu.memory_space<vmem>>, vector<1x896xf32>,
    %c1_120 = arith.constant 1 : index
    %c64_121 = arith.constant 64 : index
    %98 = vector.load %arg0[%c1_120, %c64_121] : memref<2x1152xf32, #tpu.memory_space<vmem>>, vector<1x896xf32>
    %c10_122 = arith.constant 10 : index
    %c0_123 = arith.constant 0 : index
    %99 = vector.load %arg20[%c10_122, %c0_123] : memref<32x896xf32, #tpu.memory_space<vmem>>, vector<1x896xf32>
    tpu.vector_store %arg20[%c10_122, %c0_123], %98 {strides = array<i32>} : memref<32x896xf32, #tpu.memory_space<vmem>>, vector<1x896xf32>,
    %c1_124 = arith.constant 1 : index
    %c65_125 = arith.constant 65 : index
    %100 = vector.load %arg0[%c1_124, %c65_125] : memref<2x1152xf32, #tpu.memory_space<vmem>>, vector<1x896xf32>
    %c11_126 = arith.constant 11 : index
    %c0_127 = arith.constant 0 : index
    %101 = vector.load %arg20[%c11_126, %c0_127] : memref<32x896xf32, #tpu.memory_space<vmem>>, vector<1x896xf32>
    tpu.vector_store %arg20[%c11_126, %c0_127], %100 {strides = array<i32>} : memref<32x896xf32, #tpu.memory_space<vmem>>, vector<1x896xf32>,
    %c1_128 = arith.constant 1 : index
    %c66_129 = arith.constant 66 : index
    %102 = vector.load %arg0[%c1_128, %c66_129] : memref<2x1152xf32, #tpu.memory_space<vmem>>, vector<1x896xf32>
    %c12_130 = arith.constant 12 : index
    %c0_131 = arith.constant 0 : index
    %103 = vector.load %arg20[%c12_130, %c0_131] : memref<32x896xf32, #tpu.memory_space<vmem>>, vector<1x896xf32>
    tpu.vector_store %arg20[%c12_130, %c0_131], %102 {strides = array<i32>} : memref<32x896xf32, #tpu.memory_space<vmem>>, vector<1x896xf32>,
    %c1_132 = arith.constant 1 : index
    %c67_133 = arith.constant 67 : index
    %104 = vector.load %arg0[%c1_132, %c67_133] : memref<2x1152xf32, #tpu.memory_space<vmem>>, vector<1x896xf32>
    %c13_134 = arith.constant 13 : index
    %c0_135 = arith.constant 0 : index
    %105 = vector.load %arg20[%c13_134, %c0_135] : memref<32x896xf32, #tpu.memory_space<vmem>>, vector<1x896xf32>
    tpu.vector_store %arg20[%c13_134, %c0_135], %104 {strides = array<i32>} : memref<32x896xf32, #tpu.memory_space<vmem>>, vector<1x896xf32>,
    %c1_136 = arith.constant 1 : index
    %c68_137 = arith.constant 68 : index
    %106 = vector.load %arg0[%c1_136, %c68_137] : memref<2x1152xf32, #tpu.memory_space<vmem>>, vector<1x896xf32>
    %c14_138 = arith.constant 14 : index
    %c0_139 = arith.constant 0 : index
    %107 = vector.load %arg20[%c14_138, %c0_139] : memref<32x896xf32, #tpu.memory_space<vmem>>, vector<1x896xf32>
    tpu.vector_store %arg20[%c14_138, %c0_139], %106 {strides = array<i32>} : memref<32x896xf32, #tpu.memory_space<vmem>>, vector<1x896xf32>,
    %c1_140 = arith.constant 1 : index
    %c96_141 = arith.constant 96 : index
    %108 = vector.load %arg0[%c1_140, %c96_141] : memref<2x1152xf32, #tpu.memory_space<vmem>>, vector<1x896xf32>
    %c15_142 = arith.constant 15 : index
    %c0_143 = arith.constant 0 : index
    %109 = vector.load %arg20[%c15_142, %c0_143] : memref<32x896xf32, #tpu.memory_space<vmem>>, vector<1x896xf32>
    tpu.vector_store %arg20[%c15_142, %c0_143], %108 {strides = array<i32>} : memref<32x896xf32, #tpu.memory_space<vmem>>, vector<1x896xf32>,
    %c1_144 = arith.constant 1 : index
    %c97_145 = arith.constant 97 : index
    %110 = vector.load %arg0[%c1_144, %c97_145] : memref<2x1152xf32, #tpu.memory_space<vmem>>, vector<1x896xf32>
    %c16_146 = arith.constant 16 : index
    %c0_147 = arith.constant 0 : index
    %111 = vector.load %arg20[%c16_146, %c0_147] : memref<32x896xf32, #tpu.memory_space<vmem>>, vector<1x896xf32>
    tpu.vector_store %arg20[%c16_146, %c0_147], %110 {strides = array<i32>} : memref<32x896xf32, #tpu.memory_space<vmem>>, vector<1x896xf32>,
    %c1_148 = arith.constant 1 : index
    %c98_149 = arith.constant 98 : index
    %112 = vector.load %arg0[%c1_148, %c98_149] : memref<2x1152xf32, #tpu.memory_space<vmem>>, vector<1x896xf32>
    %c17_150 = arith.constant 17 : index
    %c0_151 = arith.constant 0 : index
    %113 = vector.load %arg20[%c17_150, %c0_151] : memref<32x896xf32, #tpu.memory_space<vmem>>, vector<1x896xf32>
    tpu.vector_store %arg20[%c17_150, %c0_151], %112 {strides = array<i32>} : memref<32x896xf32, #tpu.memory_space<vmem>>, vector<1x896xf32>,
    %c1_152 = arith.constant 1 : index
    %c99_153 = arith.constant 99 : index
    %114 = vector.load %arg0[%c1_152, %c99_153] : memref<2x1152xf32, #tpu.memory_space<vmem>>, vector<1x896xf32>
    %c18_154 = arith.constant 18 : index
    %c0_155 = arith.constant 0 : index
    %115 = vector.load %arg20[%c18_154, %c0_155] : memref<32x896xf32, #tpu.memory_space<vmem>>, vector<1x896xf32>
    tpu.vector_store %arg20[%c18_154, %c0_155], %114 {strides = array<i32>} : memref<32x896xf32, #tpu.memory_space<vmem>>, vector<1x896xf32>,
    %c1_156 = arith.constant 1 : index
    %c100_157 = arith.constant 100 : index
    %116 = vector.load %arg0[%c1_156, %c100_157] : memref<2x1152xf32, #tpu.memory_space<vmem>>, vector<1x896xf32>
    %c19_158 = arith.constant 19 : index
    %c0_159 = arith.constant 0 : index
    %117 = vector.load %arg20[%c19_158, %c0_159] : memref<32x896xf32, #tpu.memory_space<vmem>>, vector<1x896xf32>
    tpu.vector_store %arg20[%c19_158, %c0_159], %116 {strides = array<i32>} : memref<32x896xf32, #tpu.memory_space<vmem>>, vector<1x896xf32>,
    %c1_160 = arith.constant 1 : index
    %c128_161 = arith.constant 128 : index
    %118 = vector.load %arg0[%c1_160, %c128_161] : memref<2x1152xf32, #tpu.memory_space<vmem>>, vector<1x896xf32>
    %c20_162 = arith.constant 20 : index
    %c0_163 = arith.constant 0 : index
    %119 = vector.load %arg20[%c20_162, %c0_163] : memref<32x896xf32, #tpu.memory_space<vmem>>, vector<1x896xf32>
    tpu.vector_store %arg20[%c20_162, %c0_163], %118 {strides = array<i32>} : memref<32x896xf32, #tpu.memory_space<vmem>>, vector<1x896xf32>,
    %c1_164 = arith.constant 1 : index
    %c129_165 = arith.constant 129 : index
    %120 = vector.load %arg0[%c1_164, %c129_165] : memref<2x1152xf32, #tpu.memory_space<vmem>>, vector<1x896xf32>
    %c21_166 = arith.constant 21 : index
    %c0_167 = arith.constant 0 : index
    %121 = vector.load %arg20[%c21_166, %c0_167] : memref<32x896xf32, #tpu.memory_space<vmem>>, vector<1x896xf32>
    tpu.vector_store %arg20[%c21_166, %c0_167], %120 {strides = array<i32>} : memref<32x896xf32, #tpu.memory_space<vmem>>, vector<1x896xf32>,
    %c1_168 = arith.constant 1 : index
    %c130_169 = arith.constant 130 : index
    %122 = vector.load %arg0[%c1_168, %c130_169] : memref<2x1152xf32, #tpu.memory_space<vmem>>, vector<1x896xf32>
    %c22_170 = arith.constant 22 : index
    %c0_171 = arith.constant 0 : index
    %123 = vector.load %arg20[%c22_170, %c0_171] : memref<32x896xf32, #tpu.memory_space<vmem>>, vector<1x896xf32>
    tpu.vector_store %arg20[%c22_170, %c0_171], %122 {strides = array<i32>} : memref<32x896xf32, #tpu.memory_space<vmem>>, vector<1x896xf32>,
    %c1_172 = arith.constant 1 : index
    %c131_173 = arith.constant 131 : index
    %124 = vector.load %arg0[%c1_172, %c131_173] : memref<2x1152xf32, #tpu.memory_space<vmem>>, vector<1x896xf32>
    %c23_174 = arith.constant 23 : index
    %c0_175 = arith.constant 0 : index
    %125 = vector.load %arg20[%c23_174, %c0_175] : memref<32x896xf32, #tpu.memory_space<vmem>>, vector<1x896xf32>
    tpu.vector_store %arg20[%c23_174, %c0_175], %124 {strides = array<i32>} : memref<32x896xf32, #tpu.memory_space<vmem>>, vector<1x896xf32>,
    %c1_176 = arith.constant 1 : index
    %c132_177 = arith.constant 132 : index
    %126 = vector.load %arg0[%c1_176, %c132_177] : memref<2x1152xf32, #tpu.memory_space<vmem>>, vector<1x896xf32>
    %c24_178 = arith.constant 24 : index
    %c0_179 = arith.constant 0 : index
    %127 = vector.load %arg20[%c24_178, %c0_179] : memref<32x896xf32, #tpu.memory_space<vmem>>, vector<1x896xf32>
    tpu.vector_store %arg20[%c24_178, %c0_179], %126 {strides = array<i32>} : memref<32x896xf32, #tpu.memory_space<vmem>>, vector<1x896xf32>,
    %c0_180 = arith.constant 0 : index
    %c0_181 = arith.constant 0 : index
    %128 = vector.load %arg20[%c0_180, %c0_181] : memref<32x896xf32, #tpu.memory_space<vmem>>, vector<32x896xf32>
    %cst_182 = arith.constant dense<0.000000e+00> : vector<8x896xf32>
    %129 = tpu.matmul %4, %128, %cst_182 {dimension_numbers = #tpu.dot_dimension_numbers<[1], [0], [0], [1], [0, 0, 1, 1], [], []>} : vector<8x32xf32>, vector<32x896xf32>, vector<8x896xf32> -> vector<8x896xf32>
    %130 = vector.broadcast %5 : vector<8x1xf32> to vector<8x896xf32>
    %131 = arith.addf %129, %130 : vector<8x896xf32>
    %c1_183 = arith.constant 1 : index
    %c0_184 = arith.constant 0 : index
    %c0_185 = arith.constant 0 : index
    %132 = vector.load %arg21[%c1_183, %c0_184, %c0_185] : memref<2x8x896xf32, #tpu.memory_space<vmem>>, vector<1x8x896xf32>
    %133 = vector.shape_cast %132 : vector<1x8x896xf32> to vector<8x896xf32>
    %134 = vector.shape_cast %131 : vector<8x896xf32> to vector<1x8x896xf32>
    tpu.vector_store %arg21[%c1_183, %c0_184, %c0_185], %134 {strides = array<i32>} : memref<2x8x896xf32, #tpu.memory_space<vmem>>, vector<1x8x896xf32>,
    %135 = vector.broadcast %8 : vector<1x896xf32> to vector<8x896xf32>
    %136 = arith.mulf %131, %135 : vector<8x896xf32>
    %cst_186 = arith.constant dense<0.000000e+00> : vector<8xf32>
    %137 = vector.multi_reduction <add>, %136, %cst_186 [1] : vector<8x896xf32> to vector<8xf32>
    %138 = vector.shape_cast %137 : vector<8xf32> to vector<8x1xf32>
    %139 = arith.addf %73, %138 : vector<8x1xf32>
    %140 = arith.mulf %136, %131 : vector<8x896xf32>
    %cst_187 = arith.constant dense<0.000000e+00> : vector<8xf32>
    %141 = vector.multi_reduction <add>, %140, %cst_187 [1] : vector<8x896xf32> to vector<8xf32>
    %142 = vector.shape_cast %141 : vector<8xf32> to vector<8x1xf32>
    %143 = arith.addf %77, %142 : vector<8x1xf32>
    %cst_188 = arith.constant 6.37755089E-4 : f32
    %144 = vector.broadcast %cst_188 : f32 to vector<8x1xf32>
    %145 = arith.mulf %139, %144 : vector<8x1xf32>
    %cst_189 = arith.constant 6.37755089E-4 : f32
    %146 = vector.broadcast %cst_189 : f32 to vector<8x1xf32>
    %147 = arith.mulf %143, %146 : vector<8x1xf32>
    %148 = arith.mulf %145, %145 : vector<8x1xf32>
    %149 = arith.subf %147, %148 : vector<8x1xf32>
    %c0_190 = arith.constant 0 : index
    %c0_191 = arith.constant 0 : index
    %150 = vector.load %arg3[%c0_190, %c0_191] : memref<8x1xf32, #tpu.memory_space<vmem>>, vector<8x1xf32>
    %cst_192 = arith.constant 9.99999974E-6 : f32
    %151 = vector.broadcast %cst_192 : f32 to vector<8x1xf32>
    %152 = arith.addf %149, %151 : vector<8x1xf32>
    %153 = math.rsqrt %152 : vector<8x1xf32>
    %154 = arith.mulf %150, %153 : vector<8x1xf32>
    %c0_193 = arith.constant 0 : index
    %c0_194 = arith.constant 0 : index
    %155 = vector.load %arg4[%c0_193, %c0_194] : memref<8x1xf32, #tpu.memory_space<vmem>>, vector<8x1xf32>
    %156 = arith.mulf %145, %154 : vector<8x1xf32>
    %157 = arith.subf %155, %156 : vector<8x1xf32>
    %cst_195 = arith.constant 0.000000e+00 : f32
    %158 = vector.broadcast %cst_195 : f32 to vector<16x1xf32>
    %cst_196 = arith.constant 0.000000e+00 : f32
    %159 = vector.broadcast %cst_196 : f32 to vector<16x1xf32>
    %c0_197 = arith.constant 0 : index
    %c0_198 = arith.constant 0 : index
    %c0_199 = arith.constant 0 : index
    %160 = vector.load %arg21[%c0_197, %c0_198, %c0_199] : memref<2x8x896xf32, #tpu.memory_space<vmem>>, vector<1x8x896xf32>
    %161 = vector.shape_cast %160 : vector<1x8x896xf32> to vector<8x896xf32>
    %162 = vector.broadcast %154 : vector<8x1xf32> to vector<8x896xf32>
    %163 = arith.mulf %161, %162 : vector<8x896xf32>
    %164 = vector.broadcast %157 : vector<8x1xf32> to vector<8x896xf32>
    %165 = arith.addf %163, %164 : vector<8x896xf32>
    %cst_200 = arith.constant 0.000000e+00 : f32
    %166 = vector.broadcast %cst_200 : f32 to vector<8x896xf32>
    %167 = arith.maximumf %165, %166 : vector<8x896xf32>
    %c0_201 = arith.constant 0 : index
    %c0_202 = arith.constant 0 : index
    %c0_203 = arith.constant 0 : index
    %168 = vector.load %arg21[%c0_201, %c0_202, %c0_203] : memref<2x8x896xf32, #tpu.memory_space<vmem>>, vector<1x8x896xf32>
    %169 = vector.shape_cast %168 : vector<1x8x896xf32> to vector<8x896xf32>
    %170 = vector.shape_cast %167 : vector<8x896xf32> to vector<1x8x896xf32>
    tpu.vector_store %arg21[%c0_201, %c0_202, %c0_203], %170 {strides = array<i32>} : memref<2x8x896xf32, #tpu.memory_space<vmem>>, vector<1x8x896xf32>,
    %c0_204 = arith.constant 0 : index
    %c0_205 = arith.constant 0 : index
    %c0_206 = arith.constant 0 : index
    %171 = vector.load %arg21[%c0_204, %c0_205, %c0_206] : memref<2x8x896xf32, #tpu.memory_space<vmem>>, vector<1x8x863xf32>
    %172 = vector.shape_cast %171 : vector<1x8x863xf32> to vector<8x863xf32>
    %c0_207 = arith.constant 0 : index
    %c0_208 = arith.constant 0 : index
    %c1_209 = arith.constant 1 : index
    %173 = vector.load %arg21[%c0_207, %c0_208, %c1_209] : memref<2x8x896xf32, #tpu.memory_space<vmem>>, vector<1x8x863xf32>
    %174 = vector.shape_cast %173 : vector<1x8x863xf32> to vector<8x863xf32>
    %175 = arith.maximumf %172, %174 : vector<8x863xf32>
    %c0_210 = arith.constant 0 : index
    %c0_211 = arith.constant 0 : index
    %c32_212 = arith.constant 32 : index
    %176 = vector.load %arg21[%c0_210, %c0_211, %c32_212] : memref<2x8x896xf32, #tpu.memory_space<vmem>>, vector<1x8x863xf32>
    %177 = vector.shape_cast %176 : vector<1x8x863xf32> to vector<8x863xf32>
    %c0_213 = arith.constant 0 : index
    %c0_214 = arith.constant 0 : index
    %c33_215 = arith.constant 33 : index
    %178 = vector.load %arg21[%c0_213, %c0_214, %c33_215] : memref<2x8x896xf32, #tpu.memory_space<vmem>>, vector<1x8x863xf32>
    %179 = vector.shape_cast %178 : vector<1x8x863xf32> to vector<8x863xf32>
    %180 = arith.maximumf %177, %179 : vector<8x863xf32>
    %181 = arith.maximumf %175, %180 : vector<8x863xf32>
    %c0_216 = arith.constant 0 : index
    %c0_217 = arith.constant 0 : index
    %182 = vector.load %arg6[%c0_216, %c0_217] : memref<863x256xf32, #tpu.memory_space<vmem>>, vector<863x256xf32>
    %cst_218 = arith.constant dense<0.000000e+00> : vector<8x256xf32>
    %183 = tpu.matmul %181, %182, %cst_218 {dimension_numbers = #tpu.dot_dimension_numbers<[1], [0], [0], [1], [0, 0, 1, 1], [], []>} : vector<8x863xf32>, vector<863x256xf32>, vector<8x256xf32> -> vector<8x256xf32>
    %c0_219 = arith.constant 0 : index
    %c0_220 = arith.constant 0 : index
    %184 = vector.load %arg22[%c0_219, %c0_220] : memref<8x256xf32, #tpu.memory_space<vmem>>, vector<8x256xf32>
    tpu.vector_store %arg22[%c0_219, %c0_220], %183 {strides = array<i32>} : memref<8x256xf32, #tpu.memory_space<vmem>>, vector<8x256xf32>,
    %c0_221 = arith.constant 0 : index
    %c0_222 = arith.constant 0 : index
    %185 = vector.load %arg22[%c0_221, %c0_222] : memref<8x256xf32, #tpu.memory_space<vmem>>, vector<6x160xf32>
    %c0_223 = arith.constant 0 : index
    %c0_224 = arith.constant 0 : index
    %186 = vector.load %arg23[%c0_223, %c0_224] : memref<160x160xf32, #tpu.memory_space<vmem>>, vector<6x160xf32>
    tpu.vector_store %arg23[%c0_223, %c0_224], %185 {strides = array<i32>} : memref<160x160xf32, #tpu.memory_space<vmem>>, vector<6x160xf32>,
    %c0_225 = arith.constant 0 : index
    %c1_226 = arith.constant 1 : index
    %187 = vector.load %arg22[%c0_225, %c1_226] : memref<8x256xf32, #tpu.memory_space<vmem>>, vector<6x160xf32>
    %c6_227 = arith.constant 6 : index
    %c0_228 = arith.constant 0 : index
    %188 = vector.load %arg23[%c6_227, %c0_228] : memref<160x160xf32, #tpu.memory_space<vmem>>, vector<6x160xf32>
    tpu.vector_store %arg23[%c6_227, %c0_228], %187 {strides = array<i32>} : memref<160x160xf32, #tpu.memory_space<vmem>>, vector<6x160xf32>,
    %c0_229 = arith.constant 0 : index
    %c2_230 = arith.constant 2 : index
    %189 = vector.load %arg22[%c0_229, %c2_230] : memref<8x256xf32, #tpu.memory_space<vmem>>, vector<6x160xf32>
    %c12_231 = arith.constant 12 : index
    %c0_232 = arith.constant 0 : index
    %190 = vector.load %arg23[%c12_231, %c0_232] : memref<160x160xf32, #tpu.memory_space<vmem>>, vector<6x160xf32>
    tpu.vector_store %arg23[%c12_231, %c0_232], %189 {strides = array<i32>} : memref<160x160xf32, #tpu.memory_space<vmem>>, vector<6x160xf32>,
    %c0_233 = arith.constant 0 : index
    %c3_234 = arith.constant 3 : index
    %191 = vector.load %arg22[%c0_233, %c3_234] : memref<8x256xf32, #tpu.memory_space<vmem>>, vector<6x160xf32>
    %c18_235 = arith.constant 18 : index
    %c0_236 = arith.constant 0 : index
    %192 = vector.load %arg23[%c18_235, %c0_236] : memref<160x160xf32, #tpu.memory_space<vmem>>, vector<6x160xf32>
    tpu.vector_store %arg23[%c18_235, %c0_236], %191 {strides = array<i32>} : memref<160x160xf32, #tpu.memory_space<vmem>>, vector<6x160xf32>,
    %c0_237 = arith.constant 0 : index
    %c4_238 = arith.constant 4 : index
    %193 = vector.load %arg22[%c0_237, %c4_238] : memref<8x256xf32, #tpu.memory_space<vmem>>, vector<6x160xf32>
    %c24_239 = arith.constant 24 : index
    %c0_240 = arith.constant 0 : index
    %194 = vector.load %arg23[%c24_239, %c0_240] : memref<160x160xf32, #tpu.memory_space<vmem>>, vector<6x160xf32>
    tpu.vector_store %arg23[%c24_239, %c0_240], %193 {strides = array<i32>} : memref<160x160xf32, #tpu.memory_space<vmem>>, vector<6x160xf32>,
    %c0_241 = arith.constant 0 : index
    %c16_242 = arith.constant 16 : index
    %195 = vector.load %arg22[%c0_241, %c16_242] : memref<8x256xf32, #tpu.memory_space<vmem>>, vector<6x160xf32>
    %c30 = arith.constant 30 : index
    %c0_243 = arith.constant 0 : index
    %196 = vector.load %arg23[%c30, %c0_243] : memref<160x160xf32, #tpu.memory_space<vmem>>, vector<6x160xf32>
    tpu.vector_store %arg23[%c30, %c0_243], %195 {strides = array<i32>} : memref<160x160xf32, #tpu.memory_space<vmem>>, vector<6x160xf32>,
    %c0_244 = arith.constant 0 : index
    %c17_245 = arith.constant 17 : index
    %197 = vector.load %arg22[%c0_244, %c17_245] : memref<8x256xf32, #tpu.memory_space<vmem>>, vector<6x160xf32>
    %c36_246 = arith.constant 36 : index
    %c0_247 = arith.constant 0 : index
    %198 = vector.load %arg23[%c36_246, %c0_247] : memref<160x160xf32, #tpu.memory_space<vmem>>, vector<6x160xf32>
    tpu.vector_store %arg23[%c36_246, %c0_247], %197 {strides = array<i32>} : memref<160x160xf32, #tpu.memory_space<vmem>>, vector<6x160xf32>,
    %c0_248 = arith.constant 0 : index
    %c18_249 = arith.constant 18 : index
    %199 = vector.load %arg22[%c0_248, %c18_249] : memref<8x256xf32, #tpu.memory_space<vmem>>, vector<6x160xf32>
    %c42 = arith.constant 42 : index
    %c0_250 = arith.constant 0 : index
    %200 = vector.load %arg23[%c42, %c0_250] : memref<160x160xf32, #tpu.memory_space<vmem>>, vector<6x160xf32>
    tpu.vector_store %arg23[%c42, %c0_250], %199 {strides = array<i32>} : memref<160x160xf32, #tpu.memory_space<vmem>>, vector<6x160xf32>,
    %c0_251 = arith.constant 0 : index
    %c19_252 = arith.constant 19 : index
    %201 = vector.load %arg22[%c0_251, %c19_252] : memref<8x256xf32, #tpu.memory_space<vmem>>, vector<6x160xf32>
    %c48 = arith.constant 48 : index
    %c0_253 = arith.constant 0 : index
    %202 = vector.load %arg23[%c48, %c0_253] : memref<160x160xf32, #tpu.memory_space<vmem>>, vector<6x160xf32>
    tpu.vector_store %arg23[%c48, %c0_253], %201 {strides = array<i32>} : memref<160x160xf32, #tpu.memory_space<vmem>>, vector<6x160xf32>,
    %c0_254 = arith.constant 0 : index
    %c20_255 = arith.constant 20 : index
    %203 = vector.load %arg22[%c0_254, %c20_255] : memref<8x256xf32, #tpu.memory_space<vmem>>, vector<6x160xf32>
    %c54 = arith.constant 54 : index
    %c0_256 = arith.constant 0 : index
    %204 = vector.load %arg23[%c54, %c0_256] : memref<160x160xf32, #tpu.memory_space<vmem>>, vector<6x160xf32>
    tpu.vector_store %arg23[%c54, %c0_256], %203 {strides = array<i32>} : memref<160x160xf32, #tpu.memory_space<vmem>>, vector<6x160xf32>,
    %c0_257 = arith.constant 0 : index
    %c32_258 = arith.constant 32 : index
    %205 = vector.load %arg22[%c0_257, %c32_258] : memref<8x256xf32, #tpu.memory_space<vmem>>, vector<6x160xf32>
    %c60 = arith.constant 60 : index
    %c0_259 = arith.constant 0 : index
    %206 = vector.load %arg23[%c60, %c0_259] : memref<160x160xf32, #tpu.memory_space<vmem>>, vector<6x160xf32>
    tpu.vector_store %arg23[%c60, %c0_259], %205 {strides = array<i32>} : memref<160x160xf32, #tpu.memory_space<vmem>>, vector<6x160xf32>,
    %c0_260 = arith.constant 0 : index
    %c33_261 = arith.constant 33 : index
    %207 = vector.load %arg22[%c0_260, %c33_261] : memref<8x256xf32, #tpu.memory_space<vmem>>, vector<6x160xf32>
    %c66_262 = arith.constant 66 : index
    %c0_263 = arith.constant 0 : index
    %208 = vector.load %arg23[%c66_262, %c0_263] : memref<160x160xf32, #tpu.memory_space<vmem>>, vector<6x160xf32>
    tpu.vector_store %arg23[%c66_262, %c0_263], %207 {strides = array<i32>} : memref<160x160xf32, #tpu.memory_space<vmem>>, vector<6x160xf32>,
    %c0_264 = arith.constant 0 : index
    %c34_265 = arith.constant 34 : index
    %209 = vector.load %arg22[%c0_264, %c34_265] : memref<8x256xf32, #tpu.memory_space<vmem>>, vector<6x160xf32>
    %c72 = arith.constant 72 : index
    %c0_266 = arith.constant 0 : index
    %210 = vector.load %arg23[%c72, %c0_266] : memref<160x160xf32, #tpu.memory_space<vmem>>, vector<6x160xf32>
    tpu.vector_store %arg23[%c72, %c0_266], %209 {strides = array<i32>} : memref<160x160xf32, #tpu.memory_space<vmem>>, vector<6x160xf32>,
    %c0_267 = arith.constant 0 : index
    %c35_268 = arith.constant 35 : index
    %211 = vector.load %arg22[%c0_267, %c35_268] : memref<8x256xf32, #tpu.memory_space<vmem>>, vector<6x160xf32>
    %c78 = arith.constant 78 : index
    %c0_269 = arith.constant 0 : index
    %212 = vector.load %arg23[%c78, %c0_269] : memref<160x160xf32, #tpu.memory_space<vmem>>, vector<6x160xf32>
    tpu.vector_store %arg23[%c78, %c0_269], %211 {strides = array<i32>} : memref<160x160xf32, #tpu.memory_space<vmem>>, vector<6x160xf32>,
    %c0_270 = arith.constant 0 : index
    %c36_271 = arith.constant 36 : index
    %213 = vector.load %arg22[%c0_270, %c36_271] : memref<8x256xf32, #tpu.memory_space<vmem>>, vector<6x160xf32>
    %c84 = arith.constant 84 : index
    %c0_272 = arith.constant 0 : index
    %214 = vector.load %arg23[%c84, %c0_272] : memref<160x160xf32, #tpu.memory_space<vmem>>, vector<6x160xf32>
    tpu.vector_store %arg23[%c84, %c0_272], %213 {strides = array<i32>} : memref<160x160xf32, #tpu.memory_space<vmem>>, vector<6x160xf32>,
    %c0_273 = arith.constant 0 : index
    %c48_274 = arith.constant 48 : index
    %215 = vector.load %arg22[%c0_273, %c48_274] : memref<8x256xf32, #tpu.memory_space<vmem>>, vector<6x160xf32>
    %c90 = arith.constant 90 : index
    %c0_275 = arith.constant 0 : index
    %216 = vector.load %arg23[%c90, %c0_275] : memref<160x160xf32, #tpu.memory_space<vmem>>, vector<6x160xf32>
    tpu.vector_store %arg23[%c90, %c0_275], %215 {strides = array<i32>} : memref<160x160xf32, #tpu.memory_space<vmem>>, vector<6x160xf32>,
    %c0_276 = arith.constant 0 : index
    %c49 = arith.constant 49 : index
    %217 = vector.load %arg22[%c0_276, %c49] : memref<8x256xf32, #tpu.memory_space<vmem>>, vector<6x160xf32>
    %c96_277 = arith.constant 96 : index
    %c0_278 = arith.constant 0 : index
    %218 = vector.load %arg23[%c96_277, %c0_278] : memref<160x160xf32, #tpu.memory_space<vmem>>, vector<6x160xf32>
    tpu.vector_store %arg23[%c96_277, %c0_278], %217 {strides = array<i32>} : memref<160x160xf32, #tpu.memory_space<vmem>>, vector<6x160xf32>,
    %c0_279 = arith.constant 0 : index
    %c50 = arith.constant 50 : index
    %219 = vector.load %arg22[%c0_279, %c50] : memref<8x256xf32, #tpu.memory_space<vmem>>, vector<6x160xf32>
    %c102 = arith.constant 102 : index
    %c0_280 = arith.constant 0 : index
    %220 = vector.load %arg23[%c102, %c0_280] : memref<160x160xf32, #tpu.memory_space<vmem>>, vector<6x160xf32>
    tpu.vector_store %arg23[%c102, %c0_280], %219 {strides = array<i32>} : memref<160x160xf32, #tpu.memory_space<vmem>>, vector<6x160xf32>,
    %c0_281 = arith.constant 0 : index
    %c51 = arith.constant 51 : index
    %221 = vector.load %arg22[%c0_281, %c51] : memref<8x256xf32, #tpu.memory_space<vmem>>, vector<6x160xf32>
    %c108 = arith.constant 108 : index
    %c0_282 = arith.constant 0 : index
    %222 = vector.load %arg23[%c108, %c0_282] : memref<160x160xf32, #tpu.memory_space<vmem>>, vector<6x160xf32>
    tpu.vector_store %arg23[%c108, %c0_282], %221 {strides = array<i32>} : memref<160x160xf32, #tpu.memory_space<vmem>>, vector<6x160xf32>,
    %c0_283 = arith.constant 0 : index
    %c52 = arith.constant 52 : index
    %223 = vector.load %arg22[%c0_283, %c52] : memref<8x256xf32, #tpu.memory_space<vmem>>, vector<6x160xf32>
    %c114 = arith.constant 114 : index
    %c0_284 = arith.constant 0 : index
    %224 = vector.load %arg23[%c114, %c0_284] : memref<160x160xf32, #tpu.memory_space<vmem>>, vector<6x160xf32>
    tpu.vector_store %arg23[%c114, %c0_284], %223 {strides = array<i32>} : memref<160x160xf32, #tpu.memory_space<vmem>>, vector<6x160xf32>,
    %c0_285 = arith.constant 0 : index
    %c64_286 = arith.constant 64 : index
    %225 = vector.load %arg22[%c0_285, %c64_286] : memref<8x256xf32, #tpu.memory_space<vmem>>, vector<6x160xf32>
    %c120 = arith.constant 120 : index
    %c0_287 = arith.constant 0 : index
    %226 = vector.load %arg23[%c120, %c0_287] : memref<160x160xf32, #tpu.memory_space<vmem>>, vector<6x160xf32>
    tpu.vector_store %arg23[%c120, %c0_287], %225 {strides = array<i32>} : memref<160x160xf32, #tpu.memory_space<vmem>>, vector<6x160xf32>,
    %c0_288 = arith.constant 0 : index
    %c65_289 = arith.constant 65 : index
    %227 = vector.load %arg22[%c0_288, %c65_289] : memref<8x256xf32, #tpu.memory_space<vmem>>, vector<6x160xf32>
    %c126 = arith.constant 126 : index
    %c0_290 = arith.constant 0 : index
    %228 = vector.load %arg23[%c126, %c0_290] : memref<160x160xf32, #tpu.memory_space<vmem>>, vector<6x160xf32>
    tpu.vector_store %arg23[%c126, %c0_290], %227 {strides = array<i32>} : memref<160x160xf32, #tpu.memory_space<vmem>>, vector<6x160xf32>,
    %c0_291 = arith.constant 0 : index
    %c66_292 = arith.constant 66 : index
    %229 = vector.load %arg22[%c0_291, %c66_292] : memref<8x256xf32, #tpu.memory_space<vmem>>, vector<6x160xf32>
    %c132_293 = arith.constant 132 : index
    %c0_294 = arith.constant 0 : index
    %230 = vector.load %arg23[%c132_293, %c0_294] : memref<160x160xf32, #tpu.memory_space<vmem>>, vector<6x160xf32>
    tpu.vector_store %arg23[%c132_293, %c0_294], %229 {strides = array<i32>} : memref<160x160xf32, #tpu.memory_space<vmem>>, vector<6x160xf32>,
    %c0_295 = arith.constant 0 : index
    %c67_296 = arith.constant 67 : index
    %231 = vector.load %arg22[%c0_295, %c67_296] : memref<8x256xf32, #tpu.memory_space<vmem>>, vector<6x160xf32>
    %c138 = arith.constant 138 : index
    %c0_297 = arith.constant 0 : index
    %232 = vector.load %arg23[%c138, %c0_297] : memref<160x160xf32, #tpu.memory_space<vmem>>, vector<6x160xf32>
    tpu.vector_store %arg23[%c138, %c0_297], %231 {strides = array<i32>} : memref<160x160xf32, #tpu.memory_space<vmem>>, vector<6x160xf32>,
    %c0_298 = arith.constant 0 : index
    %c68_299 = arith.constant 68 : index
    %233 = vector.load %arg22[%c0_298, %c68_299] : memref<8x256xf32, #tpu.memory_space<vmem>>, vector<6x160xf32>
    %c144 = arith.constant 144 : index
    %c0_300 = arith.constant 0 : index
    %234 = vector.load %arg23[%c144, %c0_300] : memref<160x160xf32, #tpu.memory_space<vmem>>, vector<6x160xf32>
    tpu.vector_store %arg23[%c144, %c0_300], %233 {strides = array<i32>} : memref<160x160xf32, #tpu.memory_space<vmem>>, vector<6x160xf32>,
    %c0_301 = arith.constant 0 : index
    %c0_302 = arith.constant 0 : index
    %235 = vector.load %arg23[%c0_301, %c0_302] : memref<160x160xf32, #tpu.memory_space<vmem>>, vector<160x160xf32>
    %cst_303 = arith.constant dense<0.000000e+00> : vector<16x160xf32>
    %236 = tpu.matmul %6, %235, %cst_303 {dimension_numbers = #tpu.dot_dimension_numbers<[1], [0], [0], [1], [0, 0, 1, 1], [], []>} : vector<16x160xf32>, vector<160x160xf32>, vector<16x160xf32> -> vector<16x160xf32>
    %237 = vector.broadcast %7 : vector<16x1xf32> to vector<16x160xf32>
    %238 = arith.addf %236, %237 : vector<16x160xf32>
    %c0_304 = arith.constant 0 : index
    %c0_305 = arith.constant 0 : index
    %c0_306 = arith.constant 0 : index
    %239 = vector.load %arg24[%c0_304, %c0_305, %c0_306] : memref<2x16x160xf32, #tpu.memory_space<vmem>>, vector<1x16x160xf32>
    %240 = vector.shape_cast %239 : vector<1x16x160xf32> to vector<16x160xf32>
    %241 = vector.shape_cast %238 : vector<16x160xf32> to vector<1x16x160xf32>
    tpu.vector_store %arg24[%c0_304, %c0_305, %c0_306], %241 {strides = array<i32>} : memref<2x16x160xf32, #tpu.memory_space<vmem>>, vector<1x16x160xf32>,
    %242 = vector.broadcast %9 : vector<1x160xf32> to vector<16x160xf32>
    %243 = arith.mulf %238, %242 : vector<16x160xf32>
    %cst_307 = arith.constant dense<0.000000e+00> : vector<16xf32>
    %244 = vector.multi_reduction <add>, %243, %cst_307 [1] : vector<16x160xf32> to vector<16xf32>
    %245 = vector.shape_cast %244 : vector<16xf32> to vector<16x1xf32>
    %246 = arith.addf %158, %245 : vector<16x1xf32>
    %247 = arith.mulf %243, %238 : vector<16x160xf32>
    %cst_308 = arith.constant dense<0.000000e+00> : vector<16xf32>
    %248 = vector.multi_reduction <add>, %247, %cst_308 [1] : vector<16x160xf32> to vector<16xf32>
    %249 = vector.shape_cast %248 : vector<16xf32> to vector<16x1xf32>
    %250 = arith.addf %159, %249 : vector<16x1xf32>
    %c1_309 = arith.constant 1 : index
    %c0_310 = arith.constant 0 : index
    %c0_311 = arith.constant 0 : index
    %251 = vector.load %arg21[%c1_309, %c0_310, %c0_311] : memref<2x8x896xf32, #tpu.memory_space<vmem>>, vector<1x8x896xf32>
    %252 = vector.shape_cast %251 : vector<1x8x896xf32> to vector<8x896xf32>
    %253 = vector.broadcast %154 : vector<8x1xf32> to vector<8x896xf32>
    %254 = arith.mulf %252, %253 : vector<8x896xf32>
    %255 = vector.broadcast %157 : vector<8x1xf32> to vector<8x896xf32>
    %256 = arith.addf %254, %255 : vector<8x896xf32>
    %cst_312 = arith.constant 0.000000e+00 : f32
    %257 = vector.broadcast %cst_312 : f32 to vector<8x896xf32>
    %258 = arith.maximumf %256, %257 : vector<8x896xf32>
    %c1_313 = arith.constant 1 : index
    %c0_314 = arith.constant 0 : index
    %c0_315 = arith.constant 0 : index
    %259 = vector.load %arg21[%c1_313, %c0_314, %c0_315] : memref<2x8x896xf32, #tpu.memory_space<vmem>>, vector<1x8x896xf32>
    %260 = vector.shape_cast %259 : vector<1x8x896xf32> to vector<8x896xf32>
    %261 = vector.shape_cast %258 : vector<8x896xf32> to vector<1x8x896xf32>
    tpu.vector_store %arg21[%c1_313, %c0_314, %c0_315], %261 {strides = array<i32>} : memref<2x8x896xf32, #tpu.memory_space<vmem>>, vector<1x8x896xf32>,
    %c1_316 = arith.constant 1 : index
    %c0_317 = arith.constant 0 : index
    %c0_318 = arith.constant 0 : index
    %262 = vector.load %arg21[%c1_316, %c0_317, %c0_318] : memref<2x8x896xf32, #tpu.memory_space<vmem>>, vector<1x8x863xf32>
    %263 = vector.shape_cast %262 : vector<1x8x863xf32> to vector<8x863xf32>
    %c1_319 = arith.constant 1 : index
    %c0_320 = arith.constant 0 : index
    %c1_321 = arith.constant 1 : index
    %264 = vector.load %arg21[%c1_319, %c0_320, %c1_321] : memref<2x8x896xf32, #tpu.memory_space<vmem>>, vector<1x8x863xf32>
    %265 = vector.shape_cast %264 : vector<1x8x863xf32> to vector<8x863xf32>
    %266 = arith.maximumf %263, %265 : vector<8x863xf32>
    %c1_322 = arith.constant 1 : index
    %c0_323 = arith.constant 0 : index
    %c32_324 = arith.constant 32 : index
    %267 = vector.load %arg21[%c1_322, %c0_323, %c32_324] : memref<2x8x896xf32, #tpu.memory_space<vmem>>, vector<1x8x863xf32>
    %268 = vector.shape_cast %267 : vector<1x8x863xf32> to vector<8x863xf32>
    %c1_325 = arith.constant 1 : index
    %c0_326 = arith.constant 0 : index
    %c33_327 = arith.constant 33 : index
    %269 = vector.load %arg21[%c1_325, %c0_326, %c33_327] : memref<2x8x896xf32, #tpu.memory_space<vmem>>, vector<1x8x863xf32>
    %270 = vector.shape_cast %269 : vector<1x8x863xf32> to vector<8x863xf32>
    %271 = arith.maximumf %268, %270 : vector<8x863xf32>
    %272 = arith.maximumf %266, %271 : vector<8x863xf32>
    %c0_328 = arith.constant 0 : index
    %c0_329 = arith.constant 0 : index
    %273 = vector.load %arg6[%c0_328, %c0_329] : memref<863x256xf32, #tpu.memory_space<vmem>>, vector<863x256xf32>
    %cst_330 = arith.constant dense<0.000000e+00> : vector<8x256xf32>
    %274 = tpu.matmul %272, %273, %cst_330 {dimension_numbers = #tpu.dot_dimension_numbers<[1], [0], [0], [1], [0, 0, 1, 1], [], []>} : vector<8x863xf32>, vector<863x256xf32>, vector<8x256xf32> -> vector<8x256xf32>
    %c0_331 = arith.constant 0 : index
    %c0_332 = arith.constant 0 : index
    %275 = vector.load %arg22[%c0_331, %c0_332] : memref<8x256xf32, #tpu.memory_space<vmem>>, vector<8x256xf32>
    tpu.vector_store %arg22[%c0_331, %c0_332], %274 {strides = array<i32>} : memref<8x256xf32, #tpu.memory_space<vmem>>, vector<8x256xf32>,
    %c0_333 = arith.constant 0 : index
    %c0_334 = arith.constant 0 : index
    %276 = vector.load %arg22[%c0_333, %c0_334] : memref<8x256xf32, #tpu.memory_space<vmem>>, vector<6x160xf32>
    %c0_335 = arith.constant 0 : index
    %c0_336 = arith.constant 0 : index
    %277 = vector.load %arg23[%c0_335, %c0_336] : memref<160x160xf32, #tpu.memory_space<vmem>>, vector<6x160xf32>
    tpu.vector_store %arg23[%c0_335, %c0_336], %276 {strides = array<i32>} : memref<160x160xf32, #tpu.memory_space<vmem>>, vector<6x160xf32>,
    %c0_337 = arith.constant 0 : index
    %c1_338 = arith.constant 1 : index
    %278 = vector.load %arg22[%c0_337, %c1_338] : memref<8x256xf32, #tpu.memory_space<vmem>>, vector<6x160xf32>
    %c6_339 = arith.constant 6 : index
    %c0_340 = arith.constant 0 : index
    %279 = vector.load %arg23[%c6_339, %c0_340] : memref<160x160xf32, #tpu.memory_space<vmem>>, vector<6x160xf32>
    tpu.vector_store %arg23[%c6_339, %c0_340], %278 {strides = array<i32>} : memref<160x160xf32, #tpu.memory_space<vmem>>, vector<6x160xf32>,
    %c0_341 = arith.constant 0 : index
    %c2_342 = arith.constant 2 : index
    %280 = vector.load %arg22[%c0_341, %c2_342] : memref<8x256xf32, #tpu.memory_space<vmem>>, vector<6x160xf32>
    %c12_343 = arith.constant 12 : index
    %c0_344 = arith.constant 0 : index
    %281 = vector.load %arg23[%c12_343, %c0_344] : memref<160x160xf32, #tpu.memory_space<vmem>>, vector<6x160xf32>
    tpu.vector_store %arg23[%c12_343, %c0_344], %280 {strides = array<i32>} : memref<160x160xf32, #tpu.memory_space<vmem>>, vector<6x160xf32>,
    %c0_345 = arith.constant 0 : index
    %c3_346 = arith.constant 3 : index
    %282 = vector.load %arg22[%c0_345, %c3_346] : memref<8x256xf32, #tpu.memory_space<vmem>>, vector<6x160xf32>
    %c18_347 = arith.constant 18 : index
    %c0_348 = arith.constant 0 : index
    %283 = vector.load %arg23[%c18_347, %c0_348] : memref<160x160xf32, #tpu.memory_space<vmem>>, vector<6x160xf32>
    tpu.vector_store %arg23[%c18_347, %c0_348], %282 {strides = array<i32>} : memref<160x160xf32, #tpu.memory_space<vmem>>, vector<6x160xf32>,
    %c0_349 = arith.constant 0 : index
    %c4_350 = arith.constant 4 : index
    %284 = vector.load %arg22[%c0_349, %c4_350] : memref<8x256xf32, #tpu.memory_space<vmem>>, vector<6x160xf32>
    %c24_351 = arith.constant 24 : index
    %c0_352 = arith.constant 0 : index
    %285 = vector.load %arg23[%c24_351, %c0_352] : memref<160x160xf32, #tpu.memory_space<vmem>>, vector<6x160xf32>
    tpu.vector_store %arg23[%c24_351, %c0_352], %284 {strides = array<i32>} : memref<160x160xf32, #tpu.memory_space<vmem>>, vector<6x160xf32>,
    %c0_353 = arith.constant 0 : index
    %c16_354 = arith.constant 16 : index
    %286 = vector.load %arg22[%c0_353, %c16_354] : memref<8x256xf32, #tpu.memory_space<vmem>>, vector<6x160xf32>
    %c30_355 = arith.constant 30 : index
    %c0_356 = arith.constant 0 : index
    %287 = vector.load %arg23[%c30_355, %c0_356] : memref<160x160xf32, #tpu.memory_space<vmem>>, vector<6x160xf32>
    tpu.vector_store %arg23[%c30_355, %c0_356], %286 {strides = array<i32>} : memref<160x160xf32, #tpu.memory_space<vmem>>, vector<6x160xf32>,
    %c0_357 = arith.constant 0 : index
    %c17_358 = arith.constant 17 : index
    %288 = vector.load %arg22[%c0_357, %c17_358] : memref<8x256xf32, #tpu.memory_space<vmem>>, vector<6x160xf32>
    %c36_359 = arith.constant 36 : index
    %c0_360 = arith.constant 0 : index
    %289 = vector.load %arg23[%c36_359, %c0_360] : memref<160x160xf32, #tpu.memory_space<vmem>>, vector<6x160xf32>
    tpu.vector_store %arg23[%c36_359, %c0_360], %288 {strides = array<i32>} : memref<160x160xf32, #tpu.memory_space<vmem>>, vector<6x160xf32>,
    %c0_361 = arith.constant 0 : index
    %c18_362 = arith.constant 18 : index
    %290 = vector.load %arg22[%c0_361, %c18_362] : memref<8x256xf32, #tpu.memory_space<vmem>>, vector<6x160xf32>
    %c42_363 = arith.constant 42 : index
    %c0_364 = arith.constant 0 : index
    %291 = vector.load %arg23[%c42_363, %c0_364] : memref<160x160xf32, #tpu.memory_space<vmem>>, vector<6x160xf32>
    tpu.vector_store %arg23[%c42_363, %c0_364], %290 {strides = array<i32>} : memref<160x160xf32, #tpu.memory_space<vmem>>, vector<6x160xf32>,
    %c0_365 = arith.constant 0 : index
    %c19_366 = arith.constant 19 : index
    %292 = vector.load %arg22[%c0_365, %c19_366] : memref<8x256xf32, #tpu.memory_space<vmem>>, vector<6x160xf32>
    %c48_367 = arith.constant 48 : index
    %c0_368 = arith.constant 0 : index
    %293 = vector.load %arg23[%c48_367, %c0_368] : memref<160x160xf32, #tpu.memory_space<vmem>>, vector<6x160xf32>
    tpu.vector_store %arg23[%c48_367, %c0_368], %292 {strides = array<i32>} : memref<160x160xf32, #tpu.memory_space<vmem>>, vector<6x160xf32>,
    %c0_369 = arith.constant 0 : index
    %c20_370 = arith.constant 20 : index
    %294 = vector.load %arg22[%c0_369, %c20_370] : memref<8x256xf32, #tpu.memory_space<vmem>>, vector<6x160xf32>
    %c54_371 = arith.constant 54 : index
    %c0_372 = arith.constant 0 : index
    %295 = vector.load %arg23[%c54_371, %c0_372] : memref<160x160xf32, #tpu.memory_space<vmem>>, vector<6x160xf32>
    tpu.vector_store %arg23[%c54_371, %c0_372], %294 {strides = array<i32>} : memref<160x160xf32, #tpu.memory_space<vmem>>, vector<6x160xf32>,
    %c0_373 = arith.constant 0 : index
    %c32_374 = arith.constant 32 : index
    %296 = vector.load %arg22[%c0_373, %c32_374] : memref<8x256xf32, #tpu.memory_space<vmem>>, vector<6x160xf32>
    %c60_375 = arith.constant 60 : index
    %c0_376 = arith.constant 0 : index
    %297 = vector.load %arg23[%c60_375, %c0_376] : memref<160x160xf32, #tpu.memory_space<vmem>>, vector<6x160xf32>
    tpu.vector_store %arg23[%c60_375, %c0_376], %296 {strides = array<i32>} : memref<160x160xf32, #tpu.memory_space<vmem>>, vector<6x160xf32>,
    %c0_377 = arith.constant 0 : index
    %c33_378 = arith.constant 33 : index
    %298 = vector.load %arg22[%c0_377, %c33_378] : memref<8x256xf32, #tpu.memory_space<vmem>>, vector<6x160xf32>
    %c66_379 = arith.constant 66 : index
    %c0_380 = arith.constant 0 : index
    %299 = vector.load %arg23[%c66_379, %c0_380] : memref<160x160xf32, #tpu.memory_space<vmem>>, vector<6x160xf32>
    tpu.vector_store %arg23[%c66_379, %c0_380], %298 {strides = array<i32>} : memref<160x160xf32, #tpu.memory_space<vmem>>, vector<6x160xf32>,
    %c0_381 = arith.constant 0 : index
    %c34_382 = arith.constant 34 : index
    %300 = vector.load %arg22[%c0_381, %c34_382] : memref<8x256xf32, #tpu.memory_space<vmem>>, vector<6x160xf32>
    %c72_383 = arith.constant 72 : index
    %c0_384 = arith.constant 0 : index
    %301 = vector.load %arg23[%c72_383, %c0_384] : memref<160x160xf32, #tpu.memory_space<vmem>>, vector<6x160xf32>
    tpu.vector_store %arg23[%c72_383, %c0_384], %300 {strides = array<i32>} : memref<160x160xf32, #tpu.memory_space<vmem>>, vector<6x160xf32>,
    %c0_385 = arith.constant 0 : index
    %c35_386 = arith.constant 35 : index
    %302 = vector.load %arg22[%c0_385, %c35_386] : memref<8x256xf32, #tpu.memory_space<vmem>>, vector<6x160xf32>
    %c78_387 = arith.constant 78 : index
    %c0_388 = arith.constant 0 : index
    %303 = vector.load %arg23[%c78_387, %c0_388] : memref<160x160xf32, #tpu.memory_space<vmem>>, vector<6x160xf32>
    tpu.vector_store %arg23[%c78_387, %c0_388], %302 {strides = array<i32>} : memref<160x160xf32, #tpu.memory_space<vmem>>, vector<6x160xf32>,
    %c0_389 = arith.constant 0 : index
    %c36_390 = arith.constant 36 : index
    %304 = vector.load %arg22[%c0_389, %c36_390] : memref<8x256xf32, #tpu.memory_space<vmem>>, vector<6x160xf32>
    %c84_391 = arith.constant 84 : index
    %c0_392 = arith.constant 0 : index
    %305 = vector.load %arg23[%c84_391, %c0_392] : memref<160x160xf32, #tpu.memory_space<vmem>>, vector<6x160xf32>
    tpu.vector_store %arg23[%c84_391, %c0_392], %304 {strides = array<i32>} : memref<160x160xf32, #tpu.memory_space<vmem>>, vector<6x160xf32>,
    %c0_393 = arith.constant 0 : index
    %c48_394 = arith.constant 48 : index
    %306 = vector.load %arg22[%c0_393, %c48_394] : memref<8x256xf32, #tpu.memory_space<vmem>>, vector<6x160xf32>
    %c90_395 = arith.constant 90 : index
    %c0_396 = arith.constant 0 : index
    %307 = vector.load %arg23[%c90_395, %c0_396] : memref<160x160xf32, #tpu.memory_space<vmem>>, vector<6x160xf32>
    tpu.vector_store %arg23[%c90_395, %c0_396], %306 {strides = array<i32>} : memref<160x160xf32, #tpu.memory_space<vmem>>, vector<6x160xf32>,
    %c0_397 = arith.constant 0 : index
    %c49_398 = arith.constant 49 : index
    %308 = vector.load %arg22[%c0_397, %c49_398] : memref<8x256xf32, #tpu.memory_space<vmem>>, vector<6x160xf32>
    %c96_399 = arith.constant 96 : index
    %c0_400 = arith.constant 0 : index
    %309 = vector.load %arg23[%c96_399, %c0_400] : memref<160x160xf32, #tpu.memory_space<vmem>>, vector<6x160xf32>
    tpu.vector_store %arg23[%c96_399, %c0_400], %308 {strides = array<i32>} : memref<160x160xf32, #tpu.memory_space<vmem>>, vector<6x160xf32>,
    %c0_401 = arith.constant 0 : index
    %c50_402 = arith.constant 50 : index
    %310 = vector.load %arg22[%c0_401, %c50_402] : memref<8x256xf32, #tpu.memory_space<vmem>>, vector<6x160xf32>
    %c102_403 = arith.constant 102 : index
    %c0_404 = arith.constant 0 : index
    %311 = vector.load %arg23[%c102_403, %c0_404] : memref<160x160xf32, #tpu.memory_space<vmem>>, vector<6x160xf32>
    tpu.vector_store %arg23[%c102_403, %c0_404], %310 {strides = array<i32>} : memref<160x160xf32, #tpu.memory_space<vmem>>, vector<6x160xf32>,
    %c0_405 = arith.constant 0 : index
    %c51_406 = arith.constant 51 : index
    %312 = vector.load %arg22[%c0_405, %c51_406] : memref<8x256xf32, #tpu.memory_space<vmem>>, vector<6x160xf32>
    %c108_407 = arith.constant 108 : index
    %c0_408 = arith.constant 0 : index
    %313 = vector.load %arg23[%c108_407, %c0_408] : memref<160x160xf32, #tpu.memory_space<vmem>>, vector<6x160xf32>
    tpu.vector_store %arg23[%c108_407, %c0_408], %312 {strides = array<i32>} : memref<160x160xf32, #tpu.memory_space<vmem>>, vector<6x160xf32>,
    %c0_409 = arith.constant 0 : index
    %c52_410 = arith.constant 52 : index
    %314 = vector.load %arg22[%c0_409, %c52_410] : memref<8x256xf32, #tpu.memory_space<vmem>>, vector<6x160xf32>
    %c114_411 = arith.constant 114 : index
    %c0_412 = arith.constant 0 : index
    %315 = vector.load %arg23[%c114_411, %c0_412] : memref<160x160xf32, #tpu.memory_space<vmem>>, vector<6x160xf32>
    tpu.vector_store %arg23[%c114_411, %c0_412], %314 {strides = array<i32>} : memref<160x160xf32, #tpu.memory_space<vmem>>, vector<6x160xf32>,
    %c0_413 = arith.constant 0 : index
    %c64_414 = arith.constant 64 : index
    %316 = vector.load %arg22[%c0_413, %c64_414] : memref<8x256xf32, #tpu.memory_space<vmem>>, vector<6x160xf32>
    %c120_415 = arith.constant 120 : index
    %c0_416 = arith.constant 0 : index
    %317 = vector.load %arg23[%c120_415, %c0_416] : memref<160x160xf32, #tpu.memory_space<vmem>>, vector<6x160xf32>
    tpu.vector_store %arg23[%c120_415, %c0_416], %316 {strides = array<i32>} : memref<160x160xf32, #tpu.memory_space<vmem>>, vector<6x160xf32>,
    %c0_417 = arith.constant 0 : index
    %c65_418 = arith.constant 65 : index
    %318 = vector.load %arg22[%c0_417, %c65_418] : memref<8x256xf32, #tpu.memory_space<vmem>>, vector<6x160xf32>
    %c126_419 = arith.constant 126 : index
    %c0_420 = arith.constant 0 : index
    %319 = vector.load %arg23[%c126_419, %c0_420] : memref<160x160xf32, #tpu.memory_space<vmem>>, vector<6x160xf32>
    tpu.vector_store %arg23[%c126_419, %c0_420], %318 {strides = array<i32>} : memref<160x160xf32, #tpu.memory_space<vmem>>, vector<6x160xf32>,
    %c0_421 = arith.constant 0 : index
    %c66_422 = arith.constant 66 : index
    %320 = vector.load %arg22[%c0_421, %c66_422] : memref<8x256xf32, #tpu.memory_space<vmem>>, vector<6x160xf32>
    %c132_423 = arith.constant 132 : index
    %c0_424 = arith.constant 0 : index
    %321 = vector.load %arg23[%c132_423, %c0_424] : memref<160x160xf32, #tpu.memory_space<vmem>>, vector<6x160xf32>
    tpu.vector_store %arg23[%c132_423, %c0_424], %320 {strides = array<i32>} : memref<160x160xf32, #tpu.memory_space<vmem>>, vector<6x160xf32>,
    %c0_425 = arith.constant 0 : index
    %c67_426 = arith.constant 67 : index
    %322 = vector.load %arg22[%c0_425, %c67_426] : memref<8x256xf32, #tpu.memory_space<vmem>>, vector<6x160xf32>
    %c138_427 = arith.constant 138 : index
    %c0_428 = arith.constant 0 : index
    %323 = vector.load %arg23[%c138_427, %c0_428] : memref<160x160xf32, #tpu.memory_space<vmem>>, vector<6x160xf32>
    tpu.vector_store %arg23[%c138_427, %c0_428], %322 {strides = array<i32>} : memref<160x160xf32, #tpu.memory_space<vmem>>, vector<6x160xf32>,
    %c0_429 = arith.constant 0 : index
    %c68_430 = arith.constant 68 : index
    %324 = vector.load %arg22[%c0_429, %c68_430] : memref<8x256xf32, #tpu.memory_space<vmem>>, vector<6x160xf32>
    %c144_431 = arith.constant 144 : index
    %c0_432 = arith.constant 0 : index
    %325 = vector.load %arg23[%c144_431, %c0_432] : memref<160x160xf32, #tpu.memory_space<vmem>>, vector<6x160xf32>
    tpu.vector_store %arg23[%c144_431, %c0_432], %324 {strides = array<i32>} : memref<160x160xf32, #tpu.memory_space<vmem>>, vector<6x160xf32>,
    %c0_433 = arith.constant 0 : index
    %c0_434 = arith.constant 0 : index
    %326 = vector.load %arg23[%c0_433, %c0_434] : memref<160x160xf32, #tpu.memory_space<vmem>>, vector<160x160xf32>
    %cst_435 = arith.constant dense<0.000000e+00> : vector<16x160xf32>
    %327 = tpu.matmul %6, %326, %cst_435 {dimension_numbers = #tpu.dot_dimension_numbers<[1], [0], [0], [1], [0, 0, 1, 1], [], []>} : vector<16x160xf32>, vector<160x160xf32>, vector<16x160xf32> -> vector<16x160xf32>
    %328 = vector.broadcast %7 : vector<16x1xf32> to vector<16x160xf32>
    %329 = arith.addf %327, %328 : vector<16x160xf32>
    %c1_436 = arith.constant 1 : index
    %c0_437 = arith.constant 0 : index
    %c0_438 = arith.constant 0 : index
    %330 = vector.load %arg24[%c1_436, %c0_437, %c0_438] : memref<2x16x160xf32, #tpu.memory_space<vmem>>, vector<1x16x160xf32>
    %331 = vector.shape_cast %330 : vector<1x16x160xf32> to vector<16x160xf32>
    %332 = vector.shape_cast %329 : vector<16x160xf32> to vector<1x16x160xf32>
    tpu.vector_store %arg24[%c1_436, %c0_437, %c0_438], %332 {strides = array<i32>} : memref<2x16x160xf32, #tpu.memory_space<vmem>>, vector<1x16x160xf32>,
    %333 = vector.broadcast %9 : vector<1x160xf32> to vector<16x160xf32>
    %334 = arith.mulf %329, %333 : vector<16x160xf32>
    %cst_439 = arith.constant dense<0.000000e+00> : vector<16xf32>
    %335 = vector.multi_reduction <add>, %334, %cst_439 [1] : vector<16x160xf32> to vector<16xf32>
    %336 = vector.shape_cast %335 : vector<16xf32> to vector<16x1xf32>
    %337 = arith.addf %246, %336 : vector<16x1xf32>
    %338 = arith.mulf %334, %329 : vector<16x160xf32>
    %cst_440 = arith.constant dense<0.000000e+00> : vector<16xf32>
    %339 = vector.multi_reduction <add>, %338, %cst_440 [1] : vector<16x160xf32> to vector<16xf32>
    %340 = vector.shape_cast %339 : vector<16xf32> to vector<16x1xf32>
    %341 = arith.addf %250, %340 : vector<16x1xf32>
    %cst_441 = arith.constant 5.000000e-03 : f32
    %342 = vector.broadcast %cst_441 : f32 to vector<16x1xf32>
    %343 = arith.mulf %337, %342 : vector<16x1xf32>
    %cst_442 = arith.constant 5.000000e-03 : f32
    %344 = vector.broadcast %cst_442 : f32 to vector<16x1xf32>
    %345 = arith.mulf %341, %344 : vector<16x1xf32>
    %346 = arith.mulf %343, %343 : vector<16x1xf32>
    %347 = arith.subf %345, %346 : vector<16x1xf32>
    %c0_443 = arith.constant 0 : index
    %c0_444 = arith.constant 0 : index
    %348 = vector.load %arg9[%c0_443, %c0_444] : memref<16x1xf32, #tpu.memory_space<vmem>>, vector<16x1xf32>
    %cst_445 = arith.constant 9.99999974E-6 : f32
    %349 = vector.broadcast %cst_445 : f32 to vector<16x1xf32>
    %350 = arith.addf %347, %349 : vector<16x1xf32>
    %351 = math.rsqrt %350 : vector<16x1xf32>
    %352 = arith.mulf %348, %351 : vector<16x1xf32>
    %c0_446 = arith.constant 0 : index
    %c0_447 = arith.constant 0 : index
    %353 = vector.load %arg10[%c0_446, %c0_447] : memref<16x1xf32, #tpu.memory_space<vmem>>, vector<16x1xf32>
    %354 = arith.mulf %343, %352 : vector<16x1xf32>
    %355 = arith.subf %353, %354 : vector<16x1xf32>
    %c0_448 = arith.constant 0 : index
    %c0_449 = arith.constant 0 : index
    %c0_450 = arith.constant 0 : index
    %356 = vector.load %arg24[%c0_448, %c0_449, %c0_450] : memref<2x16x160xf32, #tpu.memory_space<vmem>>, vector<1x16x160xf32>
    %357 = vector.shape_cast %356 : vector<1x16x160xf32> to vector<16x160xf32>
    %358 = vector.broadcast %352 : vector<16x1xf32> to vector<16x160xf32>
    %359 = arith.mulf %357, %358 : vector<16x160xf32>
    %360 = vector.broadcast %355 : vector<16x1xf32> to vector<16x160xf32>
    %361 = arith.addf %359, %360 : vector<16x160xf32>
    %cst_451 = arith.constant 0.000000e+00 : f32
    %362 = vector.broadcast %cst_451 : f32 to vector<16x160xf32>
    %363 = arith.maximumf %361, %362 : vector<16x160xf32>
    %c0_452 = arith.constant 0 : index
    %c0_453 = arith.constant 0 : index
    %c0_454 = arith.constant 0 : index
    %364 = vector.load %arg24[%c0_452, %c0_453, %c0_454] : memref<2x16x160xf32, #tpu.memory_space<vmem>>, vector<1x16x160xf32>
    %365 = vector.shape_cast %364 : vector<1x16x160xf32> to vector<16x160xf32>
    %366 = vector.shape_cast %363 : vector<16x160xf32> to vector<1x16x160xf32>
    tpu.vector_store %arg24[%c0_452, %c0_453, %c0_454], %366 {strides = array<i32>} : memref<2x16x160xf32, #tpu.memory_space<vmem>>, vector<1x16x160xf32>,
    %c0_455 = arith.constant 0 : index
    %c0_456 = arith.constant 0 : index
    %c0_457 = arith.constant 0 : index
    %367 = vector.load %arg24[%c0_455, %c0_456, %c0_457] : memref<2x16x160xf32, #tpu.memory_space<vmem>>, vector<1x16x143xf32>
    %368 = vector.shape_cast %367 : vector<1x16x143xf32> to vector<16x143xf32>
    %c0_458 = arith.constant 0 : index
    %c0_459 = arith.constant 0 : index
    %c1_460 = arith.constant 1 : index
    %369 = vector.load %arg24[%c0_458, %c0_459, %c1_460] : memref<2x16x160xf32, #tpu.memory_space<vmem>>, vector<1x16x143xf32>
    %370 = vector.shape_cast %369 : vector<1x16x143xf32> to vector<16x143xf32>
    %371 = arith.maximumf %368, %370 : vector<16x143xf32>
    %c0_461 = arith.constant 0 : index
    %c0_462 = arith.constant 0 : index
    %c16_463 = arith.constant 16 : index
    %372 = vector.load %arg24[%c0_461, %c0_462, %c16_463] : memref<2x16x160xf32, #tpu.memory_space<vmem>>, vector<1x16x143xf32>
    %373 = vector.shape_cast %372 : vector<1x16x143xf32> to vector<16x143xf32>
    %c0_464 = arith.constant 0 : index
    %c0_465 = arith.constant 0 : index
    %c17_466 = arith.constant 17 : index
    %374 = vector.load %arg24[%c0_464, %c0_465, %c17_466] : memref<2x16x160xf32, #tpu.memory_space<vmem>>, vector<1x16x143xf32>
    %375 = vector.shape_cast %374 : vector<1x16x143xf32> to vector<16x143xf32>
    %376 = arith.maximumf %373, %375 : vector<16x143xf32>
    %377 = arith.maximumf %371, %376 : vector<16x143xf32>
    %c0_467 = arith.constant 0 : index
    %c0_468 = arith.constant 0 : index
    %378 = vector.load %arg12[%c0_467, %c0_468] : memref<143x32xf32, #tpu.memory_space<vmem>>, vector<143x32xf32>
    %cst_469 = arith.constant dense<0.000000e+00> : vector<16x32xf32>
    %379 = tpu.matmul %377, %378, %cst_469 {dimension_numbers = #tpu.dot_dimension_numbers<[1], [0], [0], [1], [0, 0, 1, 1], [], []>} : vector<16x143xf32>, vector<143x32xf32>, vector<16x32xf32> -> vector<16x32xf32>
    %c0_470 = arith.constant 0 : index
    %c0_471 = arith.constant 0 : index
    %380 = vector.load %arg25[%c0_470, %c0_471] : memref<16x32xf32, #tpu.memory_space<vmem>>, vector<16x32xf32>
    tpu.vector_store %arg25[%c0_470, %c0_471], %379 {strides = array<i32>} : memref<16x32xf32, #tpu.memory_space<vmem>>, vector<16x32xf32>,
    %c0_472 = arith.constant 0 : index
    %c0_473 = arith.constant 0 : index
    %381 = vector.load %arg25[%c0_472, %c0_473] : memref<16x32xf32, #tpu.memory_space<vmem>>, vector<1x32xf32>
    %c0_474 = arith.constant 0 : index
    %c0_475 = arith.constant 0 : index
    %382 = vector.load %arg26[%c0_474, %c0_475] : memref<2x512xf32, #tpu.memory_space<vmem>>, vector<1x32xf32>
    tpu.vector_store %arg26[%c0_474, %c0_475], %381 {strides = array<i32>} : memref<2x512xf32, #tpu.memory_space<vmem>>, vector<1x32xf32>,
    %c1_476 = arith.constant 1 : index
    %c0_477 = arith.constant 0 : index
    %383 = vector.load %arg25[%c1_476, %c0_477] : memref<16x32xf32, #tpu.memory_space<vmem>>, vector<1x32xf32>
    %c0_478 = arith.constant 0 : index
    %c32_479 = arith.constant 32 : index
    %384 = vector.load %arg26[%c0_478, %c32_479] : memref<2x512xf32, #tpu.memory_space<vmem>>, vector<1x32xf32>
    tpu.vector_store %arg26[%c0_478, %c32_479], %383 {strides = array<i32>} : memref<2x512xf32, #tpu.memory_space<vmem>>, vector<1x32xf32>,
    %c2_480 = arith.constant 2 : index
    %c0_481 = arith.constant 0 : index
    %385 = vector.load %arg25[%c2_480, %c0_481] : memref<16x32xf32, #tpu.memory_space<vmem>>, vector<1x32xf32>
    %c0_482 = arith.constant 0 : index
    %c64_483 = arith.constant 64 : index
    %386 = vector.load %arg26[%c0_482, %c64_483] : memref<2x512xf32, #tpu.memory_space<vmem>>, vector<1x32xf32>
    tpu.vector_store %arg26[%c0_482, %c64_483], %385 {strides = array<i32>} : memref<2x512xf32, #tpu.memory_space<vmem>>, vector<1x32xf32>,
    %c3_484 = arith.constant 3 : index
    %c0_485 = arith.constant 0 : index
    %387 = vector.load %arg25[%c3_484, %c0_485] : memref<16x32xf32, #tpu.memory_space<vmem>>, vector<1x32xf32>
    %c0_486 = arith.constant 0 : index
    %c96_487 = arith.constant 96 : index
    %388 = vector.load %arg26[%c0_486, %c96_487] : memref<2x512xf32, #tpu.memory_space<vmem>>, vector<1x32xf32>
    tpu.vector_store %arg26[%c0_486, %c96_487], %387 {strides = array<i32>} : memref<2x512xf32, #tpu.memory_space<vmem>>, vector<1x32xf32>,
    %c4_488 = arith.constant 4 : index
    %c0_489 = arith.constant 0 : index
    %389 = vector.load %arg25[%c4_488, %c0_489] : memref<16x32xf32, #tpu.memory_space<vmem>>, vector<1x32xf32>
    %c0_490 = arith.constant 0 : index
    %c128_491 = arith.constant 128 : index
    %390 = vector.load %arg26[%c0_490, %c128_491] : memref<2x512xf32, #tpu.memory_space<vmem>>, vector<1x32xf32>
    tpu.vector_store %arg26[%c0_490, %c128_491], %389 {strides = array<i32>} : memref<2x512xf32, #tpu.memory_space<vmem>>, vector<1x32xf32>,
    %c5_492 = arith.constant 5 : index
    %c0_493 = arith.constant 0 : index
    %391 = vector.load %arg25[%c5_492, %c0_493] : memref<16x32xf32, #tpu.memory_space<vmem>>, vector<1x32xf32>
    %c0_494 = arith.constant 0 : index
    %c160 = arith.constant 160 : index
    %392 = vector.load %arg26[%c0_494, %c160] : memref<2x512xf32, #tpu.memory_space<vmem>>, vector<1x32xf32>
    tpu.vector_store %arg26[%c0_494, %c160], %391 {strides = array<i32>} : memref<2x512xf32, #tpu.memory_space<vmem>>, vector<1x32xf32>,
    %c6_495 = arith.constant 6 : index
    %c0_496 = arith.constant 0 : index
    %393 = vector.load %arg25[%c6_495, %c0_496] : memref<16x32xf32, #tpu.memory_space<vmem>>, vector<1x32xf32>
    %c0_497 = arith.constant 0 : index
    %c192 = arith.constant 192 : index
    %394 = vector.load %arg26[%c0_497, %c192] : memref<2x512xf32, #tpu.memory_space<vmem>>, vector<1x32xf32>
    tpu.vector_store %arg26[%c0_497, %c192], %393 {strides = array<i32>} : memref<2x512xf32, #tpu.memory_space<vmem>>, vector<1x32xf32>,
    %c7_498 = arith.constant 7 : index
    %c0_499 = arith.constant 0 : index
    %395 = vector.load %arg25[%c7_498, %c0_499] : memref<16x32xf32, #tpu.memory_space<vmem>>, vector<1x32xf32>
    %c0_500 = arith.constant 0 : index
    %c224 = arith.constant 224 : index
    %396 = vector.load %arg26[%c0_500, %c224] : memref<2x512xf32, #tpu.memory_space<vmem>>, vector<1x32xf32>
    tpu.vector_store %arg26[%c0_500, %c224], %395 {strides = array<i32>} : memref<2x512xf32, #tpu.memory_space<vmem>>, vector<1x32xf32>,
    %c8_501 = arith.constant 8 : index
    %c0_502 = arith.constant 0 : index
    %397 = vector.load %arg25[%c8_501, %c0_502] : memref<16x32xf32, #tpu.memory_space<vmem>>, vector<1x32xf32>
    %c0_503 = arith.constant 0 : index
    %c256 = arith.constant 256 : index
    %398 = vector.load %arg26[%c0_503, %c256] : memref<2x512xf32, #tpu.memory_space<vmem>>, vector<1x32xf32>
    tpu.vector_store %arg26[%c0_503, %c256], %397 {strides = array<i32>} : memref<2x512xf32, #tpu.memory_space<vmem>>, vector<1x32xf32>,
    %c9_504 = arith.constant 9 : index
    %c0_505 = arith.constant 0 : index
    %399 = vector.load %arg25[%c9_504, %c0_505] : memref<16x32xf32, #tpu.memory_space<vmem>>, vector<1x32xf32>
    %c0_506 = arith.constant 0 : index
    %c288 = arith.constant 288 : index
    %400 = vector.load %arg26[%c0_506, %c288] : memref<2x512xf32, #tpu.memory_space<vmem>>, vector<1x32xf32>
    tpu.vector_store %arg26[%c0_506, %c288], %399 {strides = array<i32>} : memref<2x512xf32, #tpu.memory_space<vmem>>, vector<1x32xf32>,
    %c10_507 = arith.constant 10 : index
    %c0_508 = arith.constant 0 : index
    %401 = vector.load %arg25[%c10_507, %c0_508] : memref<16x32xf32, #tpu.memory_space<vmem>>, vector<1x32xf32>
    %c0_509 = arith.constant 0 : index
    %c320 = arith.constant 320 : index
    %402 = vector.load %arg26[%c0_509, %c320] : memref<2x512xf32, #tpu.memory_space<vmem>>, vector<1x32xf32>
    tpu.vector_store %arg26[%c0_509, %c320], %401 {strides = array<i32>} : memref<2x512xf32, #tpu.memory_space<vmem>>, vector<1x32xf32>,
    %c11_510 = arith.constant 11 : index
    %c0_511 = arith.constant 0 : index
    %403 = vector.load %arg25[%c11_510, %c0_511] : memref<16x32xf32, #tpu.memory_space<vmem>>, vector<1x32xf32>
    %c0_512 = arith.constant 0 : index
    %c352 = arith.constant 352 : index
    %404 = vector.load %arg26[%c0_512, %c352] : memref<2x512xf32, #tpu.memory_space<vmem>>, vector<1x32xf32>
    tpu.vector_store %arg26[%c0_512, %c352], %403 {strides = array<i32>} : memref<2x512xf32, #tpu.memory_space<vmem>>, vector<1x32xf32>,
    %c12_513 = arith.constant 12 : index
    %c0_514 = arith.constant 0 : index
    %405 = vector.load %arg25[%c12_513, %c0_514] : memref<16x32xf32, #tpu.memory_space<vmem>>, vector<1x32xf32>
    %c0_515 = arith.constant 0 : index
    %c384 = arith.constant 384 : index
    %406 = vector.load %arg26[%c0_515, %c384] : memref<2x512xf32, #tpu.memory_space<vmem>>, vector<1x32xf32>
    tpu.vector_store %arg26[%c0_515, %c384], %405 {strides = array<i32>} : memref<2x512xf32, #tpu.memory_space<vmem>>, vector<1x32xf32>,
    %c13_516 = arith.constant 13 : index
    %c0_517 = arith.constant 0 : index
    %407 = vector.load %arg25[%c13_516, %c0_517] : memref<16x32xf32, #tpu.memory_space<vmem>>, vector<1x32xf32>
    %c0_518 = arith.constant 0 : index
    %c416 = arith.constant 416 : index
    %408 = vector.load %arg26[%c0_518, %c416] : memref<2x512xf32, #tpu.memory_space<vmem>>, vector<1x32xf32>
    tpu.vector_store %arg26[%c0_518, %c416], %407 {strides = array<i32>} : memref<2x512xf32, #tpu.memory_space<vmem>>, vector<1x32xf32>,
    %c14_519 = arith.constant 14 : index
    %c0_520 = arith.constant 0 : index
    %409 = vector.load %arg25[%c14_519, %c0_520] : memref<16x32xf32, #tpu.memory_space<vmem>>, vector<1x32xf32>
    %c0_521 = arith.constant 0 : index
    %c448 = arith.constant 448 : index
    %410 = vector.load %arg26[%c0_521, %c448] : memref<2x512xf32, #tpu.memory_space<vmem>>, vector<1x32xf32>
    tpu.vector_store %arg26[%c0_521, %c448], %409 {strides = array<i32>} : memref<2x512xf32, #tpu.memory_space<vmem>>, vector<1x32xf32>,
    %c15_522 = arith.constant 15 : index
    %c0_523 = arith.constant 0 : index
    %411 = vector.load %arg25[%c15_522, %c0_523] : memref<16x32xf32, #tpu.memory_space<vmem>>, vector<1x32xf32>
    %c0_524 = arith.constant 0 : index
    %c480 = arith.constant 480 : index
    %412 = vector.load %arg26[%c0_524, %c480] : memref<2x512xf32, #tpu.memory_space<vmem>>, vector<1x32xf32>
    tpu.vector_store %arg26[%c0_524, %c480], %411 {strides = array<i32>} : memref<2x512xf32, #tpu.memory_space<vmem>>, vector<1x32xf32>,
    %c1_525 = arith.constant 1 : index
    %c0_526 = arith.constant 0 : index
    %c0_527 = arith.constant 0 : index
    %413 = vector.load %arg24[%c1_525, %c0_526, %c0_527] : memref<2x16x160xf32, #tpu.memory_space<vmem>>, vector<1x16x160xf32>
    %414 = vector.shape_cast %413 : vector<1x16x160xf32> to vector<16x160xf32>
    %415 = vector.broadcast %352 : vector<16x1xf32> to vector<16x160xf32>
    %416 = arith.mulf %414, %415 : vector<16x160xf32>
    %417 = vector.broadcast %355 : vector<16x1xf32> to vector<16x160xf32>
    %418 = arith.addf %416, %417 : vector<16x160xf32>
    %cst_528 = arith.constant 0.000000e+00 : f32
    %419 = vector.broadcast %cst_528 : f32 to vector<16x160xf32>
    %420 = arith.maximumf %418, %419 : vector<16x160xf32>
    %c1_529 = arith.constant 1 : index
    %c0_530 = arith.constant 0 : index
    %c0_531 = arith.constant 0 : index
    %421 = vector.load %arg24[%c1_529, %c0_530, %c0_531] : memref<2x16x160xf32, #tpu.memory_space<vmem>>, vector<1x16x160xf32>
    %422 = vector.shape_cast %421 : vector<1x16x160xf32> to vector<16x160xf32>
    %423 = vector.shape_cast %420 : vector<16x160xf32> to vector<1x16x160xf32>
    tpu.vector_store %arg24[%c1_529, %c0_530, %c0_531], %423 {strides = array<i32>} : memref<2x16x160xf32, #tpu.memory_space<vmem>>, vector<1x16x160xf32>,
    %c1_532 = arith.constant 1 : index
    %c0_533 = arith.constant 0 : index
    %c0_534 = arith.constant 0 : index
    %424 = vector.load %arg24[%c1_532, %c0_533, %c0_534] : memref<2x16x160xf32, #tpu.memory_space<vmem>>, vector<1x16x143xf32>
    %425 = vector.shape_cast %424 : vector<1x16x143xf32> to vector<16x143xf32>
    %c1_535 = arith.constant 1 : index
    %c0_536 = arith.constant 0 : index
    %c1_537 = arith.constant 1 : index
    %426 = vector.load %arg24[%c1_535, %c0_536, %c1_537] : memref<2x16x160xf32, #tpu.memory_space<vmem>>, vector<1x16x143xf32>
    %427 = vector.shape_cast %426 : vector<1x16x143xf32> to vector<16x143xf32>
    %428 = arith.maximumf %425, %427 : vector<16x143xf32>
    %c1_538 = arith.constant 1 : index
    %c0_539 = arith.constant 0 : index
    %c16_540 = arith.constant 16 : index
    %429 = vector.load %arg24[%c1_538, %c0_539, %c16_540] : memref<2x16x160xf32, #tpu.memory_space<vmem>>, vector<1x16x143xf32>
    %430 = vector.shape_cast %429 : vector<1x16x143xf32> to vector<16x143xf32>
    %c1_541 = arith.constant 1 : index
    %c0_542 = arith.constant 0 : index
    %c17_543 = arith.constant 17 : index
    %431 = vector.load %arg24[%c1_541, %c0_542, %c17_543] : memref<2x16x160xf32, #tpu.memory_space<vmem>>, vector<1x16x143xf32>
    %432 = vector.shape_cast %431 : vector<1x16x143xf32> to vector<16x143xf32>
    %433 = arith.maximumf %430, %432 : vector<16x143xf32>
    %434 = arith.maximumf %428, %433 : vector<16x143xf32>
    %c0_544 = arith.constant 0 : index
    %c0_545 = arith.constant 0 : index
    %435 = vector.load %arg12[%c0_544, %c0_545] : memref<143x32xf32, #tpu.memory_space<vmem>>, vector<143x32xf32>
    %cst_546 = arith.constant dense<0.000000e+00> : vector<16x32xf32>
    %436 = tpu.matmul %434, %435, %cst_546 {dimension_numbers = #tpu.dot_dimension_numbers<[1], [0], [0], [1], [0, 0, 1, 1], [], []>} : vector<16x143xf32>, vector<143x32xf32>, vector<16x32xf32> -> vector<16x32xf32>
    %c0_547 = arith.constant 0 : index
    %c0_548 = arith.constant 0 : index
    %437 = vector.load %arg25[%c0_547, %c0_548] : memref<16x32xf32, #tpu.memory_space<vmem>>, vector<16x32xf32>
    tpu.vector_store %arg25[%c0_547, %c0_548], %436 {strides = array<i32>} : memref<16x32xf32, #tpu.memory_space<vmem>>, vector<16x32xf32>,
    %c0_549 = arith.constant 0 : index
    %c0_550 = arith.constant 0 : index
    %438 = vector.load %arg25[%c0_549, %c0_550] : memref<16x32xf32, #tpu.memory_space<vmem>>, vector<1x32xf32>
    %c1_551 = arith.constant 1 : index
    %c0_552 = arith.constant 0 : index
    %439 = vector.load %arg26[%c1_551, %c0_552] : memref<2x512xf32, #tpu.memory_space<vmem>>, vector<1x32xf32>
    tpu.vector_store %arg26[%c1_551, %c0_552], %438 {strides = array<i32>} : memref<2x512xf32, #tpu.memory_space<vmem>>, vector<1x32xf32>,
    %c1_553 = arith.constant 1 : index
    %c0_554 = arith.constant 0 : index
    %440 = vector.load %arg25[%c1_553, %c0_554] : memref<16x32xf32, #tpu.memory_space<vmem>>, vector<1x32xf32>
    %c1_555 = arith.constant 1 : index
    %c32_556 = arith.constant 32 : index
    %441 = vector.load %arg26[%c1_555, %c32_556] : memref<2x512xf32, #tpu.memory_space<vmem>>, vector<1x32xf32>
    tpu.vector_store %arg26[%c1_555, %c32_556], %440 {strides = array<i32>} : memref<2x512xf32, #tpu.memory_space<vmem>>, vector<1x32xf32>,
    %c2_557 = arith.constant 2 : index
    %c0_558 = arith.constant 0 : index
    %442 = vector.load %arg25[%c2_557, %c0_558] : memref<16x32xf32, #tpu.memory_space<vmem>>, vector<1x32xf32>
    %c1_559 = arith.constant 1 : index
    %c64_560 = arith.constant 64 : index
    %443 = vector.load %arg26[%c1_559, %c64_560] : memref<2x512xf32, #tpu.memory_space<vmem>>, vector<1x32xf32>
    tpu.vector_store %arg26[%c1_559, %c64_560], %442 {strides = array<i32>} : memref<2x512xf32, #tpu.memory_space<vmem>>, vector<1x32xf32>,
    %c3_561 = arith.constant 3 : index
    %c0_562 = arith.constant 0 : index
    %444 = vector.load %arg25[%c3_561, %c0_562] : memref<16x32xf32, #tpu.memory_space<vmem>>, vector<1x32xf32>
    %c1_563 = arith.constant 1 : index
    %c96_564 = arith.constant 96 : index
    %445 = vector.load %arg26[%c1_563, %c96_564] : memref<2x512xf32, #tpu.memory_space<vmem>>, vector<1x32xf32>
    tpu.vector_store %arg26[%c1_563, %c96_564], %444 {strides = array<i32>} : memref<2x512xf32, #tpu.memory_space<vmem>>, vector<1x32xf32>,
    %c4_565 = arith.constant 4 : index
    %c0_566 = arith.constant 0 : index
    %446 = vector.load %arg25[%c4_565, %c0_566] : memref<16x32xf32, #tpu.memory_space<vmem>>, vector<1x32xf32>
    %c1_567 = arith.constant 1 : index
    %c128_568 = arith.constant 128 : index
    %447 = vector.load %arg26[%c1_567, %c128_568] : memref<2x512xf32, #tpu.memory_space<vmem>>, vector<1x32xf32>
    tpu.vector_store %arg26[%c1_567, %c128_568], %446 {strides = array<i32>} : memref<2x512xf32, #tpu.memory_space<vmem>>, vector<1x32xf32>,
    %c5_569 = arith.constant 5 : index
    %c0_570 = arith.constant 0 : index
    %448 = vector.load %arg25[%c5_569, %c0_570] : memref<16x32xf32, #tpu.memory_space<vmem>>, vector<1x32xf32>
    %c1_571 = arith.constant 1 : index
    %c160_572 = arith.constant 160 : index
    %449 = vector.load %arg26[%c1_571, %c160_572] : memref<2x512xf32, #tpu.memory_space<vmem>>, vector<1x32xf32>
    tpu.vector_store %arg26[%c1_571, %c160_572], %448 {strides = array<i32>} : memref<2x512xf32, #tpu.memory_space<vmem>>, vector<1x32xf32>,
    %c6_573 = arith.constant 6 : index
    %c0_574 = arith.constant 0 : index
    %450 = vector.load %arg25[%c6_573, %c0_574] : memref<16x32xf32, #tpu.memory_space<vmem>>, vector<1x32xf32>
    %c1_575 = arith.constant 1 : index
    %c192_576 = arith.constant 192 : index
    %451 = vector.load %arg26[%c1_575, %c192_576] : memref<2x512xf32, #tpu.memory_space<vmem>>, vector<1x32xf32>
    tpu.vector_store %arg26[%c1_575, %c192_576], %450 {strides = array<i32>} : memref<2x512xf32, #tpu.memory_space<vmem>>, vector<1x32xf32>,
    %c7_577 = arith.constant 7 : index
    %c0_578 = arith.constant 0 : index
    %452 = vector.load %arg25[%c7_577, %c0_578] : memref<16x32xf32, #tpu.memory_space<vmem>>, vector<1x32xf32>
    %c1_579 = arith.constant 1 : index
    %c224_580 = arith.constant 224 : index
    %453 = vector.load %arg26[%c1_579, %c224_580] : memref<2x512xf32, #tpu.memory_space<vmem>>, vector<1x32xf32>
    tpu.vector_store %arg26[%c1_579, %c224_580], %452 {strides = array<i32>} : memref<2x512xf32, #tpu.memory_space<vmem>>, vector<1x32xf32>,
    %c8_581 = arith.constant 8 : index
    %c0_582 = arith.constant 0 : index
    %454 = vector.load %arg25[%c8_581, %c0_582] : memref<16x32xf32, #tpu.memory_space<vmem>>, vector<1x32xf32>
    %c1_583 = arith.constant 1 : index
    %c256_584 = arith.constant 256 : index
    %455 = vector.load %arg26[%c1_583, %c256_584] : memref<2x512xf32, #tpu.memory_space<vmem>>, vector<1x32xf32>
    tpu.vector_store %arg26[%c1_583, %c256_584], %454 {strides = array<i32>} : memref<2x512xf32, #tpu.memory_space<vmem>>, vector<1x32xf32>,
    %c9_585 = arith.constant 9 : index
    %c0_586 = arith.constant 0 : index
    %456 = vector.load %arg25[%c9_585, %c0_586] : memref<16x32xf32, #tpu.memory_space<vmem>>, vector<1x32xf32>
    %c1_587 = arith.constant 1 : index
    %c288_588 = arith.constant 288 : index
    %457 = vector.load %arg26[%c1_587, %c288_588] : memref<2x512xf32, #tpu.memory_space<vmem>>, vector<1x32xf32>
    tpu.vector_store %arg26[%c1_587, %c288_588], %456 {strides = array<i32>} : memref<2x512xf32, #tpu.memory_space<vmem>>, vector<1x32xf32>,
    %c10_589 = arith.constant 10 : index
    %c0_590 = arith.constant 0 : index
    %458 = vector.load %arg25[%c10_589, %c0_590] : memref<16x32xf32, #tpu.memory_space<vmem>>, vector<1x32xf32>
    %c1_591 = arith.constant 1 : index
    %c320_592 = arith.constant 320 : index
    %459 = vector.load %arg26[%c1_591, %c320_592] : memref<2x512xf32, #tpu.memory_space<vmem>>, vector<1x32xf32>
    tpu.vector_store %arg26[%c1_591, %c320_592], %458 {strides = array<i32>} : memref<2x512xf32, #tpu.memory_space<vmem>>, vector<1x32xf32>,
    %c11_593 = arith.constant 11 : index
    %c0_594 = arith.constant 0 : index
    %460 = vector.load %arg25[%c11_593, %c0_594] : memref<16x32xf32, #tpu.memory_space<vmem>>, vector<1x32xf32>
    %c1_595 = arith.constant 1 : index
    %c352_596 = arith.constant 352 : index
    %461 = vector.load %arg26[%c1_595, %c352_596] : memref<2x512xf32, #tpu.memory_space<vmem>>, vector<1x32xf32>
    tpu.vector_store %arg26[%c1_595, %c352_596], %460 {strides = array<i32>} : memref<2x512xf32, #tpu.memory_space<vmem>>, vector<1x32xf32>,
    %c12_597 = arith.constant 12 : index
    %c0_598 = arith.constant 0 : index
    %462 = vector.load %arg25[%c12_597, %c0_598] : memref<16x32xf32, #tpu.memory_space<vmem>>, vector<1x32xf32>
    %c1_599 = arith.constant 1 : index
    %c384_600 = arith.constant 384 : index
    %463 = vector.load %arg26[%c1_599, %c384_600] : memref<2x512xf32, #tpu.memory_space<vmem>>, vector<1x32xf32>
    tpu.vector_store %arg26[%c1_599, %c384_600], %462 {strides = array<i32>} : memref<2x512xf32, #tpu.memory_space<vmem>>, vector<1x32xf32>,
    %c13_601 = arith.constant 13 : index
    %c0_602 = arith.constant 0 : index
    %464 = vector.load %arg25[%c13_601, %c0_602] : memref<16x32xf32, #tpu.memory_space<vmem>>, vector<1x32xf32>
    %c1_603 = arith.constant 1 : index
    %c416_604 = arith.constant 416 : index
    %465 = vector.load %arg26[%c1_603, %c416_604] : memref<2x512xf32, #tpu.memory_space<vmem>>, vector<1x32xf32>
    tpu.vector_store %arg26[%c1_603, %c416_604], %464 {strides = array<i32>} : memref<2x512xf32, #tpu.memory_space<vmem>>, vector<1x32xf32>,
    %c14_605 = arith.constant 14 : index
    %c0_606 = arith.constant 0 : index
    %466 = vector.load %arg25[%c14_605, %c0_606] : memref<16x32xf32, #tpu.memory_space<vmem>>, vector<1x32xf32>
    %c1_607 = arith.constant 1 : index
    %c448_608 = arith.constant 448 : index
    %467 = vector.load %arg26[%c1_607, %c448_608] : memref<2x512xf32, #tpu.memory_space<vmem>>, vector<1x32xf32>
    tpu.vector_store %arg26[%c1_607, %c448_608], %466 {strides = array<i32>} : memref<2x512xf32, #tpu.memory_space<vmem>>, vector<1x32xf32>,
    %c15_609 = arith.constant 15 : index
    %c0_610 = arith.constant 0 : index
    %468 = vector.load %arg25[%c15_609, %c0_610] : memref<16x32xf32, #tpu.memory_space<vmem>>, vector<1x32xf32>
    %c1_611 = arith.constant 1 : index
    %c480_612 = arith.constant 480 : index
    %469 = vector.load %arg26[%c1_611, %c480_612] : memref<2x512xf32, #tpu.memory_space<vmem>>, vector<1x32xf32>
    tpu.vector_store %arg26[%c1_611, %c480_612], %468 {strides = array<i32>} : memref<2x512xf32, #tpu.memory_space<vmem>>, vector<1x32xf32>,
    %c0_613 = arith.constant 0 : index
    %c0_614 = arith.constant 0 : index
    %470 = vector.load %arg26[%c0_613, %c0_614] : memref<2x512xf32, #tpu.memory_space<vmem>>, vector<2x512xf32>
    %c0_615 = arith.constant 0 : index
    %c0_616 = arith.constant 0 : index
    %471 = vector.load %arg13[%c0_615, %c0_616] : memref<512x128xf32, #tpu.memory_space<vmem>>, vector<512x128xf32>
    %cst_617 = arith.constant dense<0.000000e+00> : vector<2x128xf32>
    %472 = tpu.matmul %470, %471, %cst_617 {dimension_numbers = #tpu.dot_dimension_numbers<[1], [0], [0], [1], [0, 0, 1, 1], [], []>} : vector<2x512xf32>, vector<512x128xf32>, vector<2x128xf32> -> vector<2x128xf32>
    %c0_618 = arith.constant 0 : index
    %c0_619 = arith.constant 0 : index
    %473 = vector.load %arg14[%c0_618, %c0_619] : memref<1x128xf32, #tpu.memory_space<vmem>>, vector<1x128xf32>
    %474 = vector.broadcast %473 : vector<1x128xf32> to vector<2x128xf32>
    %475 = arith.addf %472, %474 : vector<2x128xf32>
    %c0_620 = arith.constant 0 : index
    %c0_621 = arith.constant 0 : index
    %476 = vector.load %arg15[%c0_620, %c0_621] : memref<128x128xf32, #tpu.memory_space<vmem>>, vector<128x128xf32>
    %cst_622 = arith.constant dense<0.000000e+00> : vector<2x128xf32>
    %477 = tpu.matmul %475, %476, %cst_622 {dimension_numbers = #tpu.dot_dimension_numbers<[1], [0], [0], [1], [0, 0, 1, 1], [], []>} : vector<2x128xf32>, vector<128x128xf32>, vector<2x128xf32> -> vector<2x128xf32>
    %c0_623 = arith.constant 0 : index
    %c0_624 = arith.constant 0 : index
    %478 = vector.load %arg16[%c0_623, %c0_624] : memref<1x128xf32, #tpu.memory_space<vmem>>, vector<1x128xf32>
    %479 = vector.broadcast %478 : vector<1x128xf32> to vector<2x128xf32>
    %480 = arith.addf %477, %479 : vector<2x128xf32>
    %c0_625 = arith.constant 0 : index
    %c0_626 = arith.constant 0 : index
    %481 = vector.load %arg17[%c0_625, %c0_626] : memref<128x128xf32, #tpu.memory_space<vmem>>, vector<128x128xf32>
    %cst_627 = arith.constant dense<0.000000e+00> : vector<2x128xf32>
    %482 = tpu.matmul %480, %481, %cst_627 {dimension_numbers = #tpu.dot_dimension_numbers<[1], [0], [0], [1], [0, 0, 1, 1], [], []>} : vector<2x128xf32>, vector<128x128xf32>, vector<2x128xf32> -> vector<2x128xf32>
    %c0_628 = arith.constant 0 : index
    %c0_629 = arith.constant 0 : index
    %483 = vector.load %arg18[%c0_628, %c0_629] : memref<1x128xf32, #tpu.memory_space<vmem>>, vector<1x128xf32>
    %484 = vector.broadcast %483 : vector<1x128xf32> to vector<2x128xf32>
    %485 = arith.addf %482, %484 : vector<2x128xf32>
    %c0_630 = arith.constant 0 : index
    %c0_631 = arith.constant 0 : index
    %486 = vector.load %arg19[%c0_630, %c0_631] : memref<2x128xf32, #tpu.memory_space<vmem>>, vector<2x128xf32>
    tpu.vector_store %arg19[%c0_630, %c0_631], %485 {strides = array<i32>} : memref<2x128xf32, #tpu.memory_space<vmem>>, vector<2x128xf32>,
    return
  }
}

</mosaic_0001>

<bundles_post_ra>
// kernel: lenet_forward.1
= control target key start
LH: loop header
LB: loop body
LE: loop exit
PB: predicated region body
PF: predicated region fallthrough
CT: control target
= control target key end

     0   :  { %s7845_s0 = inlined_call_operand.vmem [shape: f32[2,1152], index: 0, kind: input, shape index: {}]   ;;  %s7846_s1 = inlined_call_operand.vmem [shape: f32[8,32], index: 1, kind: input, shape index: {}]   ;;  %s7847_s2 = inlined_call_operand.vmem [shape: f32[8,1], index: 2, kind: input, shape index: {}]   ;;  %s7848_s3 = inlined_call_operand.vmem [shape: f32[8,1], index: 3, kind: input, shape index: {}]   ;;  %s7849_s4 = inlined_call_operand.vmem [shape: f32[8,1], index: 4, kind: input, shape index: {}]   ;;  %s7850_s5 = inlined_call_operand.vmem [shape: f32[1,896], index: 5, kind: input, shape index: {}]   ;;  %s7851_s6 = inlined_call_operand.hbm [shape: f32[863,256], index: 6, kind: input, shape index: {}]   ;;  %s7852_s7 = inlined_call_operand.vmem [shape: f32[16,160], index: 7, kind: input, shape index: {}]   ;;  %s7853_s8 = inlined_call_operand.vmem [shape: f32[16,1], index: 8, kind: input, shape index: {}]   ;;  %s7854_s9 = inlined_call_operand.vmem [shape: f32[16,1], index: 9, kind: input, shape index: {}]   ;;  %s7855_s10 = inlined_call_operand.vmem [shape: f32[16,1], index: 10, kind: input, shape index: {}]   ;;  %s7856_s11 = inlined_call_operand.vmem [shape: f32[1,160], index: 11, kind: input, shape index: {}]   ;;  %s7857_s12 = inlined_call_operand.vmem [shape: f32[143,32], index: 12, kind: input, shape index: {}]   ;;  %s7858_s13 = inlined_call_operand.hbm [shape: f32[512,128], index: 13, kind: input, shape index: {}]   ;;  %s7859_s14 = inlined_call_operand.vmem [shape: f32[1,128], index: 14, kind: input, shape index: {}]   ;;  %s7860_s15 = inlined_call_operand.vmem [shape: f32[128,128], index: 15, kind: input, shape index: {}]   ;;  %s7861_s16 = inlined_call_operand.vmem [shape: f32[1,128], index: 16, kind: input, shape index: {}]   ;;  %s7862_s17 = inlined_call_operand.vmem [shape: f32[128,128], index: 17, kind: input, shape index: {}]   ;;  %s7863_s18 = inlined_call_operand.vmem [shape: f32[1,128], index: 18, kind: input, shape index: {}]   ;;  %s7864_s19 = inlined_call_operand.hbm [shape: f32[2,128], index: 19, kind: output, shape index: {}]  }
   0x1   :  { %7932 = sst [smem:[#allocation18_spill]] %s7845_s0 }
   0x2   :  { %7933 = sst [smem:[#allocation19_spill]] %s7846_s1 }
   0x3   :  { %7934 = sst [smem:[#allocation20_spill]] %s7847_s2 }
   0x4   :  { %7935 = sst [smem:[#allocation21_spill]] %s7848_s3 }
   0x5   :  { %7936 = sst [smem:[#allocation22_spill]] %s7859_s14 }
   0x6   :  { %7937 = sst [smem:[#allocation23_spill]] %s7861_s16 }
   0x7   :  { %7938 = sst [smem:[#allocation24_spill]] %s7863_s18 }
   0x8   :  { %7939 = sst [smem:[#allocation25_spill]] %s7864_s19 }
   0x9   :  { %24 = vsyncpa [#allocation10], 0 }
   0xa   :  { %25 = vsyncpa [#allocation13], 0 }
   0xb   :  { %26 = vsyncpa [#allocation11], 0  ;;  %s6099_s0 = smov [#allocation9]   ;;  %s6027_s1 = scalar_lea.hbm %s7851_s6, 27648 }
   0xc   :  { %s44_s30 = sshll.u32 %s6099_s0, 4  ;;  %p6028_p0 = scmp.ne.s32.totalorder %s7851_s6, %s6027_s1  ;;  %s45_s30 = int_to_ptr.vmem [resolvable:$true] %s44_s30 }
   0xd   :  { %p6031_p1 = scmp.lt.u32.totalorder %s6027_s1, %s7851_s6 }
   0xf   :  { %p6033_p2 = pnand %p6031_p1, %p6028_p0 }
  0x11   :  { %6036 = shalt.err (!%p6033_p2)
}
  0x12   :  { %s6037_s25 = scalar_lea.vmem %s45_s30, 27648  ;;  %p6042_p4 = scmp.lt.s32.totalorder %s45_s30, %s45_s30 }
  0x13   :  { %p6038_p3 = scmp.ne.s32.totalorder %s45_s30, %s6037_s25  ;;  %p6043_p5 = scmp.lt.s32.totalorder %s6037_s25, %s6037_s25 }
  0x15   :  { %p6044_p6 = por %p6043_p5, %p6042_p4 }
  0x17   :  { %p6045_p7 = pnand %p6044_p6, %p6038_p3 }
  0x19   :  { %6048 = shalt.err (!%p6045_p7)
}
  0x1a   :  { %s6100_s3 = smov 256   ;;  %s6101_s26 = smov 16  }
  0x1b   :  { %50 = dma.hbm_to_vmem [thread:$0]  %s7851_s6, 27648, %s45_s30, [#allocation10], %s6100_s3, %s6100_s3, %s6101_s26  }
  0x1c   :  { %s6102_s29 = smov [#allocation12]   ;;  %s6049_s1 = scalar_lea.hbm %s7858_s13, 8192 }
  0x1d   :  { %s68_s0 = sshll.u32 %s6102_s29, 4  ;;  %p6050_p8 = scmp.ne.s32.totalorder %s7858_s13, %s6049_s1  ;;  %s69_s0 = int_to_ptr.vmem [resolvable:$true] %s68_s0 }
  0x1e   :  { %p6053_p9 = scmp.lt.u32.totalorder %s6049_s1, %s7858_s13 }
  0x20   :  { %p6055_p10 = pnand %p6053_p9, %p6050_p8 }
  0x22   :  { %6058 = shalt.err (!%p6055_p10)
}
  0x23   :  { %s6059_s25 = scalar_lea.vmem %s69_s0, 8192  ;;  %p6064_p12 = scmp.lt.s32.totalorder %s69_s0, %s69_s0 }
  0x24   :  { %p6060_p11 = scmp.ne.s32.totalorder %s69_s0, %s6059_s25  ;;  %p6065_p13 = scmp.lt.s32.totalorder %s6059_s25, %s6059_s25 }
  0x26   :  { %p6066_p0 = por %p6065_p13, %p6064_p12 }
  0x28   :  { %p6067_p1 = pnand %p6066_p0, %p6060_p11 }
  0x2a   :  { %6070 = shalt.err (!%p6067_p1)
}
  0x2b   :  { %s6103_s6 = smov 128   ;;  %s6104_s30 = smov 8  }
  0x2c   :  { %74 = dma.hbm_to_vmem [thread:$0]  %s7858_s13, 8192, %s69_s0, [#allocation13], %s6103_s6, %s6103_s6, %s6104_s30  }
  0x2d   :  { %6093 = dma.done.wait [#allocation10], 27648  }
  0x2e   :  { %6094 = vsyncadd [#allocation10], 4294939648 }
  0x2f   :  { %6095 = dma.done.wait [#allocation13], 8192  }
  0x30   :  { %6096 = vsyncadd [#allocation13], 4294959104  ;;  %s7940_s29 = sld [smem:[#allocation18_spill]]  ;;  %s7885_s1 = smov 125   ;;  %v115_v8 = vlaneseq  ;;  %vm102_vm1 = vcmask 261120   ;;  %v6124_v24 = vmov 0.0  }
  0x31   :  { %s7893_s22 = smov 127   ;;  %s7889_s24 = smov 124   ;;  %92 = vst [vmem:[#allocation2 + $0xb0] sm:$0xfe] %v6124_v24  ;;  %91 = vst [vmem:[#allocation2 + $0xa8] sm:$0xfe] %v6124_v24  ;;  %475 = vmatprep.mubr.f32.mxu0 %v6124_v24  ;;  %546 = vmatprep.mubr.f32.mxu1 %v6124_v24 }
  0x32   :  { %s7895_s25 = smov 126   ;;  %s7872_s27 = smov 95   ;;  %vm6306_vm0 = vcmp.lt.s32.totalorder %v115_v8, 896  ;;  %93 = vst [vmem:[#allocation2 + $0xb8] sm:$0xfe] %v6124_v24  ;;  %101 = vst [vmem:[#allocation5 + $0x130] sm:$0xff] %v6124_v24 }
  0x33   :  { %s7887_s28 = smov 96   ;;  %s7868_s0 = smov 93   ;;  %94 = vst [vmem:[#allocation2 + $0xc0] sm:$0xfe] %v6124_v24  ;;  %95 = vst [vmem:[#allocation2 + $0xc8] sm:$0xfe] %v6124_v24 }
  0x34   :  { %s7891_s23 = smov 94   ;;  %s7866_s20 = smov 64   ;;  %96 = vst [vmem:[#allocation2 + $0xd0] sm:$0xfe] %v6124_v24  ;;  %97 = vst [vmem:[#allocation2 + $0xd8] sm:$0xfe] %v6124_v24 }
  0x35   :  { %s7870_s21 = smov 92   ;;  %s7878_s3 = smov 60   ;;  %98 = vst [vmem:[#allocation5 + $0x120] sm:$0xc0] %v6124_v24  ;;  %103 = vst.msk [vmem:[#allocation5 + $0x138] sm:$0xff] %vm102_vm1, %v6124_v24  ;;  %v6125_v52 = vmov 0  }
  0x36   :  { %v143_v0 = vld [vmem:[%s7940_s29] ss:$2 sm:$0xff]  ;;  %s7880_s26 = smov 61   ;;  %s7884_s2 = smov 31   ;;  %v4887_v27 = vld [vmem:[%s7940_s29 + $0x1] ss:$2 sm:$0xff]  ;;  %5962 = vset.pattern.permute.xlu0 %v6125_v52  ;;  %5963 = vset.pattern.permute.xlu1 %v6125_v52 }
  0x37   :  { %v121_v1 = vld [vmem:[%s7940_s29] ss:$2 sm:$0xff]  ;;  %145 = vrot.lane.b32.xlu1 %v143_v0, %s7885_s1  ;;  %s7899_s13 = smov 32   ;;  %v4889_v29 = vld [vmem:[%s7940_s29 + $0x1] ss:$2 sm:$0xff]  ;;  %s7951_s18 = smov 30  }
  0x38   :  { %123 = vrot.lane.b32.xlu0 %v121_v1, %s7893_s22  ;;  %v154_v2 = vld [vmem:[%s7940_s29] ss:$2 sm:$0xff]  ;;  %v4888_v30 = vld [vmem:[%s7940_s29 + $0x1] ss:$2 sm:$0xff]  ;;  %s7954_s19 = smov 29   ;;  %s7956_s16 = smov 127  }
  0x39   :  { %v132_v3 = vld [vmem:[%s7940_s29] ss:$2 sm:$0xff]  ;;  %v4891_v31 = vld [vmem:[%s7940_s29 + $0x1] ss:$2 sm:$0xff]  ;;  %s7958_s14 = smov 125   ;;  %vm7921_vm2 = vcmask 1022976  }
  0x3a   :  { %v176_v4 = vld [vmem:[%s7940_s29] ss:$2 sm:$0xff]  ;;  %v4890_v32 = vld [vmem:[%s7940_s29 + $0x1] ss:$2 sm:$0xff]  ;;  %vm126_vm3 = vcmask 1039360   ;;  %vm159_vm4 = vcmask 1014784  }
  0x3b   :  { %156 = vrot.lane.b32.xlu1 %v154_v2, %s7889_s24  ;;  %v165_v5 = vld [vmem:[%s7940_s29] ss:$2 sm:$0xff]  ;;  %v4893_v33 = vld [vmem:[%s7940_s29 + $0x1] ss:$2 sm:$0xff]  ;;  %vm7919_vm5 = vcmask 1031168   ;;  %vm181_vm6 = vcmask 777216  }
  0x3c   :  { %134 = vrot.lane.b32.xlu0 %v132_v3, %s7895_s25  ;;  %v198_v6 = vld [vmem:[%s7940_s29] ss:$2 sm:$0xff]  ;;  %v4892_v34 = vld [vmem:[%s7940_s29 + $0x1] ss:$2 sm:$0xff]  ;;  %vm170_vm7 = vcmask 785408   ;;  %vm7907_vm8 = vcmask 760832  }
  0x3d   :  { %v187_v7 = vld [vmem:[%s7940_s29] ss:$2 sm:$0xff]  ;;  %v4895_v35 = vld [vmem:[%s7940_s29 + $0x1] ss:$2 sm:$0xff]  ;;  %vm7918_vm9 = vcmask 769024   ;;  %vm7917_vm10 = vcmask 523264  }
  0x3e   :  { %v220_v9 = vld [vmem:[%s7940_s29] ss:$2 sm:$0xff]  ;;  %v4894_v36 = vld [vmem:[%s7940_s29 + $0x1] ss:$2 sm:$0xff]  ;;  %vm7905_vm11 = vcmask 752640   ;;  %vm7901_vm12 = vcmask 506880  }
  0x3f   :  { %178 = vrot.lane.b32.xlu1 %v176_v4, %s7872_s27  ;;  %v209_v10 = vld [vmem:[%s7940_s29] ss:$2 sm:$0xff]  ;;  %s7883_s27 = smov 28   ;;  %v4897_v37 = vld [vmem:[%s7940_s29 + $0x1] ss:$2 sm:$0xff]  ;;  %vm7906_vm13 = vcmask 515072  }
  0x40   :  { %167 = vrot.lane.b32.xlu0 %v165_v5, %s7887_s28  ;;  %v114_v12 = vld [vmem:[%s7940_s29] ss:$2 sm:$0xff]  ;;  %v4896_v38 = vld [vmem:[%s7940_s29 + $0x1] ss:$2 sm:$0xff]  ;;  %vm7902_vm14 = vcmask 490496   ;;  %vm7903_vm15 = vcmask 498688  }
  0x41   :  { %v242_v13 = vld [vmem:[%s7940_s29] ss:$2 sm:$0xff]  ;;  %119 = vst.msk [vmem:[#allocation2] ss:$8 sm:$0xf] %vm6306_vm0, %v114_v12  ;;  %s7928_s6 = smov 78  }
  0x42   :  { %v231_v14 = vld [vmem:[%s7940_s29] ss:$2 sm:$0xff]  ;;  %120 = vst.msk [vmem:[#allocation2] ss:$8 sm:$0x70] %vm6306_vm0, %v114_v12  ;;  %s7912_s30 = smov 77  }
  0x43   :  { %200 = vrot.lane.b32.xlu1 %v198_v6, %s7868_s0  ;;  %s7876_s0 = smov 63   ;;  %v264_v15 = vld [vmem:[%s7940_s29] ss:$2 sm:$0xff]  ;;  %v4899_v39 = vld [vmem:[%s7940_s29 + $0x1] ss:$2 sm:$0xff] }
  0x44   :  { %189 = vrot.lane.b32.xlu0 %v187_v7, %s7891_s23  ;;  %v253_v16 = vld [vmem:[%s7940_s29] ss:$2 sm:$0xff]  ;;  %v4898_v40 = vld [vmem:[%s7940_s29 + $0x1] ss:$2 sm:$0xff] }
  0x45   :  { %v285_v17 = vld [vmem:[%s7940_s29] ss:$2 sm:$0xff]  ;;  %v4901_v41 = vld [vmem:[%s7940_s29 + $0x1] ss:$2 sm:$0xff] }
  0x46   :  { %v275_v18 = vld [vmem:[%s7940_s29] ss:$2 sm:$0xff]  ;;  %v4900_v42 = vld [vmem:[%s7940_s29 + $0x1] ss:$2 sm:$0xff] }
  0x47   :  { %222 = vrot.lane.b32.xlu1 %v220_v9, %s7866_s20  ;;  %s7874_s20 = smov 62   ;;  %v307_v19 = vld [vmem:[%s7940_s29] ss:$2 sm:$0xff]  ;;  %v4903_v43 = vld [vmem:[%s7940_s29 + $0x1] ss:$2 sm:$0xff] }
  0x48   :  { %211 = vrot.lane.b32.xlu0 %v209_v10, %s7870_s21  ;;  %v296_v20 = vld [vmem:[%s7940_s29] ss:$2 sm:$0xff]  ;;  %s7945_s21 = smov 93   ;;  %v4902_v44 = vld [vmem:[%s7940_s29 + $0x1] ss:$2 sm:$0xff] }
  0x49   :  { %v4877_v21 = vld [vmem:[%s7940_s29 + $0x2] ss:$2 sm:$0xff]  ;;  %v4905_v45 = vld [vmem:[%s7940_s29 + $0x1] ss:$2 sm:$0xff] }
  0x4a   :  { %332 = vst.msk [vmem:[#allocation2 + $0x74] ss:$8 sm:$0xf] %vm6306_vm0, %v4877_v21  ;;  %333 = vst.msk [vmem:[#allocation2 + $0x74] ss:$8 sm:$0x70] %vm6306_vm0, %v4877_v21 }
  0x4b   :  { %244 = vrot.lane.b32.xlu1 %v242_v13, %s7874_s20  ;;  %s7897_s20 = smov 30   ;;  %v4878_v22 = vld [vmem:[%s7940_s29 + $0x2] ss:$2 sm:$0xff]  ;;  %v4904_v46 = vld [vmem:[%s7940_s29 + $0x1] ss:$2 sm:$0xff] }
  0x4c   :  { %233 = vrot.lane.b32.xlu0 %v231_v14, %s7876_s0  ;;  %s7882_s0 = smov 29   ;;  %v318_v23 = vld [vmem:[%s7940_s29] ss:$2 sm:$0xff]  ;;  %v4908_v47 = vld [vmem:[%s7940_s29 + $0x3] ss:$2 sm:$0xff] }
  0x4d   :  { %v4880_v25 = vld [vmem:[%s7940_s29 + $0x2] ss:$2 sm:$0xff]  ;;  %v4907_v48 = vld [vmem:[%s7940_s29 + $0x3] ss:$2 sm:$0xff] }
  0x4e   :  { %v4879_v26 = vld [vmem:[%s7940_s29 + $0x2] ss:$2 sm:$0xff]  ;;  %v4910_v49 = vld [vmem:[%s7940_s29 + $0x3] ss:$2 sm:$0xff] }
  0x4f   :  { %266 = vrot.lane.b32.xlu1 %v264_v15, %s7878_s3  ;;  %v4881_v28 = vld [vmem:[%s7940_s29 + $0x2] ss:$2 sm:$0xff]  ;;  %v4909_v50 = vld [vmem:[%s7940_s29 + $0x3] ss:$2 sm:$0xff]  ;;  %s7957_s3 = smov 124  }
  0x50   :  { %255 = vrot.lane.b32.xlu0 %v253_v16, %s7880_s26  ;;  %s6131_s26 = smov 112  }
  0x53   :  { %287 = vrot.lane.b32.xlu1 %v285_v17, %s7884_s2  ;;  %s7959_s2 = sld [smem:[#allocation20_spill]] }
  0x54   :  { %277 = vrot.lane.b32.xlu0 %v275_v18, %s7899_s13 }
  0x57   :  { %309 = vrot.lane.b32.xlu1 %v307_v19, %s7882_s0  ;;  %s7943_s0 = smov 95  }
  0x58   :  { %298 = vrot.lane.b32.xlu0 %v296_v20, %s7897_s20  ;;  %s7952_s20 = smov 31  }
  0x59   :  { %v105_v51 = vld [vmem:[%s7959_s2] sm:$0xff]  ;;  %s6132_s2 = smov 111  }
  0x5b   :  { %337 = vrot.lane.b32.xlu1 %v4878_v22, %s7893_s22 }
  0x5c   :  { %320 = vrot.lane.b32.xlu0 %v318_v23, %s7883_s27  ;;  %s7955_s27 = smov 126  }
  0x5f   :  { %357 = vrot.lane.b32.xlu1 %v4880_v25, %s7885_s1 }
  0x60   :  { %347 = vrot.lane.b32.xlu0 %v4879_v26, %s7895_s25  ;;  %v4886_v26 = vld [vmem:[%s7940_s29 + $0x1] ss:$2 sm:$0xff] }
  0x63   :  { %775 = vrot.lane.b32.xlu1 %v4887_v27, %s7893_s22  ;;  %s7950_s22 = smov 60  }
  0x64   :  { %367 = vrot.lane.b32.xlu0 %v4881_v28, %s7889_s24 }
  0x67   :  { %793 = vrot.lane.b32.xlu1 %v4889_v29, %s7885_s1  ;;  %s7947_s1 = smov 64  }
  0x68   :  { %784 = vrot.lane.b32.xlu0 %v4888_v30, %s7895_s25  ;;  %s7948_s25 = smov 61  }
  0x6b   :  { %811 = vrot.lane.b32.xlu1 %v4891_v31, %s7887_s28  ;;  %s7944_s28 = smov 92  }
  0x6c   :  { %802 = vrot.lane.b32.xlu0 %v4890_v32, %s7889_s24  ;;  %s7949_s24 = smov 62  }
  0x6f   :  { %829 = vrot.lane.b32.xlu1 %v4893_v33, %s7891_s23  ;;  %s7946_s23 = smov 63  }
  0x70   :  { %820 = vrot.lane.b32.xlu0 %v4892_v34, %s7943_s0 }
  0x73   :  { %847 = vrot.lane.b32.xlu1 %v4895_v35, %s7944_s28 }
  0x74   :  { %838 = vrot.lane.b32.xlu0 %v4894_v36, %s7945_s21 }
  0x77   :  { %865 = vrot.lane.b32.xlu1 %v4897_v37, %s7946_s23 }
  0x78   :  { %856 = vrot.lane.b32.xlu0 %v4896_v38, %s7947_s1 }
  0x7b   :  { %883 = vrot.lane.b32.xlu1 %v4899_v39, %s7948_s25 }
  0x7c   :  { %874 = vrot.lane.b32.xlu0 %v4898_v40, %s7949_s24 }
  0x7f   :  { %901 = vrot.lane.b32.xlu1 %v4901_v41, %s7899_s13  ;;  %s7953_s13 = smov 28  }
  0x80   :  { %892 = vrot.lane.b32.xlu0 %v4900_v42, %s7950_s22 }
  0x83   :  { %919 = vrot.lane.b32.xlu1 %v4903_v43, %s7951_s18  ;;  %s7930_s18 = smov 108  }
  0x84   :  { %910 = vrot.lane.b32.xlu0 %v4902_v44, %s7952_s20  ;;  %s7965_s20 = sld [smem:[#allocation21_spill]] }
  0x87   :  { %937 = vrot.lane.b32.xlu1 %v4905_v45, %s7953_s13  ;;  %s7969_s13 = smov 94  }
  0x88   :  { %928 = vrot.lane.b32.xlu0 %v4904_v46, %s7954_s19  ;;  %s7960_s19 = sld [smem:[#allocation19_spill]] }
  0x8b   :  { %960 = vrot.lane.b32.xlu1 %v4908_v47, %s7955_s27 }
  0x8c   :  { %951 = vrot.lane.b32.xlu0 %v4907_v48, %s7956_s16 }
  0x8f   :  { %978 = vrot.lane.b32.xlu1 %v4910_v49, %s7957_s3 }
  0x90   :  { %969 = vrot.lane.b32.xlu0 %v4909_v50, %s7958_s14 }
  0x94   :  { %405 = vperm.xlu0 %5962, %v105_v51  }
  0xa9   :  { %v146_v53 = vpop.permute.xlu1 %145 }
  0xaa   :  { %v124_v54 = vpop.permute.xlu0 %123  ;;  %v147_v55 = vrot.slane %v146_v53, 1 }
  0xab   :  { %v125_v56 = vrot.slane %v124_v54, 1 }
  0xac   :  { %v149_v57 = vsel %vm7921_vm2, %v146_v53, %v147_v55 }
  0xad   :  { %v127_v58 = vsel %vm126_vm3, %v124_v54, %v125_v56  ;;  %152 = vst.msk [vmem:[#allocation2 + $0x3] ss:$8 sm:$0xf] %vm6306_vm0, %v149_v57  ;;  %153 = vst.msk [vmem:[#allocation2 + $0x3] ss:$8 sm:$0x70] %vm6306_vm0, %v149_v57  ;;  %v157_v59 = vpop.permute.xlu1 %156 }
  0xae   :  { %130 = vst.msk [vmem:[#allocation2 + $0x1] ss:$8 sm:$0xf] %vm6306_vm0, %v127_v58  ;;  %131 = vst.msk [vmem:[#allocation2 + $0x1] ss:$8 sm:$0x70] %vm6306_vm0, %v127_v58  ;;  %v135_v60 = vpop.permute.xlu0 %134 }
  0xaf   :  { %v158_v61 = vrot.slane %v157_v59, 1  ;;  %v136_v62 = vrot.slane %v135_v60, 1 }
  0xb1   :  { %v160_v63 = vsel %vm159_vm4, %v157_v59, %v158_v61  ;;  %v138_v0 = vsel %vm7919_vm5, %v135_v60, %v136_v62  ;;  %v179_v1 = vpop.permute.xlu1 %178 }
  0xb2   :  { %163 = vst.msk [vmem:[#allocation2 + $0x4] ss:$8 sm:$0xf] %vm6306_vm0, %v160_v63  ;;  %164 = vst.msk [vmem:[#allocation2 + $0x4] ss:$8 sm:$0x70] %vm6306_vm0, %v160_v63  ;;  %v168_v2 = vpop.permute.xlu0 %167 }
  0xb3   :  { %141 = vst.msk [vmem:[#allocation2 + $0x2] ss:$8 sm:$0xf] %vm6306_vm0, %v138_v0  ;;  %142 = vst.msk [vmem:[#allocation2 + $0x2] ss:$8 sm:$0x70] %vm6306_vm0, %v138_v0 }
  0xb4   :  { %v180_v3 = vrot.slane %v179_v1, 1  ;;  %v169_v4 = vrot.slane %v168_v2, 1 }
  0xb5   :  { %v201_v7 = vpop.permute.xlu1 %200 }
  0xb6   :  { %v182_v5 = vsel %vm181_vm6, %v179_v1, %v180_v3  ;;  %v171_v6 = vsel %vm170_vm7, %v168_v2, %v169_v4  ;;  %v190_v9 = vpop.permute.xlu0 %189  ;;  %v202_v10 = vrot.slane %v201_v7, 1 }
  0xb7   :  { %185 = vst.msk [vmem:[#allocation2 + $0x6] ss:$8 sm:$0xf] %vm6306_vm0, %v182_v5  ;;  %186 = vst.msk [vmem:[#allocation2 + $0x6] ss:$8 sm:$0x70] %vm6306_vm0, %v182_v5 }
  0xb8   :  { %174 = vst.msk [vmem:[#allocation2 + $0x5] ss:$8 sm:$0xf] %vm6306_vm0, %v171_v6  ;;  %175 = vst.msk [vmem:[#allocation2 + $0x5] ss:$8 sm:$0x70] %vm6306_vm0, %v171_v6  ;;  %v204_v13 = vsel %vm7907_vm8, %v201_v7, %v202_v10 }
  0xb9   :  { %v191_v12 = vrot.slane %v190_v9, 1  ;;  %207 = vst.msk [vmem:[#allocation2 + $0x38] ss:$8 sm:$0xf] %vm6306_vm0, %v204_v13  ;;  %v223_v15 = vpop.permute.xlu1 %222 }
  0xba   :  { %208 = vst.msk [vmem:[#allocation2 + $0x38] ss:$8 sm:$0x70] %vm6306_vm0, %v204_v13  ;;  %v212_v16 = vpop.permute.xlu0 %211  ;;  %v224_v17 = vrot.slane %v223_v15, 1 }
  0xbb   :  { %v193_v14 = vsel %vm7918_vm9, %v190_v9, %v191_v12  ;;  %v213_v18 = vrot.slane %v212_v16, 1 }
  0xbc   :  { %196 = vst.msk [vmem:[#allocation2 + $0x7] ss:$8 sm:$0xf] %vm6306_vm0, %v193_v14  ;;  %197 = vst.msk [vmem:[#allocation2 + $0x7] ss:$8 sm:$0x70] %vm6306_vm0, %v193_v14  ;;  %v226_v19 = vsel %vm7917_vm10, %v223_v15, %v224_v17 }
  0xbd   :  { %v215_v20 = vsel %vm7905_vm11, %v212_v16, %v213_v18  ;;  %229 = vst.msk [vmem:[#allocation2 + $0x3a] ss:$8 sm:$0xf] %vm6306_vm0, %v226_v19  ;;  %230 = vst.msk [vmem:[#allocation2 + $0x3a] ss:$8 sm:$0x70] %vm6306_vm0, %v226_v19  ;;  %v245_v21 = vpop.permute.xlu1 %244 }
  0xbe   :  { %218 = vst.msk [vmem:[#allocation2 + $0x39] ss:$8 sm:$0xf] %vm6306_vm0, %v215_v20  ;;  %219 = vst.msk [vmem:[#allocation2 + $0x39] ss:$8 sm:$0x70] %vm6306_vm0, %v215_v20  ;;  %v234_v22 = vpop.permute.xlu0 %233 }
  0xbf   :  { %v246_v23 = vrot.slane %v245_v21, 1  ;;  %v235_v25 = vrot.slane %v234_v22, 1 }
  0xc1   :  { %v248_v27 = vsel %vm7901_vm12, %v245_v21, %v246_v23  ;;  %v237_v28 = vsel %vm7906_vm13, %v234_v22, %v235_v25  ;;  %v267_v30 = vpop.permute.xlu1 %266  ;;  %vm7904_vm12 = vcmask 252928   ;;  %v4906_v22 = vld [vmem:[%s7940_s29 + $0x3] ss:$2 sm:$0xff]  ;;  %s6129_s29 = smov 109  }
  0xc2   :  { %251 = vst.msk [vmem:[#allocation2 + $0x3c] ss:$8 sm:$0xf] %vm6306_vm0, %v248_v27  ;;  %252 = vst.msk [vmem:[#allocation2 + $0x3c] ss:$8 sm:$0x70] %vm6306_vm0, %v248_v27  ;;  %v256_v31 = vpop.permute.xlu0 %255 }
  0xc3   :  { %v6539_v29 = vld [vmem:[#allocation2 + $0x8] sm:$0xff]  ;;  %240 = vst.msk [vmem:[#allocation2 + $0x3b] ss:$8 sm:$0xf] %vm6306_vm0, %v237_v28  ;;  %v6549_v32 = vld [vmem:[#allocation2 + $0x18] sm:$0xff]  ;;  %v6551_v33 = vld [vmem:[#allocation2] sm:$0xff] }
  0xc4   :  { %241 = vst.msk [vmem:[#allocation2 + $0x3b] ss:$8 sm:$0x70] %vm6306_vm0, %v237_v28  ;;  %v6553_v34 = vld [vmem:[#allocation2 + $0x10] sm:$0xff]  ;;  %v268_v35 = vrot.slane %v267_v30, 1  ;;  %v257_v36 = vrot.slane %v256_v31, 1 }
  0xc5   :  { %v6555_v37 = vld [vmem:[#allocation2 + $0x20] sm:$0xff]  ;;  %v6557_v38 = vld [vmem:[#allocation2 + $0x28] sm:$0xff]  ;;  %v6559_v39 = vld [vmem:[#allocation2 + $0x30] sm:$0xff]  ;;  %771 = vst.msk [vmem:[#allocation2] ss:$8 sm:$0xf] %vm6306_vm0, %v4886_v26  ;;  %v288_v42 = vpop.permute.xlu1 %287 }
  0xc6   :  { %772 = vst.msk [vmem:[#allocation2] ss:$8 sm:$0x70] %vm6306_vm0, %v4886_v26  ;;  %v270_v40 = vsel %vm7902_vm14, %v267_v30, %v268_v35  ;;  %v259_v41 = vsel %vm7903_vm15, %v256_v31, %v257_v36  ;;  %v278_v43 = vpop.permute.xlu0 %277  ;;  %v289_v44 = vrot.slane %v288_v42, 1  ;;  %vm312_vm14 = vcmask 236544  }
  0xc7   :  { %273 = vst.msk [vmem:[#allocation2 + $0x3e] ss:$8 sm:$0xf] %vm6306_vm0, %v270_v40  ;;  %274 = vst.msk [vmem:[#allocation2 + $0x3e] ss:$8 sm:$0x70] %vm6306_vm0, %v270_v40 }
  0xc8   :  { %262 = vst.msk [vmem:[#allocation2 + $0x3d] ss:$8 sm:$0xf] %vm6306_vm0, %v259_v41  ;;  %263 = vst.msk [vmem:[#allocation2 + $0x3d] ss:$8 sm:$0x70] %vm6306_vm0, %v259_v41  ;;  %v291_v46 = vsel %vm7904_vm12, %v288_v42, %v289_v44 }
  0xc9   :  { %v279_v45 = vrot.slane %v278_v43, 1  ;;  %294 = vst.msk [vmem:[#allocation2 + $0x70] ss:$8 sm:$0xf] %vm6306_vm0, %v291_v46  ;;  %v310_v48 = vpop.permute.xlu1 %309  ;;  %vm301_vm15 = vcmask 244736   ;;  %vm323_vm12 = vcmask 228352  }
  0xca   :  { %295 = vst.msk [vmem:[#allocation2 + $0x70] ss:$8 sm:$0x70] %vm6306_vm0, %v291_v46  ;;  %v299_v49 = vpop.permute.xlu0 %298  ;;  %v311_v50 = vrot.slane %v310_v48, 1 }
  0xcb   :  { %v280_v47 = vsel %vm102_vm1, %v278_v43, %v279_v45  ;;  %v300_v51 = vrot.slane %v299_v49, 1 }
  0xcc   :  { %283 = vst.msk [vmem:[#allocation2 + $0x3f] ss:$8 sm:$0xf] %vm6306_vm0, %v280_v47  ;;  %284 = vst.msk [vmem:[#allocation2 + $0x3f] ss:$8 sm:$0x70] %vm6306_vm0, %v280_v47  ;;  %v313_v52 = vsel %vm312_vm14, %v310_v48, %v311_v50 }
  0xcd   :  { %v302_v53 = vsel %vm301_vm15, %v299_v49, %v300_v51  ;;  %316 = vst.msk [vmem:[#allocation2 + $0x72] ss:$8 sm:$0xf] %vm6306_vm0, %v313_v52  ;;  %317 = vst.msk [vmem:[#allocation2 + $0x72] ss:$8 sm:$0x70] %vm6306_vm0, %v313_v52  ;;  %v338_v54 = vpop.permute.xlu1 %337 }
  0xce   :  { %305 = vst.msk [vmem:[#allocation2 + $0x71] ss:$8 sm:$0xf] %vm6306_vm0, %v302_v53  ;;  %306 = vst.msk [vmem:[#allocation2 + $0x71] ss:$8 sm:$0x70] %vm6306_vm0, %v302_v53  ;;  %v321_v55 = vpop.permute.xlu0 %320 }
  0xcf   :  { %v339_v56 = vrot.slane %v338_v54, 1  ;;  %v322_v57 = vrot.slane %v321_v55, 1 }
  0xd1   :  { %v340_v58 = vsel %vm126_vm3, %v338_v54, %v339_v56  ;;  %v324_v59 = vsel %vm323_vm12, %v321_v55, %v322_v57  ;;  %v358_v63 = vpop.permute.xlu1 %357 }
  0xd2   :  { %343 = vst.msk [vmem:[#allocation2 + $0x75] ss:$8 sm:$0xf] %vm6306_vm0, %v340_v58  ;;  %344 = vst.msk [vmem:[#allocation2 + $0x75] ss:$8 sm:$0x70] %vm6306_vm0, %v340_v58  ;;  %v348_v0 = vpop.permute.xlu0 %347 }
  0xd3   :  { %v383_v60 = vld [vmem:[#allocation2 + $0x40] sm:$0xff]  ;;  %v385_v61 = vld [vmem:[#allocation2 + $0x50] sm:$0xff]  ;;  %v382_v62 = vld [vmem:[#allocation2 + $0x38] sm:$0xff]  ;;  %327 = vst.msk [vmem:[#allocation2 + $0x73] ss:$8 sm:$0xf] %vm6306_vm0, %v324_v59 }
  0xd4   :  { %328 = vst.msk [vmem:[#allocation2 + $0x73] ss:$8 sm:$0x70] %vm6306_vm0, %v324_v59  ;;  %v5164_v1 = vpack.c.bf16 %v383_v60, %v6539_v29  ;;  %v5172_v2 = vpack.c.bf16 %v385_v61, %v6549_v32  ;;  %v5166_v3 = vpack.c.bf16 %v382_v62, %v6551_v33  ;;  %v384_v4 = vld [vmem:[#allocation2 + $0x48] sm:$0xff]  ;;  %v359_v5 = vrot.slane %v358_v63, 1  ;;  %v387_v40 = vld [vmem:[#allocation2 + $0x60] sm:$0xff] }
  0xd5   :  { %v349_v6 = vrot.slane %v348_v0, 1  ;;  %v5174_v7 = vpack.c.bf16 %v384_v4, %v6553_v34  ;;  %v776_v12 = vpop.permute.xlu1 %775  ;;  %v386_v55 = vld [vmem:[#allocation2 + $0x58] sm:$0xff]  ;;  %v388_v56 = vld [vmem:[#allocation2 + $0x68] sm:$0xff]  ;;  %v5180_v57 = vpack.c.bf16 %v387_v40, %v6557_v38  ;;  %v6668_v60 = vld [vmem:[%s7960_s19] sm:$0xff]  ;;  %s6130_s19 = smov 79  }
  0xd6   :  { %5165 = vmatprep.subr.bf16.mxu0 %v5164_v1  ;;  %5173 = vmatprep.subr.bf16.mxu1 %v5172_v2  ;;  %v360_v9 = vsel %vm7921_vm2, %v358_v63, %v359_v5  ;;  %v368_v13 = vpop.permute.xlu0 %367  ;;  %v777_v14 = vrot.slane %v776_v12, 1  ;;  %v6126_v63 = vmov 0.0|0.0   ;;  %v5182_v2 = vpack.c.bf16 %v386_v55, %v6555_v37 }
  0xd7   :  { %v350_v10 = vsel %vm7919_vm5, %v348_v0, %v349_v6  ;;  %5167 = vmatpush1.bf16.msra.mxu0 %v5166_v3  ;;  %5175 = vmatpush1.bf16.msra.mxu1 %v5174_v7  ;;  %363 = vst.msk [vmem:[#allocation2 + $0x77] ss:$8 sm:$0xf] %vm6306_vm0, %v360_v9  ;;  %364 = vst.msk [vmem:[#allocation2 + $0x77] ss:$8 sm:$0x70] %vm6306_vm0, %v360_v9  ;;  %v5189_v3 = vpack.c.bf16 %v388_v56, %v6559_v39 }
  0xd8   :  { %353 = vst.msk [vmem:[#allocation2 + $0x76] ss:$8 sm:$0xf] %vm6306_vm0, %v350_v10  ;;  %354 = vst.msk [vmem:[#allocation2 + $0x76] ss:$8 sm:$0x70] %vm6306_vm0, %v350_v10  ;;  %v778_v16 = vsel %vm126_vm3, %v776_v12, %v777_v14 }
  0xd9   :  { %v369_v15 = vrot.slane %v368_v13, 1  ;;  %780 = vst.msk [vmem:[#allocation2 + $0x1] ss:$8 sm:$0xf] %vm6306_vm0, %v778_v16  ;;  %v794_v18 = vpop.permute.xlu1 %793 }
  0xda   :  { %781 = vst.msk [vmem:[#allocation2 + $0x1] ss:$8 sm:$0x70] %vm6306_vm0, %v778_v16  ;;  %v785_v19 = vpop.permute.xlu0 %784  ;;  %v795_v20 = vrot.slane %v794_v18, 1 }
  0xdb   :  { %v370_v17 = vsel %vm159_vm4, %v368_v13, %v369_v15  ;;  %v786_v21 = vrot.slane %v785_v19, 1 }
  0xdc   :  { %373 = vst.msk [vmem:[#allocation2 + $0xa8] ss:$8 sm:$0xf] %vm6306_vm0, %v370_v17  ;;  %374 = vst.msk [vmem:[#allocation2 + $0xa8] ss:$8 sm:$0x70] %vm6306_vm0, %v370_v17  ;;  %v796_v23 = vsel %vm7921_vm2, %v794_v18, %v795_v20 }
  0xdd   :  { %v787_v25 = vsel %vm7919_vm5, %v785_v19, %v786_v21  ;;  %798 = vst.msk [vmem:[#allocation2 + $0x3] ss:$8 sm:$0xf] %vm6306_vm0, %v796_v23  ;;  %799 = vst.msk [vmem:[#allocation2 + $0x3] ss:$8 sm:$0x70] %vm6306_vm0, %v796_v23  ;;  %v812_v27 = vpop.permute.xlu1 %811 }
  0xde   :  { %789 = vst.msk [vmem:[#allocation2 + $0x2] ss:$8 sm:$0xf] %vm6306_vm0, %v787_v25  ;;  %790 = vst.msk [vmem:[#allocation2 + $0x2] ss:$8 sm:$0x70] %vm6306_vm0, %v787_v25  ;;  %v803_v28 = vpop.permute.xlu0 %802 }
  0xdf   :  { %v390_v26 = vld [vmem:[#allocation2 + $0x78] sm:$0xff]  ;;  %v392_v29 = vld [vmem:[#allocation2 + $0x88] sm:$0xff]  ;;  %v389_v30 = vld [vmem:[#allocation2 + $0x70] sm:$0xff]  ;;  %v813_v32 = vrot.slane %v812_v27, 1  ;;  %v804_v33 = vrot.slane %v803_v28, 1 }
  0xe0   :  { %v391_v31 = vld [vmem:[#allocation2 + $0x80] sm:$0xff]  ;;  %v6642_v34 = vld [vmem:[#allocation2 + $0x98] sm:$0xff]  ;;  %v6644_v35 = vld [vmem:[#allocation2 + $0x90] sm:$0xff] }
  0xe1   :  { %v6646_v36 = vld [vmem:[#allocation2 + $0xa0] sm:$0xff]  ;;  %946 = vst.msk [vmem:[#allocation2 + $0x74] ss:$8 sm:$0xf] %vm6306_vm0, %v4906_v22  ;;  %v814_v41 = vsel %vm170_vm7, %v812_v27, %v813_v32  ;;  %v805_v42 = vsel %vm159_vm4, %v803_v28, %v804_v33  ;;  %v830_v46 = vpop.permute.xlu1 %829 }
  0xe2   :  { %947 = vst.msk [vmem:[#allocation2 + $0x74] ss:$8 sm:$0x70] %vm6306_vm0, %v4906_v22  ;;  %816 = vst.msk [vmem:[#allocation2 + $0x5] ss:$8 sm:$0xf] %vm6306_vm0, %v814_v41  ;;  %v821_v47 = vpop.permute.xlu0 %820 }
  0xe3   :  { %v397_v43 = vld [vmem:[#allocation2 + $0xb0] sm:$0xff]  ;;  %v399_v44 = vld [vmem:[#allocation2 + $0xc0] sm:$0xff]  ;;  %v396_v45 = vld [vmem:[#allocation2 + $0xa8] sm:$0xff]  ;;  %817 = vst.msk [vmem:[#allocation2 + $0x5] ss:$8 sm:$0x70] %vm6306_vm0, %v814_v41 }
  0xe4   :  { %807 = vst.msk [vmem:[#allocation2 + $0x4] ss:$8 sm:$0xf] %vm6306_vm0, %v805_v42  ;;  %808 = vst.msk [vmem:[#allocation2 + $0x4] ss:$8 sm:$0x70] %vm6306_vm0, %v805_v42  ;;  %v5168_v48 = vpack.c.bf16 %v397_v43, %v390_v26  ;;  %v5176_v49 = vpack.c.bf16 %v399_v44, %v392_v29  ;;  %v5170_v50 = vpack.c.bf16 %v396_v45, %v389_v30 }
  0xe5   :  { %v398_v51 = vld [vmem:[#allocation2 + $0xb8] sm:$0xff]  ;;  %v831_v52 = vrot.slane %v830_v46, 1  ;;  %v822_v53 = vrot.slane %v821_v47, 1  ;;  %v401_v61 = vld [vmem:[#allocation2 + $0xd0] sm:$0xff]  ;;  %v848_v38 = vpop.permute.xlu1 %847  ;;  %v400_v5 = vld [vmem:[#allocation2 + $0xc8] sm:$0xff] }
  0xe6   :  { %v5178_v54 = vpack.c.bf16 %v398_v51, %v391_v31  ;;  %5169 = vmatprep.subr.bf16.mxu0 %v5168_v48  ;;  %5177 = vmatprep.subr.bf16.mxu1 %v5176_v49  ;;  %v839_v62 = vpop.permute.xlu0 %838  ;;  %v849_v0 = vrot.slane %v848_v38, 1  ;;  %v5184_v4 = vpack.c.bf16 %v401_v61, %v6642_v34  ;;  %v402_v6 = vld [vmem:[#allocation2 + $0xd8] sm:$0xff]  ;;  %v5186_v13 = vpack.c.bf16 %v400_v5, %v6644_v35 }
  0xe7   :  { %v832_v58 = vsel %vm7918_vm9, %v830_v46, %v831_v52  ;;  %v823_v59 = vsel %vm181_vm6, %v821_v47, %v822_v53  ;;  %5171 = vmatpush1.bf16.msra.mxu0 %v5170_v50  ;;  %v840_v1 = vrot.slane %v839_v62, 1  ;;  %v5192_v14 = vpack.c.bf16 %v402_v6, %v6646_v36 }
  0xe8   :  { %5179 = vmatpush1.bf16.msra.mxu1 %v5178_v54  ;;  %834 = vst.msk [vmem:[#allocation2 + $0x7] ss:$8 sm:$0xf] %vm6306_vm0, %v832_v58  ;;  %835 = vst.msk [vmem:[#allocation2 + $0x7] ss:$8 sm:$0x70] %vm6306_vm0, %v832_v58  ;;  %5181 = vmatprep.subr.bf16.mxu0 %v5180_v57  ;;  %v850_v7 = vsel %vm7905_vm11, %v848_v38, %v849_v0 }
  0xe9   :  { %825 = vst.msk [vmem:[#allocation2 + $0x6] ss:$8 sm:$0xf] %vm6306_vm0, %v823_v59  ;;  %826 = vst.msk [vmem:[#allocation2 + $0x6] ss:$8 sm:$0x70] %vm6306_vm0, %v823_v59  ;;  %5188 = vmatprep.subr.bf16.mxu1 %v6126_v63  ;;  %v841_v9 = vsel %vm7907_vm8, %v839_v62, %v840_v1  ;;  %v866_v37 = vpop.permute.xlu1 %865 }
  0xea   :  { %4882 = vmatmul.mubr.msk.f32.vlgmr.msra.gmra.mrb[0].mxu0 %vm102_vm1, %v6668_v60  ;;  %852 = vst.msk [vmem:[#allocation2 + $0x39] ss:$8 sm:$0xf] %vm6306_vm0, %v850_v7  ;;  %853 = vst.msk [vmem:[#allocation2 + $0x39] ss:$8 sm:$0x70] %vm6306_vm0, %v850_v7  ;;  %v857_v39 = vpop.permute.xlu0 %856 }
  0xeb   :  { %4883 = vmatmul.mubr.msk.f32.vlgmr.msra.gmra.mrb[0].mxu1 %vm102_vm1, %v6668_v60  ;;  %5183 = vmatpush1.bf16.msra.mxu0 %v5182_v2  ;;  %843 = vst.msk [vmem:[#allocation2 + $0x38] ss:$8 sm:$0xf] %vm6306_vm0, %v841_v9  ;;  %844 = vst.msk [vmem:[#allocation2 + $0x38] ss:$8 sm:$0x70] %vm6306_vm0, %v841_v9 }
  0xec   :  { %5190 = vmatpush3.bf16.msra.mxu1 %v5189_v3  ;;  %5185 = vmatprep.subr.bf16.mxu0 %v5184_v4  ;;  %v867_v10 = vrot.slane %v866_v37, 1  ;;  %v858_v12 = vrot.slane %v857_v39, 1  ;;  %vm7914_vm11 = vmmov 0   ;;  %vm7962_vm8 = vcmask 506880  }
  0xed   :  { %5191 = vmatprep.subr.bf16.mxu1 %v6126_v63  ;;  %617 = vmatprep.mubr.f32.mxu0 %v6124_v24  ;;  %v884_v17 = vpop.permute.xlu1 %883 }
  0xee   :  { %5080 = vmatprep.mubr.msk.f32.mxu1 %vm7914_vm11, %v6124_v24  ;;  %v868_v15 = vsel %vm7906_vm13, %v866_v37, %v867_v10  ;;  %v859_v16 = vsel %vm7917_vm10, %v857_v39, %v858_v12  ;;  %v875_v18 = vpop.permute.xlu0 %874  ;;  %v885_v19 = vrot.slane %v884_v17, 1  ;;  %vm7961_vm13 = vcmask 498688  }
  0xef   :  { %5187 = vmatpush1.bf16.msra.mxu0 %v5186_v13  ;;  %870 = vst.msk [vmem:[#allocation2 + $0x3b] ss:$8 sm:$0xf] %vm6306_vm0, %v868_v15  ;;  %871 = vst.msk [vmem:[#allocation2 + $0x3b] ss:$8 sm:$0x70] %vm6306_vm0, %v868_v15 }
  0xf0   :  { %5193 = vmatpush3.bf16.msra.mxu1 %v5192_v14  ;;  %861 = vst.msk [vmem:[#allocation2 + $0x3a] ss:$8 sm:$0xf] %vm6306_vm0, %v859_v16  ;;  %862 = vst.msk [vmem:[#allocation2 + $0x3a] ss:$8 sm:$0x70] %vm6306_vm0, %v859_v16  ;;  %v886_v21 = vsel %vm7961_vm13, %v884_v17, %v885_v19 }
  0xf1   :  { %v876_v20 = vrot.slane %v875_v18, 1  ;;  %888 = vst.msk [vmem:[#allocation2 + $0x3d] ss:$8 sm:$0xf] %vm6306_vm0, %v886_v21  ;;  %v902_v23 = vpop.permute.xlu1 %901  ;;  %vm7964_vm13 = vcmask 252928   ;;  %v986_v43 = vld [vmem:[#allocation2 + $0x8] sm:$0xff] }
  0xf2   :  { %4884 = vmatmul.mubr.msk.f32.vlgmr.msra.gmra.mrb[2].mxu0 %vm102_vm1, %v6668_v60  ;;  %889 = vst.msk [vmem:[#allocation2 + $0x3d] ss:$8 sm:$0x70] %vm6306_vm0, %v886_v21  ;;  %v893_v25 = vpop.permute.xlu0 %892  ;;  %v903_v26 = vrot.slane %v902_v23, 1  ;;  %v988_v44 = vld [vmem:[#allocation2 + $0x18] sm:$0xff]  ;;  %v985_v45 = vld [vmem:[#allocation2] sm:$0xff] }
  0xf3   :  { %5081 = vmatmul.mubr.msk.f32.vlgmr.msra.gmra.mrb[2].mxu1 %vm102_vm1, %v6668_v60  ;;  %v877_v22 = vsel %vm7962_vm8, %v875_v18, %v876_v20  ;;  %1077 = vmatprep.mubr.f32.mxu0 %v6124_v24  ;;  %v894_v27 = vrot.slane %v893_v25, 1  ;;  %vm7963_vm8 = vcmask 490496   ;;  %v987_v56 = vld [vmem:[#allocation2 + $0x10] sm:$0xff]  ;;  %v990_v18 = vld [vmem:[#allocation2 + $0x28] sm:$0xff] }
  0xf4   :  { %1148 = vmatprep.mubr.f32.mxu1 %v6124_v24  ;;  %879 = vst.msk [vmem:[#allocation2 + $0x3c] ss:$8 sm:$0xf] %vm6306_vm0, %v877_v22  ;;  %880 = vst.msk [vmem:[#allocation2 + $0x3c] ss:$8 sm:$0x70] %vm6306_vm0, %v877_v22  ;;  %v904_v28 = vsel %vm102_vm1, %v902_v23, %v903_v26 }
  0xf5   :  { %v895_v29 = vsel %vm7963_vm8, %v893_v25, %v894_v27  ;;  %906 = vst.msk [vmem:[#allocation2 + $0x3f] ss:$8 sm:$0xf] %vm6306_vm0, %v904_v28  ;;  %907 = vst.msk [vmem:[#allocation2 + $0x3f] ss:$8 sm:$0x70] %vm6306_vm0, %v904_v28  ;;  %v920_v30 = vpop.permute.xlu1 %919 }
  0xf6   :  { %897 = vst.msk [vmem:[#allocation2 + $0x3e] ss:$8 sm:$0xf] %vm6306_vm0, %v895_v29  ;;  %898 = vst.msk [vmem:[#allocation2 + $0x3e] ss:$8 sm:$0x70] %vm6306_vm0, %v895_v29  ;;  %v911_v31 = vpop.permute.xlu0 %910 }
  0xf7   :  { %v921_v32 = vrot.slane %v920_v30, 1  ;;  %v912_v33 = vrot.slane %v911_v31, 1  ;;  %v989_v25 = vld [vmem:[#allocation2 + $0x20] sm:$0xff]  ;;  %v991_v27 = vld [vmem:[#allocation2 + $0x30] sm:$0xff]  ;;  %vm99_vm8 = vcmask 261126  }
  0xf9   :  { %v922_v34 = vsel %vm301_vm15, %v920_v30, %v921_v32  ;;  %v913_v35 = vsel %vm7964_vm13, %v911_v31, %v912_v33  ;;  %v938_v36 = vpop.permute.xlu1 %937  ;;  %vm1996_vm15 = vcmask 259072   ;;  %vm2124_vm13 = vcmask 891904  }
  0xfa   :  { %924 = vst.msk [vmem:[#allocation2 + $0x71] ss:$8 sm:$0xf] %vm6306_vm0, %v922_v34  ;;  %925 = vst.msk [vmem:[#allocation2 + $0x71] ss:$8 sm:$0x70] %vm6306_vm0, %v922_v34  ;;  %v929_v40 = vpop.permute.xlu0 %928 }
  0xfb   :  { %915 = vst.msk [vmem:[#allocation2 + $0x70] ss:$8 sm:$0xf] %vm6306_vm0, %v913_v35  ;;  %916 = vst.msk [vmem:[#allocation2 + $0x70] ss:$8 sm:$0x70] %vm6306_vm0, %v913_v35 }
  0xfc   :  { %v939_v41 = vrot.slane %v938_v36, 1  ;;  %v930_v42 = vrot.slane %v929_v40, 1 }
  0xfd   :  { %v993_v48 = vld [vmem:[#allocation2 + $0x40] sm:$0xff]  ;;  %v995_v49 = vld [vmem:[#allocation2 + $0x50] sm:$0xff]  ;;  %v992_v50 = vld [vmem:[#allocation2 + $0x38] sm:$0xff]  ;;  %v961_v51 = vpop.permute.xlu1 %960 }
  0xfe   :  { %v940_v46 = vsel %vm323_vm12, %v938_v36, %v939_v41  ;;  %v931_v47 = vsel %vm312_vm14, %v929_v40, %v930_v42  ;;  %v952_v52 = vpop.permute.xlu0 %951  ;;  %v5194_v53 = vpack.c.bf16 %v993_v48, %v986_v43  ;;  %v5202_v54 = vpack.c.bf16 %v995_v49, %v988_v44  ;;  %v994_v57 = vld [vmem:[#allocation2 + $0x48] sm:$0xff]  ;;  %v997_v6 = vld [vmem:[#allocation2 + $0x60] sm:$0xff]  ;;  %v996_v21 = vld [vmem:[#allocation2 + $0x58] sm:$0xff] }
  0xff   :  { %942 = vst.msk [vmem:[#allocation2 + $0x73] ss:$8 sm:$0xf] %vm6306_vm0, %v940_v46  ;;  %943 = vst.msk [vmem:[#allocation2 + $0x73] ss:$8 sm:$0x70] %vm6306_vm0, %v940_v46  ;;  %v5196_v55 = vpack.c.bf16 %v992_v50, %v985_v45  ;;  %v5204_v61 = vpack.c.bf16 %v994_v57, %v987_v56  ;;  %v5210_v20 = vpack.c.bf16 %v997_v6, %v990_v18 }
 0x100   :  { %933 = vst.msk [vmem:[#allocation2 + $0x72] ss:$8 sm:$0xf] %vm6306_vm0, %v931_v47  ;;  %934 = vst.msk [vmem:[#allocation2 + $0x72] ss:$8 sm:$0x70] %vm6306_vm0, %v931_v47  ;;  %5195 = vmatprep.subr.bf16.mxu0 %v5194_v53  ;;  %5203 = vmatprep.subr.bf16.mxu1 %v5202_v54  ;;  %v5212_v26 = vpack.c.bf16 %v996_v21, %v989_v25 }
 0x101   :  { %v962_v58 = vrot.slane %v961_v51, 1  ;;  %v953_v59 = vrot.slane %v952_v52, 1  ;;  %5197 = vmatpush1.bf16.msra.mxu0 %v5196_v55  ;;  %5205 = vmatpush1.bf16.msra.mxu1 %v5204_v61  ;;  %v979_v0 = vpop.permute.xlu1 %978  ;;  %v998_v11 = vld [vmem:[#allocation2 + $0x68] sm:$0xff]  ;;  %v6792_v36 = vshrl.u32 %v115_v8, 7  ;;  %v112_v41 = vld [vmem:[%s7850_s5] sm:$0xff]  ;;  %vm6128_vm12 = vmmov 1  }
 0x102   :  { %v970_v1 = vpop.permute.xlu0 %969  ;;  %v980_v2 = vrot.slane %v979_v0, 1  ;;  %v5219_v28 = vpack.c.bf16 %v998_v11, %v991_v27  ;;  %s6133_s5 = smov 110  }
 0x103   :  { %v963_v38 = vsel %vm7919_vm5, %v961_v51, %v962_v58  ;;  %v954_v62 = vsel %vm126_vm3, %v952_v52, %v953_v59  ;;  %v971_v3 = vrot.slane %v970_v1, 1  ;;  %v704_v40 = vsub.s32 0, %v6792_v36 }
 0x104   :  { %965 = vst.msk [vmem:[#allocation2 + $0x76] ss:$8 sm:$0xf] %vm6306_vm0, %v963_v38  ;;  %966 = vst.msk [vmem:[#allocation2 + $0x76] ss:$8 sm:$0x70] %vm6306_vm0, %v963_v38  ;;  %v981_v4 = vsel %vm159_vm4, %v979_v0, %v980_v2 }
 0x105   :  { %956 = vst.msk [vmem:[#allocation2 + $0x75] ss:$8 sm:$0xf] %vm6306_vm0, %v954_v62  ;;  %957 = vst.msk [vmem:[#allocation2 + $0x75] ss:$8 sm:$0x70] %vm6306_vm0, %v954_v62  ;;  %v972_v5 = vsel %vm7921_vm2, %v970_v1, %v971_v3 }
 0x106   :  { %983 = vst.msk [vmem:[#allocation2 + $0xa8] ss:$8 sm:$0xf] %vm6306_vm0, %v981_v4  ;;  %984 = vst.msk [vmem:[#allocation2 + $0xa8] ss:$8 sm:$0x70] %vm6306_vm0, %v981_v4 }
 0x107   :  { %974 = vst.msk [vmem:[#allocation2 + $0x77] ss:$8 sm:$0xf] %vm6306_vm0, %v972_v5  ;;  %975 = vst.msk [vmem:[#allocation2 + $0x77] ss:$8 sm:$0x70] %vm6306_vm0, %v972_v5 }
 0x108   :  { %v708_v42 = vsub.s32 1, %v6792_v36  ;;  %v716_v44 = vsub.s32 3, %v6792_v36  ;;  %v720_v56 = vsub.s32 4, %v6792_v36  ;;  %v724_v59 = vsub.s32 5, %v6792_v36 }
 0x109   :  { %v728_v38 = vsub.s32 6, %v6792_v36  ;;  %vm1700_vm0 = vcmask 1046528  }
 0x10a   :  { %v709_v8 = vrot.slane %v112_v41, %v708_v42  ;;  %v717_v54 = vrot.slane %v112_v41, %v716_v44  ;;  %v721_v3 = vrot.slane %v112_v41, %v720_v56  ;;  %vm7008_vm14 = vmpackc.low %vm1700_vm0, %vm6128_vm12  ;;  %vm7916_vm0 = vcmask 646144  }
 0x10b   :  { %vm2014_vm12 = vcmask 257024  }
 0x10d   :  { %v1007_v9 = vld [vmem:[#allocation2 + $0xb0] sm:$0xff]  ;;  %v1009_v10 = vld [vmem:[#allocation2 + $0xc0] sm:$0xff]  ;;  %v1006_v13 = vld [vmem:[#allocation2 + $0xa8] sm:$0xff] }
 0x10e   :  { %v1000_v7 = vld [vmem:[#allocation2 + $0x78] sm:$0xff]  ;;  %v1002_v37 = vld [vmem:[#allocation2 + $0x88] sm:$0xff]  ;;  %v999_v12 = vld [vmem:[#allocation2 + $0x70] sm:$0xff] }
 0x10f   :  { %v5198_v39 = vpack.c.bf16 %v1007_v9, %v1000_v7  ;;  %v5206_v14 = vpack.c.bf16 %v1009_v10, %v1002_v37  ;;  %v5200_v15 = vpack.c.bf16 %v1006_v13, %v999_v12  ;;  %v1001_v16 = vld [vmem:[#allocation2 + $0x80] sm:$0xff]  ;;  %v1008_v17 = vld [vmem:[#allocation2 + $0xb8] sm:$0xff]  ;;  %v1011_v23 = vld [vmem:[#allocation2 + $0xd0] sm:$0xff]  ;;  %v725_v9 = vrot.slane %v112_v41, %v724_v59 }
 0x110   :  { %v5208_v19 = vpack.c.bf16 %v1008_v17, %v1001_v16  ;;  %v1004_v22 = vld [vmem:[#allocation2 + $0x98] sm:$0xff]  ;;  %v1003_v30 = vld [vmem:[#allocation2 + $0x90] sm:$0xff]  ;;  %v1010_v31 = vld [vmem:[#allocation2 + $0xc8] sm:$0xff] }
 0x111   :  { %5199 = vmatprep.subr.bf16.mxu0 %v5198_v39  ;;  %5207 = vmatprep.subr.bf16.mxu1 %v5206_v14  ;;  %v5214_v29 = vpack.c.bf16 %v1011_v23, %v1004_v22  ;;  %v1005_v32 = vld [vmem:[#allocation2 + $0xa0] sm:$0xff]  ;;  %v1012_v33 = vld [vmem:[#allocation2 + $0xd8] sm:$0xff]  ;;  %v5216_v34 = vpack.c.bf16 %v1010_v31, %v1003_v30  ;;  %v729_v14 = vrot.slane %v112_v41, %v728_v38 }
 0x112   :  { %5201 = vmatpush1.bf16.msra.mxu0 %v5200_v15  ;;  %5209 = vmatpush1.bf16.msra.mxu1 %v5208_v19  ;;  %v5222_v35 = vpack.c.bf16 %v1012_v33, %v1005_v32 }
 0x113   :  { %5211 = vmatprep.subr.bf16.mxu0 %v5210_v20  ;;  %5218 = vmatprep.subr.bf16.mxu1 %v6126_v63  ;;  %v6800_v43 = vpop.permute.xlu0 %405 }
 0x115   :  { %4911 = vmatmul.mubr.msk.f32.vlgmr.msra.gmra.mrb[4].mxu0 %vm102_vm1, %v6668_v60  ;;  %4912 = vmatmul.mubr.msk.f32.vlgmr.msra.gmra.mrb[4].mxu1 %vm102_vm1, %v6668_v60 }
 0x116   :  { %5213 = vmatpush1.bf16.msra.mxu0 %v5212_v26  ;;  %5220 = vmatpush3.bf16.msra.mxu1 %v5219_v28 }
 0x117   :  { %5215 = vmatprep.subr.bf16.mxu0 %v5214_v29  ;;  %5221 = vmatprep.subr.bf16.mxu1 %v6126_v63 }
 0x118   :  { %1219 = vmatprep.mubr.f32.mxu0 %v6124_v24  ;;  %5091 = vmatprep.mubr.msk.f32.mxu1 %vm7914_vm11, %v6124_v24  ;;  %v712_v24 = vsub.s32 2, %v6792_v36  ;;  %vm2030_vm11 = vcmask 261124  }
 0x11a   :  { %5217 = vmatpush1.bf16.msra.mxu0 %v5216_v34  ;;  %5223 = vmatpush3.bf16.msra.mxu1 %v5222_v35  ;;  %v713_v47 = vrot.slane %v112_v41, %v712_v24 }
 0x11d   :  { %4913 = vmatmul.mubr.msk.f32.vlgmr.msra.gmra.mrb[6].mxu0 %vm102_vm1, %v6668_v60  ;;  %5092 = vmatmul.mubr.msk.f32.vlgmr.msra.gmra.mrb[6].mxu1 %vm102_vm1, %v6668_v60  ;;  %v705_v60 = vrot.slane %v112_v41, %v704_v40 }
 0x1bd   :  { %v477_v45 = vpop.f32.mrb[0].mxu0 }
 0x1be   :  { %v548_v46 = vpop.f32.mrb[0].mxu1  ;;  %v6808_v48 = vadd.f32 %v477_v45, %v6800_v43  ;;  %v479_v49 = vpop.f32.mrb[1].mxu0 }
 0x1bf   :  { %v6811_v50 = vadd.f32 %v548_v46, %v6800_v43  ;;  %v550_v51 = vpop.f32.mrb[1].mxu1  ;;  %v6814_v52 = vadd.f32 %v479_v49, %v6800_v43 }
 0x1c0   :  { %v6817_v53 = vadd.f32 %v550_v51, %v6800_v43  ;;  %v737_v55 = vmul.f32 %v705_v60, %v6808_v48 }
 0x1c1   :  { %v738_v57 = vmul.f32 %v709_v8, %v6814_v52  ;;  %v739_v58 = vmul.f32 %v713_v47, %v6811_v50 }
 0x1c2   :  { %v753_v61 = vmul.f32 %v737_v55, %v6808_v48  ;;  %v740_v2 = vmul.f32 %v717_v54, %v6817_v53 }
 0x1c3   :  { %v744_v62 = vadd.f32 %v738_v57, %v737_v55  ;;  %v754_v0 = vmul.f32 %v738_v57, %v6814_v52  ;;  %v755_v1 = vmul.f32 %v739_v58, %v6811_v50 }
 0x1c4   :  { %v756_v6 = vmul.f32 %v740_v2, %v6817_v53 }
 0x1c5   :  { %v760_v4 = vadd.f32 %v754_v0, %v753_v61  ;;  %v745_v5 = vadd.f32 %v744_v62, %v739_v58  ;;  %v619_v7 = vpop.f32.mrb[2].mxu0 }
 0x1c6   :  { %v690_v37 = vpop.f32.mrb[2].mxu1  ;;  %v6831_v39 = vadd.f32 %v619_v7, %v6800_v43  ;;  %v621_v10 = vpop.f32.mrb[3].mxu0 }
 0x1c7   :  { %v6834_v12 = vadd.f32 %v690_v37, %v6800_v43  ;;  %v5082_v13 = vpop.f32.mrb[3].mxu1  ;;  %v761_v15 = vadd.f32 %v760_v4, %v755_v1  ;;  %v746_v16 = vadd.f32 %v745_v5, %v740_v2  ;;  %v6837_v17 = vadd.f32 %v621_v10, %v6800_v43 }
 0x1c8   :  { %v741_v18 = vmul.f32 %v721_v3, %v6831_v39 }
 0x1c9   :  { %v762_v19 = vadd.f32 %v761_v15, %v756_v6  ;;  %v742_v20 = vmul.f32 %v725_v9, %v6837_v17  ;;  %v743_v11 = vmul.f32 %v729_v14, %v6834_v12 }
 0x1ca   :  { %v757_v21 = vmul.f32 %v741_v18, %v6831_v39  ;;  %v747_v22 = vadd.f32 %v746_v16, %v741_v18 }
 0x1cb   :  { %v758_v23 = vmul.f32 %v742_v20, %v6837_v17  ;;  %v759_v26 = vmul.f32 %v743_v11, %v6834_v12 }
 0x1cc   :  { %v748_v25 = vadd.f32 %v747_v22, %v742_v20  ;;  %v763_v27 = vadd.f32 %v762_v19, %v757_v21 }
 0x1ce   :  { %v749_v28 = vadd.f32 %v748_v25, %v743_v11  ;;  %v764_v29 = vadd.f32 %v763_v27, %v758_v23 }
 0x1d0   :  { %750 = vadd.xlane.f32.xlu1 %v749_v28  ;;  %v765_v30 = vadd.f32 %v764_v29, %v759_v26 }
 0x1d4   :  { %766 = vadd.xlane.f32.xlu1 %v765_v30  ;;  %v1340_v30 = vld [vmem:[%s7965_s20] sm:$0xff]  ;;  %s7908_s20 = smov 80  }
 0x1e8   :  { %v1079_v31 = vpop.f32.mrb[4].mxu0  ;;  %v1150_v33 = vpop.f32.mrb[4].mxu1 }
 0x1e9   :  { %v6846_v32 = vadd.f32 %v1079_v31, %v6800_v43  ;;  %v1081_v34 = vpop.f32.mrb[5].mxu0  ;;  %v6849_v35 = vadd.f32 %v1150_v33, %v6800_v43  ;;  %v1152_v24 = vpop.f32.mrb[5].mxu1 }
 0x1ea   :  { %v6852_v41 = vadd.f32 %v1081_v34, %v6800_v43  ;;  %v6856_v45 = vadd.f32 %v1152_v24, %v6800_v43  ;;  %v1344_v34 = vld [vmem:[%s7849_s4] sm:$0xff]  ;;  %s7966_s4 = smov 96  }
 0x1eb   :  { %v1304_v44 = vmul.f32 %v6846_v32, %v705_v60  ;;  %v1306_v46 = vmul.f32 %v6849_v35, %v713_v47 }
 0x1ec   :  { %v1305_v49 = vmul.f32 %v6852_v41, %v709_v8  ;;  %v1307_v57 = vmul.f32 %v6856_v45, %v717_v54 }
 0x1ed   :  { %v1320_v51 = vmul.f32 %v1304_v44, %v6846_v32  ;;  %v1322_v58 = vmul.f32 %v1306_v46, %v6849_v35 }
 0x1ee   :  { %v1311_v55 = vadd.f32 %v1305_v49, %v1304_v44  ;;  %v1321_v56 = vmul.f32 %v1305_v49, %v6852_v41  ;;  %v1323_v8 = vmul.f32 %v1307_v57, %v6856_v45 }
 0x1f0   :  { %v1327_v59 = vadd.f32 %v1321_v56, %v1320_v51  ;;  %v1312_v61 = vadd.f32 %v1311_v55, %v1306_v46  ;;  %v1221_v38 = vpop.f32.mrb[6].mxu0  ;;  %v1292_v62 = vpop.f32.mrb[6].mxu1 }
 0x1f1   :  { %v6865_v60 = vadd.f32 %v1221_v38, %v6800_v43  ;;  %v1223_v0 = vpop.f32.mrb[7].mxu0  ;;  %v5093_v4 = vpop.f32.mrb[7].mxu1  ;;  %v6873_v5 = vadd.f32 %v1292_v62, %v6800_v43 }
 0x1f2   :  { %v1313_v47 = vadd.f32 %v1312_v61, %v1307_v57  ;;  %v1328_v1 = vadd.f32 %v1327_v59, %v1322_v58  ;;  %v6869_v2 = vadd.f32 %v1223_v0, %v6800_v43 }
 0x1f3   :  { %v1308_v54 = vmul.f32 %v6865_v60, %v721_v3  ;;  %v1310_v15 = vmul.f32 %v6873_v5, %v729_v14 }
 0x1f4   :  { %v1329_v6 = vadd.f32 %v1328_v1, %v1323_v8  ;;  %v1309_v7 = vmul.f32 %v6869_v2, %v725_v9  ;;  %v1484_v8 = vld [vmem:[#allocation9 + $0x18] sm:$0xff]  ;;  %v1481_v1 = vld [vmem:[#allocation9] sm:$0xff] }
 0x1f5   :  { %v1324_v37 = vmul.f32 %v1308_v54, %v6865_v60  ;;  %v1314_v10 = vadd.f32 %v1313_v47, %v1308_v54  ;;  %v1326_v3 = vmul.f32 %v1310_v15, %v6873_v5  ;;  %v1482_v47 = vld [vmem:[#allocation9 + $0x8] sm:$0xff]  ;;  %v1483_v54 = vld [vmem:[#allocation9 + $0x10] sm:$0xff] }
 0x1f6   :  { %v1325_v13 = vmul.f32 %v1309_v7, %v6869_v2  ;;  %v5224_v4 = vpack.c.bf16 %v1484_v8, %v1482_v47  ;;  %v1507_v47 = vld [vmem:[#allocation9 + $0xd0] sm:$0xff]  ;;  %v1510_v8 = vld [vmem:[#allocation9 + $0xe8] sm:$0xff] }
 0x1f7   :  { %v1315_v16 = vadd.f32 %v1314_v10, %v1309_v7  ;;  %v1330_v18 = vadd.f32 %v1329_v6, %v1324_v37  ;;  %v1486_v6 = vld [vmem:[#allocation9 + $0x28] sm:$0xff]  ;;  %v1488_v7 = vld [vmem:[#allocation9 + $0x38] sm:$0xff]  ;;  %v5226_v37 = vpack.c.bf16 %v1483_v54, %v1481_v1 }
 0x1f8   :  { %v5228_v10 = vpack.c.bf16 %v1488_v7, %v1486_v6  ;;  %5225 = vmatprep.subr.bf16.mxu0 %v5224_v4  ;;  %v1512_v1 = vld [vmem:[#allocation9 + $0xf8] sm:$0xff]  ;;  %v1509_v6 = vld [vmem:[#allocation9 + $0xe0] sm:$0xff]  ;;  %v1511_v7 = vld [vmem:[#allocation9 + $0xf0] sm:$0xff] }
 0x1f9   :  { %v1316_v19 = vadd.f32 %v1315_v16, %v1310_v15  ;;  %v1331_v20 = vadd.f32 %v1330_v18, %v1325_v13  ;;  %v1485_v13 = vld [vmem:[#allocation9 + $0x20] sm:$0xff]  ;;  %v1487_v15 = vld [vmem:[#allocation9 + $0x30] sm:$0xff]  ;;  %v1490_v16 = vld [vmem:[#allocation9 + $0x48] sm:$0xff]  ;;  %5227 = vmatpush1.bf16.msra.mxu0 %v5226_v37  ;;  %v5252_v54 = vpack.c.bf16 %v1512_v1, %v1510_v8 }
 0x1fa   :  { %v1492_v18 = vld [vmem:[#allocation9 + $0x58] sm:$0xff]  ;;  %5229 = vmatprep.subr.bf16.mxu0 %v5228_v10  ;;  %v1514_v37 = vld [vmem:[#allocation9 + $0x108] sm:$0xff]  ;;  %v1533_v8 = vld [vmem:[#allocation9 + $0x1a0] sm:$0xff] }
 0x1fb   :  { %1317 = vadd.xlane.f32.xlu0 %v1316_v19  ;;  %v1332_v21 = vadd.f32 %v1331_v20, %v1326_v3  ;;  %v5230_v19 = vpack.c.bf16 %v1487_v15, %v1485_v13  ;;  %v5232_v20 = vpack.c.bf16 %v1492_v18, %v1490_v16  ;;  %v1489_v3 = vld [vmem:[#allocation9 + $0x40] sm:$0xff]  ;;  %v1516_v10 = vld [vmem:[#allocation9 + $0x118] sm:$0xff]  ;;  %v5254_v13 = vpack.c.bf16 %v1511_v7, %v1509_v6  ;;  %v1515_v18 = vld [vmem:[#allocation9 + $0x110] sm:$0xff] }
 0x1fc   :  { %v5256_v15 = vpack.c.bf16 %v1516_v10, %v1514_v37  ;;  %v1513_v16 = vld [vmem:[#allocation9 + $0x100] sm:$0xff]  ;;  %v1535_v1 = vld [vmem:[#allocation9 + $0x1b0] sm:$0xff]  ;;  %v1540_v6 = vld [vmem:[#allocation9 + $0x1d8] sm:$0xff] }
 0x1fd   :  { %5231 = vmatpush1.bf16.msra.mxu0 %v5230_v19  ;;  %v1518_v19 = vld [vmem:[#allocation9 + $0x128] sm:$0xff]  ;;  %v1537_v7 = vld [vmem:[#allocation9 + $0x1c0] sm:$0xff]  ;;  %v1539_v10 = vld [vmem:[#allocation9 + $0x1d0] sm:$0xff] }
 0x1fe   :  { %5233 = vmatprep.subr.bf16.mxu0 %v5232_v20  ;;  %v1520_v20 = vld [vmem:[#allocation9 + $0x138] sm:$0xff] }
 0x1ff   :  { %1333 = vadd.xlane.f32.xlu0 %v1332_v21  ;;  %v1491_v21 = vld [vmem:[#allocation9 + $0x50] sm:$0xff] }
 0x25d   :  { %v751_v43 = vpop.xlane.xlu1 %750 }
 0x261   :  { %v767_v23 = vpop.xlane.xlu1 %766 }
 0x288   :  { %v1318_v11 = vpop.xlane.xlu0 %1317 }
 0x289   :  { %v1319_v22 = vadd.f32 %v1318_v11, %v751_v43  ;;  %v1494_v43 = vld [vmem:[#allocation9 + $0x68] sm:$0xff]  ;;  %v1496_v11 = vld [vmem:[#allocation9 + $0x78] sm:$0xff] }
 0x28b   :  { %v1336_v9 = vmul.f32 0.0006377551, %v1319_v22  ;;  %v5234_v22 = vpack.c.bf16 %v1491_v21, %v1489_v3  ;;  %v5258_v3 = vpack.c.bf16 %v1515_v18, %v1513_v16  ;;  %v5260_v21 = vpack.c.bf16 %v1520_v20, %v1518_v19  ;;  %v1542_v19 = vld [vmem:[#allocation9 + $0x1e8] sm:$0xff]  ;;  %v1544_v20 = vld [vmem:[#allocation9 + $0x1f8] sm:$0xff] }
 0x28c   :  { %v1334_v25 = vpop.xlane.xlu0 %1333 }
 0x28d   :  { %v1335_v26 = vadd.f32 %v1334_v25, %v767_v23  ;;  %v1338_v27 = vmul.f32 %v1336_v9, %v1336_v9  ;;  %v1493_v23 = vld [vmem:[#allocation9 + $0x60] sm:$0xff]  ;;  %v1495_v25 = vld [vmem:[#allocation9 + $0x70] sm:$0xff]  ;;  %5235 = vmatpush1.bf16.msra.mxu0 %v5234_v22  ;;  %v1522_v22 = vld [vmem:[#allocation9 + $0x148] sm:$0xff] }
 0x28f   :  { %v1337_v28 = vmul.f32 0.0006377551, %v1335_v26  ;;  %v1498_v26 = vld [vmem:[#allocation9 + $0x88] sm:$0xff] }
 0x291   :  { %v1339_v29 = vsub.f32 %v1337_v28, %v1338_v27  ;;  %v1500_v27 = vld [vmem:[#allocation9 + $0x98] sm:$0xff]  ;;  %v5238_v28 = vpack.c.bf16 %v1495_v25, %v1493_v23 }
 0x293   :  { %v1341_v14 = vadd.f32 1e-05, %v1339_v29  ;;  %v5240_v29 = vpack.c.bf16 %v1500_v27, %v1498_v26  ;;  %v1521_v26 = vld [vmem:[#allocation9 + $0x140] sm:$0xff]  ;;  %v1523_v27 = vld [vmem:[#allocation9 + $0x150] sm:$0xff] }
 0x295   :  { %6015 = vrsqrt.f32 %v1341_v14  ;;  %v1497_v14 = vld [vmem:[#allocation9 + $0x80] sm:$0xff] }
 0x29f   :  { %v6016_v31 = vpop.eup %6015 }
 0x2a0   :  { %v1343_v33 = vmul.f32 %v6016_v31, %v1340_v30  ;;  %v1499_v30 = vld [vmem:[#allocation9 + $0x90] sm:$0xff]  ;;  %v1502_v31 = vld [vmem:[#allocation9 + $0xa8] sm:$0xff] }
 0x2a2   :  { %1356 = vperm.xlu1 %5963, %v1343_v33   ;;  %v1345_v24 = vmul.f32 %v1343_v33, %v1336_v9  ;;  %v5236_v9 = vpack.c.bf16 %v1496_v11, %v1494_v43  ;;  %v1504_v33 = vld [vmem:[#allocation9 + $0xb8] sm:$0xff]  ;;  %v1517_v43 = vld [vmem:[#allocation9 + $0x120] sm:$0xff]  ;;  %v1519_v11 = vld [vmem:[#allocation9 + $0x130] sm:$0xff] }
 0x2a3   :  { %v5262_v23 = vpack.c.bf16 %v1519_v11, %v1517_v43  ;;  %v1543_v43 = vld [vmem:[#allocation9 + $0x1f0] sm:$0xff] }
 0x2a4   :  { %v1346_v44 = vsub.f32 %v1344_v34, %v1345_v24  ;;  %5237 = vmatprep.subr.bf16.mxu0 %v5236_v9  ;;  %v5242_v34 = vpack.c.bf16 %v1499_v30, %v1497_v14  ;;  %v5244_v24 = vpack.c.bf16 %v1504_v33, %v1502_v31  ;;  %v1524_v9 = vld [vmem:[#allocation9 + $0x158] sm:$0xff]  ;;  %v5266_v14 = vpack.c.bf16 %v1523_v27, %v1521_v26  ;;  %v1525_v31 = vld [vmem:[#allocation9 + $0x160] sm:$0xff]  ;;  %v1527_v33 = vld [vmem:[#allocation9 + $0x170] sm:$0xff] }
 0x2a5   :  { %5239 = vmatpush1.bf16.msra.mxu0 %v5238_v28  ;;  %v5264_v25 = vpack.c.bf16 %v1524_v9, %v1522_v22  ;;  %v1526_v28 = vld [vmem:[#allocation9 + $0x168] sm:$0xff] }
 0x2a6   :  { %1368 = vperm.xlu0 %5962, %v1346_v44   ;;  %5241 = vmatprep.subr.bf16.mxu0 %v5240_v29  ;;  %v1501_v44 = vld [vmem:[#allocation9 + $0xa0] sm:$0xff]  ;;  %v1528_v29 = vld [vmem:[#allocation9 + $0x178] sm:$0xff] }
 0x2a7   :  { %v5268_v30 = vpack.c.bf16 %v1528_v29, %v1526_v28 }
 0x2a9   :  { %5243 = vmatpush1.bf16.msra.mxu0 %v5242_v34  ;;  %v1530_v34 = vld [vmem:[#allocation9 + $0x188] sm:$0xff] }
 0x2aa   :  { %5245 = vmatprep.subr.bf16.mxu0 %v5244_v24  ;;  %v1532_v24 = vld [vmem:[#allocation9 + $0x198] sm:$0xff] }
 0x321   :  { %v6886_v46 = vpop.permute.xlu1 %1356 }
 0x322   :  { %v1360_v49 = vmul.f32 %v6886_v46, %v6814_v52  ;;  %v1361_v51 = vmul.f32 %v6886_v46, %v6811_v50  ;;  %v1359_v55 = vmul.f32 %v6886_v46, %v6808_v48  ;;  %v1362_v56 = vmul.f32 %v6886_v46, %v6817_v53 }
 0x323   :  { %v1363_v9 = vmul.f32 %v6886_v46, %v6831_v39 }
 0x325   :  { %v6896_v57 = vpop.permute.xlu0 %1368 }
 0x326   :  { %v6899_v58 = vadd.f32 %v6896_v57, %v1360_v49  ;;  %v6902_v59 = vadd.f32 %v6896_v57, %v1361_v51  ;;  %v6905_v61 = vadd.f32 %v6896_v57, %v1359_v55  ;;  %v6908_v52 = vadd.f32 %v6896_v57, %v1362_v56  ;;  %v1503_v49 = vld [vmem:[#allocation9 + $0xb0] sm:$0xff]  ;;  %v1506_v51 = vld [vmem:[#allocation9 + $0xc8] sm:$0xff]  ;;  %v1508_v55 = vld [vmem:[#allocation9 + $0xd8] sm:$0xff] }
 0x327   :  { %v5246_v56 = vpack.c.bf16 %v1503_v49, %v1501_v44  ;;  %v5270_v44 = vpack.c.bf16 %v1527_v33, %v1525_v31  ;;  %v5272_v49 = vpack.c.bf16 %v1532_v24, %v1530_v34  ;;  %v1375_v28 = vadd.f32 %v6896_v57, %v1363_v9 }
 0x328   :  { %v1379_v50 = vmax.f32 %v6899_v58, 0.0  ;;  %v1380_v48 = vmax.f32 %v6902_v59, 0.0  ;;  %v1378_v38 = vmax.f32 %v6905_v61, 0.0  ;;  %v1381_v62 = vmax.f32 %v6908_v52, 0.0 }
 0x329   :  { %5247 = vmatpush1.bf16.msra.mxu0 %v5246_v56  ;;  %v1534_v56 = vld [vmem:[#allocation9 + $0x1a8] sm:$0xff]  ;;  %v1382_v34 = vmax.f32 %v1375_v28, 0.0  ;;  %v1365_v61 = vmul.f32 %v6886_v46, %v6834_v12  ;;  %v1547_v12 = vld [vmem:[#allocation9 + $0x210] sm:$0xff] }
 0x32a   :  { %v5964_v53 = vpack.i.bf16 %v1380_v48, %v1379_v50  ;;  %v5969_v0 = vpack.i.bf16 %v1378_v38, %v1381_v62  ;;  %v1558_v28 = vld [vmem:[#allocation9 + $0x268] sm:$0xff] }
 0x32b   :  { %v1377_v58 = vadd.f32 %v6896_v57, %v1365_v61 }
 0x32c   :  { %5965 = vrot.lane.b32.xlu1 %v5964_v53, %s7956_s16  ;;  %v5248_v53 = vpack.c.bf16 %v1508_v55, %v1506_v51  ;;  %v1529_v51 = vld [vmem:[#allocation9 + $0x180] sm:$0xff]  ;;  %v1531_v55 = vld [vmem:[#allocation9 + $0x190] sm:$0xff] }
 0x32e   :  { %5249 = vmatprep.subr.bf16.mxu0 %v5248_v53  ;;  %v1536_v53 = vld [vmem:[#allocation9 + $0x1b8] sm:$0xff] }
 0x330   :  { %5970 = vrot.lane.b32.xlu1 %v5969_v0, %s7956_s16  ;;  %v1505_v0 = vld [vmem:[#allocation9 + $0xc0] sm:$0xff] }
 0x331   :  { %v5250_v4 = vpack.c.bf16 %v1507_v47, %v1505_v0  ;;  %v5274_v0 = vpack.c.bf16 %v1531_v55, %v1529_v51  ;;  %v5276_v47 = vpack.c.bf16 %v1536_v53, %v1534_v56  ;;  %v1545_v56 = vld [vmem:[#allocation9 + $0x200] sm:$0xff] }
 0x333   :  { %5251 = vmatpush1.bf16.msra.mxu0 %v5250_v4  ;;  %v5278_v4 = vpack.c.bf16 %v1535_v1, %v1533_v8 }
 0x334   :  { %5253 = vmatprep.subr.bf16.mxu0 %v5252_v54  ;;  %v1538_v54 = vld [vmem:[#allocation9 + $0x1c8] sm:$0xff] }
 0x335   :  { %v5280_v37 = vpack.c.bf16 %v1540_v6, %v1538_v54 }
 0x337   :  { %5255 = vmatpush1.bf16.msra.mxu0 %v5254_v13  ;;  %v5282_v13 = vpack.c.bf16 %v1539_v10, %v1537_v7  ;;  %v5290_v7 = vpack.c.bf16 %v1547_v12, %v1545_v56  ;;  %v1565_v56 = vld [vmem:[#allocation9 + $0x2a0] sm:$0xff]  ;;  %v1570_v12 = vld [vmem:[#allocation9 + $0x2c8] sm:$0xff] }
 0x338   :  { %5257 = vmatprep.subr.bf16.mxu0 %v5256_v15 }
 0x33b   :  { %5259 = vmatpush1.bf16.msra.mxu0 %v5258_v3  ;;  %v1541_v3 = vld [vmem:[#allocation9 + $0x1e0] sm:$0xff] }
 0x33c   :  { %5261 = vmatprep.subr.bf16.mxu0 %v5260_v21  ;;  %v5284_v21 = vpack.c.bf16 %v1544_v20, %v1542_v19  ;;  %v5286_v11 = vpack.c.bf16 %v1543_v43, %v1541_v3  ;;  %v1556_v19 = vld [vmem:[#allocation9 + $0x258] sm:$0xff] }
 0x33f   :  { %5263 = vmatpush1.bf16.msra.mxu0 %v5262_v23  ;;  %v1364_v23 = vmul.f32 %v6886_v46, %v6837_v17 }
 0x340   :  { %5265 = vmatprep.subr.bf16.mxu0 %v5264_v25 }
 0x341   :  { %v6931_v29 = vadd.f32 %v6896_v57, %v1364_v23 }
 0x343   :  { %5267 = vmatpush1.bf16.msra.mxu0 %v5266_v14  ;;  %v1383_v24 = vmax.f32 %v6931_v29, 0.0  ;;  %v1560_v29 = vld [vmem:[#allocation9 + $0x278] sm:$0xff] }
 0x344   :  { %5269 = vmatprep.subr.bf16.mxu0 %v5268_v30 }
 0x347   :  { %5271 = vmatpush1.bf16.msra.mxu0 %v5270_v44  ;;  %v1548_v44 = vld [vmem:[#allocation9 + $0x218] sm:$0xff] }
 0x348   :  { %5273 = vmatprep.subr.bf16.mxu0 %v5272_v49 }
 0x34b   :  { %5275 = vmatpush1.bf16.msra.mxu0 %v5274_v0  ;;  %v1550_v0 = vld [vmem:[#allocation9 + $0x228] sm:$0xff] }
 0x34c   :  { %5277 = vmatprep.subr.bf16.mxu0 %v5276_v47  ;;  %v1552_v47 = vld [vmem:[#allocation9 + $0x238] sm:$0xff] }
 0x34f   :  { %5279 = vmatpush1.bf16.msra.mxu0 %v5278_v4 }
 0x350   :  { %5281 = vmatprep.subr.bf16.mxu0 %v5280_v37 }
 0x353   :  { %5283 = vmatpush1.bf16.msra.mxu0 %v5282_v13  ;;  %v5292_v13 = vpack.c.bf16 %v1552_v47, %v1550_v0 }
 0x354   :  { %5285 = vmatprep.subr.bf16.mxu0 %v5284_v21 }
 0x357   :  { %5287 = vmatpush1.bf16.msra.mxu0 %v5286_v11 }
 0x39e   :  { %v5966_v15 = vpop.permute.xlu1 %5965 }
 0x39f   :  { %v5968_v16 = vunpack.i.h.bf16 %v5966_v15  ;;  %v5967_v18 = vunpack.i.l.bf16 %v5966_v15  ;;  %v1549_v15 = vld [vmem:[#allocation9 + $0x220] sm:$0xff] }
 0x3a1   :  { %v1421_v27 = vsel %vm126_vm3, %v5967_v18, %v5968_v16 }
 0x3a2   :  { %v5971_v22 = vpop.permute.xlu1 %5970  ;;  %v1434_v17 = vmax.f32 %v1379_v50, %v1421_v27  ;;  %v1546_v50 = vld [vmem:[#allocation9 + $0x208] sm:$0xff]  ;;  %v1555_v27 = vld [vmem:[#allocation9 + $0x250] sm:$0xff] }
 0x3a3   :  { %v5973_v25 = vunpack.i.h.bf16 %v5971_v22  ;;  %v5972_v26 = vunpack.i.l.bf16 %v5971_v22  ;;  %v5288_v59 = vpack.c.bf16 %v1548_v44, %v1546_v50  ;;  %v1563_v50 = vld [vmem:[#allocation9 + $0x290] sm:$0xff]  ;;  %v1566_v44 = vld [vmem:[#allocation9 + $0x2a8] sm:$0xff] }
 0x3a5   :  { %v1420_v14 = vsel %vm126_vm3, %v5973_v25, %v5967_v18  ;;  %v1422_v30 = vsel %vm126_vm3, %v5968_v16, %v5972_v26  ;;  %5289 = vmatprep.subr.bf16.mxu0 %v5288_v59  ;;  %v1551_v16 = vld [vmem:[#allocation9 + $0x230] sm:$0xff]  ;;  %v1554_v18 = vld [vmem:[#allocation9 + $0x248] sm:$0xff]  ;;  %v1553_v25 = vld [vmem:[#allocation9 + $0x240] sm:$0xff] }
 0x3a6   :  { %v1433_v39 = vmax.f32 %v1378_v38, %v1420_v14  ;;  %v6941_v31 = vmax.f32 %v1380_v48, %v1422_v30  ;;  %v5979_v38 = vpack.i.bf16 %v1383_v24, %v1382_v34  ;;  %v1384_v48 = vmax.f32 %v1377_v58, 0.0  ;;  %v1557_v30 = vld [vmem:[#allocation9 + $0x260] sm:$0xff]  ;;  %v1568_v59 = vld [vmem:[#allocation9 + $0x2b8] sm:$0xff] }
 0x3a7   :  { %v5294_v22 = vpack.c.bf16 %v1551_v16, %v1549_v15  ;;  %v5296_v23 = vpack.c.bf16 %v1556_v19, %v1554_v18  ;;  %v5298_v52 = vpack.c.bf16 %v1555_v27, %v1553_v25  ;;  %v1561_v58 = vld [vmem:[#allocation9 + $0x280] sm:$0xff]  ;;  %v1580_v15 = vld [vmem:[#allocation9 + $0x318] sm:$0xff]  ;;  %v1583_v27 = vld [vmem:[#allocation9 + $0x330] sm:$0xff] }
 0x3a8   :  { %1447 = vrot.lane.b32.xlu1 %v1433_v39, %s7966_s4  ;;  %v5974_v33 = vpack.i.bf16 %v6941_v31, %v1434_v17  ;;  %v1577_v19 = vld [vmem:[#allocation9 + $0x300] sm:$0xff] }
 0x3a9   :  { %v1581_v25 = vld [vmem:[#allocation9 + $0x320] sm:$0xff] }
 0x3aa   :  { %5975 = vrot.lane.b32.xlu0 %v5974_v33, %s7966_s4  ;;  %v1562_v33 = vld [vmem:[#allocation9 + $0x288] sm:$0xff] }
 0x3ae   :  { %5980 = vrot.lane.b32.xlu0 %v5979_v38, %s7956_s16 }
 0x3b2   :  { %1418 = vrot.lane.b32.xlu0 %v1384_v48, %s7956_s16 }
 0x41a   :  { %v1448_v53 = vpop.permute.xlu1 %1447 }
 0x41c   :  { %v6952_v49 = vpop.permute.xlu0 %5975 }
 0x41d   :  { %v5978_v51 = vunpack.i.h.bf16 %v6952_v49  ;;  %v5977_v55 = vunpack.i.l.bf16 %v6952_v49 }
 0x41f   :  { %v1461_v8 = vsel %vm170_vm7, %v1448_v53, %v5977_v55  ;;  %v1462_v1 = vsel %vm170_vm7, %v5977_v55, %v5978_v51  ;;  %v5308_v55 = vpack.c.bf16 %v1568_v59, %v1566_v44  ;;  %v1572_v53 = vld [vmem:[#allocation9 + $0x2d8] sm:$0xff] }
 0x420   :  { %v5981_v4 = vpop.permute.xlu0 %5980  ;;  %v1475_v54 = vmax.f32 %v1434_v17, %v1462_v1  ;;  %v1474_v6 = vmax.f32 %v1433_v39, %v1461_v8  ;;  %v1559_v39 = vld [vmem:[#allocation9 + $0x270] sm:$0xff]  ;;  %v5312_v47 = vpack.c.bf16 %v1572_v53, %v1570_v12  ;;  %v1569_v8 = vld [vmem:[#allocation9 + $0x2c0] sm:$0xff] }
 0x421   :  { %v5983_v37 = vunpack.i.h.bf16 %v5981_v4  ;;  %v5982_v10 = vunpack.i.l.bf16 %v5981_v4  ;;  %v5302_v61 = vpack.c.bf16 %v1559_v39, %v1557_v30  ;;  %v1571_v1 = vld [vmem:[#allocation9 + $0x2d0] sm:$0xff]  ;;  %v1574_v4 = vld [vmem:[#allocation9 + $0x2e8] sm:$0xff]  ;;  %v1592_v39 = vld [vmem:[#allocation9 + $0x378] sm:$0xff] }
 0x422   :  { %1771 = vmatprep.mubr.f32.mxu0 %v1475_v54  ;;  %v1576_v54 = vld [vmem:[#allocation9 + $0x2f8] sm:$0xff]  ;;  %v1590_v30 = vld [vmem:[#allocation9 + $0x368] sm:$0xff] }
 0x423   :  { %1772 = vmatmul.mubr.f32.vlgmr.msra.gmra.mrb[8].mxu0 %v1474_v6  ;;  %v1423_v20 = vsel %vm126_vm3, %v5972_v26, %v5982_v10  ;;  %v1424_v3 = vsel %vm126_vm3, %v5982_v10, %v5983_v37  ;;  %v5314_v6 = vpack.c.bf16 %v1571_v1, %v1569_v8  ;;  %v1575_v10 = vld [vmem:[#allocation9 + $0x2f0] sm:$0xff]  ;;  %v1602_v8 = vld [vmem:[#allocation9 + $0x3c8] sm:$0xff]  ;;  %v1604_v1 = vld [vmem:[#allocation9 + $0x3d8] sm:$0xff] }
 0x424   :  { %v1419_v21 = vpop.permute.xlu0 %1418  ;;  %v6964_v43 = vmax.f32 %v1381_v62, %v1423_v20  ;;  %v6966_v11 = vmax.f32 %v1382_v34, %v1424_v3  ;;  %5291 = vmatpush1.bf16.msra.mxu0 %v5290_v7  ;;  %v5300_v62 = vpack.c.bf16 %v1560_v29, %v1558_v28  ;;  %v1564_v34 = vld [vmem:[#allocation9 + $0x298] sm:$0xff]  ;;  %v5316_v7 = vpack.c.bf16 %v1576_v54, %v1574_v4  ;;  %v1579_v20 = vld [vmem:[#allocation9 + $0x310] sm:$0xff]  ;;  %v1582_v3 = vld [vmem:[#allocation9 + $0x328] sm:$0xff] }
 0x425   :  { %v6968_v9 = vmax.f32 %v1384_v48, %v1419_v21  ;;  %5293 = vmatprep.subr.bf16.mxu0 %v5292_v13  ;;  %v1425_v14 = vsel %vm126_vm3, %v5983_v37, %v1419_v21  ;;  %v5304_v38 = vpack.c.bf16 %v1564_v34, %v1562_v33  ;;  %v5306_v48 = vpack.c.bf16 %v1563_v50, %v1561_v58  ;;  %v1573_v37 = vld [vmem:[#allocation9 + $0x2e0] sm:$0xff]  ;;  %v1578_v13 = vld [vmem:[#allocation9 + $0x308] sm:$0xff]  ;;  %v1584_v21 = vld [vmem:[#allocation9 + $0x338] sm:$0xff] }
 0x426   :  { %v5984_v26 = vpack.i.bf16 %v6966_v11, %v6964_v43  ;;  %v6976_v17 = vmax.f32 %v1383_v24, %v1425_v14  ;;  %v1567_v24 = vld [vmem:[#allocation9 + $0x2b0] sm:$0xff]  ;;  %v5318_v16 = vpack.c.bf16 %v1575_v10, %v1573_v37  ;;  %v5320_v18 = vpack.c.bf16 %v1580_v15, %v1578_v13  ;;  %v1588_v28 = vld [vmem:[#allocation9 + $0x358] sm:$0xff]  ;;  %v1594_v58 = vld [vmem:[#allocation9 + $0x388] sm:$0xff] }
 0x427   :  { %1459 = vrot.lane.b32.xlu0 %v6968_v9, %s7966_s4  ;;  %v5310_v0 = vpack.c.bf16 %v1567_v24, %v1565_v56  ;;  %v5326_v29 = vpack.c.bf16 %v1583_v27, %v1581_v25  ;;  %v5332_v34 = vpack.c.bf16 %v1592_v39, %v1590_v30  ;;  %v1596_v50 = vld [vmem:[#allocation9 + $0x398] sm:$0xff]  ;;  %v1598_v56 = vld [vmem:[#allocation9 + $0x3a8] sm:$0xff]  ;;  %v5344_v54 = vpack.c.bf16 %v1604_v1, %v1602_v8  ;;  %v1609_v27 = vld [vmem:[#allocation9 + $0x400] sm:$0xff] }
 0x428   :  { %5985 = vrot.lane.b32.xlu1 %v5984_v26, %s7966_s4  ;;  %5295 = vmatpush1.bf16.msra.mxu0 %v5294_v22  ;;  %v5322_v22 = vpack.c.bf16 %v1579_v20, %v1577_v19  ;;  %v1586_v26 = vld [vmem:[#allocation9 + $0x348] sm:$0xff]  ;;  %v5336_v59 = vpack.c.bf16 %v1596_v50, %v1594_v58  ;;  %v1600_v24 = vld [vmem:[#allocation9 + $0x3b8] sm:$0xff] }
 0x429   :  { %5297 = vmatprep.subr.bf16.mxu0 %v5296_v23  ;;  %v5324_v23 = vpack.c.bf16 %v1584_v21, %v1582_v3  ;;  %v5328_v14 = vpack.c.bf16 %v1588_v28, %v1586_v26  ;;  %v5340_v53 = vpack.c.bf16 %v1600_v24, %v1598_v56  ;;  %v1606_v37 = vld [vmem:[#allocation9 + $0x3e8] sm:$0xff]  ;;  %v1608_v10 = vld [vmem:[#allocation9 + $0x3f8] sm:$0xff]  ;;  %v1611_v26 = vld [vmem:[#allocation9 + $0x410] sm:$0xff] }
 0x42a   :  { %v5348_v15 = vpack.c.bf16 %v1608_v10, %v1606_v37  ;;  %v1610_v19 = vld [vmem:[#allocation9 + $0x408] sm:$0xff]  ;;  %v1612_v20 = vld [vmem:[#allocation9 + $0x418] sm:$0xff] }
 0x42b   :  { %v5352_v21 = vpack.c.bf16 %v1612_v20, %v1610_v19  ;;  %v1614_v28 = vld [vmem:[#allocation9 + $0x428] sm:$0xff]  ;;  %v1624_v56 = vld [vmem:[#allocation9 + $0x478] sm:$0xff] }
 0x42c   :  { %1457 = vrot.lane.b32.xlu1 %v6976_v17, %s7966_s4  ;;  %5299 = vmatpush1.bf16.msra.mxu0 %v5298_v52  ;;  %v1585_v52 = vld [vmem:[#allocation9 + $0x340] sm:$0xff]  ;;  %v1618_v50 = vld [vmem:[#allocation9 + $0x448] sm:$0xff] }
 0x42d   :  { %5301 = vmatprep.subr.bf16.mxu0 %v5300_v62  ;;  %v1587_v62 = vld [vmem:[#allocation9 + $0x350] sm:$0xff] }
 0x42e   :  { %v5330_v33 = vpack.c.bf16 %v1587_v62, %v1585_v52 }
 0x430   :  { %5303 = vmatpush1.bf16.msra.mxu0 %v5302_v61  ;;  %v1589_v61 = vld [vmem:[#allocation9 + $0x360] sm:$0xff] }
 0x431   :  { %5305 = vmatprep.subr.bf16.mxu0 %v5304_v38  ;;  %v1591_v38 = vld [vmem:[#allocation9 + $0x370] sm:$0xff] }
 0x432   :  { %v5334_v44 = vpack.c.bf16 %v1591_v38, %v1589_v61  ;;  %v1613_v38 = vld [vmem:[#allocation9 + $0x420] sm:$0xff] }
 0x434   :  { %5307 = vmatpush1.bf16.msra.mxu0 %v5306_v48  ;;  %v1593_v48 = vld [vmem:[#allocation9 + $0x380] sm:$0xff] }
 0x435   :  { %5309 = vmatprep.subr.bf16.mxu0 %v5308_v55  ;;  %v1595_v55 = vld [vmem:[#allocation9 + $0x390] sm:$0xff] }
 0x436   :  { %v5338_v12 = vpack.c.bf16 %v1595_v55, %v1593_v48  ;;  %v1619_v48 = vld [vmem:[#allocation9 + $0x450] sm:$0xff]  ;;  %v1622_v55 = vld [vmem:[#allocation9 + $0x468] sm:$0xff] }
 0x438   :  { %5311 = vmatpush1.bf16.msra.mxu0 %v5310_v0  ;;  %v1597_v0 = vld [vmem:[#allocation9 + $0x3a0] sm:$0xff] }
 0x439   :  { %5313 = vmatprep.subr.bf16.mxu0 %v5312_v47  ;;  %v1599_v47 = vld [vmem:[#allocation9 + $0x3b0] sm:$0xff] }
 0x43a   :  { %v5342_v4 = vpack.c.bf16 %v1599_v47, %v1597_v0  ;;  %v1623_v0 = vld [vmem:[#allocation9 + $0x470] sm:$0xff]  ;;  %v1626_v47 = vld [vmem:[#allocation9 + $0x488] sm:$0xff] }
 0x43c   :  { %5315 = vmatpush1.bf16.msra.mxu0 %v5314_v6  ;;  %v1601_v6 = vld [vmem:[#allocation9 + $0x3c0] sm:$0xff] }
 0x43d   :  { %5317 = vmatprep.subr.bf16.mxu0 %v5316_v7  ;;  %v1603_v7 = vld [vmem:[#allocation9 + $0x3d0] sm:$0xff] }
 0x43e   :  { %v5346_v13 = vpack.c.bf16 %v1603_v7, %v1601_v6  ;;  %v1630_v6 = vld [vmem:[#allocation9 + $0x4a8] sm:$0xff]  ;;  %v1632_v7 = vld [vmem:[#allocation9 + $0x4b8] sm:$0xff] }
 0x43f   :  { %v5372_v10 = vpack.c.bf16 %v1632_v7, %v1630_v6  ;;  %v1657_v7 = vld [vmem:[#allocation9 + $0x580] sm:$0xff] }
 0x440   :  { %5319 = vmatpush1.bf16.msra.mxu0 %v5318_v16  ;;  %v1605_v16 = vld [vmem:[#allocation9 + $0x3e0] sm:$0xff] }
 0x441   :  { %5321 = vmatprep.subr.bf16.mxu0 %v5320_v18  ;;  %v1607_v18 = vld [vmem:[#allocation9 + $0x3f0] sm:$0xff] }
 0x442   :  { %v5350_v3 = vpack.c.bf16 %v1607_v18, %v1605_v16  ;;  %v1634_v16 = vld [vmem:[#allocation9 + $0x4c8] sm:$0xff]  ;;  %v1636_v18 = vld [vmem:[#allocation9 + $0x4d8] sm:$0xff] }
 0x443   :  { %v5376_v20 = vpack.c.bf16 %v1636_v18, %v1634_v16  ;;  %v1661_v18 = vld [vmem:[#allocation9 + $0x5a0] sm:$0xff] }
 0x444   :  { %5323 = vmatpush1.bf16.msra.mxu0 %v5322_v22 }
 0x445   :  { %5325 = vmatprep.subr.bf16.mxu0 %v5324_v23 }
 0x448   :  { %5327 = vmatpush1.bf16.msra.mxu0 %v5326_v29  ;;  %v1616_v29 = vld [vmem:[#allocation9 + $0x438] sm:$0xff] }
 0x449   :  { %5329 = vmatprep.subr.bf16.mxu0 %v5328_v14  ;;  %v5356_v49 = vpack.c.bf16 %v1616_v29, %v1614_v28  ;;  %v1637_v29 = vld [vmem:[#allocation9 + $0x4e0] sm:$0xff] }
 0x44c   :  { %5331 = vmatpush1.bf16.msra.mxu0 %v5330_v33 }
 0x44d   :  { %5333 = vmatprep.subr.bf16.mxu0 %v5332_v34  ;;  %v5354_v34 = vpack.c.bf16 %v1611_v26, %v1609_v27  ;;  %v1640_v27 = vld [vmem:[#allocation9 + $0x4f8] sm:$0xff] }
 0x450   :  { %5335 = vmatpush1.bf16.msra.mxu0 %v5334_v44  ;;  %v1620_v44 = vld [vmem:[#allocation9 + $0x458] sm:$0xff] }
 0x451   :  { %5337 = vmatprep.subr.bf16.mxu0 %v5336_v59 }
 0x454   :  { %5339 = vmatpush1.bf16.msra.mxu0 %v5338_v12  ;;  %v5364_v12 = vpack.c.bf16 %v1624_v56, %v1622_v55  ;;  %v1649_v56 = vld [vmem:[#allocation9 + $0x540] sm:$0xff] }
 0x455   :  { %5341 = vmatprep.subr.bf16.mxu0 %v5340_v53  ;;  %v1621_v53 = vld [vmem:[#allocation9 + $0x460] sm:$0xff] }
 0x456   :  { %v5366_v8 = vpack.c.bf16 %v1623_v0, %v1621_v53  ;;  %v1656_v53 = vld [vmem:[#allocation9 + $0x578] sm:$0xff] }
 0x458   :  { %5343 = vmatpush1.bf16.msra.mxu0 %v5342_v4  ;;  %v1625_v4 = vld [vmem:[#allocation9 + $0x480] sm:$0xff] }
 0x459   :  { %5345 = vmatprep.subr.bf16.mxu0 %v5344_v54  ;;  %v1627_v54 = vld [vmem:[#allocation9 + $0x490] sm:$0xff] }
 0x45a   :  { %v5370_v37 = vpack.c.bf16 %v1627_v54, %v1625_v4  ;;  %v1660_v4 = vld [vmem:[#allocation9 + $0x598] sm:$0xff] }
 0x45c   :  { %5347 = vmatpush1.bf16.msra.mxu0 %v5346_v13  ;;  %v1629_v13 = vld [vmem:[#allocation9 + $0x4a0] sm:$0xff] }
 0x45d   :  { %5349 = vmatprep.subr.bf16.mxu0 %v5348_v15  ;;  %v1631_v15 = vld [vmem:[#allocation9 + $0x4b0] sm:$0xff] }
 0x45e   :  { %v5374_v19 = vpack.c.bf16 %v1631_v15, %v1629_v13  ;;  %v1664_v13 = vld [vmem:[#allocation9 + $0x5b8] sm:$0xff] }
 0x460   :  { %5351 = vmatpush1.bf16.msra.mxu0 %v5350_v3  ;;  %v1633_v3 = vld [vmem:[#allocation9 + $0x4c0] sm:$0xff] }
 0x461   :  { %5353 = vmatprep.subr.bf16.mxu0 %v5352_v21  ;;  %v1635_v21 = vld [vmem:[#allocation9 + $0x4d0] sm:$0xff] }
 0x462   :  { %v5378_v26 = vpack.c.bf16 %v1635_v21, %v1633_v3  ;;  %v1668_v3 = vld [vmem:[#allocation9 + $0x5d8] sm:$0xff] }
 0x499   :  { %v6990_v62 = vpop.permute.xlu0 %1459 }
 0x49a   :  { %v6980_v22 = vpop.permute.xlu1 %5985 }
 0x49b   :  { %v5988_v23 = vunpack.i.h.bf16 %v6980_v22  ;;  %v5987_v25 = vunpack.i.l.bf16 %v6980_v22 }
 0x49d   :  { %v1463_v14 = vsel %vm170_vm7, %v5978_v51, %v5987_v25  ;;  %v1464_v52 = vsel %vm170_vm7, %v5987_v25, %v5988_v23  ;;  %v1615_v51 = vld [vmem:[#allocation9 + $0x430] sm:$0xff]  ;;  %v1638_v25 = vld [vmem:[#allocation9 + $0x4e8] sm:$0xff] }
 0x49e   :  { %v6992_v30 = vpop.permute.xlu1 %1457  ;;  %v1477_v39 = vmax.f32 %v6964_v43, %v1464_v52  ;;  %v1476_v33 = vmax.f32 %v6941_v31, %v1463_v14  ;;  %v5358_v59 = vpack.c.bf16 %v1615_v51, %v1613_v38  ;;  %v5360_v43 = vpack.c.bf16 %v1620_v44, %v1618_v50  ;;  %v1617_v31 = vld [vmem:[#allocation9 + $0x440] sm:$0xff]  ;;  %v1639_v14 = vld [vmem:[#allocation9 + $0x4f0] sm:$0xff]  ;;  %v1642_v52 = vld [vmem:[#allocation9 + $0x508] sm:$0xff] }
 0x49f   :  { %v1466_v61 = vsel %vm170_vm7, %v6992_v30, %v6990_v62  ;;  %v5362_v24 = vpack.c.bf16 %v1619_v48, %v1617_v31  ;;  %v5380_v28 = vpack.c.bf16 %v1640_v27, %v1638_v25  ;;  %v1646_v38 = vld [vmem:[#allocation9 + $0x528] sm:$0xff]  ;;  %v1648_v51 = vld [vmem:[#allocation9 + $0x538] sm:$0xff]  ;;  %v1645_v44 = vld [vmem:[#allocation9 + $0x520] sm:$0xff] }
 0x4a0   :  { %1842 = vmatprep.mubr.f32.mxu0 %v1477_v39  ;;  %v1479_v58 = vmax.f32 %v6976_v17, %v1466_v61  ;;  %v1628_v17 = vld [vmem:[#allocation9 + $0x498] sm:$0xff]  ;;  %v1641_v61 = vld [vmem:[#allocation9 + $0x500] sm:$0xff]  ;;  %v5388_v50 = vpack.c.bf16 %v1648_v51, %v1646_v38 }
 0x4a1   :  { %1843 = vmatmul.mubr.f32.vlgmr.msra.gmra.mrb[8].mxu0 %v1476_v33  ;;  %v5368_v1 = vpack.c.bf16 %v1628_v17, %v1626_v47  ;;  %v1644_v39 = vld [vmem:[#allocation9 + $0x518] sm:$0xff]  ;;  %v5382_v33 = vpack.c.bf16 %v1639_v14, %v1637_v29  ;;  %v1653_v17 = vld [vmem:[#allocation9 + $0x560] sm:$0xff] }
 0x4a2   :  { %5355 = vmatpush1.bf16.msra.mxu0 %v5354_v34  ;;  %1913 = vmatprep.mubr.f32.mxu0 %v1479_v58  ;;  %v5384_v34 = vpack.c.bf16 %v1644_v39, %v1642_v52  ;;  %v1652_v31 = vld [vmem:[#allocation9 + $0x558] sm:$0xff]  ;;  %v1665_v27 = vld [vmem:[#allocation9 + $0x5c0] sm:$0xff] }
 0x4a3   :  { %5357 = vmatprep.subr.bf16.mxu0 %v5356_v49  ;;  %v1643_v49 = vld [vmem:[#allocation9 + $0x510] sm:$0xff]  ;;  %v1672_v29 = vld [vmem:[#allocation9 + $0x5f8] sm:$0xff]  ;;  %v1669_v39 = vld [vmem:[#allocation9 + $0x5e0] sm:$0xff] }
 0x4a4   :  { %v5386_v58 = vpack.c.bf16 %v1643_v49, %v1641_v61  ;;  %v1676_v61 = vld [vmem:[#allocation9 + $0x618] sm:$0xff]  ;;  %v1673_v51 = vld [vmem:[#allocation9 + $0x600] sm:$0xff] }
 0x4a6   :  { %5359 = vmatpush1.bf16.msra.mxu0 %v5358_v59  ;;  %v1647_v59 = vld [vmem:[#allocation9 + $0x530] sm:$0xff] }
 0x4a7   :  { %5361 = vmatprep.subr.bf16.mxu0 %v5360_v43  ;;  %v1650_v43 = vld [vmem:[#allocation9 + $0x548] sm:$0xff]  ;;  %v5390_v48 = vpack.c.bf16 %v1647_v59, %v1645_v44  ;;  %v1680_v59 = vld [vmem:[#allocation9 + $0x638] sm:$0xff] }
 0x4a8   :  { %v5392_v55 = vpack.c.bf16 %v1652_v31, %v1650_v43  ;;  %v1678_v44 = vld [vmem:[#allocation9 + $0x628] sm:$0xff] }
 0x4aa   :  { %5363 = vmatpush1.bf16.msra.mxu0 %v5362_v24  ;;  %v1651_v24 = vld [vmem:[#allocation9 + $0x550] sm:$0xff] }
 0x4ab   :  { %5365 = vmatprep.subr.bf16.mxu0 %v5364_v12  ;;  %v1654_v12 = vld [vmem:[#allocation9 + $0x568] sm:$0xff]  ;;  %v5394_v0 = vpack.c.bf16 %v1651_v24, %v1649_v56  ;;  %v1679_v56 = vld [vmem:[#allocation9 + $0x630] sm:$0xff] }
 0x4ac   :  { %v5396_v47 = vpack.c.bf16 %v1656_v53, %v1654_v12  ;;  %v1682_v24 = vld [vmem:[#allocation9 + $0x648] sm:$0xff]  ;;  %v1684_v12 = vld [vmem:[#allocation9 + $0x658] sm:$0xff] }
 0x4ad   :  { %v5424_v22 = vpack.c.bf16 %v1684_v12, %v1682_v24 }
 0x4ae   :  { %5367 = vmatpush1.bf16.msra.mxu0 %v5366_v8  ;;  %v1655_v8 = vld [vmem:[#allocation9 + $0x570] sm:$0xff] }
 0x4af   :  { %5369 = vmatprep.subr.bf16.mxu0 %v5368_v1  ;;  %v1658_v1 = vld [vmem:[#allocation9 + $0x588] sm:$0xff]  ;;  %v5398_v54 = vpack.c.bf16 %v1655_v8, %v1653_v17  ;;  %v1688_v17 = vld [vmem:[#allocation9 + $0x678] sm:$0xff] }
 0x4b0   :  { %v5400_v6 = vpack.c.bf16 %v1660_v4, %v1658_v1  ;;  %v1685_v1 = vld [vmem:[#allocation9 + $0x660] sm:$0xff]  ;;  %v1687_v4 = vld [vmem:[#allocation9 + $0x670] sm:$0xff] }
 0x4b2   :  { %5371 = vmatpush1.bf16.msra.mxu0 %v5370_v37  ;;  %v1659_v37 = vld [vmem:[#allocation9 + $0x590] sm:$0xff] }
 0x4b3   :  { %5373 = vmatprep.subr.bf16.mxu0 %v5372_v10  ;;  %v1662_v10 = vld [vmem:[#allocation9 + $0x5a8] sm:$0xff]  ;;  %v5402_v15 = vpack.c.bf16 %v1659_v37, %v1657_v7  ;;  %v5430_v7 = vpack.c.bf16 %v1687_v4, %v1685_v1 }
 0x4b4   :  { %v5404_v16 = vpack.c.bf16 %v1664_v13, %v1662_v10  ;;  %v1689_v10 = vld [vmem:[#allocation9 + $0x680] sm:$0xff]  ;;  %v1691_v13 = vld [vmem:[#allocation9 + $0x690] sm:$0xff] }
 0x4b6   :  { %5375 = vmatpush1.bf16.msra.mxu0 %v5374_v19  ;;  %v1663_v19 = vld [vmem:[#allocation9 + $0x5b0] sm:$0xff] }
 0x4b7   :  { %5377 = vmatprep.subr.bf16.mxu0 %v5376_v20  ;;  %v1666_v20 = vld [vmem:[#allocation9 + $0x5c8] sm:$0xff]  ;;  %v5406_v21 = vpack.c.bf16 %v1663_v19, %v1661_v18  ;;  %v5434_v18 = vpack.c.bf16 %v1691_v13, %v1689_v10 }
 0x4b8   :  { %v5408_v25 = vpack.c.bf16 %v1668_v3, %v1666_v20  ;;  %v1693_v20 = vld [vmem:[#allocation9 + $0x6a0] sm:$0xff]  ;;  %v1695_v3 = vld [vmem:[#allocation9 + $0x6b0] sm:$0x7f] }
 0x4ba   :  { %5379 = vmatpush1.bf16.msra.mxu0 %v5378_v26  ;;  %v1667_v26 = vld [vmem:[#allocation9 + $0x5d0] sm:$0xff] }
 0x4bb   :  { %5381 = vmatprep.subr.bf16.mxu0 %v5380_v28  ;;  %v1670_v28 = vld [vmem:[#allocation9 + $0x5e8] sm:$0xff]  ;;  %v5410_v14 = vpack.c.bf16 %v1667_v26, %v1665_v27  ;;  %v1480_v27 = vmax.f32 %v6968_v9, %v6990_v62 }
 0x4bc   :  { %v5412_v52 = vpack.c.bf16 %v1672_v29, %v1670_v28 }
 0x4be   :  { %5383 = vmatpush1.bf16.msra.mxu0 %v5382_v33  ;;  %v1671_v33 = vld [vmem:[#allocation9 + $0x5f0] sm:$0xff] }
 0x4bf   :  { %5385 = vmatprep.subr.bf16.mxu0 %v5384_v34  ;;  %v1674_v34 = vld [vmem:[#allocation9 + $0x608] sm:$0xff]  ;;  %v5414_v49 = vpack.c.bf16 %v1671_v33, %v1669_v39 }
 0x4c0   :  { %v5416_v38 = vpack.c.bf16 %v1676_v61, %v1674_v34 }
 0x4c2   :  { %5387 = vmatpush1.bf16.msra.mxu0 %v5386_v58  ;;  %v1675_v58 = vld [vmem:[#allocation9 + $0x610] sm:$0xff] }
 0x4c3   :  { %5389 = vmatprep.subr.bf16.mxu0 %v5388_v50  ;;  %v1465_v50 = vsel %vm170_vm7, %v5988_v23, %v6992_v30  ;;  %v5418_v43 = vpack.c.bf16 %v1675_v58, %v1673_v51  ;;  %v1681_v23 = vld [vmem:[#allocation9 + $0x640] sm:$0xff]  ;;  %v1683_v30 = vld [vmem:[#allocation9 + $0x650] sm:$0xff] }
 0x4c4   :  { %v1478_v31 = vmax.f32 %v6966_v11, %v1465_v50  ;;  %v5426_v11 = vpack.c.bf16 %v1683_v30, %v1681_v23 }
 0x4c6   :  { %5391 = vmatpush1.bf16.msra.mxu0 %v5390_v48  ;;  %v5420_v48 = vpack.c.bf16 %v1680_v59, %v1678_v44 }
 0x4c7   :  { %5393 = vmatprep.subr.bf16.mxu0 %v5392_v55  ;;  %v1677_v55 = vld [vmem:[#allocation9 + $0x620] sm:$0xff] }
 0x4c8   :  { %v5422_v53 = vpack.c.bf16 %v1679_v56, %v1677_v55 }
 0x4ca   :  { %5395 = vmatpush1.bf16.msra.mxu0 %v5394_v0  ;;  %v7005_v0 = vld [vmem:[#allocation5 + $0x130] sm:$0xff] }
 0x4cb   :  { %5397 = vmatprep.subr.bf16.mxu0 %v5396_v47  ;;  %v1686_v47 = vld [vmem:[#allocation9 + $0x668] sm:$0xff]  ;;  %100 = vst.msk [vmem:[#allocation5 + $0x128] sm:$0xc0] %vm99_vm8, %v7005_v0 }
 0x4cc   :  { %v5428_v8 = vpack.c.bf16 %v1688_v17, %v1686_v47 }
 0x4ce   :  { %5399 = vmatpush1.bf16.msra.mxu0 %v5398_v54  ;;  %v1690_v54 = vld [vmem:[#allocation9 + $0x688] sm:$0xff] }
 0x4cf   :  { %5401 = vmatprep.subr.bf16.mxu0 %v5400_v6  ;;  %v1692_v6 = vld [vmem:[#allocation9 + $0x698] sm:$0xff] }
 0x4d0   :  { %v5432_v37 = vpack.c.bf16 %v1692_v6, %v1690_v54 }
 0x4d2   :  { %5403 = vmatpush1.bf16.msra.mxu0 %v5402_v15  ;;  %v1694_v15 = vld [vmem:[#allocation9 + $0x6a8] sm:$0xff] }
 0x4d3   :  { %5405 = vmatprep.subr.bf16.mxu0 %v5404_v16  ;;  %v1696_v16 = vld [vmem:[#allocation9 + $0x6b8] sm:$0x7f] }
 0x4d4   :  { %v5436_v19 = vpack.c.bf16 %v1696_v16, %v1694_v15 }
 0x4d6   :  { %5407 = vmatpush1.bf16.msra.mxu0 %v5406_v21 }
 0x4d7   :  { %5409 = vmatprep.subr.bf16.mxu0 %v5408_v25  ;;  %v5439_v25 = vpack.c.bf16 %v1695_v3, %v1693_v20 }
 0x4da   :  { %5411 = vmatpush1.bf16.msra.mxu0 %v5410_v14 }
 0x4db   :  { %5413 = vmatprep.subr.bf16.mxu0 %v5412_v52 }
 0x4de   :  { %5415 = vmatpush1.bf16.msra.mxu0 %v5414_v49 }
 0x4df   :  { %5417 = vmatprep.subr.bf16.mxu0 %v5416_v38 }
 0x4e1   :  { %1914 = vmatmul.mubr.f32.vlgmr.msra.gmra.mrb[8].mxu0 %v1478_v31 }
 0x4e2   :  { %5419 = vmatpush1.bf16.msra.mxu0 %v5418_v43  ;;  %1984 = vmatprep.mubr.f32.mxu0 %v7005_v0 }
 0x4e3   :  { %5421 = vmatprep.subr.bf16.mxu0 %v5420_v48 }
 0x4e6   :  { %5423 = vmatpush1.bf16.msra.mxu0 %v5422_v53 }
 0x4e7   :  { %5425 = vmatprep.subr.bf16.mxu0 %v5424_v22 }
 0x4ea   :  { %5427 = vmatpush1.bf16.msra.mxu0 %v5426_v11 }
 0x4eb   :  { %5429 = vmatprep.subr.bf16.mxu0 %v5428_v8 }
 0x4ee   :  { %5431 = vmatpush1.bf16.msra.mxu0 %v5430_v7 }
 0x4ef   :  { %5433 = vmatprep.subr.bf16.mxu0 %v5432_v37 }
 0x4f2   :  { %5435 = vmatpush1.bf16.msra.mxu0 %v5434_v18 }
 0x4f3   :  { %5438 = vmatprep.subr.msk.bf16.mxu0 %vm7008_vm14, %v5436_v19 }
 0x4f6   :  { %5441 = vmatpush1.bf16.msk.msra.mxu0 %vm7008_vm14, %v5439_v25 }
 0x4f9   :  { %4917 = vmatmul.mubr.msk.f32.vlgmr.msra.gmra.mrb[8].mxu0 %vm181_vm6, %v1480_v27 }
 0x5cc   :  { %v1986_v26 = vpop.f32.mrb[8].mxu0 }
 0x5cd   :  { %1991 = vst [vmem:[#allocation4] sm:$0xff] %v1986_v26  ;;  %v1988_v28 = vpop.f32.mrb[9].mxu0 }
 0x5ce   :  { %1992 = vst [vmem:[#allocation4 + $0x8] sm:$0xff] %v1988_v28 }
 0x5d4   :  { %v1993_v29 = vld [vmem:[#allocation4] sm:$0x3f] }
 0x5d5   :  { %v2051_v14 = vld [vmem:[#allocation4] sm:$0x3f]  ;;  %1995 = vst [vmem:[#allocation5] sm:$0x3f] %v1993_v29  ;;  %v1994_v52 = vld [vmem:[#allocation4 + $0x8] sm:$0x3f] }
 0x5d6   :  { %2055 = vrot.lane.b32.xlu1 %v2051_v14, %s7957_s3  ;;  %v2052_v39 = vld [vmem:[#allocation4 + $0x8] sm:$0x3f]  ;;  %1997 = vst.msk [vmem:[#allocation5 + $0x8] sm:$0x3f] %vm1996_vm15, %v1994_v52  ;;  %v2116_v33 = vld [vmem:[#allocation4] sm:$0x3f] }
 0x5d7   :  { %2057 = vrot.lane.b32.xlu0 %v2052_v39, %s7957_s3  ;;  %v2117_v9 = vld [vmem:[#allocation4 + $0x8] sm:$0x3f]  ;;  %v2180_v62 = vld [vmem:[#allocation4] sm:$0x3f] }
 0x5d8   :  { %v2181_v34 = vld [vmem:[#allocation4 + $0x8] sm:$0x3f]  ;;  %v2243_v61 = vld [vmem:[#allocation4] sm:$0x3f] }
 0x5d9   :  { %v2244_v49 = vld [vmem:[#allocation4 + $0x8] sm:$0x3f]  ;;  %v2309_v38 = vld [vmem:[#allocation4] sm:$0x3f] }
 0x5da   :  { %2120 = vrot.lane.b32.xlu1 %v2116_v33, %s6129_s29  ;;  %v1998_v51 = vld [vmem:[#allocation4] sm:$0x3f]  ;;  %v2310_v58 = vld [vmem:[#allocation4 + $0x8] sm:$0x3f] }
 0x5db   :  { %2122 = vrot.lane.b32.xlu0 %v2117_v9, %s6129_s29  ;;  %v1999_v50 = vld [vmem:[#allocation4 + $0x8] sm:$0x3f]  ;;  %v2002_v44 = vrot.slane %v1998_v51, 2  ;;  %v2016_v43 = vld [vmem:[#allocation4] sm:$0x3f] }
 0x5dc   :  { %v2003_v59 = vrot.slane %v1999_v50, 2  ;;  %v2017_v31 = vld [vmem:[#allocation4 + $0x8] sm:$0x3f]  ;;  %v2020_v48 = vrot.slane %v2016_v43, 4  ;;  %v2035_v56 = vld [vmem:[#allocation4] sm:$0x3f] }
 0x5dd   :  { %v2021_v55 = vrot.slane %v2017_v31, 4  ;;  %v2036_v24 = vld [vmem:[#allocation4 + $0x8] sm:$0x3f]  ;;  %v2039_v12 = vrot.slane %v2035_v56, 6  ;;  %v2064_v22 = vld [vmem:[#allocation4] sm:$0x3f] }
 0x5de   :  { %2184 = vrot.lane.b32.xlu1 %v2180_v62, %s7969_s13  ;;  %v2040_v53 = vrot.slane %v2036_v24, 6  ;;  %v2065_v23 = vld [vmem:[#allocation4 + $0x8] sm:$0x3f]  ;;  %v2068_v30 = vrot.slane %v2064_v22, 2  ;;  %v2082_v17 = vld [vmem:[#allocation4] sm:$0x3f] }
 0x5df   :  { %2186 = vrot.lane.b32.xlu0 %v2181_v34, %s7969_s13  ;;  %v2069_v47 = vrot.slane %v2065_v23, 2  ;;  %v2083_v11 = vld [vmem:[#allocation4 + $0x8] sm:$0x3f]  ;;  %v2086_v8 = vrot.slane %v2082_v17, 4  ;;  %v2100_v4 = vld [vmem:[#allocation4] sm:$0x3f] }
 0x5e0   :  { %v2087_v1 = vrot.slane %v2083_v11, 4  ;;  %v2101_v54 = vld [vmem:[#allocation4 + $0x8] sm:$0x3f]  ;;  %v2104_v6 = vrot.slane %v2100_v4, 6  ;;  %v2130_v37 = vld [vmem:[#allocation4] sm:$0x3f] }
 0x5e1   :  { %v2105_v7 = vrot.slane %v2101_v54, 6  ;;  %v2131_v10 = vld [vmem:[#allocation4 + $0x8] sm:$0x3f]  ;;  %v2134_v13 = vrot.slane %v2130_v37, 2  ;;  %v2148_v16 = vld [vmem:[#allocation4] sm:$0x3f]  ;;  %v2568_v54 = vmul.f32 %v6886_v46, %v6852_v41  ;;  %v2570_v37 = vmul.f32 %v6886_v46, %v6856_v45 }
 0x5e2   :  { %2247 = vrot.lane.b32.xlu1 %v2243_v61, %s6130_s19  ;;  %v2135_v15 = vrot.slane %v2131_v10, 2  ;;  %v2149_v18 = vld [vmem:[#allocation4 + $0x8] sm:$0x3f]  ;;  %v2152_v19 = vrot.slane %v2148_v16, 4  ;;  %v2165_v3 = vld [vmem:[#allocation4] sm:$0x3f] }
 0x5e3   :  { %2249 = vrot.lane.b32.xlu0 %v2244_v49, %s6130_s19  ;;  %v2153_v20 = vrot.slane %v2149_v18, 4  ;;  %v2166_v25 = vld [vmem:[#allocation4 + $0x8] sm:$0x3f]  ;;  %v2169_v27 = vrot.slane %v2165_v3, 6  ;;  %v2193_v28 = vld [vmem:[#allocation4] sm:$0x3f] }
 0x5e4   :  { %v2170_v26 = vrot.slane %v2166_v25, 6  ;;  %v2194_v29 = vld [vmem:[#allocation4 + $0x8] sm:$0x3f]  ;;  %v2197_v14 = vrot.slane %v2193_v28, 2  ;;  %v2210_v39 = vld [vmem:[#allocation4] sm:$0x3f] }
 0x5e5   :  { %v2198_v52 = vrot.slane %v2194_v29, 2  ;;  %v2211_v33 = vld [vmem:[#allocation4 + $0x8] sm:$0x3f]  ;;  %v2214_v9 = vrot.slane %v2210_v39, 4  ;;  %v2227_v34 = vld [vmem:[#allocation4] sm:$0x3f] }
 0x5e6   :  { %2313 = vrot.lane.b32.xlu1 %v2309_v38, %s7947_s1  ;;  %v2215_v62 = vrot.slane %v2211_v33, 4  ;;  %v2228_v61 = vld [vmem:[#allocation4 + $0x8] sm:$0x3f]  ;;  %v2231_v49 = vrot.slane %v2227_v34, 6  ;;  %v2257_v51 = vld [vmem:[#allocation4] sm:$0x3f] }
 0x5e7   :  { %2315 = vrot.lane.b32.xlu0 %v2310_v58, %s7947_s1  ;;  %v2232_v38 = vrot.slane %v2228_v61, 6  ;;  %v2258_v58 = vld [vmem:[#allocation4 + $0x8] sm:$0x3f]  ;;  %v2261_v50 = vrot.slane %v2257_v51, 2  ;;  %v2371_v18 = vld [vmem:[#allocation4] sm:$0x3f] }
 0x5e8   :  { %v2276_v43 = vld [vmem:[#allocation4 + $0x8] sm:$0x3f] }
 0x5e9   :  { %v2294_v56 = vld [vmem:[#allocation4 + $0x8] sm:$0x3f] }
 0x5ea   :  { %2004 = vrot.lane.b32.xlu1 %v2002_v44, %s7956_s16  ;;  %v2262_v44 = vrot.slane %v2258_v58, 2  ;;  %v2323_v22 = vld [vmem:[#allocation4 + $0x8] sm:$0x3f] }
 0x5eb   :  { %2006 = vrot.lane.b32.xlu0 %v2003_v59, %s7956_s16  ;;  %v2275_v59 = vld [vmem:[#allocation4] sm:$0x3f]  ;;  %v2340_v17 = vld [vmem:[#allocation4 + $0x8] sm:$0x3f] }
 0x5ec   :  { %v2279_v31 = vrot.slane %v2275_v59, 4  ;;  %v2357_v4 = vld [vmem:[#allocation4 + $0x8] sm:$0x3f] }
 0x5ed   :  { %v2361_v16 = vrot.slane %v2357_v4, 6  ;;  %v2372_v3 = vld [vmem:[#allocation4 + $0x8] sm:$0x3f] }
 0x5ee   :  { %2022 = vrot.lane.b32.xlu1 %v2020_v48, %s7955_s27  ;;  %v2280_v48 = vrot.slane %v2276_v43, 4 }
 0x5ef   :  { %2024 = vrot.lane.b32.xlu0 %v2021_v55, %s7955_s27  ;;  %v2293_v55 = vld [vmem:[#allocation4] sm:$0x3f] }
 0x5f0   :  { %v2297_v24 = vrot.slane %v2293_v55, 6 }
 0x5f2   :  { %2041 = vrot.lane.b32.xlu1 %v2039_v12, %s7958_s14  ;;  %v2298_v12 = vrot.slane %v2294_v56, 6 }
 0x5f3   :  { %2043 = vrot.lane.b32.xlu0 %v2040_v53, %s7958_s14  ;;  %v2322_v53 = vld [vmem:[#allocation4] sm:$0x3f] }
 0x5f4   :  { %v2326_v23 = vrot.slane %v2322_v53, 2 }
 0x5f6   :  { %2070 = vrot.lane.b32.xlu1 %v2068_v30, %s6131_s26  ;;  %v2327_v30 = vrot.slane %v2323_v22, 2 }
 0x5f7   :  { %2072 = vrot.lane.b32.xlu0 %v2069_v47, %s6131_s26  ;;  %v2339_v47 = vld [vmem:[#allocation4] sm:$0x3f] }
 0x5f8   :  { %v2343_v11 = vrot.slane %v2339_v47, 4 }
 0x5fa   :  { %2088 = vrot.lane.b32.xlu1 %v2086_v8, %s6132_s2  ;;  %v2344_v8 = vrot.slane %v2340_v17, 4 }
 0x5fb   :  { %2090 = vrot.lane.b32.xlu0 %v2087_v1, %s6132_s2  ;;  %v2356_v1 = vld [vmem:[#allocation4] sm:$0x3f] }
 0x5fc   :  { %v2360_v10 = vrot.slane %v2356_v1, 6 }
 0x5fe   :  { %2106 = vrot.lane.b32.xlu1 %v2104_v6, %s6133_s5  ;;  %v2569_v6 = vmul.f32 %v6886_v46, %v6849_v35  ;;  %v7084_v35 = vadd.f32 %v2570_v37, %v6896_v57 }
 0x5ff   :  { %2108 = vrot.lane.b32.xlu0 %v2105_v7, %s6133_s5  ;;  %v2567_v7 = vmul.f32 %v6886_v46, %v6846_v32 }
 0x601   :  { %v7081_v41 = vadd.f32 %v2567_v7, %v6896_v57 }
 0x602   :  { %2136 = vrot.lane.b32.xlu1 %v2134_v13, %s7930_s18  ;;  %v7075_v13 = vadd.f32 %v2568_v54, %v6896_v57 }
 0x603   :  { %2138 = vrot.lane.b32.xlu0 %v2135_v15, %s7930_s18  ;;  %v7078_v15 = vadd.f32 %v2569_v6, %v6896_v57 }
 0x604   :  { %v2582_v32 = vmax.f32 %v7075_v13, 0.0 }
 0x605   :  { %v2583_v45 = vmax.f32 %v7078_v15, 0.0 }
 0x606   :  { %2154 = vrot.lane.b32.xlu1 %v2152_v19, %s7966_s4  ;;  %v2581_v19 = vmax.f32 %v7081_v41, 0.0 }
 0x607   :  { %2156 = vrot.lane.b32.xlu0 %v2153_v20, %s7966_s4  ;;  %v2584_v20 = vmax.f32 %v7084_v35, 0.0  ;;  %v5989_v25 = vpack.i.bf16 %v2583_v45, %v2582_v32 }
 0x60a   :  { %2171 = vrot.lane.b32.xlu1 %v2169_v27, %s7943_s0  ;;  %v5994_v27 = vpack.i.bf16 %v2581_v19, %v2584_v20 }
 0x60b   :  { %2173 = vrot.lane.b32.xlu0 %v2170_v26, %s7943_s0  ;;  %v107_v26 = vld [vmem:[%s7852_s7 + $0x8] sm:$0xff] }
 0x60c   :  { %4918 = vmatprep.mubr.msk.f32.mxu1 %vm102_vm1, %v107_v26  ;;  %4923 = vmatprep.mubr.msk.f32.mxu0 %vm102_vm1, %v107_v26 }
 0x60e   :  { %2199 = vrot.lane.b32.xlu1 %v2197_v14, %s7945_s21 }
 0x60f   :  { %2201 = vrot.lane.b32.xlu0 %v2198_v52, %s7945_s21 }
 0x612   :  { %2216 = vrot.lane.b32.xlu1 %v2214_v9, %s7944_s28 }
 0x613   :  { %2218 = vrot.lane.b32.xlu0 %v2215_v62, %s7944_s28 }
 0x616   :  { %2233 = vrot.lane.b32.xlu1 %v2231_v49, %s7908_s20 }
 0x617   :  { %2235 = vrot.lane.b32.xlu0 %v2232_v38, %s7908_s20  ;;  %s7910_s20 = smov 76  }
 0x61a   :  { %2263 = vrot.lane.b32.xlu1 %v2261_v50, %s7928_s6 }
 0x61b   :  { %2265 = vrot.lane.b32.xlu0 %v2262_v44, %s7928_s6 }
 0x61e   :  { %2281 = vrot.lane.b32.xlu1 %v2279_v31, %s7912_s30 }
 0x61f   :  { %2283 = vrot.lane.b32.xlu0 %v2280_v48, %s7912_s30 }
 0x622   :  { %2299 = vrot.lane.b32.xlu1 %v2297_v24, %s7910_s20 }
 0x623   :  { %2301 = vrot.lane.b32.xlu0 %v2298_v12, %s7910_s20 }
 0x626   :  { %2328 = vrot.lane.b32.xlu1 %v2326_v23, %s7946_s23 }
 0x627   :  { %2330 = vrot.lane.b32.xlu0 %v2327_v30, %s7946_s23 }
 0x62a   :  { %2345 = vrot.lane.b32.xlu1 %v2343_v11, %s7949_s24 }
 0x62b   :  { %2347 = vrot.lane.b32.xlu0 %v2344_v8, %s7949_s24 }
 0x62e   :  { %2362 = vrot.lane.b32.xlu1 %v2360_v10, %s7948_s25 }
 0x62f   :  { %2364 = vrot.lane.b32.xlu0 %v2361_v16, %s7948_s25 }
 0x632   :  { %2375 = vrot.lane.b32.xlu1 %v2371_v18, %s7950_s22 }
 0x633   :  { %2377 = vrot.lane.b32.xlu0 %v2372_v3, %s7950_s22 }
 0x636   :  { %5990 = vrot.lane.b32.xlu1 %v5989_v25, %s7956_s16 }
 0x637   :  { %5995 = vrot.lane.b32.xlu0 %v5994_v27, %s7956_s16 }
 0x648   :  { %v2056_v28 = vpop.permute.xlu1 %2055 }
 0x649   :  { %v2058_v29 = vpop.permute.xlu0 %2057 }
 0x64a   :  { %v2059_v14 = vsel %vm159_vm4, %v2056_v28, %v2058_v29  ;;  %2063 = vst.msk [vmem:[#allocation5 + $0x38] sm:$0x3f] %vm1996_vm15, %v2058_v29 }
 0x64b   :  { %2062 = vst [vmem:[#allocation5 + $0x30] sm:$0x3f] %v2059_v14 }
 0x64c   :  { %v2121_v52 = vpop.permute.xlu1 %2120 }
 0x64d   :  { %v2123_v39 = vpop.permute.xlu0 %2122 }
 0x64e   :  { %v2125_v33 = vsel %vm2124_vm13, %v2121_v52, %v2123_v39  ;;  %2129 = vst.msk [vmem:[#allocation5 + $0x68] sm:$0x3f] %vm1996_vm15, %v2123_v39 }
 0x64f   :  { %2128 = vst [vmem:[#allocation5 + $0x60] sm:$0x3f] %v2125_v33 }
 0x650   :  { %v2185_v9 = vpop.permute.xlu1 %2184 }
 0x651   :  { %v2187_v62 = vpop.permute.xlu0 %2186 }
 0x652   :  { %v2188_v34 = vsel %vm7918_vm9, %v2185_v9, %v2187_v62  ;;  %2192 = vst.msk [vmem:[#allocation5 + $0x98] sm:$0x3f] %vm1996_vm15, %v2187_v62  ;;  %vm7920_vm9 = vcmask 916480  }
 0x653   :  { %2191 = vst [vmem:[#allocation5 + $0x90] sm:$0x3f] %v2188_v34 }
 0x654   :  { %v2248_v61 = vpop.permute.xlu1 %2247 }
 0x655   :  { %v2250_v49 = vpop.permute.xlu0 %2249 }
 0x656   :  { %v2252_v38 = vsel %vm7916_vm0, %v2248_v61, %v2250_v49  ;;  %2256 = vst.msk [vmem:[#allocation5 + $0xc8] sm:$0x3f] %vm1996_vm15, %v2250_v49  ;;  %vm2033_vm0 = vcmask 254976  }
 0x657   :  { %2255 = vst [vmem:[#allocation5 + $0xc0] sm:$0x3f] %v2252_v38 }
 0x658   :  { %v2314_v51 = vpop.permute.xlu1 %2313 }
 0x659   :  { %v2316_v58 = vpop.permute.xlu0 %2315 }
 0x65a   :  { %v2317_v50 = vsel %vm7917_vm10, %v2314_v51, %v2316_v58  ;;  %2321 = vst.msk [vmem:[#allocation5 + $0xf8] sm:$0x3f] %vm1996_vm15, %v2316_v58  ;;  %vm2049_vm10 = vcmask 261122  }
 0x65b   :  { %2320 = vst [vmem:[#allocation5 + $0xf0] sm:$0x3f] %v2317_v50 }
 0x65c   :  { %v2005_v44 = vpop.permute.xlu1 %2004 }
 0x65d   :  { %v2007_v59 = vpop.permute.xlu0 %2006 }
 0x65e   :  { %v2008_v43 = vsel %vm126_vm3, %v2005_v44, %v2007_v59  ;;  %2012 = vst.msk [vmem:[#allocation5 + $0x8] sm:$0xc0] %vm99_vm8, %v2007_v59 }
 0x65f   :  { %2015 = vst.msk [vmem:[#allocation5 + $0x18] sm:$0xf] %vm2014_vm12, %v2007_v59  ;;  %2011 = vst [vmem:[#allocation5 + $0x10] ss:$-12 sps:$4 sm:$0xcf] %v2008_v43  }
 0x660   :  { %v2023_v31 = vpop.permute.xlu1 %2022 }
 0x661   :  { %v2025_v48 = vpop.permute.xlu0 %2024 }
 0x662   :  { %v2026_v55 = vsel %vm7919_vm5, %v2023_v31, %v2025_v48  ;;  %2031 = vst.msk [vmem:[#allocation5 + $0x18] sm:$0xf0] %vm2030_vm11, %v2025_v48  ;;  %vm7924_vm5 = vcmask 908288  }
 0x663   :  { %2034 = vst.msk [vmem:[#allocation5 + $0x28] sm:$0x3] %vm2033_vm0, %v2025_v48  ;;  %2029 = vst [vmem:[#allocation5 + $0x20] ss:$-12 sps:$4 sm:$0xf3] %v2026_v55  }
 0x664   :  { %v2042_v56 = vpop.permute.xlu1 %2041 }
 0x665   :  { %v2044_v24 = vpop.permute.xlu0 %2043  ;;  %v2385_v23 = vld [vmem:[#allocation5 + $0x8] sm:$0xff] }
 0x666   :  { %v2045_v12 = vsel %vm7921_vm2, %v2042_v56, %v2044_v24  ;;  %2050 = vst.msk [vmem:[#allocation5 + $0x28] sm:$0xfc] %vm2049_vm10, %v2044_v24  ;;  %v2384_v11 = vld [vmem:[#allocation5] sm:$0xff]  ;;  %vm7922_vm2 = vcmask 883712  }
 0x667   :  { %2048 = vst [vmem:[#allocation5 + $0x20] sm:$0xfc] %v2045_v12 }
 0x668   :  { %v2071_v53 = vpop.permute.xlu1 %2070 }
 0x669   :  { %v2073_v22 = vpop.permute.xlu0 %2072  ;;  %v2387_v30 = vld [vmem:[#allocation5 + $0x18] sm:$0xff] }
 0x66a   :  { %v2075_v47 = vsel %vm7920_vm9, %v2071_v53, %v2073_v22  ;;  %2079 = vst.msk [vmem:[#allocation5 + $0x38] sm:$0xc0] %vm99_vm8, %v2073_v22  ;;  %v5442_v17 = vpack.c.bf16 %v2387_v30, %v2385_v23  ;;  %v2386_v8 = vld [vmem:[#allocation5 + $0x10] sm:$0xff]  ;;  %vm7923_vm9 = vcmask 900096  }
 0x66b   :  { %2081 = vst.msk [vmem:[#allocation5 + $0x48] sm:$0xf] %vm2014_vm12, %v2073_v22  ;;  %2078 = vst [vmem:[#allocation5 + $0x40] ss:$-12 sps:$4 sm:$0xcf] %v2075_v47   ;;  %v5444_v1 = vpack.c.bf16 %v2386_v8, %v2384_v11 }
 0x66c   :  { %v2089_v4 = vpop.permute.xlu1 %2088  ;;  %5443 = vmatprep.subr.bf16.mxu1 %v5442_v17 }
 0x66d   :  { %v2091_v54 = vpop.permute.xlu0 %2090  ;;  %5445 = vmatpush1.bf16.msra.mxu1 %v5444_v1  ;;  %v2389_v10 = vld [vmem:[#allocation5 + $0x28] sm:$0xff] }
 0x66e   :  { %v2093_v6 = vsel %vm7924_vm5, %v2089_v4, %v2091_v54  ;;  %2097 = vst.msk [vmem:[#allocation5 + $0x48] sm:$0xf0] %vm2030_vm11, %v2091_v54  ;;  %v2388_v25 = vld [vmem:[#allocation5 + $0x20] sm:$0xff]  ;;  %vm7925_vm5 = vcmask 637952  }
 0x66f   :  { %2099 = vst.msk [vmem:[#allocation5 + $0x58] sm:$0x3] %vm2033_vm0, %v2091_v54  ;;  %2096 = vst [vmem:[#allocation5 + $0x50] ss:$-12 sps:$4 sm:$0xf3] %v2093_v6  }
 0x670   :  { %v2107_v7 = vpop.permute.xlu1 %2106 }
 0x671   :  { %v2109_v37 = vpop.permute.xlu0 %2108  ;;  %v2391_v16 = vld [vmem:[#allocation5 + $0x38] sm:$0xff] }
 0x672   :  { %v2111_v18 = vsel %vm7923_vm9, %v2107_v7, %v2109_v37  ;;  %2115 = vst.msk [vmem:[#allocation5 + $0x58] sm:$0xfc] %vm2049_vm10, %v2109_v37  ;;  %v5446_v3 = vpack.c.bf16 %v2391_v16, %v2389_v10  ;;  %v2390_v27 = vld [vmem:[#allocation5 + $0x30] sm:$0xff]  ;;  %vm7971_vm9 = vcmask 752640  }
 0x673   :  { %2114 = vst [vmem:[#allocation5 + $0x50] sm:$0xfc] %v2111_v18  ;;  %v5448_v26 = vpack.c.bf16 %v2390_v27, %v2388_v25 }
 0x674   :  { %v2137_v28 = vpop.permute.xlu1 %2136  ;;  %5447 = vmatprep.subr.bf16.mxu1 %v5446_v3 }
 0x675   :  { %v2139_v29 = vpop.permute.xlu0 %2138  ;;  %5449 = vmatpush1.bf16.msra.mxu1 %v5448_v26  ;;  %v2393_v33 = vld [vmem:[#allocation5 + $0x48] sm:$0xff] }
 0x676   :  { %v2141_v14 = vsel %vm7922_vm2, %v2137_v28, %v2139_v29  ;;  %2145 = vst.msk [vmem:[#allocation5 + $0x68] sm:$0xc0] %vm99_vm8, %v2139_v29  ;;  %v2392_v61 = vld [vmem:[#allocation5 + $0x40] sm:$0xff]  ;;  %vm7970_vm2 = vcmask 760832  }
 0x677   :  { %2147 = vst.msk [vmem:[#allocation5 + $0x78] sm:$0xf] %vm2014_vm12, %v2139_v29  ;;  %2144 = vst [vmem:[#allocation5 + $0x70] ss:$-12 sps:$4 sm:$0xcf] %v2141_v14  }
 0x678   :  { %v2155_v52 = vpop.permute.xlu1 %2154 }
 0x679   :  { %v2157_v39 = vpop.permute.xlu0 %2156  ;;  %v2395_v9 = vld [vmem:[#allocation5 + $0x58] sm:$0xff] }
 0x67a   :  { %v2158_v62 = vsel %vm170_vm7, %v2155_v52, %v2157_v39  ;;  %2162 = vst.msk [vmem:[#allocation5 + $0x78] sm:$0xf0] %vm2030_vm11, %v2157_v39  ;;  %v5450_v34 = vpack.c.bf16 %v2395_v9, %v2393_v33  ;;  %v2394_v49 = vld [vmem:[#allocation5 + $0x50] sm:$0xff] }
 0x67b   :  { %2164 = vst.msk [vmem:[#allocation5 + $0x88] sm:$0x3] %vm2033_vm0, %v2157_v39  ;;  %2161 = vst [vmem:[#allocation5 + $0x80] ss:$-12 sps:$4 sm:$0xf3] %v2158_v62   ;;  %v5452_v38 = vpack.c.bf16 %v2394_v49, %v2392_v61 }
 0x67c   :  { %v2172_v51 = vpop.permute.xlu1 %2171  ;;  %5451 = vmatprep.subr.bf16.mxu1 %v5450_v34 }
 0x67d   :  { %v2174_v58 = vpop.permute.xlu0 %2173  ;;  %5453 = vmatpush1.bf16.msra.mxu1 %v5452_v38  ;;  %v2397_v43 = vld [vmem:[#allocation5 + $0x68] sm:$0xff] }
 0x67e   :  { %v2175_v50 = vsel %vm181_vm6, %v2172_v51, %v2174_v58  ;;  %2179 = vst.msk [vmem:[#allocation5 + $0x88] sm:$0xfc] %vm2049_vm10, %v2174_v58  ;;  %v2396_v56 = vld [vmem:[#allocation5 + $0x60] sm:$0xff] }
 0x67f   :  { %2178 = vst [vmem:[#allocation5 + $0x80] sm:$0xfc] %v2175_v50 }
 0x680   :  { %v2200_v44 = vpop.permute.xlu1 %2199 }
 0x681   :  { %v2202_v59 = vpop.permute.xlu0 %2201  ;;  %v2399_v31 = vld [vmem:[#allocation5 + $0x78] sm:$0xff] }
 0x682   :  { %v2203_v48 = vsel %vm7970_vm2, %v2200_v44, %v2202_v59  ;;  %2207 = vst.msk [vmem:[#allocation5 + $0x98] sm:$0xc0] %vm99_vm8, %v2202_v59  ;;  %v5454_v55 = vpack.c.bf16 %v2399_v31, %v2397_v43  ;;  %v2398_v24 = vld [vmem:[#allocation5 + $0x70] sm:$0xff]  ;;  %vm2237_vm2 = vcmask 654336  }
 0x683   :  { %2209 = vst.msk [vmem:[#allocation5 + $0xa8] sm:$0xf] %vm2014_vm12, %v2202_v59  ;;  %2206 = vst [vmem:[#allocation5 + $0xa0] ss:$-12 sps:$4 sm:$0xcf] %v2203_v48   ;;  %v5456_v12 = vpack.c.bf16 %v2398_v24, %v2396_v56 }
 0x684   :  { %v2217_v53 = vpop.permute.xlu1 %2216  ;;  %5455 = vmatprep.subr.bf16.mxu1 %v5454_v55 }
 0x685   :  { %v2219_v22 = vpop.permute.xlu0 %2218  ;;  %5457 = vmatpush1.bf16.msra.mxu1 %v5456_v12  ;;  %v2401_v17 = vld [vmem:[#allocation5 + $0x88] sm:$0xff] }
 0x686   :  { %v2220_v23 = vsel %vm7971_vm9, %v2217_v53, %v2219_v22  ;;  %2224 = vst.msk [vmem:[#allocation5 + $0xa8] sm:$0xf0] %vm2030_vm11, %v2219_v22  ;;  %v2400_v4 = vld [vmem:[#allocation5 + $0x80] sm:$0xff]  ;;  %vm7926_vm9 = vcmask 629760  }
 0x687   :  { %2226 = vst.msk [vmem:[#allocation5 + $0xb8] sm:$0x3] %vm2033_vm0, %v2219_v22  ;;  %2223 = vst [vmem:[#allocation5 + $0xb0] ss:$-12 sps:$4 sm:$0xf3] %v2220_v23  }
 0x688   :  { %v2234_v30 = vpop.permute.xlu1 %2233 }
 0x689   :  { %v2236_v47 = vpop.permute.xlu0 %2235  ;;  %v2403_v11 = vld [vmem:[#allocation5 + $0x98] sm:$0xff] }
 0x68a   :  { %v2238_v8 = vsel %vm2237_vm2, %v2234_v30, %v2236_v47  ;;  %2242 = vst.msk [vmem:[#allocation5 + $0xb8] sm:$0xfc] %vm2049_vm10, %v2236_v47  ;;  %v5458_v1 = vpack.c.bf16 %v2403_v11, %v2401_v17  ;;  %v2402_v54 = vld [vmem:[#allocation5 + $0x90] sm:$0xff] }
 0x68b   :  { %2241 = vst [vmem:[#allocation5 + $0xb0] sm:$0xfc] %v2238_v8  ;;  %v5460_v6 = vpack.c.bf16 %v2402_v54, %v2400_v4 }
 0x68c   :  { %v2264_v7 = vpop.permute.xlu1 %2263  ;;  %5459 = vmatprep.subr.bf16.mxu1 %v5458_v1 }
 0x68d   :  { %v2266_v37 = vpop.permute.xlu0 %2265  ;;  %5461 = vmatpush1.bf16.msra.mxu1 %v5460_v6  ;;  %v2405_v3 = vld [vmem:[#allocation5 + $0xa8] sm:$0xff] }
 0x68e   :  { %v2268_v10 = vsel %vm7925_vm5, %v2264_v7, %v2266_v37  ;;  %2272 = vst.msk [vmem:[#allocation5 + $0xc8] sm:$0xc0] %vm99_vm8, %v2266_v37  ;;  %v2404_v28 = vld [vmem:[#allocation5 + $0xa0] sm:$0xff]  ;;  %vm7927_vm5 = vcmask 621568   ;;  %v2571_v7 = vmul.f32 %v6886_v46, %v6865_v60 }
 0x68f   :  { %2274 = vst.msk [vmem:[#allocation5 + $0xd8] sm:$0xf] %vm2014_vm12, %v2266_v37  ;;  %2271 = vst [vmem:[#allocation5 + $0xd0] ss:$-12 sps:$4 sm:$0xcf] %v2268_v10   ;;  %v2572_v37 = vmul.f32 %v6886_v46, %v6869_v2  ;;  %v2685_v60 = vld [vmem:[#allocation9 + $0x8] sm:$0xff] }
 0x690   :  { %v2282_v16 = vpop.permute.xlu1 %2281 }
 0x691   :  { %v2284_v18 = vpop.permute.xlu0 %2283  ;;  %v2407_v25 = vld [vmem:[#allocation5 + $0xb8] sm:$0xff] }
 0x692   :  { %v2286_v27 = vsel %vm7926_vm9, %v2282_v16, %v2284_v18  ;;  %2290 = vst.msk [vmem:[#allocation5 + $0xd8] sm:$0xf0] %vm2030_vm11, %v2284_v18  ;;  %v5462_v26 = vpack.c.bf16 %v2407_v25, %v2405_v3  ;;  %v2406_v29 = vld [vmem:[#allocation5 + $0xb0] sm:$0xff]  ;;  %vm7972_vm9 = vcmask 515072  }
 0x693   :  { %2292 = vst.msk [vmem:[#allocation5 + $0xe8] sm:$0x3] %vm2033_vm0, %v2284_v18  ;;  %2289 = vst [vmem:[#allocation5 + $0xe0] ss:$-12 sps:$4 sm:$0xf3] %v2286_v27   ;;  %v5464_v14 = vpack.c.bf16 %v2406_v29, %v2404_v28  ;;  %v2423_v28 = vld [vmem:[#allocation5 + $0x138] sm:$0xff]  ;;  %v7179_v29 = vadd.f32 %v2571_v7, %v6896_v57 }
 0x694   :  { %v2300_v52 = vpop.permute.xlu1 %2299  ;;  %5463 = vmatprep.subr.bf16.mxu1 %v5462_v26 }
 0x695   :  { %v2302_v39 = vpop.permute.xlu0 %2301  ;;  %5465 = vmatpush1.bf16.msra.mxu1 %v5464_v14  ;;  %v2409_v34 = vld [vmem:[#allocation5 + $0xc8] sm:$0xff]  ;;  %v7182_v14 = vadd.f32 %v2572_v37, %v6896_v57 }
 0x696   :  { %v2304_v33 = vsel %vm7927_vm5, %v2300_v52, %v2302_v39  ;;  %2308 = vst.msk [vmem:[#allocation5 + $0xe8] sm:$0xfc] %vm2049_vm10, %v2302_v39  ;;  %v2408_v51 = vld [vmem:[#allocation5 + $0xc0] sm:$0xff]  ;;  %vm7973_vm5 = vcmask 506880   ;;  %v2687_v52 = vld [vmem:[#allocation9 + $0x18] sm:$0xff] }
 0x697   :  { %2307 = vst [vmem:[#allocation5 + $0xe0] sm:$0xfc] %v2304_v33  ;;  %v2586_v41 = vmax.f32 %v7182_v14, 0.0  ;;  %v2768_v14 = vld [vmem:[#allocation9 + $0x2a0] sm:$0xff] }
 0x698   :  { %v2329_v9 = vpop.permute.xlu1 %2328 }
 0x699   :  { %v2331_v62 = vpop.permute.xlu0 %2330  ;;  %v2411_v61 = vld [vmem:[#allocation5 + $0xd8] sm:$0xff] }
 0x69a   :  { %v2332_v49 = vsel %vm7972_vm9, %v2329_v9, %v2331_v62  ;;  %2336 = vst.msk [vmem:[#allocation5 + $0xf8] sm:$0xc0] %vm99_vm8, %v2331_v62  ;;  %v5466_v38 = vpack.c.bf16 %v2411_v61, %v2409_v34  ;;  %v2410_v58 = vld [vmem:[#allocation5 + $0xd0] sm:$0xff]  ;;  %vm7974_vm9 = vcmask 498688   ;;  %v5482_v61 = vpack.c.bf16 %v2687_v52, %v2685_v60  ;;  %v2706_v60 = vld [vmem:[#allocation9 + $0xb0] sm:$0xff]  ;;  %v2709_v52 = vld [vmem:[#allocation9 + $0xc8] sm:$0xff] }
 0x69b   :  { %2338 = vst.msk [vmem:[#allocation5 + $0x108] sm:$0xf] %vm2014_vm12, %v2331_v62  ;;  %2335 = vst [vmem:[#allocation5 + $0x100] ss:$-12 sps:$4 sm:$0xcf] %v2332_v49   ;;  %v5468_v50 = vpack.c.bf16 %v2410_v58, %v2408_v51  ;;  %v2684_v49 = vld [vmem:[#allocation9] sm:$0xff] }
 0x69c   :  { %v2346_v44 = vpop.permute.xlu1 %2345  ;;  %5467 = vmatprep.subr.bf16.mxu1 %v5466_v38  ;;  %v2686_v38 = vld [vmem:[#allocation9 + $0x10] sm:$0xff]  ;;  %v2691_v58 = vld [vmem:[#allocation9 + $0x38] sm:$0xff] }
 0x69d   :  { %v2348_v59 = vpop.permute.xlu0 %2347  ;;  %5469 = vmatpush1.bf16.msra.mxu1 %v5468_v50  ;;  %v2413_v55 = vld [vmem:[#allocation5 + $0xe8] sm:$0xff]  ;;  %v2573_v50 = vmul.f32 %v6886_v46, %v6873_v5 }
 0x69e   :  { %v2349_v43 = vsel %vm7973_vm5, %v2346_v44, %v2348_v59  ;;  %2353 = vst.msk [vmem:[#allocation5 + $0x108] sm:$0xf0] %vm2030_vm11, %v2348_v59  ;;  %v2412_v53 = vld [vmem:[#allocation5 + $0xe0] sm:$0xff]  ;;  %vm7975_vm5 = vcmask 490496   ;;  %v5484_v44 = vpack.c.bf16 %v2686_v38, %v2684_v49  ;;  %v109_v5 = vld [vmem:[%s7852_s7 + $0x18] sm:$0xff]  ;;  %v2715_v49 = vld [vmem:[#allocation9 + $0xf8] sm:$0xff] }
 0x69f   :  { %2355 = vst.msk [vmem:[#allocation5 + $0x118] sm:$0x3] %vm2033_vm0, %v2348_v59  ;;  %2352 = vst [vmem:[#allocation5 + $0x110] ss:$-12 sps:$4 sm:$0xf3] %v2349_v43   ;;  %v2688_v43 = vld [vmem:[#allocation9 + $0x20] sm:$0xff] }
 0x6a0   :  { %v2363_v31 = vpop.permute.xlu1 %2362 }
 0x6a1   :  { %v2365_v48 = vpop.permute.xlu0 %2364  ;;  %v2415_v56 = vld [vmem:[#allocation5 + $0xf8] sm:$0xff] }
 0x6a2   :  { %v2366_v24 = vsel %vm7974_vm9, %v2363_v31, %v2365_v48  ;;  %2370 = vst.msk [vmem:[#allocation5 + $0x118] sm:$0xfc] %vm2049_vm10, %v2365_v48  ;;  %v5470_v12 = vpack.c.bf16 %v2415_v56, %v2413_v55  ;;  %v2414_v22 = vld [vmem:[#allocation5 + $0xf0] sm:$0xff]  ;;  %v2690_v31 = vld [vmem:[#allocation9 + $0x30] sm:$0xff]  ;;  %v7218_v55 = vadd.f32 %v2573_v50, %v6896_v57  ;;  %v2693_v56 = vld [vmem:[#allocation9 + $0x48] sm:$0xff]  ;;  %vm7981_vm9 = vcmask 769024  }
 0x6a3   :  { %2369 = vst [vmem:[#allocation5 + $0x110] sm:$0xfc] %v2366_v24  ;;  %v5472_v23 = vpack.c.bf16 %v2414_v22, %v2412_v53  ;;  %v2695_v24 = vld [vmem:[#allocation9 + $0x58] sm:$0xff]  ;;  %v5488_v46 = vpack.c.bf16 %v2690_v31, %v2688_v43  ;;  %v2692_v22 = vld [vmem:[#allocation9 + $0x40] sm:$0xff]  ;;  %v2694_v57 = vld [vmem:[#allocation9 + $0x50] sm:$0xff] }
 0x6a4   :  { %v2376_v30 = vpop.permute.xlu1 %2375  ;;  %5471 = vmatprep.subr.bf16.mxu1 %v5470_v12  ;;  %v108_v12 = vld [vmem:[%s7852_s7 + $0x10] sm:$0xff]  ;;  %v5490_v53 = vpack.c.bf16 %v2695_v24, %v2693_v56  ;;  %v2719_v50 = vld [vmem:[#allocation9 + $0x118] sm:$0xff]  ;;  %v2718_v43 = vld [vmem:[#allocation9 + $0x110] sm:$0xff] }
 0x6a5   :  { %v2378_v47 = vpop.permute.xlu0 %2377  ;;  %5473 = vmatpush1.bf16.msra.mxu1 %v5472_v23  ;;  %v2417_v54 = vld [vmem:[#allocation5 + $0x108] sm:$0xff]  ;;  %v2587_v23 = vmax.f32 %v7218_v55, 0.0  ;;  %v2721_v31 = vld [vmem:[#allocation9 + $0x128] sm:$0xff] }
 0x6a6   :  { %v2379_v17 = vsel %vm7975_vm5, %v2376_v30, %v2378_v47  ;;  %2383 = vst.msk [vmem:[#allocation5 + $0x128] sm:$0x3f] %vm1996_vm15, %v2378_v47  ;;  %v2416_v3 = vld [vmem:[#allocation5 + $0x100] sm:$0xff]  ;;  %v2699_v47 = vld [vmem:[#allocation9 + $0x78] sm:$0xff]  ;;  %vm7984_vm5 = vcmask 1031168  }
 0x6a7   :  { %2382 = vst [vmem:[#allocation5 + $0x120] sm:$0x3f] %v2379_v17  ;;  %v2697_v30 = vld [vmem:[#allocation9 + $0x68] sm:$0xff]  ;;  %v5492_v17 = vpack.c.bf16 %v2694_v57, %v2692_v22 }
 0x6a8   :  { %v5991_v11 = vpop.permute.xlu1 %5990 }
 0x6a9   :  { %v5993_v8 = vunpack.i.h.bf16 %v5991_v11  ;;  %v5992_v1 = vunpack.i.l.bf16 %v5991_v11  ;;  %v7169_v4 = vpop.permute.xlu0 %5995  ;;  %v2419_v6 = vld [vmem:[#allocation5 + $0x118] sm:$0xff]  ;;  %v5494_v11 = vpack.c.bf16 %v2699_v47, %v2697_v30  ;;  %v2726_v47 = vld [vmem:[#allocation9 + $0x150] sm:$0xff] }
 0x6aa   :  { %v5998_v10 = vunpack.i.h.bf16 %v7169_v4  ;;  %v5997_v16 = vunpack.i.l.bf16 %v7169_v4  ;;  %v5474_v18 = vpack.c.bf16 %v2419_v6, %v2417_v54  ;;  %v2418_v25 = vld [vmem:[#allocation5 + $0x110] sm:$0xff]  ;;  %v2701_v54 = vld [vmem:[#allocation9 + $0x88] sm:$0xff]  ;;  %v2724_v30 = vld [vmem:[#allocation9 + $0x140] sm:$0xff] }
 0x6ab   :  { %v2624_v27 = vsel %vm126_vm3, %v5992_v1, %v5993_v8  ;;  %v5476_v26 = vpack.c.bf16 %v2418_v25, %v2416_v3  ;;  %v2703_v6 = vld [vmem:[#allocation9 + $0x98] sm:$0xff]  ;;  %v2705_v3 = vld [vmem:[#allocation9 + $0xa8] sm:$0xff] }
 0x6ac   :  { %v7186_v2 = vmax.f32 %v2582_v32, %v2624_v27  ;;  %v2623_v39 = vsel %vm126_vm3, %v5998_v10, %v5992_v1  ;;  %v2625_v33 = vsel %vm126_vm3, %v5993_v8, %v5997_v16  ;;  %5475 = vmatprep.subr.bf16.mxu1 %v5474_v18  ;;  %v2696_v8 = vld [vmem:[#allocation9 + $0x60] sm:$0xff]  ;;  %v2698_v1 = vld [vmem:[#allocation9 + $0x70] sm:$0xff]  ;;  %v5498_v37 = vpack.c.bf16 %v2703_v6, %v2701_v54  ;;  %v2707_v25 = vld [vmem:[#allocation9 + $0xb8] sm:$0xff] }
 0x6ad   :  { %v7194_v9 = vmax.f32 %v2583_v45, %v2625_v33  ;;  %5477 = vmatpush1.bf16.msra.mxu1 %v5476_v26  ;;  %v7198_v62 = vmax.f32 %v2581_v19, %v2623_v39  ;;  %v2421_v34 = vld [vmem:[#allocation5 + $0x128] sm:$0xff]  ;;  %v2585_v45 = vmax.f32 %v7179_v29, 0.0  ;;  %v2689_v19 = vld [vmem:[#allocation9 + $0x28] sm:$0xff]  ;;  %v5496_v7 = vpack.c.bf16 %v2698_v1, %v2696_v8  ;;  %v2700_v10 = vld [vmem:[#allocation9 + $0x80] sm:$0xff] }
 0x6ae   :  { %v5478_v13 = vpack.c.bf16 %v2423_v28, %v2421_v34  ;;  %v2420_v32 = vld [vmem:[#allocation5 + $0x120] sm:$0xff]  ;;  %v5486_v59 = vpack.c.bf16 %v2691_v58, %v2689_v19  ;;  %v2702_v18 = vld [vmem:[#allocation9 + $0x90] sm:$0xff]  ;;  %v5502_v26 = vpack.c.bf16 %v2707_v25, %v2705_v3  ;;  %v2704_v28 = vld [vmem:[#allocation9 + $0xa0] sm:$0xff]  ;;  %v5524_v8 = vpack.c.bf16 %v2726_v47, %v2724_v30 }
 0x6af   :  { %2650 = vrot.lane.b32.xlu0 %v7198_v62, %s7966_s4  ;;  %v5480_v51 = vpack.c.bf16 %v7005_v0, %v2420_v32  ;;  %v5999_v15 = vpack.i.bf16 %v7194_v9, %v7186_v2  ;;  %v106_v0 = vld [vmem:[%s7852_s7] sm:$0xff]  ;;  %v6004_v48 = vpack.i.bf16 %v2586_v41, %v2585_v45  ;;  %v5500_v27 = vpack.c.bf16 %v2702_v18, %v2700_v10  ;;  %v2710_v32 = vld [vmem:[#allocation9 + $0xd0] sm:$0xff]  ;;  %v2717_v58 = vld [vmem:[#allocation9 + $0x108] sm:$0xff] }
 0x6b0   :  { %5479 = vmatprep.subr.bf16.mxu1 %v5478_v13  ;;  %v2711_v39 = vld [vmem:[#allocation9 + $0xd8] sm:$0xff]  ;;  %v5504_v33 = vpack.c.bf16 %v2706_v60, %v2704_v28  ;;  %v2708_v13 = vld [vmem:[#allocation9 + $0xc0] sm:$0xff]  ;;  %v2714_v19 = vld [vmem:[#allocation9 + $0xf0] sm:$0xff] }
 0x6b1   :  { %5481 = vmatpush1.bf16.msra.mxu1 %v5480_v51  ;;  %6000 = vrot.lane.b32.xlu1 %v5999_v15, %s7966_s4  ;;  %v5506_v34 = vpack.c.bf16 %v2711_v39, %v2709_v52  ;;  %v5508_v38 = vpack.c.bf16 %v2710_v32, %v2708_v13  ;;  %v2712_v15 = vld [vmem:[#allocation9 + $0xe0] sm:$0xff]  ;;  %v2730_v6 = vld [vmem:[#allocation9 + $0x170] sm:$0xff] }
 0x6b2   :  { %5483 = vmatprep.subr.bf16.mxu1 %v5482_v61  ;;  %v2713_v61 = vld [vmem:[#allocation9 + $0xe8] sm:$0xff]  ;;  %v2728_v54 = vld [vmem:[#allocation9 + $0x160] sm:$0xff]  ;;  %v2734_v25 = vld [vmem:[#allocation9 + $0x190] sm:$0xff] }
 0x6b3   :  { %v5510_v51 = vpack.c.bf16 %v2715_v49, %v2713_v61  ;;  %v5528_v10 = vpack.c.bf16 %v2730_v6, %v2728_v54  ;;  %v2732_v3 = vld [vmem:[#allocation9 + $0x180] sm:$0xff]  ;;  %v2738_v39 = vld [vmem:[#allocation9 + $0x1b0] sm:$0xff] }
 0x6b4   :  { %2505 = vmatmul.mubr.f32.vlgmr.msra.gmra.mrb[8].mxu1 %v106_v0  ;;  %v5512_v0 = vpack.c.bf16 %v2714_v19, %v2712_v15  ;;  %v5532_v28 = vpack.c.bf16 %v2734_v25, %v2732_v3  ;;  %v2736_v52 = vld [vmem:[#allocation9 + $0x1a0] sm:$0xff]  ;;  %v2742_v49 = vld [vmem:[#allocation9 + $0x1d0] sm:$0xff] }
 0x6b5   :  { %6005 = vrot.lane.b32.xlu1 %v6004_v48, %s7956_s16  ;;  %5485 = vmatpush1.bf16.msra.mxu1 %v5484_v44  ;;  %v5514_v44 = vpack.c.bf16 %v2719_v50, %v2717_v58  ;;  %v2723_v48 = vld [vmem:[#allocation9 + $0x138] sm:$0xff]  ;;  %v5536_v13 = vpack.c.bf16 %v2738_v39, %v2736_v52  ;;  %v2740_v61 = vld [vmem:[#allocation9 + $0x1c0] sm:$0xff]  ;;  %v2746_v50 = vld [vmem:[#allocation9 + $0x1f0] sm:$0xff] }
 0x6b6   :  { %5487 = vmatprep.subr.bf16.mxu1 %v5486_v59  ;;  %4919 = vmatprep.mubr.msk.f32.mxu1 %vm102_vm1, %v109_v5  ;;  %v2716_v59 = vld [vmem:[#allocation9 + $0x100] sm:$0xff]  ;;  %v5518_v24 = vpack.c.bf16 %v2723_v48, %v2721_v31  ;;  %v5540_v15 = vpack.c.bf16 %v2742_v49, %v2740_v61  ;;  %v2762_v52 = vld [vmem:[#allocation9 + $0x270] sm:$0xff] }
 0x6b7   :  { %v5516_v56 = vpack.c.bf16 %v2718_v43, %v2716_v59  ;;  %v2720_v5 = vld [vmem:[#allocation9 + $0x120] sm:$0xff]  ;;  %v2766_v49 = vld [vmem:[#allocation9 + $0x290] sm:$0xff] }
 0x6b8   :  { %2511 = vmatmul.mubr.f32.gmra.mrb[10].mxu1 %v108_v12  ;;  %v2725_v12 = vld [vmem:[#allocation9 + $0x148] sm:$0xff]  ;;  %v2744_v58 = vld [vmem:[#allocation9 + $0x1e0] sm:$0xff] }
 0x6b9   :  { %2621 = vrot.lane.b32.xlu1 %v2587_v23, %s7956_s16  ;;  %5489 = vmatpush1.bf16.msra.mxu1 %v5488_v46  ;;  %v2722_v46 = vld [vmem:[#allocation9 + $0x130] sm:$0xff]  ;;  %v5544_v59 = vpack.c.bf16 %v2746_v50, %v2744_v58  ;;  %v2752_v6 = vld [vmem:[#allocation9 + $0x220] sm:$0xff]  ;;  %v2773_v58 = vld [vmem:[#allocation9 + $0x2c8] sm:$0xff] }
 0x6ba   :  { %5491 = vmatprep.subr.bf16.mxu1 %v5490_v53  ;;  %v2727_v53 = vld [vmem:[#allocation9 + $0x158] sm:$0xff]  ;;  %v5520_v22 = vpack.c.bf16 %v2722_v46, %v2720_v5  ;;  %v2750_v5 = vld [vmem:[#allocation9 + $0x210] sm:$0xff]  ;;  %v2764_v61 = vld [vmem:[#allocation9 + $0x280] sm:$0xff] }
 0x6bb   :  { %v5522_v57 = vpack.c.bf16 %v2727_v53, %v2725_v12  ;;  %v2753_v12 = vld [vmem:[#allocation9 + $0x228] sm:$0xff]  ;;  %v2755_v53 = vld [vmem:[#allocation9 + $0x238] sm:$0xff] }
 0x6bc   :  { %v5550_v54 = vpack.c.bf16 %v2755_v53, %v2753_v12  ;;  %v2775_v50 = vld [vmem:[#allocation9 + $0x2d8] sm:$0xff]  ;;  %v2776_v12 = vld [vmem:[#allocation9 + $0x2e0] sm:$0xff]  ;;  %v2778_v53 = vld [vmem:[#allocation9 + $0x2f0] sm:$0xff] }
 0x6bd   :  { %5493 = vmatpush1.bf16.msra.mxu1 %v5492_v17  ;;  %v2729_v17 = vld [vmem:[#allocation9 + $0x168] sm:$0xff] }
 0x6be   :  { %5495 = vmatprep.subr.bf16.mxu1 %v5494_v11  ;;  %v2731_v11 = vld [vmem:[#allocation9 + $0x178] sm:$0xff] }
 0x6bf   :  { %v5526_v1 = vpack.c.bf16 %v2731_v11, %v2729_v17 }
 0x6c1   :  { %5497 = vmatpush1.bf16.msra.mxu1 %v5496_v7  ;;  %v2733_v7 = vld [vmem:[#allocation9 + $0x188] sm:$0xff] }
 0x6c2   :  { %5499 = vmatprep.subr.bf16.mxu1 %v5498_v37  ;;  %v2735_v37 = vld [vmem:[#allocation9 + $0x198] sm:$0xff] }
 0x6c3   :  { %v5530_v18 = vpack.c.bf16 %v2735_v37, %v2733_v7  ;;  %v2754_v7 = vld [vmem:[#allocation9 + $0x230] sm:$0xff]  ;;  %v2757_v37 = vld [vmem:[#allocation9 + $0x248] sm:$0xff] }
 0x6c5   :  { %5501 = vmatpush1.bf16.msra.mxu1 %v5500_v27  ;;  %v2737_v27 = vld [vmem:[#allocation9 + $0x1a8] sm:$0xff] }
 0x6c6   :  { %5503 = vmatprep.subr.bf16.mxu1 %v5502_v26  ;;  %v2739_v26 = vld [vmem:[#allocation9 + $0x1b8] sm:$0xff] }
 0x6c7   :  { %v5534_v60 = vpack.c.bf16 %v2739_v26, %v2737_v27  ;;  %v5552_v27 = vpack.c.bf16 %v2754_v7, %v2752_v6  ;;  %v2784_v7 = vld [vmem:[#allocation9 + $0x320] sm:$0xff] }
 0x6c9   :  { %5505 = vmatpush1.bf16.msra.mxu1 %v5504_v33  ;;  %v2741_v33 = vld [vmem:[#allocation9 + $0x1c8] sm:$0xff] }
 0x6ca   :  { %5507 = vmatprep.subr.bf16.mxu1 %v5506_v34  ;;  %v2743_v34 = vld [vmem:[#allocation9 + $0x1d8] sm:$0xff] }
 0x6cb   :  { %v5538_v32 = vpack.c.bf16 %v2743_v34, %v2741_v33  ;;  %v2765_v33 = vld [vmem:[#allocation9 + $0x288] sm:$0xff]  ;;  %v2767_v34 = vld [vmem:[#allocation9 + $0x298] sm:$0xff] }
 0x6cd   :  { %5509 = vmatpush1.bf16.msra.mxu1 %v5508_v38  ;;  %v2745_v38 = vld [vmem:[#allocation9 + $0x1e8] sm:$0xff] }
 0x6ce   :  { %5511 = vmatprep.subr.bf16.mxu1 %v5510_v51  ;;  %v2747_v51 = vld [vmem:[#allocation9 + $0x1f8] sm:$0xff] }
 0x6cf   :  { %v5542_v19 = vpack.c.bf16 %v2747_v51, %v2745_v38  ;;  %v2769_v38 = vld [vmem:[#allocation9 + $0x2a8] sm:$0xff]  ;;  %v2771_v51 = vld [vmem:[#allocation9 + $0x2b8] sm:$0xff] }
 0x6d1   :  { %5513 = vmatpush1.bf16.msra.mxu1 %v5512_v0  ;;  %v2749_v0 = vld [vmem:[#allocation9 + $0x208] sm:$0xff] }
 0x6d2   :  { %5515 = vmatprep.subr.bf16.mxu1 %v5514_v44  ;;  %v2751_v44 = vld [vmem:[#allocation9 + $0x218] sm:$0xff] }
 0x6d3   :  { %v5546_v43 = vpack.c.bf16 %v2751_v44, %v2749_v0  ;;  %v5570_v44 = vpack.c.bf16 %v2775_v50, %v2773_v58  ;;  %v2804_v58 = vld [vmem:[#allocation9 + $0x3c0] sm:$0xff]  ;;  %v2806_v50 = vld [vmem:[#allocation9 + $0x3d0] sm:$0xff] }
 0x6d5   :  { %5517 = vmatpush1.bf16.msra.mxu1 %v5516_v56 }
 0x6d6   :  { %5519 = vmatprep.subr.bf16.mxu1 %v5518_v24  ;;  %v2748_v24 = vld [vmem:[#allocation9 + $0x200] sm:$0xff] }
 0x6d7   :  { %v5548_v11 = vpack.c.bf16 %v2750_v5, %v2748_v24  ;;  %v2779_v24 = vld [vmem:[#allocation9 + $0x2f8] sm:$0xff] }
 0x6d9   :  { %5521 = vmatpush1.bf16.msra.mxu1 %v5520_v22 }
 0x6da   :  { %5523 = vmatprep.subr.bf16.mxu1 %v5522_v57 }
 0x6dd   :  { %5525 = vmatpush1.bf16.msra.mxu1 %v5524_v8 }
 0x6de   :  { %5527 = vmatprep.subr.bf16.mxu1 %v5526_v1 }
 0x6e1   :  { %5529 = vmatpush1.bf16.msra.mxu1 %v5528_v10  ;;  %v2759_v10 = vld [vmem:[#allocation9 + $0x258] sm:$0xff] }
 0x6e2   :  { %5531 = vmatprep.subr.bf16.mxu1 %v5530_v18  ;;  %v5554_v4 = vpack.c.bf16 %v2759_v10, %v2757_v37  ;;  %v2786_v37 = vld [vmem:[#allocation9 + $0x330] sm:$0xff]  ;;  %v2789_v10 = vld [vmem:[#allocation9 + $0x348] sm:$0xff] }
 0x6e5   :  { %5533 = vmatpush1.bf16.msra.mxu1 %v5532_v28  ;;  %v2758_v28 = vld [vmem:[#allocation9 + $0x250] sm:$0xff] }
 0x6e6   :  { %5535 = vmatprep.subr.bf16.mxu1 %v5534_v60  ;;  %v2763_v60 = vld [vmem:[#allocation9 + $0x278] sm:$0xff] }
 0x6e9   :  { %5537 = vmatpush1.bf16.msra.mxu1 %v5536_v13 }
 0x6ea   :  { %5539 = vmatprep.subr.bf16.mxu1 %v5538_v32  ;;  %v5562_v32 = vpack.c.bf16 %v2767_v34, %v2765_v33  ;;  %v2796_v33 = vld [vmem:[#allocation9 + $0x380] sm:$0xff]  ;;  %v2798_v34 = vld [vmem:[#allocation9 + $0x390] sm:$0xff] }
 0x6ed   :  { %5541 = vmatpush1.bf16.msra.mxu1 %v5540_v15  ;;  %v5564_v15 = vpack.c.bf16 %v2766_v49, %v2764_v61  ;;  %v5596_v61 = vpack.c.bf16 %v2798_v34, %v2796_v33  ;;  %v2824_v34 = vld [vmem:[#allocation9 + $0x460] sm:$0xff] }
 0x6ee   :  { %5543 = vmatprep.subr.bf16.mxu1 %v5542_v19  ;;  %v5566_v19 = vpack.c.bf16 %v2771_v51, %v2769_v38  ;;  %v2800_v38 = vld [vmem:[#allocation9 + $0x3a0] sm:$0xff]  ;;  %v2802_v51 = vld [vmem:[#allocation9 + $0x3b0] sm:$0xff] }
 0x6f1   :  { %5545 = vmatpush1.bf16.msra.mxu1 %v5544_v59  ;;  %v2772_v59 = vld [vmem:[#allocation9 + $0x2c0] sm:$0xff] }
 0x6f2   :  { %5547 = vmatprep.subr.bf16.mxu1 %v5546_v43  ;;  %v2774_v43 = vld [vmem:[#allocation9 + $0x2d0] sm:$0xff] }
 0x6f3   :  { %v5572_v5 = vpack.c.bf16 %v2774_v43, %v2772_v59  ;;  %v5604_v59 = vpack.c.bf16 %v2806_v50, %v2804_v58  ;;  %v2832_v58 = vld [vmem:[#allocation9 + $0x4a0] sm:$0xff]  ;;  %v2834_v50 = vld [vmem:[#allocation9 + $0x4b0] sm:$0xff] }
 0x721   :  { %v2651_v46 = vpop.permute.xlu0 %2650 }
 0x723   :  { %v7232_v31 = vpop.permute.xlu1 %6000 }
 0x724   :  { %v6003_v48 = vunpack.i.h.bf16 %v7232_v31  ;;  %v6002_v56 = vunpack.i.l.bf16 %v7232_v31 }
 0x726   :  { %v2664_v22 = vsel %vm170_vm7, %v2651_v46, %v6002_v56  ;;  %v2665_v57 = vsel %vm170_vm7, %v6002_v56, %v6003_v48  ;;  %v2777_v56 = vld [vmem:[#allocation9 + $0x2e8] sm:$0xff] }
 0x727   :  { %v2677_v30 = vmax.f32 %v7198_v62, %v2664_v22  ;;  %v6006_v47 = vpop.permute.xlu1 %6005  ;;  %v2678_v17 = vmax.f32 %v7186_v2, %v2665_v57  ;;  %v5574_v46 = vpack.c.bf16 %v2779_v24, %v2777_v56  ;;  %v2781_v22 = vld [vmem:[#allocation9 + $0x308] sm:$0xff]  ;;  %v2783_v57 = vld [vmem:[#allocation9 + $0x318] sm:$0xff]  ;;  %v2808_v56 = vld [vmem:[#allocation9 + $0x3e0] sm:$0xff] }
 0x728   :  { %v6008_v8 = vunpack.i.h.bf16 %v6006_v47  ;;  %v6007_v1 = vunpack.i.l.bf16 %v6006_v47  ;;  %v5578_v47 = vpack.c.bf16 %v2783_v57, %v2781_v22  ;;  %v2810_v24 = vld [vmem:[#allocation9 + $0x3f0] sm:$0xff] }
 0x729   :  { %2973 = vmatprep.mubr.f32.mxu1 %v2678_v17  ;;  %v2780_v17 = vld [vmem:[#allocation9 + $0x300] sm:$0xff] }
 0x72a   :  { %v2626_v18 = vsel %vm126_vm3, %v5997_v16, %v6007_v1  ;;  %v2627_v3 = vsel %vm126_vm3, %v6007_v1, %v6008_v8  ;;  %2974 = vmatmul.mubr.f32.vlgmr.msra.gmra.mrb[12].mxu1 %v2677_v30  ;;  %v2756_v16 = vld [vmem:[#allocation9 + $0x240] sm:$0xff]  ;;  %v5576_v30 = vpack.c.bf16 %v2778_v53, %v2776_v12  ;;  %v2787_v1 = vld [vmem:[#allocation9 + $0x338] sm:$0xff]  ;;  %v5608_v12 = vpack.c.bf16 %v2810_v24, %v2808_v56  ;;  %v2838_v24 = vld [vmem:[#allocation9 + $0x4d0] sm:$0xff] }
 0x72b   :  { %v7248_v62 = vmax.f32 %v2584_v20, %v2626_v18  ;;  %v7252_v2 = vmax.f32 %v2585_v45, %v2627_v3  ;;  %v2622_v25 = vpop.permute.xlu1 %2621  ;;  %5549 = vmatpush1.bf16.msra.mxu1 %v5548_v11  ;;  %v2761_v20 = vld [vmem:[#allocation9 + $0x268] sm:$0xff]  ;;  %v5556_v45 = vpack.c.bf16 %v2758_v28, %v2756_v16  ;;  %v2782_v11 = vld [vmem:[#allocation9 + $0x310] sm:$0xff]  ;;  %v2791_v18 = vld [vmem:[#allocation9 + $0x358] sm:$0xff]  ;;  %v5584_v3 = vpack.c.bf16 %v2786_v37, %v2784_v7 }
 0x72c   :  { %v7256_v26 = vmax.f32 %v2587_v23, %v2622_v25  ;;  %5551 = vmatprep.subr.bf16.mxu1 %v5550_v54  ;;  %v2628_v29 = vsel %vm126_vm3, %v6008_v8, %v2622_v25  ;;  %v5558_v55 = vpack.c.bf16 %v2763_v60, %v2761_v20  ;;  %v2760_v23 = vld [vmem:[#allocation9 + $0x260] sm:$0xff]  ;;  %v2785_v8 = vld [vmem:[#allocation9 + $0x328] sm:$0xff]  ;;  %v5580_v54 = vpack.c.bf16 %v2782_v11, %v2780_v17  ;;  %v2795_v28 = vld [vmem:[#allocation9 + $0x378] sm:$0xff] }
 0x72d   :  { %v6009_v35 = vpack.i.bf16 %v7252_v2, %v7248_v62  ;;  %v7266_v39 = vmax.f32 %v2586_v41, %v2628_v29  ;;  %v5560_v13 = vpack.c.bf16 %v2762_v52, %v2760_v23  ;;  %v2770_v41 = vld [vmem:[#allocation9 + $0x2b0] sm:$0xff]  ;;  %v5582_v6 = vpack.c.bf16 %v2787_v1, %v2785_v8  ;;  %v2793_v16 = vld [vmem:[#allocation9 + $0x368] sm:$0xff]  ;;  %v2792_v60 = vld [vmem:[#allocation9 + $0x360] sm:$0xff] }
 0x72e   :  { %2662 = vrot.lane.b32.xlu1 %v7256_v26, %s7966_s4  ;;  %v5568_v0 = vpack.c.bf16 %v2770_v41, %v2768_v14  ;;  %v5586_v25 = vpack.c.bf16 %v2791_v18, %v2789_v10  ;;  %v5590_v20 = vpack.c.bf16 %v2795_v28, %v2793_v16  ;;  %v2794_v29 = vld [vmem:[#allocation9 + $0x370] sm:$0xff]  ;;  %v5600_v14 = vpack.c.bf16 %v2802_v51, %v2800_v38  ;;  %v2812_v1 = vld [vmem:[#allocation9 + $0x400] sm:$0xff]  ;;  %v2819_v7 = vld [vmem:[#allocation9 + $0x438] sm:$0xff] }
 0x72f   :  { %6010 = vrot.lane.b32.xlu0 %v6009_v35, %s7966_s4  ;;  %5553 = vmatpush1.bf16.msra.mxu1 %v5552_v27  ;;  %v2788_v27 = vld [vmem:[#allocation9 + $0x340] sm:$0xff]  ;;  %v5592_v23 = vpack.c.bf16 %v2794_v29, %v2792_v60  ;;  %v2823_v60 = vld [vmem:[#allocation9 + $0x458] sm:$0xff]  ;;  %v2830_v51 = vld [vmem:[#allocation9 + $0x490] sm:$0xff] }
 0x730   :  { %5555 = vmatprep.subr.bf16.mxu1 %v5554_v4  ;;  %v2790_v4 = vld [vmem:[#allocation9 + $0x350] sm:$0xff]  ;;  %v2816_v28 = vld [vmem:[#allocation9 + $0x420] sm:$0xff] }
 0x731   :  { %v5588_v35 = vpack.c.bf16 %v2790_v4, %v2788_v27  ;;  %v2828_v38 = vld [vmem:[#allocation9 + $0x480] sm:$0xff] }
 0x732   :  { %v2836_v56 = vld [vmem:[#allocation9 + $0x4c0] sm:$0xff] }
 0x733   :  { %2660 = vrot.lane.b32.xlu0 %v7266_v39, %s7966_s4  ;;  %5557 = vmatpush1.bf16.msra.mxu1 %v5556_v45  ;;  %v2797_v45 = vld [vmem:[#allocation9 + $0x388] sm:$0xff] }
 0x734   :  { %5559 = vmatprep.subr.bf16.mxu1 %v5558_v55  ;;  %v2799_v55 = vld [vmem:[#allocation9 + $0x398] sm:$0xff] }
 0x735   :  { %v5594_v52 = vpack.c.bf16 %v2799_v55, %v2797_v45  ;;  %v2822_v45 = vld [vmem:[#allocation9 + $0x450] sm:$0xff]  ;;  %v2825_v55 = vld [vmem:[#allocation9 + $0x468] sm:$0xff] }
 0x737   :  { %5561 = vmatpush1.bf16.msra.mxu1 %v5560_v13  ;;  %v2801_v13 = vld [vmem:[#allocation9 + $0x3a8] sm:$0xff] }
 0x738   :  { %5563 = vmatprep.subr.bf16.mxu1 %v5562_v32  ;;  %v2803_v32 = vld [vmem:[#allocation9 + $0x3b8] sm:$0xff] }
 0x739   :  { %v5598_v49 = vpack.c.bf16 %v2803_v32, %v2801_v13  ;;  %v2826_v13 = vld [vmem:[#allocation9 + $0x470] sm:$0xff]  ;;  %v2829_v32 = vld [vmem:[#allocation9 + $0x488] sm:$0xff] }
 0x73b   :  { %5565 = vmatpush1.bf16.msra.mxu1 %v5564_v15  ;;  %v2805_v15 = vld [vmem:[#allocation9 + $0x3c8] sm:$0xff] }
 0x73c   :  { %5567 = vmatprep.subr.bf16.mxu1 %v5566_v19  ;;  %v2807_v19 = vld [vmem:[#allocation9 + $0x3d8] sm:$0xff] }
 0x73d   :  { %v5602_v41 = vpack.c.bf16 %v2807_v19, %v2805_v15  ;;  %v2833_v15 = vld [vmem:[#allocation9 + $0x4a8] sm:$0xff]  ;;  %v2835_v19 = vld [vmem:[#allocation9 + $0x4b8] sm:$0xff] }
 0x73f   :  { %5569 = vmatpush1.bf16.msra.mxu1 %v5568_v0  ;;  %v2809_v0 = vld [vmem:[#allocation9 + $0x3e8] sm:$0xff] }
 0x740   :  { %5571 = vmatprep.subr.bf16.mxu1 %v5570_v44  ;;  %v2811_v44 = vld [vmem:[#allocation9 + $0x3f8] sm:$0xff] }
 0x741   :  { %v5606_v43 = vpack.c.bf16 %v2811_v44, %v2809_v0  ;;  %v2837_v0 = vld [vmem:[#allocation9 + $0x4c8] sm:$0xff]  ;;  %v2839_v44 = vld [vmem:[#allocation9 + $0x4d8] sm:$0xff] }
 0x743   :  { %5573 = vmatpush1.bf16.msra.mxu1 %v5572_v5  ;;  %v2813_v5 = vld [vmem:[#allocation9 + $0x408] sm:$0xff] }
 0x744   :  { %5575 = vmatprep.subr.bf16.mxu1 %v5574_v46  ;;  %v2815_v46 = vld [vmem:[#allocation9 + $0x418] sm:$0xff] }
 0x745   :  { %v5610_v53 = vpack.c.bf16 %v2815_v46, %v2813_v5  ;;  %v2841_v5 = vld [vmem:[#allocation9 + $0x4e8] sm:$0xff]  ;;  %v2843_v46 = vld [vmem:[#allocation9 + $0x4f8] sm:$0xff] }
 0x747   :  { %5577 = vmatpush1.bf16.msra.mxu1 %v5576_v30 }
 0x748   :  { %5579 = vmatprep.subr.bf16.mxu1 %v5578_v47 }
 0x74b   :  { %5581 = vmatpush1.bf16.msra.mxu1 %v5580_v54  ;;  %v2814_v54 = vld [vmem:[#allocation9 + $0x410] sm:$0xff] }
 0x74c   :  { %5583 = vmatprep.subr.bf16.mxu1 %v5582_v6  ;;  %v2817_v6 = vld [vmem:[#allocation9 + $0x428] sm:$0xff]  ;;  %v5612_v4 = vpack.c.bf16 %v2814_v54, %v2812_v1  ;;  %v2842_v1 = vld [vmem:[#allocation9 + $0x4f0] sm:$0xff] }
 0x74d   :  { %v5614_v31 = vpack.c.bf16 %v2819_v7, %v2817_v6  ;;  %v2845_v54 = vld [vmem:[#allocation9 + $0x508] sm:$0xff]  ;;  %v2847_v6 = vld [vmem:[#allocation9 + $0x518] sm:$0xff] }
 0x74f   :  { %5585 = vmatpush1.bf16.msra.mxu1 %v5584_v3 }
 0x750   :  { %5587 = vmatprep.subr.bf16.mxu1 %v5586_v25 }
 0x753   :  { %5589 = vmatpush1.bf16.msra.mxu1 %v5588_v35 }
 0x754   :  { %5591 = vmatprep.subr.bf16.mxu1 %v5590_v20  ;;  %v2821_v20 = vld [vmem:[#allocation9 + $0x448] sm:$0xff] }
 0x757   :  { %5593 = vmatpush1.bf16.msra.mxu1 %v5592_v23  ;;  %v2827_v23 = vld [vmem:[#allocation9 + $0x478] sm:$0xff] }
 0x758   :  { %5595 = vmatprep.subr.bf16.mxu1 %v5594_v52  ;;  %v5622_v33 = vpack.c.bf16 %v2827_v23, %v2825_v55  ;;  %v2859_v55 = vld [vmem:[#allocation9 + $0x578] sm:$0xff] }
 0x75b   :  { %5597 = vmatpush1.bf16.msra.mxu1 %v5596_v61  ;;  %v5624_v61 = vpack.c.bf16 %v2826_v13, %v2824_v34  ;;  %v2858_v34 = vld [vmem:[#allocation9 + $0x570] sm:$0xff]  ;;  %v2861_v13 = vld [vmem:[#allocation9 + $0x588] sm:$0xff] }
 0x75c   :  { %5599 = vmatprep.subr.bf16.mxu1 %v5598_v49 }
 0x75f   :  { %5601 = vmatpush1.bf16.msra.mxu1 %v5600_v14  ;;  %v5628_v14 = vpack.c.bf16 %v2830_v51, %v2828_v38  ;;  %v2862_v38 = vld [vmem:[#allocation9 + $0x590] sm:$0xff]  ;;  %v2865_v51 = vld [vmem:[#allocation9 + $0x5a8] sm:$0xff] }
 0x760   :  { %5603 = vmatprep.subr.bf16.mxu1 %v5602_v41  ;;  %v5630_v41 = vpack.c.bf16 %v2835_v19, %v2833_v15  ;;  %v2867_v15 = vld [vmem:[#allocation9 + $0x5b8] sm:$0xff] }
 0x763   :  { %5605 = vmatpush1.bf16.msra.mxu1 %v5604_v59  ;;  %v5632_v59 = vpack.c.bf16 %v2834_v50, %v2832_v58  ;;  %v2866_v58 = vld [vmem:[#allocation9 + $0x5b0] sm:$0xff]  ;;  %v2869_v50 = vld [vmem:[#allocation9 + $0x5c8] sm:$0xff] }
 0x764   :  { %5607 = vmatprep.subr.bf16.mxu1 %v5606_v43  ;;  %v5634_v43 = vpack.c.bf16 %v2839_v44, %v2837_v0  ;;  %v2871_v0 = vld [vmem:[#allocation9 + $0x5d8] sm:$0xff] }
 0x767   :  { %5609 = vmatpush1.bf16.msra.mxu1 %v5608_v12  ;;  %v5636_v12 = vpack.c.bf16 %v2838_v24, %v2836_v56  ;;  %v2870_v56 = vld [vmem:[#allocation9 + $0x5d0] sm:$0xff]  ;;  %v2873_v24 = vld [vmem:[#allocation9 + $0x5e8] sm:$0xff] }
 0x768   :  { %5611 = vmatprep.subr.bf16.mxu1 %v5610_v53  ;;  %v5638_v53 = vpack.c.bf16 %v2843_v46, %v2841_v5  ;;  %v2875_v5 = vld [vmem:[#allocation9 + $0x5f8] sm:$0xff] }
 0x787   :  { %v7270_v22 = vpop.f32.mrb[8].mxu1 }
 0x788   :  { %v7272_v57 = vpop.f32.mrb[9].mxu1 }
 0x78b   :  { %v7274_v30 = vpop.f32.mrb[10].mxu1 }
 0x78c   :  { %v7276_v47 = vpop.f32.mrb[11].mxu1 }
 0x7a0   :  { %v7288_v18 = vpop.permute.xlu1 %2662 }
 0x7a1   :  { %v7278_v17 = vpop.permute.xlu0 %6010 }
 0x7a2   :  { %v6013_v11 = vunpack.i.h.bf16 %v7278_v17  ;;  %v6012_v8 = vunpack.i.l.bf16 %v7278_v17 }
 0x7a4   :  { %v2666_v37 = vsel %vm170_vm7, %v6003_v48, %v6012_v8  ;;  %v2667_v10 = vsel %vm170_vm7, %v6012_v8, %v6013_v11  ;;  %v2818_v48 = vld [vmem:[#allocation9 + $0x430] sm:$0xff]  ;;  %v2840_v8 = vld [vmem:[#allocation9 + $0x4e0] sm:$0xff] }
 0x7a5   :  { %v7290_v3 = vpop.permute.xlu0 %2660  ;;  %v2680_v25 = vmax.f32 %v7248_v62, %v2667_v10  ;;  %v2679_v27 = vmax.f32 %v7194_v9, %v2666_v37  ;;  %v5616_v29 = vpack.c.bf16 %v2818_v48, %v2816_v28  ;;  %v5618_v62 = vpack.c.bf16 %v2823_v60, %v2821_v20  ;;  %v2820_v9 = vld [vmem:[#allocation9 + $0x440] sm:$0xff]  ;;  %v2850_v48 = vld [vmem:[#allocation9 + $0x530] sm:$0xff]  ;;  %v2855_v20 = vld [vmem:[#allocation9 + $0x558] sm:$0xff] }
 0x7a6   :  { %v2669_v16 = vsel %vm170_vm7, %v7290_v3, %v7288_v18  ;;  %v5620_v52 = vpack.c.bf16 %v2822_v45, %v2820_v9  ;;  %v5640_v7 = vpack.c.bf16 %v2842_v1, %v2840_v8  ;;  %v5642_v37 = vpack.c.bf16 %v2847_v6, %v2845_v54  ;;  %v2844_v10 = vld [vmem:[#allocation9 + $0x500] sm:$0xff]  ;;  %v2854_v9 = vld [vmem:[#allocation9 + $0x550] sm:$0xff]  ;;  %v2857_v45 = vld [vmem:[#allocation9 + $0x568] sm:$0xff] }
 0x7a7   :  { %3044 = vmatprep.mubr.f32.mxu1 %v2680_v25  ;;  %v2682_v35 = vmax.f32 %v7266_v39, %v2669_v16  ;;  %v2831_v39 = vld [vmem:[#allocation9 + $0x498] sm:$0xff]  ;;  %v2846_v25 = vld [vmem:[#allocation9 + $0x510] sm:$0xff]  ;;  %v2848_v28 = vld [vmem:[#allocation9 + $0x520] sm:$0xff] }
 0x7a8   :  { %3045 = vmatmul.mubr.f32.vlgmr.msra.gmra.mrb[12].mxu1 %v2679_v27  ;;  %v5626_v49 = vpack.c.bf16 %v2831_v39, %v2829_v32  ;;  %v2849_v27 = vld [vmem:[#allocation9 + $0x528] sm:$0xff]  ;;  %v5644_v16 = vpack.c.bf16 %v2846_v25, %v2844_v10  ;;  %v5648_v60 = vpack.c.bf16 %v2850_v48, %v2848_v28  ;;  %v2863_v32 = vld [vmem:[#allocation9 + $0x598] sm:$0xff]  ;;  %v2874_v8 = vld [vmem:[#allocation9 + $0x5f0] sm:$0xff]  ;;  %v2668_v25 = vsel %vm170_vm7, %v6013_v11, %v7290_v3 }
 0x7a9   :  { %5613 = vmatpush1.bf16.msra.mxu1 %v5612_v4  ;;  %3115 = vmatprep.mubr.f32.mxu1 %v2682_v35  ;;  %v2851_v4 = vld [vmem:[#allocation9 + $0x538] sm:$0xff]  ;;  %v2853_v35 = vld [vmem:[#allocation9 + $0x548] sm:$0xff]  ;;  %v2878_v10 = vld [vmem:[#allocation9 + $0x610] sm:$0xff] }
 0x7aa   :  { %5615 = vmatprep.subr.bf16.mxu1 %v5614_v31  ;;  %v5646_v31 = vpack.c.bf16 %v2851_v4, %v2849_v27  ;;  %v2877_v1 = vld [vmem:[#allocation9 + $0x608] sm:$0xff]  ;;  %v2879_v54 = vld [vmem:[#allocation9 + $0x618] sm:$0xff]  ;;  %v2880_v48 = vld [vmem:[#allocation9 + $0x620] sm:$0xff] }
 0x7ab   :  { %v2881_v27 = vld [vmem:[#allocation9 + $0x628] sm:$0xff]  ;;  %v2883_v4 = vld [vmem:[#allocation9 + $0x638] sm:$0xff]  ;;  %v2884_v11 = vld [vmem:[#allocation9 + $0x640] sm:$0xff] }
 0x7ac   :  { %v5678_v28 = vpack.c.bf16 %v2883_v4, %v2881_v27  ;;  %v2886_v3 = vld [vmem:[#allocation9 + $0x650] sm:$0xff] }
 0x7ad   :  { %5617 = vmatpush1.bf16.msra.mxu1 %v5616_v29  ;;  %v5650_v29 = vpack.c.bf16 %v2855_v20, %v2853_v35  ;;  %v2882_v35 = vld [vmem:[#allocation9 + $0x630] sm:$0xff]  ;;  %v2885_v20 = vld [vmem:[#allocation9 + $0x648] sm:$0xff] }
 0x7ae   :  { %5619 = vmatprep.subr.bf16.mxu1 %v5618_v62  ;;  %v2852_v62 = vld [vmem:[#allocation9 + $0x540] sm:$0xff] }
 0x7af   :  { %v5652_v23 = vpack.c.bf16 %v2854_v9, %v2852_v62  ;;  %v7303_v62 = vld [vmem:[#allocation5 + $0x130] sm:$0xff]  ;;  %v2889_v9 = vld [vmem:[#allocation9 + $0x668] sm:$0xff] }
 0x7b1   :  { %5621 = vmatpush1.bf16.msra.mxu1 %v5620_v52  ;;  %v5654_v52 = vpack.c.bf16 %v2859_v55, %v2857_v45  ;;  %v2891_v45 = vld [vmem:[#allocation9 + $0x678] sm:$0xff] }
 0x7b2   :  { %5623 = vmatprep.subr.bf16.mxu1 %v5622_v33  ;;  %v2856_v33 = vld [vmem:[#allocation9 + $0x560] sm:$0xff]  ;;  %v5686_v55 = vpack.c.bf16 %v2891_v45, %v2889_v9 }
 0x7b3   :  { %v5656_v39 = vpack.c.bf16 %v2858_v34, %v2856_v33  ;;  %v2893_v33 = vld [vmem:[#allocation9 + $0x688] sm:$0xff]  ;;  %v2895_v34 = vld [vmem:[#allocation9 + $0x698] sm:$0xff] }
 0x7b5   :  { %5625 = vmatpush1.bf16.msra.mxu1 %v5624_v61  ;;  %v5658_v61 = vpack.c.bf16 %v2863_v32, %v2861_v13  ;;  %v5690_v32 = vpack.c.bf16 %v2895_v34, %v2893_v33 }
 0x7b6   :  { %5627 = vmatprep.subr.bf16.mxu1 %v5626_v49  ;;  %v2860_v49 = vld [vmem:[#allocation9 + $0x580] sm:$0xff] }
 0x7b7   :  { %v5660_v19 = vpack.c.bf16 %v2862_v38, %v2860_v49  ;;  %v2897_v49 = vld [vmem:[#allocation9 + $0x6a8] sm:$0xff]  ;;  %v2899_v38 = vld [vmem:[#allocation9 + $0x6b8] sm:$0x7f] }
 0x7b9   :  { %5629 = vmatpush1.bf16.msra.mxu1 %v5628_v14  ;;  %v5662_v14 = vpack.c.bf16 %v2867_v15, %v2865_v51  ;;  %v5694_v15 = vpack.c.bf16 %v2899_v38, %v2897_v49 }
 0x7ba   :  { %5631 = vmatprep.subr.bf16.mxu1 %v5630_v41  ;;  %v2864_v41 = vld [vmem:[#allocation9 + $0x5a0] sm:$0xff] }
 0x7bb   :  { %v5664_v44 = vpack.c.bf16 %v2866_v58, %v2864_v41  ;;  %v2683_v58 = vmax.f32 %v7256_v26, %v7288_v18 }
 0x7bd   :  { %5633 = vmatpush1.bf16.msra.mxu1 %v5632_v59  ;;  %v5666_v59 = vpack.c.bf16 %v2871_v0, %v2869_v50 }
 0x7be   :  { %5635 = vmatprep.subr.bf16.mxu1 %v5634_v43  ;;  %v2868_v43 = vld [vmem:[#allocation9 + $0x5c0] sm:$0xff] }
 0x7bf   :  { %v5668_v46 = vpack.c.bf16 %v2870_v56, %v2868_v43 }
 0x7c1   :  { %5637 = vmatpush1.bf16.msra.mxu1 %v5636_v12  ;;  %v5670_v12 = vpack.c.bf16 %v2875_v5, %v2873_v24 }
 0x7c2   :  { %5639 = vmatprep.subr.bf16.mxu1 %v5638_v53  ;;  %v2872_v53 = vld [vmem:[#allocation9 + $0x5e0] sm:$0xff] }
 0x7c3   :  { %v5672_v6 = vpack.c.bf16 %v2874_v8, %v2872_v53 }
 0x7c5   :  { %5641 = vmatpush1.bf16.msra.mxu1 %v5640_v7  ;;  %v5674_v7 = vpack.c.bf16 %v2879_v54, %v2877_v1 }
 0x7c6   :  { %5643 = vmatprep.subr.bf16.mxu1 %v5642_v37  ;;  %v2876_v37 = vld [vmem:[#allocation9 + $0x600] sm:$0xff] }
 0x7c9   :  { %5645 = vmatpush1.bf16.msra.mxu1 %v5644_v16  ;;  %v5676_v16 = vpack.c.bf16 %v2878_v10, %v2876_v37 }
 0x7ca   :  { %5647 = vmatprep.subr.bf16.mxu1 %v5646_v31  ;;  %v2681_v31 = vmax.f32 %v7252_v2, %v2668_v25  ;;  %v5684_v2 = vpack.c.bf16 %v2886_v3, %v2884_v11 }
 0x7cd   :  { %5649 = vmatpush1.bf16.msra.mxu1 %v5648_v60  ;;  %v2887_v60 = vld [vmem:[#allocation9 + $0x658] sm:$0xff] }
 0x7ce   :  { %5651 = vmatprep.subr.bf16.mxu1 %v5650_v29  ;;  %v5680_v29 = vpack.c.bf16 %v2882_v35, %v2880_v48  ;;  %v5682_v17 = vpack.c.bf16 %v2887_v60, %v2885_v20 }
 0x7d1   :  { %5653 = vmatpush1.bf16.msra.mxu1 %v5652_v23  ;;  %v2888_v23 = vld [vmem:[#allocation9 + $0x660] sm:$0xff] }
 0x7d2   :  { %5655 = vmatprep.subr.bf16.mxu1 %v5654_v52  ;;  %v2890_v52 = vld [vmem:[#allocation9 + $0x670] sm:$0xff] }
 0x7d3   :  { %v5688_v13 = vpack.c.bf16 %v2890_v52, %v2888_v23 }
 0x7d5   :  { %5657 = vmatpush1.bf16.msra.mxu1 %v5656_v39  ;;  %v2892_v39 = vld [vmem:[#allocation9 + $0x680] sm:$0xff] }
 0x7d6   :  { %5659 = vmatprep.subr.bf16.mxu1 %v5658_v61  ;;  %v2894_v61 = vld [vmem:[#allocation9 + $0x690] sm:$0xff] }
 0x7d7   :  { %v5692_v51 = vpack.c.bf16 %v2894_v61, %v2892_v39 }
 0x7d9   :  { %5661 = vmatpush1.bf16.msra.mxu1 %v5660_v19  ;;  %v2896_v19 = vld [vmem:[#allocation9 + $0x6a0] sm:$0xff] }
 0x7da   :  { %5663 = vmatprep.subr.bf16.mxu1 %v5662_v14  ;;  %v2898_v14 = vld [vmem:[#allocation9 + $0x6b0] sm:$0x7f] }
 0x7db   :  { %v5697_v41 = vpack.c.bf16 %v2898_v14, %v2896_v19 }
 0x7dd   :  { %5665 = vmatpush1.bf16.msra.mxu1 %v5664_v44 }
 0x7de   :  { %5667 = vmatprep.subr.bf16.mxu1 %v5666_v59 }
 0x7e1   :  { %5669 = vmatpush1.bf16.msra.mxu1 %v5668_v46 }
 0x7e2   :  { %5671 = vmatprep.subr.bf16.mxu1 %v5670_v12 }
 0x7e5   :  { %5673 = vmatpush1.bf16.msra.mxu1 %v5672_v6 }
 0x7e6   :  { %5675 = vmatprep.subr.bf16.mxu1 %v5674_v7 }
 0x7e8   :  { %3116 = vmatmul.mubr.f32.vlgmr.msra.gmra.mrb[12].mxu1 %v2681_v31 }
 0x7e9   :  { %5677 = vmatpush1.bf16.msra.mxu1 %v5676_v16  ;;  %3186 = vmatprep.mubr.f32.mxu1 %v7303_v62 }
 0x7ea   :  { %5679 = vmatprep.subr.bf16.mxu1 %v5678_v28 }
 0x7ed   :  { %5681 = vmatpush1.bf16.msra.mxu1 %v5680_v29 }
 0x7ee   :  { %5683 = vmatprep.subr.bf16.mxu1 %v5682_v17 }
 0x7f1   :  { %5685 = vmatpush1.bf16.msra.mxu1 %v5684_v2 }
 0x7f2   :  { %5687 = vmatprep.subr.bf16.mxu1 %v5686_v55 }
 0x7f5   :  { %5689 = vmatpush1.bf16.msra.mxu1 %v5688_v13 }
 0x7f6   :  { %5691 = vmatprep.subr.bf16.mxu1 %v5690_v32 }
 0x7f9   :  { %5693 = vmatpush1.bf16.msra.mxu1 %v5692_v51 }
 0x7fa   :  { %5696 = vmatprep.subr.msk.bf16.mxu1 %vm7008_vm14, %v5694_v15 }
 0x7fd   :  { %5699 = vmatpush1.bf16.msk.msra.mxu1 %vm7008_vm14, %v5697_v41 }
 0x7fe   :  { %5768 = vmatprep.subr.bf16.mxu1 %v6126_v63 }
 0x800   :  { %4922 = vmatmul.mubr.msk.f32.vlgmr.msra.gmra.mrb[12].mxu1 %vm181_vm6, %v2683_v58 }
 0x8d3   :  { %v3188_v50 = vpop.f32.mrb[12].mxu1 }
 0x8d4   :  { %3193 = vst [vmem:[#allocation4] sm:$0xff] %v3188_v50  ;;  %v3190_v0 = vpop.f32.mrb[13].mxu1 }
 0x8d5   :  { %3194 = vst [vmem:[#allocation4 + $0x8] sm:$0xff] %v3190_v0 }
 0x8db   :  { %v3248_v44 = vld [vmem:[#allocation4] sm:$0x3f] }
 0x8dc   :  { %3252 = vrot.lane.b32.xlu0 %v3248_v44, %s7957_s3  ;;  %v3249_v59 = vld [vmem:[#allocation4 + $0x8] sm:$0x3f]  ;;  %v3310_v43 = vld [vmem:[#allocation4] sm:$0x3f] }
 0x8dd   :  { %3254 = vrot.lane.b32.xlu1 %v3249_v59, %s7957_s3  ;;  %v3311_v56 = vld [vmem:[#allocation4 + $0x8] sm:$0x3f]  ;;  %v3372_v26 = vld [vmem:[#allocation4] sm:$0x3f]  ;;  %s7980_s3 = smov 76  }
 0x8de   :  { %v3373_v18 = vld [vmem:[#allocation4 + $0x8] sm:$0x3f]  ;;  %v3434_v24 = vld [vmem:[#allocation4] sm:$0x3f] }
 0x8df   :  { %v3435_v5 = vld [vmem:[#allocation4 + $0x8] sm:$0x3f]  ;;  %v3496_v46 = vld [vmem:[#allocation4] sm:$0x3f] }
 0x8e0   :  { %3314 = vrot.lane.b32.xlu0 %v3310_v43, %s6129_s29  ;;  %v3199_v12 = vld [vmem:[#allocation4] sm:$0x3f]  ;;  %v3497_v53 = vld [vmem:[#allocation4 + $0x8] sm:$0x3f] }
 0x8e1   :  { %3316 = vrot.lane.b32.xlu1 %v3311_v56, %s6129_s29  ;;  %v3200_v8 = vld [vmem:[#allocation4 + $0x8] sm:$0x3f]  ;;  %v3203_v1 = vrot.slane %v3199_v12, 2  ;;  %v3216_v6 = vld [vmem:[#allocation4] sm:$0x3f] }
 0x8e2   :  { %v3204_v54 = vrot.slane %v3200_v8, 2  ;;  %v3217_v7 = vld [vmem:[#allocation4 + $0x8] sm:$0x3f]  ;;  %v3195_v10 = vld [vmem:[#allocation4] sm:$0x3f]  ;;  %v3220_v25 = vrot.slane %v3216_v6, 4 }
 0x8e3   :  { %v3196_v37 = vld [vmem:[#allocation4 + $0x8] sm:$0x3f]  ;;  %3197 = vst [vmem:[#allocation5] sm:$0x3f] %v3195_v10  ;;  %v3221_v27 = vrot.slane %v3217_v7, 4 }
 0x8e4   :  { %3376 = vrot.lane.b32.xlu0 %v3372_v26, %s7969_s13  ;;  %3198 = vst.msk [vmem:[#allocation5 + $0x8] sm:$0x3f] %vm1996_vm15, %v3196_v37  ;;  %v3233_v4 = vld [vmem:[#allocation4] sm:$0x3f]  ;;  %v3234_v16 = vld [vmem:[#allocation4 + $0x8] sm:$0x3f] }
 0x8e5   :  { %3378 = vrot.lane.b32.xlu1 %v3373_v18, %s7969_s13  ;;  %v3237_v31 = vrot.slane %v3233_v4, 6  ;;  %v3238_v28 = vrot.slane %v3234_v16, 6  ;;  %v3261_v48 = vld [vmem:[#allocation4] sm:$0x3f]  ;;  %v3262_v35 = vld [vmem:[#allocation4 + $0x8] sm:$0x3f] }
 0x8e6   :  { %v3265_v20 = vrot.slane %v3261_v48, 2  ;;  %v3266_v60 = vrot.slane %v3262_v35, 2  ;;  %v3278_v29 = vld [vmem:[#allocation4] sm:$0x3f]  ;;  %v3279_v17 = vld [vmem:[#allocation4 + $0x8] sm:$0x3f] }
 0x8e7   :  { %v3282_v11 = vrot.slane %v3278_v29, 4  ;;  %v3283_v3 = vrot.slane %v3279_v17, 4  ;;  %v3295_v9 = vld [vmem:[#allocation4] sm:$0x3f]  ;;  %v3296_v45 = vld [vmem:[#allocation4 + $0x8] sm:$0x3f] }
 0x8e8   :  { %3438 = vrot.lane.b32.xlu0 %v3434_v24, %s6130_s19  ;;  %v3299_v2 = vrot.slane %v3295_v9, 6  ;;  %v3300_v55 = vrot.slane %v3296_v45, 6  ;;  %v3323_v23 = vld [vmem:[#allocation4] sm:$0x3f]  ;;  %v3324_v52 = vld [vmem:[#allocation4 + $0x8] sm:$0x3f] }
 0x8e9   :  { %3440 = vrot.lane.b32.xlu1 %v3435_v5, %s6130_s19  ;;  %v3327_v33 = vrot.slane %v3323_v23, 2  ;;  %v3328_v34 = vrot.slane %v3324_v52, 2  ;;  %v3340_v13 = vld [vmem:[#allocation4] sm:$0x3f]  ;;  %v3341_v32 = vld [vmem:[#allocation4 + $0x8] sm:$0x3f] }
 0x8ea   :  { %v3344_v39 = vrot.slane %v3340_v13, 4  ;;  %v3345_v61 = vrot.slane %v3341_v32, 4  ;;  %v3357_v49 = vld [vmem:[#allocation4] sm:$0x3f]  ;;  %v3358_v38 = vld [vmem:[#allocation4 + $0x8] sm:$0x3f] }
 0x8eb   :  { %v3361_v51 = vrot.slane %v3357_v49, 6  ;;  %v3362_v15 = vrot.slane %v3358_v38, 6  ;;  %v3385_v19 = vld [vmem:[#allocation4] sm:$0x3f]  ;;  %v3386_v14 = vld [vmem:[#allocation4 + $0x8] sm:$0x3f] }
 0x8ec   :  { %3500 = vrot.lane.b32.xlu0 %v3496_v46, %s7947_s1  ;;  %v3389_v41 = vrot.slane %v3385_v19, 2  ;;  %v3390_v58 = vrot.slane %v3386_v14, 2  ;;  %v3402_v50 = vld [vmem:[#allocation4] sm:$0x3f]  ;;  %v3403_v0 = vld [vmem:[#allocation4 + $0x8] sm:$0x3f] }
 0x8ed   :  { %3502 = vrot.lane.b32.xlu1 %v3497_v53, %s7947_s1  ;;  %v3406_v44 = vrot.slane %v3402_v50, 4  ;;  %v3407_v59 = vrot.slane %v3403_v0, 4  ;;  %v3419_v43 = vld [vmem:[#allocation4] sm:$0x3f]  ;;  %v3420_v56 = vld [vmem:[#allocation4 + $0x8] sm:$0x3f] }
 0x8ee   :  { %v3423_v26 = vrot.slane %v3419_v43, 6  ;;  %v3424_v18 = vrot.slane %v3420_v56, 6  ;;  %v3447_v24 = vld [vmem:[#allocation4] sm:$0x3f]  ;;  %v3448_v5 = vld [vmem:[#allocation4 + $0x8] sm:$0x3f] }
 0x8ef   :  { %v3451_v46 = vrot.slane %v3447_v24, 2  ;;  %v3452_v12 = vrot.slane %v3448_v5, 2  ;;  %v3464_v53 = vld [vmem:[#allocation4] sm:$0x3f]  ;;  %v3465_v8 = vld [vmem:[#allocation4 + $0x8] sm:$0x3f] }
 0x8f0   :  { %3205 = vrot.lane.b32.xlu0 %v3203_v1, %s7956_s16  ;;  %v3468_v1 = vrot.slane %v3464_v53, 4  ;;  %v3481_v6 = vld [vmem:[#allocation4] sm:$0x3f]  ;;  %v3482_v7 = vld [vmem:[#allocation4 + $0x8] sm:$0x3f] }
 0x8f1   :  { %3207 = vrot.lane.b32.xlu1 %v3204_v54, %s7956_s16  ;;  %v3469_v54 = vrot.slane %v3465_v8, 4  ;;  %v3485_v37 = vrot.slane %v3481_v6, 6  ;;  %v3486_v10 = vrot.slane %v3482_v7, 6  ;;  %v110_v9 = vld [vmem:[%s7853_s8] sm:$0xff]  ;;  %v111_v45 = vld [vmem:[%s7853_s8 + $0x8] sm:$0xff] }
 0x8f4   :  { %3222 = vrot.lane.b32.xlu0 %v3220_v25, %s7955_s27  ;;  %v3509_v25 = vld [vmem:[#allocation4] sm:$0x3f] }
 0x8f5   :  { %3224 = vrot.lane.b32.xlu1 %v3221_v27, %s7955_s27  ;;  %s7976_s27 = smov 108   ;;  %v3510_v27 = vld [vmem:[#allocation4 + $0x8] sm:$0x3f]  ;;  %v3513_v4 = vrot.slane %v3509_v25, 2 }
 0x8f6   :  { %v3514_v16 = vrot.slane %v3510_v27, 2 }
 0x8f8   :  { %3239 = vrot.lane.b32.xlu0 %v3237_v31, %s7958_s14  ;;  %v3526_v31 = vld [vmem:[#allocation4] sm:$0x3f] }
 0x8f9   :  { %3241 = vrot.lane.b32.xlu1 %v3238_v28, %s7958_s14  ;;  %v3527_v28 = vld [vmem:[#allocation4 + $0x8] sm:$0x3f]  ;;  %v3530_v48 = vrot.slane %v3526_v31, 4 }
 0x8fa   :  { %v3531_v35 = vrot.slane %v3527_v28, 4 }
 0x8fc   :  { %3267 = vrot.lane.b32.xlu0 %v3265_v20, %s6131_s26  ;;  %v3543_v20 = vld [vmem:[#allocation4] sm:$0x3f] }
 0x8fd   :  { %3269 = vrot.lane.b32.xlu1 %v3266_v60, %s6131_s26  ;;  %v3544_v60 = vld [vmem:[#allocation4 + $0x8] sm:$0x3f]  ;;  %v3547_v29 = vrot.slane %v3543_v20, 6 }
 0x8fe   :  { %v3548_v17 = vrot.slane %v3544_v60, 6 }
 0x900   :  { %3284 = vrot.lane.b32.xlu0 %v3282_v11, %s6132_s2  ;;  %v3558_v11 = vld [vmem:[#allocation4] sm:$0x3f] }
 0x901   :  { %3286 = vrot.lane.b32.xlu1 %v3283_v3, %s6132_s2  ;;  %v3559_v3 = vld [vmem:[#allocation4 + $0x8] sm:$0x3f]  ;;  %s8005_s2 = sld [smem:[#allocation22_spill]] }
 0x904   :  { %3301 = vrot.lane.b32.xlu0 %v3299_v2, %s6133_s5 }
 0x905   :  { %3303 = vrot.lane.b32.xlu1 %v3300_v55, %s6133_s5 }
 0x908   :  { %3329 = vrot.lane.b32.xlu0 %v3327_v33, %s7976_s27 }
 0x909   :  { %3331 = vrot.lane.b32.xlu1 %v3328_v34, %s7976_s27  ;;  %s8007_s27 = sld [smem:[#allocation24_spill]] }
 0x90c   :  { %3346 = vrot.lane.b32.xlu0 %v3344_v39, %s7966_s4 }
 0x90d   :  { %3348 = vrot.lane.b32.xlu1 %v3345_v61, %s7966_s4 }
 0x910   :  { %3363 = vrot.lane.b32.xlu0 %v3361_v51, %s7943_s0 }
 0x911   :  { %3365 = vrot.lane.b32.xlu1 %v3362_v15, %s7943_s0  ;;  %s7977_s0 = smov 80  }
 0x914   :  { %3391 = vrot.lane.b32.xlu0 %v3389_v41, %s7945_s21 }
 0x915   :  { %3393 = vrot.lane.b32.xlu1 %v3390_v58, %s7945_s21  ;;  %s7978_s21 = smov 78  }
 0x918   :  { %3408 = vrot.lane.b32.xlu0 %v3406_v44, %s7944_s28 }
 0x919   :  { %3410 = vrot.lane.b32.xlu1 %v3407_v59, %s7944_s28  ;;  %s7979_s28 = smov 77  }
 0x91c   :  { %3425 = vrot.lane.b32.xlu0 %v3423_v26, %s7977_s0 }
 0x91d   :  { %3427 = vrot.lane.b32.xlu1 %v3424_v18, %s7977_s0  ;;  %s6140_s0 = smov [#allocation14]  }
 0x920   :  { %3453 = vrot.lane.b32.xlu0 %v3451_v46, %s7978_s21 }
 0x921   :  { %3455 = vrot.lane.b32.xlu1 %v3452_v12, %s7978_s21  ;;  %s4867_s21 = sshll.u32 %s6140_s0, 4  ;;  %s4868_s21 = int_to_ptr.vmem [resolvable:$true] %s4867_s21 }
 0x922   :  { %p6076_p3 = scmp.lt.s32.totalorder %s4868_s21, %s4868_s21 }
 0x924   :  { %3470 = vrot.lane.b32.xlu0 %v3468_v1, %s7979_s28 }
 0x925   :  { %3472 = vrot.lane.b32.xlu1 %v3469_v54, %s7979_s28 }
 0x928   :  { %3487 = vrot.lane.b32.xlu0 %v3485_v37, %s7980_s3 }
 0x929   :  { %3489 = vrot.lane.b32.xlu1 %v3486_v10, %s7980_s3 }
 0x92c   :  { %3515 = vrot.lane.b32.xlu0 %v3513_v4, %s7946_s23 }
 0x92d   :  { %3517 = vrot.lane.b32.xlu1 %v3514_v16, %s7946_s23 }
 0x930   :  { %3532 = vrot.lane.b32.xlu0 %v3530_v48, %s7949_s24 }
 0x931   :  { %3534 = vrot.lane.b32.xlu1 %v3531_v35, %s7949_s24 }
 0x934   :  { %3549 = vrot.lane.b32.xlu0 %v3547_v29, %s7948_s25 }
 0x935   :  { %3551 = vrot.lane.b32.xlu1 %v3548_v17, %s7948_s25 }
 0x938   :  { %3562 = vrot.lane.b32.xlu0 %v3558_v11, %s7950_s22 }
 0x939   :  { %3564 = vrot.lane.b32.xlu1 %v3559_v3, %s7950_s22 }
 0x93c   :  { %2426 = vperm.xlu0 %5962, %v110_v9  }
 0x93d   :  { %2431 = vperm.xlu1 %5963, %v111_v45  }
 0x94e   :  { %v3253_v2 = vpop.permute.xlu0 %3252 }
 0x94f   :  { %v3255_v55 = vpop.permute.xlu1 %3254 }
 0x950   :  { %v3256_v23 = vsel %vm159_vm4, %v3253_v2, %v3255_v55  ;;  %3260 = vst.msk [vmem:[#allocation5 + $0x38] sm:$0x3f] %vm1996_vm15, %v3255_v55  ;;  %vm7982_vm4 = vcmask 646144  }
 0x951   :  { %3259 = vst [vmem:[#allocation5 + $0x30] sm:$0x3f] %v3256_v23 }
 0x952   :  { %v3315_v52 = vpop.permute.xlu0 %3314 }
 0x953   :  { %v3317_v33 = vpop.permute.xlu1 %3316 }
 0x954   :  { %v3318_v34 = vsel %vm2124_vm13, %v3315_v52, %v3317_v33  ;;  %3322 = vst.msk [vmem:[#allocation5 + $0x68] sm:$0x3f] %vm1996_vm15, %v3317_v33  ;;  %vm7983_vm13 = vcmask 523264  }
 0x955   :  { %3321 = vst [vmem:[#allocation5 + $0x60] sm:$0x3f] %v3318_v34 }
 0x956   :  { %v3377_v13 = vpop.permute.xlu0 %3376 }
 0x957   :  { %v3379_v32 = vpop.permute.xlu1 %3378 }
 0x958   :  { %v3380_v39 = vsel %vm7981_vm9, %v3377_v13, %v3379_v32  ;;  %3384 = vst.msk [vmem:[#allocation5 + $0x98] sm:$0x3f] %vm1996_vm15, %v3379_v32  ;;  %vm7985_vm9 = vcmask 1022976  }
 0x959   :  { %3383 = vst [vmem:[#allocation5 + $0x90] sm:$0x3f] %v3380_v39 }
 0x95a   :  { %v3439_v61 = vpop.permute.xlu0 %3438 }
 0x95b   :  { %v3441_v49 = vpop.permute.xlu1 %3440 }
 0x95c   :  { %v3442_v38 = vsel %vm7982_vm4, %v3439_v61, %v3441_v49  ;;  %3446 = vst.msk [vmem:[#allocation5 + $0xc8] sm:$0x3f] %vm1996_vm15, %v3441_v49  ;;  %vm7986_vm4 = vcmask 916480  }
 0x95d   :  { %3445 = vst [vmem:[#allocation5 + $0xc0] sm:$0x3f] %v3442_v38 }
 0x95e   :  { %v3501_v51 = vpop.permute.xlu0 %3500 }
 0x95f   :  { %v3503_v15 = vpop.permute.xlu1 %3502 }
 0x960   :  { %v3504_v19 = vsel %vm7983_vm13, %v3501_v51, %v3503_v15  ;;  %3508 = vst.msk [vmem:[#allocation5 + $0xf8] sm:$0x3f] %vm1996_vm15, %v3503_v15  ;;  %vm7987_vm13 = vcmask 908288  }
 0x961   :  { %3507 = vst [vmem:[#allocation5 + $0xf0] sm:$0x3f] %v3504_v19 }
 0x962   :  { %v3206_v14 = vpop.permute.xlu0 %3205 }
 0x963   :  { %v3208_v41 = vpop.permute.xlu1 %3207 }
 0x964   :  { %v3209_v58 = vsel %vm126_vm3, %v3206_v14, %v3208_v41  ;;  %3213 = vst.msk [vmem:[#allocation5 + $0x8] sm:$0xc0] %vm99_vm8, %v3208_v41 }
 0x965   :  { %3215 = vst.msk [vmem:[#allocation5 + $0x18] sm:$0xf] %vm2014_vm12, %v3208_v41  ;;  %3212 = vst [vmem:[#allocation5 + $0x10] ss:$-12 sps:$4 sm:$0xcf] %v3209_v58  }
 0x966   :  { %v3223_v50 = vpop.permute.xlu0 %3222 }
 0x967   :  { %v3225_v0 = vpop.permute.xlu1 %3224 }
 0x968   :  { %v3226_v44 = vsel %vm7984_vm5, %v3223_v50, %v3225_v0  ;;  %3230 = vst.msk [vmem:[#allocation5 + $0x18] sm:$0xf0] %vm2030_vm11, %v3225_v0  ;;  %vm7988_vm5 = vcmask 900096  }
 0x969   :  { %3232 = vst.msk [vmem:[#allocation5 + $0x28] sm:$0x3] %vm2033_vm0, %v3225_v0  ;;  %3229 = vst [vmem:[#allocation5 + $0x20] ss:$-12 sps:$4 sm:$0xf3] %v3226_v44  }
 0x96a   :  { %v3240_v59 = vpop.permute.xlu0 %3239 }
 0x96b   :  { %v3242_v43 = vpop.permute.xlu1 %3241  ;;  %v3572_v24 = vld [vmem:[#allocation5 + $0x8] sm:$0xff] }
 0x96c   :  { %v3243_v56 = vsel %vm7985_vm9, %v3240_v59, %v3242_v43  ;;  %3247 = vst.msk [vmem:[#allocation5 + $0x28] sm:$0xfc] %vm2049_vm10, %v3242_v43  ;;  %v3571_v53 = vld [vmem:[#allocation5] sm:$0xff]  ;;  %vm7989_vm9 = vcmask 883712  }
 0x96d   :  { %3246 = vst [vmem:[#allocation5 + $0x20] sm:$0xfc] %v3243_v56 }
 0x96e   :  { %v3268_v26 = vpop.permute.xlu0 %3267 }
 0x96f   :  { %v3270_v18 = vpop.permute.xlu1 %3269  ;;  %v3574_v5 = vld [vmem:[#allocation5 + $0x18] sm:$0xff] }
 0x970   :  { %v3271_v46 = vsel %vm7986_vm4, %v3268_v26, %v3270_v18  ;;  %3275 = vst.msk [vmem:[#allocation5 + $0x38] sm:$0xc0] %vm99_vm8, %v3270_v18  ;;  %v5700_v12 = vpack.c.bf16 %v3574_v5, %v3572_v24  ;;  %v3573_v8 = vld [vmem:[#allocation5 + $0x10] sm:$0xff]  ;;  %vm7992_vm4 = vcmask 637952  }
 0x971   :  { %3277 = vst.msk [vmem:[#allocation5 + $0x48] sm:$0xf] %vm2014_vm12, %v3270_v18  ;;  %3274 = vst [vmem:[#allocation5 + $0x40] ss:$-12 sps:$4 sm:$0xcf] %v3271_v46   ;;  %v5702_v1 = vpack.c.bf16 %v3573_v8, %v3571_v53 }
 0x972   :  { %v3285_v54 = vpop.permute.xlu0 %3284  ;;  %5701 = vmatprep.subr.bf16.mxu0 %v5700_v12 }
 0x973   :  { %v3287_v6 = vpop.permute.xlu1 %3286  ;;  %5703 = vmatpush1.bf16.msra.mxu0 %v5702_v1  ;;  %v3576_v25 = vld [vmem:[#allocation5 + $0x28] sm:$0xff] }
 0x974   :  { %v3288_v7 = vsel %vm7987_vm13, %v3285_v54, %v3287_v6  ;;  %3292 = vst.msk [vmem:[#allocation5 + $0x48] sm:$0xf0] %vm2030_vm11, %v3287_v6  ;;  %v3575_v31 = vld [vmem:[#allocation5 + $0x20] sm:$0xff]  ;;  %vm7994_vm13 = vcmask 621568  }
 0x975   :  { %3294 = vst.msk [vmem:[#allocation5 + $0x58] sm:$0x3] %vm2033_vm0, %v3287_v6  ;;  %3291 = vst [vmem:[#allocation5 + $0x50] ss:$-12 sps:$4 sm:$0xf3] %v3288_v7  }
 0x976   :  { %v3302_v37 = vpop.permute.xlu0 %3301 }
 0x977   :  { %v3304_v10 = vpop.permute.xlu1 %3303  ;;  %v3578_v27 = vld [vmem:[#allocation5 + $0x38] sm:$0xff] }
 0x978   :  { %v3305_v4 = vsel %vm7988_vm5, %v3302_v37, %v3304_v10  ;;  %3309 = vst.msk [vmem:[#allocation5 + $0x58] sm:$0xfc] %vm2049_vm10, %v3304_v10  ;;  %v5704_v16 = vpack.c.bf16 %v3578_v27, %v3576_v25  ;;  %v3577_v28 = vld [vmem:[#allocation5 + $0x30] sm:$0xff]  ;;  %vm7995_vm5 = vcmask 515072  }
 0x979   :  { %3308 = vst [vmem:[#allocation5 + $0x50] sm:$0xfc] %v3305_v4  ;;  %v5706_v48 = vpack.c.bf16 %v3577_v28, %v3575_v31 }
 0x97a   :  { %v3330_v35 = vpop.permute.xlu0 %3329  ;;  %5705 = vmatprep.subr.bf16.mxu0 %v5704_v16 }
 0x97b   :  { %v3332_v20 = vpop.permute.xlu1 %3331  ;;  %5707 = vmatpush1.bf16.msra.mxu0 %v5706_v48  ;;  %v3580_v11 = vld [vmem:[#allocation5 + $0x48] sm:$0xff] }
 0x97c   :  { %v3333_v60 = vsel %vm7989_vm9, %v3330_v35, %v3332_v20  ;;  %3337 = vst.msk [vmem:[#allocation5 + $0x68] sm:$0xc0] %vm99_vm8, %v3332_v20  ;;  %v3579_v2 = vld [vmem:[#allocation5 + $0x40] sm:$0xff]  ;;  %vm7996_vm9 = vcmask 506880  }
 0x97d   :  { %3339 = vst.msk [vmem:[#allocation5 + $0x78] sm:$0xf] %vm2014_vm12, %v3332_v20  ;;  %3336 = vst [vmem:[#allocation5 + $0x70] ss:$-12 sps:$4 sm:$0xcf] %v3333_v60  }
 0x97e   :  { %v3347_v29 = vpop.permute.xlu0 %3346 }
 0x97f   :  { %v3349_v17 = vpop.permute.xlu1 %3348  ;;  %v3582_v3 = vld [vmem:[#allocation5 + $0x58] sm:$0xff] }
 0x980   :  { %v3350_v9 = vsel %vm170_vm7, %v3347_v29, %v3349_v17  ;;  %3354 = vst.msk [vmem:[#allocation5 + $0x78] sm:$0xf0] %vm2030_vm11, %v3349_v17  ;;  %v5708_v45 = vpack.c.bf16 %v3582_v3, %v3580_v11  ;;  %v3581_v55 = vld [vmem:[#allocation5 + $0x50] sm:$0xff]  ;;  %vm7990_vm7 = vcmask 760832  }
 0x981   :  { %3356 = vst.msk [vmem:[#allocation5 + $0x88] sm:$0x3] %vm2033_vm0, %v3349_v17  ;;  %3353 = vst [vmem:[#allocation5 + $0x80] ss:$-12 sps:$4 sm:$0xf3] %v3350_v9   ;;  %v5710_v23 = vpack.c.bf16 %v3581_v55, %v3579_v2 }
 0x982   :  { %v3364_v52 = vpop.permute.xlu0 %3363  ;;  %5709 = vmatprep.subr.bf16.mxu0 %v5708_v45 }
 0x983   :  { %v3366_v33 = vpop.permute.xlu1 %3365  ;;  %5711 = vmatpush1.bf16.msra.mxu0 %v5710_v23  ;;  %v3584_v39 = vld [vmem:[#allocation5 + $0x68] sm:$0xff] }
 0x984   :  { %v3367_v34 = vsel %vm181_vm6, %v3364_v52, %v3366_v33  ;;  %3371 = vst.msk [vmem:[#allocation5 + $0x88] sm:$0xfc] %vm2049_vm10, %v3366_v33  ;;  %v3583_v51 = vld [vmem:[#allocation5 + $0x60] sm:$0xff]  ;;  %vm7991_vm6 = vcmask 752640  }
 0x985   :  { %3370 = vst [vmem:[#allocation5 + $0x80] sm:$0xfc] %v3367_v34 }
 0x986   :  { %v3392_v13 = vpop.permute.xlu0 %3391 }
 0x987   :  { %v3394_v32 = vpop.permute.xlu1 %3393  ;;  %v3586_v61 = vld [vmem:[#allocation5 + $0x78] sm:$0xff] }
 0x988   :  { %v3395_v49 = vsel %vm7990_vm7, %v3392_v13, %v3394_v32  ;;  %3399 = vst.msk [vmem:[#allocation5 + $0x98] sm:$0xc0] %vm99_vm8, %v3394_v32  ;;  %v5712_v38 = vpack.c.bf16 %v3586_v61, %v3584_v39  ;;  %v3585_v15 = vld [vmem:[#allocation5 + $0x70] sm:$0xff]  ;;  %vm3965_vm7 = vcmask 778752  }
 0x989   :  { %3401 = vst.msk [vmem:[#allocation5 + $0xa8] sm:$0xf] %vm2014_vm12, %v3394_v32  ;;  %3398 = vst [vmem:[#allocation5 + $0xa0] ss:$-12 sps:$4 sm:$0xcf] %v3395_v49   ;;  %v5714_v19 = vpack.c.bf16 %v3585_v15, %v3583_v51 }
 0x98a   :  { %v3409_v14 = vpop.permute.xlu0 %3408  ;;  %5713 = vmatprep.subr.bf16.mxu0 %v5712_v38 }
 0x98b   :  { %v3411_v41 = vpop.permute.xlu1 %3410  ;;  %5715 = vmatpush1.bf16.msra.mxu0 %v5714_v19  ;;  %v3588_v44 = vld [vmem:[#allocation5 + $0x88] sm:$0xff] }
 0x98c   :  { %v3412_v58 = vsel %vm7991_vm6, %v3409_v14, %v3411_v41  ;;  %3416 = vst.msk [vmem:[#allocation5 + $0xa8] sm:$0xf0] %vm2030_vm11, %v3411_v41  ;;  %v3587_v26 = vld [vmem:[#allocation5 + $0x80] sm:$0xff]  ;;  %vm3979_vm6 = vcmask 1041152  }
 0x98d   :  { %3418 = vst.msk [vmem:[#allocation5 + $0xb8] sm:$0x3] %vm2033_vm0, %v3411_v41  ;;  %3415 = vst [vmem:[#allocation5 + $0xb0] ss:$-12 sps:$4 sm:$0xf3] %v3412_v58  }
 0x98e   :  { %v3426_v50 = vpop.permute.xlu0 %3425 }
 0x98f   :  { %v3428_v0 = vpop.permute.xlu1 %3427  ;;  %v3590_v59 = vld [vmem:[#allocation5 + $0x98] sm:$0xff] }
 0x990   :  { %v3429_v43 = vsel %vm2237_vm2, %v3426_v50, %v3428_v0  ;;  %3433 = vst.msk [vmem:[#allocation5 + $0xb8] sm:$0xfc] %vm2049_vm10, %v3428_v0  ;;  %v5716_v56 = vpack.c.bf16 %v3590_v59, %v3588_v44  ;;  %v3589_v18 = vld [vmem:[#allocation5 + $0x90] sm:$0xff]  ;;  %vm7993_vm2 = vcmask 629760   ;;  %v3610_v50 = vld [vmem:[#allocation5 + $0x138] sm:$0xff] }
 0x991   :  { %3432 = vst [vmem:[#allocation5 + $0xb0] sm:$0xfc] %v3429_v43  ;;  %v5718_v24 = vpack.c.bf16 %v3589_v18, %v3587_v26 }
 0x992   :  { %v3454_v5 = vpop.permute.xlu0 %3453  ;;  %5717 = vmatprep.subr.bf16.mxu0 %v5716_v56  ;;  %v113_v56 = vld [vmem:[%s7856_s11] sm:$0x3] }
 0x993   :  { %v3456_v46 = vpop.permute.xlu1 %3455  ;;  %5719 = vmatpush1.bf16.msra.mxu0 %v5718_v24  ;;  %v3592_v1 = vld [vmem:[#allocation5 + $0xa8] sm:$0xff]  ;;  %v2525_v26 = vrot.slane %v113_v56, %v704_v40  ;;  %v2529_v18 = vrot.slane %v113_v56, %v708_v42  ;;  %v6023_v24 = vld [vmem:[%s7852_s7] sm:$0xff] }
 0x994   :  { %v3457_v12 = vsel %vm7992_vm4, %v3454_v5, %v3456_v46  ;;  %3461 = vst.msk [vmem:[#allocation5 + $0xc8] sm:$0xc0] %vm99_vm8, %v3456_v46  ;;  %v3591_v37 = vld [vmem:[#allocation5 + $0xa0] sm:$0xff]  ;;  %v6024_v5 = vld [vmem:[%s7852_s7 + $0x18] sm:$0xff]  ;;  %vm8004_vm4 = vmmov 0  }
 0x995   :  { %3463 = vst.msk [vmem:[#allocation5 + $0xd8] sm:$0xf] %vm2014_vm12, %v3456_v46  ;;  %3460 = vst [vmem:[#allocation5 + $0xd0] ss:$-12 sps:$4 sm:$0xcf] %v3457_v12  }
 0x996   :  { %v3471_v53 = vpop.permute.xlu0 %3470 }
 0x997   :  { %v3473_v8 = vpop.permute.xlu1 %3472  ;;  %v3594_v54 = vld [vmem:[#allocation5 + $0xb8] sm:$0xff] }
 0x998   :  { %v3474_v6 = vsel %vm7993_vm2, %v3471_v53, %v3473_v8  ;;  %3478 = vst.msk [vmem:[#allocation5 + $0xd8] sm:$0xf0] %vm2030_vm11, %v3473_v8  ;;  %v5720_v7 = vpack.c.bf16 %v3594_v54, %v3592_v1  ;;  %v3593_v10 = vld [vmem:[#allocation5 + $0xb0] sm:$0xff]  ;;  %v6025_v53 = vld [vmem:[%s7852_s7 + $0x10] sm:$0xff] }
 0x999   :  { %3480 = vst.msk [vmem:[#allocation5 + $0xe8] sm:$0x3] %vm2033_vm0, %v3473_v8  ;;  %3477 = vst [vmem:[#allocation5 + $0xe0] ss:$-12 sps:$4 sm:$0xf3] %v3474_v6   ;;  %v5722_v25 = vpack.c.bf16 %v3593_v10, %v3591_v37 }
 0x99a   :  { %v3488_v27 = vpop.permute.xlu0 %3487  ;;  %5721 = vmatprep.subr.bf16.mxu0 %v5720_v7 }
 0x99b   :  { %v3490_v4 = vpop.permute.xlu1 %3489  ;;  %5723 = vmatpush1.bf16.msra.mxu0 %v5722_v25  ;;  %v3596_v48 = vld [vmem:[#allocation5 + $0xc8] sm:$0xff] }
 0x99c   :  { %v3491_v16 = vsel %vm7994_vm13, %v3488_v27, %v3490_v4  ;;  %3495 = vst.msk [vmem:[#allocation5 + $0xe8] sm:$0xfc] %vm2049_vm10, %v3490_v4  ;;  %v3595_v29 = vld [vmem:[#allocation5 + $0xc0] sm:$0xff] }
 0x99d   :  { %3494 = vst [vmem:[#allocation5 + $0xe0] sm:$0xfc] %v3491_v16 }
 0x99e   :  { %v3516_v31 = vpop.permute.xlu0 %3515 }
 0x99f   :  { %v3518_v28 = vpop.permute.xlu1 %3517  ;;  %v3598_v35 = vld [vmem:[#allocation5 + $0xd8] sm:$0xff] }
 0x9a0   :  { %v3519_v20 = vsel %vm7995_vm5, %v3516_v31, %v3518_v28  ;;  %3523 = vst.msk [vmem:[#allocation5 + $0xf8] sm:$0xc0] %vm99_vm8, %v3518_v28  ;;  %v5724_v60 = vpack.c.bf16 %v3598_v35, %v3596_v48  ;;  %v3597_v17 = vld [vmem:[#allocation5 + $0xd0] sm:$0xff]  ;;  %vm7997_vm8 = vcmask 498688  }
 0x9a1   :  { %3525 = vst.msk [vmem:[#allocation5 + $0x108] sm:$0xf] %vm2014_vm12, %v3518_v28  ;;  %3522 = vst [vmem:[#allocation5 + $0x100] ss:$-12 sps:$4 sm:$0xcf] %v3519_v20   ;;  %v5726_v11 = vpack.c.bf16 %v3597_v17, %v3595_v29  ;;  %vm3937_vm12 = vcmask 253952  }
 0x9a2   :  { %v3533_v3 = vpop.permute.xlu0 %3532  ;;  %5725 = vmatprep.subr.bf16.mxu0 %v5724_v60 }
 0x9a3   :  { %v3535_v9 = vpop.permute.xlu1 %3534  ;;  %5727 = vmatpush1.bf16.msra.mxu0 %v5726_v11  ;;  %v3600_v23 = vld [vmem:[#allocation5 + $0xe8] sm:$0xff] }
 0x9a4   :  { %v3536_v45 = vsel %vm7996_vm9, %v3533_v3, %v3535_v9  ;;  %3540 = vst.msk [vmem:[#allocation5 + $0x108] sm:$0xf0] %vm2030_vm11, %v3535_v9  ;;  %v3599_v13 = vld [vmem:[#allocation5 + $0xe0] sm:$0xff]  ;;  %vm7998_vm11 = vcmask 490496  }
 0x9a5   :  { %3542 = vst.msk [vmem:[#allocation5 + $0x118] sm:$0x3] %vm2033_vm0, %v3535_v9  ;;  %3539 = vst [vmem:[#allocation5 + $0x110] ss:$-12 sps:$4 sm:$0xf3] %v3536_v45  }
 0x9a6   :  { %v3550_v2 = vpop.permute.xlu0 %3549 }
 0x9a7   :  { %v3552_v55 = vpop.permute.xlu1 %3551  ;;  %v3602_v52 = vld [vmem:[#allocation5 + $0xf8] sm:$0xff] }
 0x9a8   :  { %v3553_v33 = vsel %vm7997_vm8, %v3550_v2, %v3552_v55  ;;  %3557 = vst.msk [vmem:[#allocation5 + $0x118] sm:$0xfc] %vm2049_vm10, %v3552_v55  ;;  %v5728_v34 = vpack.c.bf16 %v3602_v52, %v3600_v23  ;;  %v3601_v32 = vld [vmem:[#allocation5 + $0xf0] sm:$0xff]  ;;  %vm3849_vm10 = vcmask 121856  }
 0x9a9   :  { %3556 = vst [vmem:[#allocation5 + $0x110] sm:$0xfc] %v3553_v33  ;;  %v5730_v39 = vpack.c.bf16 %v3601_v32, %v3599_v13 }
 0x9aa   :  { %v3563_v61 = vpop.permute.xlu0 %3562  ;;  %5729 = vmatprep.subr.bf16.mxu0 %v5728_v34 }
 0x9ab   :  { %v3565_v49 = vpop.permute.xlu1 %3564  ;;  %5731 = vmatpush1.bf16.msra.mxu0 %v5730_v39  ;;  %v3604_v51 = vld [vmem:[#allocation5 + $0x108] sm:$0xff] }
 0x9ac   :  { %v3566_v38 = vsel %vm7998_vm11, %v3563_v61, %v3565_v49  ;;  %3570 = vst.msk [vmem:[#allocation5 + $0x128] sm:$0x3f] %vm1996_vm15, %v3565_v49  ;;  %v3603_v14 = vld [vmem:[#allocation5 + $0x100] sm:$0xff] }
 0x9ad   :  { %3569 = vst [vmem:[#allocation5 + $0x120] sm:$0x3f] %v3566_v38 }
 0x9af   :  { %v3606_v15 = vld [vmem:[#allocation5 + $0x118] sm:$0xff] }
 0x9b0   :  { %v5732_v19 = vpack.c.bf16 %v3606_v15, %v3604_v51  ;;  %v3605_v41 = vld [vmem:[#allocation5 + $0x110] sm:$0xff] }
 0x9b1   :  { %v5734_v58 = vpack.c.bf16 %v3605_v41, %v3603_v14 }
 0x9b2   :  { %5733 = vmatprep.subr.bf16.mxu0 %v5732_v19 }
 0x9b3   :  { %5735 = vmatpush1.bf16.msra.mxu0 %v5734_v58  ;;  %v3608_v0 = vld [vmem:[#allocation5 + $0x128] sm:$0xff] }
 0x9b4   :  { %v5736_v44 = vpack.c.bf16 %v3610_v50, %v3608_v0  ;;  %v3607_v59 = vld [vmem:[#allocation5 + $0x120] sm:$0xff] }
 0x9b5   :  { %v5738_v43 = vpack.c.bf16 %v7303_v62, %v3607_v59 }
 0x9b6   :  { %5737 = vmatprep.subr.bf16.mxu0 %v5736_v44 }
 0x9b7   :  { %5739 = vmatpush1.bf16.msra.mxu0 %v5738_v43 }
 0x9b8   :  { %5740 = vmatprep.subr.bf16.mxu0 %v6126_v63 }
 0x9ba   :  { %3676 = vmatmul.mubr.f32.vlgmr.msra.gmra.mrb[10].mxu0 %v6023_v24 }
 0x9bb   :  { %v2427_v62 = vpop.permute.xlu0 %2426  ;;  %4924 = vmatprep.mubr.msk.f32.mxu0 %vm102_vm1, %v6024_v5 }
 0x9bc   :  { %v7446_v46 = vadd.f32 %v7270_v22, %v2427_v62  ;;  %v2509_v40 = vadd.f32 %v7272_v57, %v2427_v62  ;;  %v2432_v12 = vpop.permute.xlu1 %2431 }
 0x9bd   :  { %v2515_v42 = vadd.f32 %v7276_v47, %v2432_v12  ;;  %v7462_v4 = vadd.f32 %v7274_v30, %v2432_v12 }
 0x9be   :  { %2518 = vst.msk [vmem:[#allocation6 + $0x8] sm:$0xff] %vm102_vm1, %v2509_v40  ;;  %3682 = vmatmul.mubr.f32.gmra.mrb[12].mxu0 %v6025_v53  ;;  %v2532_v8 = vmul.f32 %v2525_v26, %v7446_v46  ;;  %v2533_v1 = vmul.f32 %v2529_v18, %v2509_v40 }
 0x9bf   :  { %2520 = vst.msk [vmem:[#allocation6 + $0x18] sm:$0xff] %vm102_vm1, %v2515_v42  ;;  %v2535_v48 = vmul.f32 %v2529_v18, %v2515_v42  ;;  %v2534_v30 = vmul.f32 %v2525_v26, %v7462_v4 }
 0x9c0   :  { %v2536_v22 = vsel %vm102_vm1, %v2533_v1, 0.0  ;;  %v2547_v54 = vmul.f32 %v2533_v1, %v2509_v40  ;;  %v2546_v57 = vmul.f32 %v2532_v8, %v7446_v46 }
 0x9c1   :  { %v2537_v6 = vadd.f32 %v2536_v22, %v2532_v8  ;;  %v2540_v2 = vsel %vm102_vm1, %v2535_v48, 0.0  ;;  %v2549_v55 = vmul.f32 %v2535_v48, %v2515_v42  ;;  %v2548_v32 = vmul.f32 %v2534_v30, %v7462_v4 }
 0x9c2   :  { %v2550_v47 = vsel %vm102_vm1, %v2547_v54, 0.0  ;;  %v2541_v13 = vadd.f32 %v2540_v2, %v2534_v30  ;;  %v3729_v54 = vld [vmem:[%s7854_s9] sm:$0xff] }
 0x9c3   :  { %2538 = vadd.xlane.f32.xlu0 %v2537_v6  ;;  %v2551_v7 = vadd.f32 %v2550_v47, %v2546_v57  ;;  %v2554_v39 = vsel %vm102_vm1, %v2549_v55, 0.0  ;;  %v3737_v47 = vld [vmem:[%s7855_s10] sm:$0xff] }
 0x9c4   :  { %v2555_v51 = vadd.f32 %v2554_v39, %v2548_v32 }
 0x9c7   :  { %2552 = vadd.xlane.f32.xlu0 %v2551_v7 }
 0xa50   :  { %v2539_v19 = vpop.xlane.xlu0 %2538 }
 0xa54   :  { %v2553_v14 = vpop.xlane.xlu0 %2552 }
 0xa8d   :  { %v3677_v37 = vpop.f32.mrb[10].mxu0 }
 0xa8e   :  { %v7459_v10 = vadd.f32 %v3677_v37, %v2427_v62  ;;  %v3679_v25 = vpop.f32.mrb[11].mxu0 }
 0xa8f   :  { %v3680_v27 = vadd.f32 %v3679_v25, %v2427_v62  ;;  %v3730_v25 = vld [vmem:[%s7854_s9 + $0x8] sm:$0xff] }
 0xa90   :  { %v3693_v16 = vmul.f32 %v7459_v10, %v2525_v26 }
 0xa91   :  { %3690 = vst.msk [vmem:[#allocation6 + $0x28] sm:$0xff] %vm102_vm1, %v3680_v27  ;;  %v3694_v31 = vmul.f32 %v3680_v27, %v2529_v18  ;;  %v3683_v28 = vpop.f32.mrb[12].mxu0 }
 0xa92   :  { %v3685_v35 = vpop.f32.mrb[13].mxu0  ;;  %v3707_v17 = vmul.f32 %v3693_v16, %v7459_v10  ;;  %v7468_v11 = vadd.f32 %v3683_v28, %v2432_v12 }
 0xa93   :  { %v3708_v20 = vmul.f32 %v3694_v31, %v3680_v27  ;;  %v3686_v60 = vadd.f32 %v3685_v35, %v2432_v12  ;;  %v3697_v29 = vsel %vm102_vm1, %v3694_v31, 0.0  ;;  %v3738_v31 = vld [vmem:[%s7855_s10 + $0x8] sm:$0xff] }
 0xa94   :  { %v3698_v3 = vadd.f32 %v3697_v29, %v3693_v16  ;;  %v3695_v34 = vmul.f32 %v7468_v11, %v2525_v26 }
 0xa95   :  { %3692 = vst.msk [vmem:[#allocation6 + $0x38] sm:$0xff] %vm102_vm1, %v3686_v60  ;;  %v3696_v9 = vmul.f32 %v3686_v60, %v2529_v18  ;;  %v3711_v45 = vsel %vm102_vm1, %v3708_v20, 0.0  ;;  %v3744_v20 = vld [vmem:[#allocation6 + $0x8] sm:$0xff] }
 0xa96   :  { %3699 = vadd.xlane.f32.xlu1 %v3698_v3  ;;  %v3712_v23 = vadd.f32 %v3711_v45, %v3707_v17  ;;  %v3709_v38 = vmul.f32 %v3695_v34, %v7468_v11 }
 0xa97   :  { %v3710_v52 = vmul.f32 %v3696_v9, %v3686_v60  ;;  %v3701_v33 = vsel %vm102_vm1, %v3696_v9, 0.0 }
 0xa98   :  { %3713 = vadd.xlane.f32.xlu0 %v3712_v23  ;;  %v3702_v61 = vadd.f32 %v3701_v33, %v3695_v34  ;;  %v4105_v60 = vld [vmem:[#allocation6 + $0x28] sm:$0xff] }
 0xa99   :  { %v3715_v49 = vsel %vm102_vm1, %v3710_v52, 0.0 }
 0xa9a   :  { %2542 = vadd.xlane.f32.xlu1 %v2541_v13  ;;  %v3716_v15 = vadd.f32 %v3715_v49, %v3709_v38 }
 0xa9c   :  { %3703 = vadd.xlane.f32.xlu0 %v3702_v61 }
 0xa9e   :  { %2556 = vadd.xlane.f32.xlu1 %v2555_v51 }
 0xaa0   :  { %3717 = vadd.xlane.f32.xlu0 %v3716_v15 }
 0xb23   :  { %v3700_v41 = vpop.xlane.xlu1 %3699 }
 0xb24   :  { %v3705_v58 = vadd.f32 %v3700_v41, %v2539_v19 }
 0xb25   :  { %v3714_v50 = vpop.xlane.xlu0 %3713 }
 0xb26   :  { %v3721_v0 = vmul.f32 0.005, %v3705_v58  ;;  %v3719_v44 = vadd.f32 %v3714_v50, %v2553_v14 }
 0xb27   :  { %v2543_v59 = vpop.xlane.xlu1 %2542 }
 0xb28   :  { %v3725_v43 = vmul.f32 %v3721_v0, %v3721_v0  ;;  %v3723_v56 = vmul.f32 0.005, %v3719_v44 }
 0xb29   :  { %v3704_v26 = vpop.xlane.xlu0 %3703 }
 0xb2a   :  { %v3727_v18 = vsub.f32 %v3723_v56, %v3725_v43  ;;  %v3706_v24 = vadd.f32 %v3704_v26, %v2543_v59  ;;  %v3833_v43 = vld [vmem:[%s7857_s12 + $0x10] sm:$0xff] }
 0xb2b   :  { %v2557_v40 = vpop.xlane.xlu1 %2556 }
 0xb2c   :  { %v3731_v62 = vadd.f32 1e-05, %v3727_v18  ;;  %v3722_v5 = vmul.f32 0.005, %v3706_v24  ;;  %v3834_v18 = vld [vmem:[%s7857_s12 + $0x18] sm:$0xff] }
 0xb2d   :  { %v3718_v12 = vpop.xlane.xlu0 %3717  ;;  %v5744_v24 = vpack.c.bf16 %v3834_v18, %v3833_v43 }
 0xb2e   :  { %6017 = vrsqrt.f32 %v3731_v62  ;;  %v3720_v42 = vadd.f32 %v3718_v12, %v2557_v40  ;;  %v3726_v53 = vmul.f32 %v3722_v5, %v3722_v5  ;;  %v3835_v62 = vld [vmem:[%s7857_s12 + $0x20] sm:$0xff] }
 0xb30   :  { %v3724_v8 = vmul.f32 0.005, %v3720_v42  ;;  %v3837_v42 = vld [vmem:[%s7857_s12 + $0x30] sm:$0xff] }
 0xb32   :  { %v3728_v1 = vsub.f32 %v3724_v8, %v3726_v53  ;;  %v3838_v53 = vld [vmem:[%s7857_s12 + $0x38] sm:$0xff] }
 0xb34   :  { %v3732_v22 = vadd.f32 1e-05, %v3728_v1  ;;  %v5750_v1 = vpack.c.bf16 %v3838_v53, %v3837_v42 }
 0xb36   :  { %6019 = vrsqrt.f32 %v3732_v22  ;;  %v3839_v22 = vld [vmem:[%s7857_s12 + $0x40] sm:$0xff] }
 0xb38   :  { %v6018_v6 = vpop.eup %6017 }
 0xb39   :  { %v3735_v57 = vmul.f32 %v6018_v6, %v3729_v54  ;;  %v3840_v54 = vld [vmem:[%s7857_s12 + $0x48] sm:$0xff] }
 0xb3a   :  { %v5753_v6 = vpack.c.bf16 %v3840_v54, %v3839_v22 }
 0xb3b   :  { %3749 = vperm.xlu1 %5963, %v3735_v57   ;;  %v3739_v7 = vmul.f32 %v3735_v57, %v3721_v0  ;;  %v3841_v57 = vld [vmem:[%s7857_s12 + $0x50] sm:$0xff] }
 0xb3d   :  { %v3741_v37 = vsub.f32 %v3737_v47, %v3739_v7  ;;  %v3842_v47 = vld [vmem:[%s7857_s12 + $0x58] sm:$0xff] }
 0xb3e   :  { %v5756_v7 = vpack.c.bf16 %v3842_v47, %v3841_v57 }
 0xb3f   :  { %3763 = vperm.xlu0 %5962, %v3741_v37   ;;  %v3843_v37 = vld [vmem:[%s7857_s12 + $0x60] sm:$0xff] }
 0xb40   :  { %v6020_v27 = vpop.eup %6019 }
 0xb41   :  { %v3736_v16 = vmul.f32 %v6020_v27, %v3730_v25  ;;  %v3844_v25 = vld [vmem:[%s7857_s12 + $0x68] sm:$0xff] }
 0xb42   :  { %v5759_v27 = vpack.c.bf16 %v3844_v25, %v3843_v37 }
 0xb43   :  { %3754 = vperm.xlu1 %5963, %v3736_v16   ;;  %v3740_v28 = vmul.f32 %v3736_v16, %v3722_v5  ;;  %v3836_v5 = vld [vmem:[%s7857_s12 + $0x28] sm:$0xff]  ;;  %v3845_v16 = vld [vmem:[%s7857_s12 + $0x70] sm:$0xff] }
 0xb44   :  { %v5747_v12 = vpack.c.bf16 %v3836_v5, %v3835_v62 }
 0xb45   :  { %v3742_v48 = vsub.f32 %v3738_v31, %v3740_v28  ;;  %v3846_v31 = vld [vmem:[%s7857_s12 + $0x78] sm:$0xff] }
 0xb46   :  { %v5762_v28 = vpack.c.bf16 %v3846_v31, %v3845_v16 }
 0xb47   :  { %3768 = vperm.xlu1 %5963, %v3742_v48   ;;  %v3847_v48 = vld [vmem:[%s7857_s12 + $0x80] sm:$0xff] }
 0xbba   :  { %v3750_v35 = vpop.permute.xlu1 %3749 }
 0xbbb   :  { %v3757_v29 = vmul.f32 %v3750_v35, %v7446_v46  ;;  %v3758_v17 = vmul.f32 %v3750_v35, %v3744_v20  ;;  %v4108_v3 = vmul.f32 %v3750_v35, %v7459_v10  ;;  %v4109_v30 = vmul.f32 %v4105_v60, %v3750_v35  ;;  %v3746_v46 = vld [vmem:[#allocation6 + $0x18] sm:$0xff] }
 0xbbc   :  { %v4107_v10 = vld [vmem:[#allocation6 + $0x38] sm:$0xff] }
 0xbbd   :  { %v3848_v35 = vld [vmem:[%s7857_s12 + $0x88] sm:$0x7f] }
 0xbbe   :  { %v3764_v9 = vpop.permute.xlu0 %3763  ;;  %v5765_v20 = vpack.c.bf16 %v3848_v35, %v3847_v48 }
 0xbbf   :  { %v7494_v45 = vadd.f32 %v3764_v9, %v3757_v29  ;;  %v3772_v2 = vadd.f32 %v3764_v9, %v3758_v17  ;;  %v7496_v55 = vadd.f32 %v4108_v3, %v3764_v9  ;;  %v4113_v23 = vadd.f32 %v4109_v30, %v3764_v9 }
 0xbc1   :  { %v3775_v52 = vmax.f32 %v7494_v45, 0.0  ;;  %v3776_v33 = vmax.f32 %v3772_v2, 0.0  ;;  %v4116_v34 = vmax.f32 %v7496_v55, 0.0  ;;  %v4117_v13 = vmax.f32 %v4113_v23, 0.0  ;;  %v4189_v2 = vld [vmem:[%s7857_s12 + $0x88] sm:$0x7f] }
 0xbc2   :  { %v3755_v32 = vpop.permute.xlu1 %3754  ;;  %v5793_v23 = vpack.c.bf16 %v4189_v2, %v3847_v48  ;;  %v4457_v2 = vld [vmem:[#allocation12 + $0x80] sm:$0xff] }
 0xbc3   :  { %3780 = vst.msk [vmem:[#allocation6 + $0x8] sm:$0xff] %vm102_vm1, %v3776_v33  ;;  %4121 = vst.msk [vmem:[#allocation6 + $0x28] sm:$0xff] %vm102_vm1, %v4117_v13  ;;  %3791 = vrot.lane.b32.xlu0 %v3775_v52, %s7956_s16  ;;  %v3759_v39 = vmul.f32 %v3755_v32, %v7462_v4  ;;  %v3760_v61 = vmul.f32 %v3755_v32, %v3746_v46  ;;  %v4110_v49 = vmul.f32 %v3755_v32, %v7468_v11  ;;  %v3831_v4 = vld [vmem:[%s7857_s12] sm:$0xff]  ;;  %v3832_v11 = vld [vmem:[%s7857_s12 + $0x8] sm:$0xff]  ;;  %s8003_s12 = smov 32  }
 0xbc4   :  { %v4111_v38 = vmul.f32 %v4107_v10, %v3755_v32  ;;  %v5741_v26 = vpack.c.bf16 %v3832_v11, %v3831_v4 }
 0xbc6   :  { %v3769_v51 = vpop.permute.xlu1 %3768  ;;  %5742 = vmatpush1.bf16.msra.mxu0 %v5741_v26  ;;  %5770 = vmatpush1.bf16.msra.mxu1 %v5741_v26 }
 0xbc7   :  { %v7507_v15 = vadd.f32 %v3769_v51, %v3759_v39  ;;  %v3774_v19 = vadd.f32 %v3769_v51, %v3760_v61  ;;  %v7509_v14 = vadd.f32 %v4110_v49, %v3769_v51  ;;  %v4115_v41 = vadd.f32 %v4111_v38, %v3769_v51  ;;  %5743 = vmatprep.subr.bf16.mxu0 %v6126_v63 }
 0xbc8   :  { %5771 = vmatprep.subr.bf16.mxu1 %v6126_v63 }
 0xbc9   :  { %v3777_v58 = vmax.f32 %v7507_v15, 0.0  ;;  %v3778_v50 = vmax.f32 %v3774_v19, 0.0  ;;  %v4118_v0 = vmax.f32 %v7509_v14, 0.0  ;;  %v4119_v44 = vmax.f32 %v4115_v41, 0.0 }
 0xbca   :  { %v7513_v59 = vld [vmem:[#allocation6 + $0x8] sm:$0xff]  ;;  %5745 = vmatpush1.bf16.msra.mxu0 %v5744_v24  ;;  %5773 = vmatpush1.bf16.msra.mxu1 %v5744_v24 }
 0xbcb   :  { %3782 = vst.msk [vmem:[#allocation6 + $0x18] sm:$0xff] %vm102_vm1, %v3778_v50  ;;  %4123 = vst.msk [vmem:[#allocation6 + $0x38] sm:$0xff] %vm102_vm1, %v4119_v44  ;;  %3793 = vrot.lane.b32.xlu1 %v7513_v59, %s7956_s16  ;;  %3795 = vrot.lane.b32.xlu0 %v3777_v58, %s7956_s16  ;;  %v7552_v40 = vld [vmem:[#allocation6 + $0x28] sm:$0xff] }
 0xbcc   :  { %5746 = vmatprep.subr.bf16.mxu0 %v6126_v63  ;;  %5774 = vmatprep.subr.bf16.mxu1 %v6126_v63 }
 0xbce   :  { %5748 = vmatpush1.bf16.msra.mxu0 %v5747_v12  ;;  %5776 = vmatpush1.bf16.msra.mxu1 %v5747_v12 }
 0xbcf   :  { %4132 = vrot.lane.b32.xlu0 %v4116_v34, %s7956_s16  ;;  %5749 = vmatprep.subr.bf16.mxu0 %v6126_v63 }
 0xbd0   :  { %5777 = vmatprep.subr.bf16.mxu1 %v6126_v63 }
 0xbd2   :  { %v7534_v56 = vld [vmem:[#allocation6 + $0x18] sm:$0xff]  ;;  %5751 = vmatpush1.bf16.msra.mxu0 %v5750_v1  ;;  %5779 = vmatpush1.bf16.msra.mxu1 %v5750_v1 }
 0xbd3   :  { %3797 = vrot.lane.b32.xlu1 %v7534_v56, %s7956_s16  ;;  %4136 = vrot.lane.b32.xlu0 %v4118_v0, %s7956_s16  ;;  %v7564_v8 = vld [vmem:[#allocation6 + $0x38] sm:$0xff] }
 0xbd4   :  { %5752 = vmatprep.subr.bf16.mxu0 %v6126_v63  ;;  %5780 = vmatprep.subr.bf16.mxu1 %v6126_v63 }
 0xbd6   :  { %5754 = vmatpush1.bf16.msra.mxu0 %v5753_v6  ;;  %5782 = vmatpush1.bf16.msra.mxu1 %v5753_v6 }
 0xbd7   :  { %4134 = vrot.lane.b32.xlu1 %v7552_v40, %s7956_s16  ;;  %5755 = vmatprep.subr.bf16.mxu0 %v6126_v63 }
 0xbd8   :  { %5783 = vmatprep.subr.bf16.mxu1 %v6126_v63 }
 0xbda   :  { %5757 = vmatpush1.bf16.msra.mxu0 %v5756_v7  ;;  %5785 = vmatpush1.bf16.msra.mxu1 %v5756_v7 }
 0xbdb   :  { %4138 = vrot.lane.b32.xlu1 %v7564_v8, %s7956_s16  ;;  %5758 = vmatprep.subr.bf16.mxu0 %v6126_v63  ;;  %s8006_s16 = sld [smem:[#allocation23_spill]] }
 0xbdc   :  { %5786 = vmatprep.subr.bf16.mxu1 %v6126_v63 }
 0xbde   :  { %5760 = vmatpush1.bf16.msra.mxu0 %v5759_v27  ;;  %5788 = vmatpush1.bf16.msra.mxu1 %v5759_v27 }
 0xbdf   :  { %5761 = vmatprep.subr.bf16.mxu0 %v6126_v63  ;;  %5789 = vmatprep.subr.bf16.mxu1 %v6126_v63 }
 0xbe2   :  { %5763 = vmatpush1.bf16.msra.mxu0 %v5762_v28  ;;  %5791 = vmatpush1.bf16.msra.mxu1 %v5762_v28 }
 0xbe3   :  { %5764 = vmatprep.subr.bf16.mxu0 %v6126_v63  ;;  %5792 = vmatprep.subr.bf16.mxu1 %v6126_v63 }
 0xbe6   :  { %5767 = vmatpush1.bf16.msk.msra.mxu0 %vm7008_vm14, %v5765_v20  ;;  %5795 = vmatpush1.bf16.msk.msra.mxu1 %vm7008_vm14, %v5793_v23  ;;  %vm7999_vm14 = vcmask 916480   ;;  %v4458_v23 = vld [vmem:[#allocation12 + $0x88] sm:$0xff] }
 0xc35   :  { %v3792_v60 = vpop.permute.xlu0 %3791 }
 0xc3d   :  { %v3794_v29 = vpop.permute.xlu1 %3793  ;;  %v3796_v9 = vpop.permute.xlu0 %3795 }
 0xc3e   :  { %v3799_v17 = vsel %vm126_vm3, %v3792_v60, %v3794_v29  ;;  %v3806_v3 = vmax.f32 %v7513_v59, %v3794_v29 }
 0xc3f   :  { %v3805_v30 = vmax.f32 %v3775_v52, %v3799_v17 }
 0xc40   :  { %3815 = vrot.lane.b32.xlu1 %v3806_v3, %s6131_s26 }
 0xc41   :  { %3813 = vrot.lane.b32.xlu0 %v3805_v30, %s6131_s26  ;;  %v4133_v52 = vpop.permute.xlu0 %4132 }
 0xc45   :  { %v3798_v33 = vpop.permute.xlu1 %3797  ;;  %v4137_v49 = vpop.permute.xlu0 %4136 }
 0xc46   :  { %v3800_v13 = vsel %vm126_vm3, %v3796_v9, %v3798_v33  ;;  %v3808_v32 = vmax.f32 %v7534_v56, %v3798_v33  ;;  %v5796_v33 = vpack.c.bf16 %v4458_v23, %v4457_v2  ;;  %v4498_v23 = vld [vmem:[#allocation12 + $0x1c8] sm:$0xff] }
 0xc47   :  { %v3807_v45 = vmax.f32 %v3777_v58, %v3800_v13  ;;  %v4441_v13 = vld [vmem:[#allocation12] sm:$0xff] }
 0xc48   :  { %3819 = vrot.lane.b32.xlu1 %v3808_v32, %s6131_s26  ;;  %5797 = vmatprep.subr.bf16.mxu0 %v5796_v33 }
 0xc49   :  { %v4135_v46 = vpop.permute.xlu1 %4134  ;;  %3817 = vrot.lane.b32.xlu0 %v3807_v45, %s6131_s26 }
 0xc4a   :  { %v4147_v10 = vmax.f32 %v7552_v40, %v4135_v46  ;;  %v4140_v39 = vsel %vm126_vm3, %v4133_v52, %v4135_v46  ;;  %v4489_v52 = vld [vmem:[#allocation12 + $0x180] sm:$0xff]  ;;  %v4490_v46 = vld [vmem:[#allocation12 + $0x188] sm:$0xff] }
 0xc4b   :  { %v4146_v21 = vmax.f32 %v4116_v34, %v4140_v39  ;;  %v4473_v39 = vld [vmem:[#allocation12 + $0x100] sm:$0xff] }
 0xc4c   :  { %4156 = vrot.lane.b32.xlu1 %v4147_v10, %s6131_s26 }
 0xc4d   :  { %v4139_v61 = vpop.permute.xlu1 %4138  ;;  %4154 = vrot.lane.b32.xlu0 %v4146_v21, %s6131_s26 }
 0xc4e   :  { %v4149_v38 = vmax.f32 %v7564_v8, %v4139_v61  ;;  %v4141_v51 = vsel %vm126_vm3, %v4137_v49, %v4139_v61  ;;  %vm8000_vm3 = vmmov %vm7999_vm14  ;;  %v4459_v49 = vld [vmem:[#allocation12 + $0x90] sm:$0xff] }
 0xc4f   :  { %v4148_v15 = vmax.f32 %v4118_v0, %v4141_v51  ;;  %vm8001_vm15 = vmmov %vm8000_vm3 }
 0xc50   :  { %4160 = vrot.lane.b32.xlu1 %v4149_v38, %s6131_s26  ;;  %vm8002_vm0 = vmmov %vm8000_vm3 }
 0xc51   :  { %4158 = vrot.lane.b32.xlu0 %v4148_v15, %s6131_s26 }
 0xcb2   :  { %v3816_v19 = vpop.permute.xlu1 %3815 }
 0xcb3   :  { %v3828_v55 = vmax.f32 %v3806_v3, %v3816_v19  ;;  %v3814_v34 = vpop.permute.xlu0 %3813 }
 0xcb4   :  { %v3821_v41 = vsel %vm7999_vm14, %v3814_v34, %v3816_v19  ;;  %v4444_v19 = vld [vmem:[#allocation12 + $0x18] sm:$0xff] }
 0xcb5   :  { %v3827_v58 = vmax.f32 %v3805_v30, %v3821_v41  ;;  %4926 = vmatprep.mubr.msk.f32.mxu0 %vm3849_vm10, %v3828_v55  ;;  %v4491_v55 = vld [vmem:[#allocation12 + $0x190] sm:$0xff]  ;;  %v4492_v41 = vld [vmem:[#allocation12 + $0x198] sm:$0xff] }
 0xcb7   :  { %3924 = vmatmul.mubr.f32.vlgmr.msra.gmra.mrb[14].mxu0 %v3827_v58  ;;  %v4475_v58 = vld [vmem:[#allocation12 + $0x110] sm:$0xff] }
 0xcba   :  { %v3820_v50 = vpop.permute.xlu1 %3819 }
 0xcbb   :  { %v3830_v44 = vmax.f32 %v3808_v32, %v3820_v50  ;;  %v3818_v59 = vpop.permute.xlu0 %3817  ;;  %v4442_v32 = vld [vmem:[#allocation12 + $0x8] sm:$0xff] }
 0xcbc   :  { %v3822_v14 = vsel %vm8000_vm3, %v3818_v59, %v3820_v50  ;;  %v5832_v50 = vpack.c.bf16 %v4492_v41, %v4491_v55  ;;  %v4461_v59 = vld [vmem:[#allocation12 + $0xa0] sm:$0xff] }
 0xcbd   :  { %v3829_v0 = vmax.f32 %v3807_v45, %v3822_v14  ;;  %4927 = vmatprep.mubr.msk.f32.mxu0 %vm3849_vm10, %v3830_v44  ;;  %v5798_v45 = vpack.c.bf16 %v4442_v32, %v4441_v13  ;;  %v4476_v44 = vld [vmem:[#allocation12 + $0x118] sm:$0xff]  ;;  %v4481_v13 = vld [vmem:[#allocation12 + $0x140] sm:$0xff]  ;;  %v4482_v32 = vld [vmem:[#allocation12 + $0x148] sm:$0xff] }
 0xcbe   :  { %v4157_v4 = vpop.permute.xlu1 %4156  ;;  %v5834_v14 = vpack.c.bf16 %v4476_v44, %v4475_v58  ;;  %v4469_v41 = vld [vmem:[#allocation12 + $0xe0] sm:$0xff]  ;;  %v4470_v58 = vld [vmem:[#allocation12 + $0xe8] sm:$0xff] }
 0xcbf   :  { %v4169_v11 = vmax.f32 %v4147_v10, %v4157_v4  ;;  %3929 = vmatmul.mubr.f32.gmra.mrb[16].mxu0 %v3829_v0  ;;  %v4155_v43 = vpop.permute.xlu0 %4154  ;;  %v5828_v10 = vpack.c.bf16 %v4490_v46, %v4489_v52  ;;  %v4462_v0 = vld [vmem:[#allocation12 + $0xa8] sm:$0xff]  ;;  %v5846_v46 = vpack.c.bf16 %v4482_v32, %v4481_v13  ;;  %v4453_v44 = vld [vmem:[#allocation12 + $0x60] sm:$0xff] }
 0xcc0   :  { %v4162_v56 = vsel %vm8001_vm15, %v4155_v43, %v4157_v4  ;;  %5799 = vmatpush3.bf16.msra.mxu0 %v5798_v45  ;;  %v4445_v4 = vld [vmem:[#allocation12 + $0x20] sm:$0xff]  ;;  %v5804_v43 = vpack.c.bf16 %v4462_v0, %v4461_v59  ;;  %v4467_v45 = vld [vmem:[#allocation12 + $0xd0] sm:$0xff]  ;;  %v4454_v59 = vld [vmem:[#allocation12 + $0x68] sm:$0xff] }
 0xcc1   :  { %v4168_v26 = vmax.f32 %v4146_v21, %v4162_v56  ;;  %4941 = vmatprep.mubr.msk.f32.mxu1 %vm3849_vm10, %v4169_v11  ;;  %v4474_v21 = vld [vmem:[#allocation12 + $0x108] sm:$0xff]  ;;  %5829 = vmatprep.subr.bf16.mxu1 %v5828_v10  ;;  %v4468_v10 = vld [vmem:[#allocation12 + $0xd8] sm:$0xff] }
 0xcc2   :  { %v4161_v18 = vpop.permute.xlu1 %4160  ;;  %v5830_v61 = vpack.c.bf16 %v4474_v21, %v4473_v39  ;;  %v4446_v56 = vld [vmem:[#allocation12 + $0x28] sm:$0xff]  ;;  %v4451_v39 = vld [vmem:[#allocation12 + $0x50] sm:$0xff]  ;;  %v4452_v21 = vld [vmem:[#allocation12 + $0x58] sm:$0xff] }
 0xcc3   :  { %v4171_v24 = vmax.f32 %v4149_v38, %v4161_v18  ;;  %4264 = vmatmul.mubr.f32.vlgmr.msra.gmra.mrb[14].mxu1 %v4168_v26  ;;  %v4159_v62 = vpop.permute.xlu0 %4158  ;;  %v4460_v38 = vld [vmem:[#allocation12 + $0x98] sm:$0xff]  ;;  %v4493_v26 = vld [vmem:[#allocation12 + $0x1a0] sm:$0xff] }
 0xcc4   :  { %v4163_v5 = vsel %vm8002_vm0, %v4159_v62, %v4161_v18  ;;  %v5800_v51 = vpack.c.bf16 %v4460_v38, %v4459_v49  ;;  %5831 = vmatpush3.bf16.msra.mxu1 %v5830_v61  ;;  %v4494_v62 = vld [vmem:[#allocation12 + $0x1a8] sm:$0xff]  ;;  %v5816_v49 = vpack.c.bf16 %v4468_v10, %v4467_v45  ;;  %v4499_v38 = vld [vmem:[#allocation12 + $0x1d0] sm:$0xff]  ;;  %v6139_v10 = vmov 1983009808  }
 0xcc5   :  { %v4170_v40 = vmax.f32 %v4148_v15, %v4163_v5  ;;  %4942 = vmatprep.mubr.msk.f32.mxu1 %vm3849_vm10, %v4171_v24  ;;  %v4443_v15 = vld [vmem:[#allocation12 + $0x10] sm:$0xff]  ;;  %5833 = vmatprep.subr.bf16.mxu1 %v5832_v50  ;;  %v5806_v24 = vpack.c.bf16 %v4446_v56, %v4445_v4  ;;  %v4477_v5 = vld [vmem:[#allocation12 + $0x120] sm:$0xff]  ;;  %v5820_v50 = vpack.c.bf16 %v4470_v58, %v4469_v41  ;;  %v4502_v4 = vld [vmem:[#allocation12 + $0x1e8] sm:$0xff] }
 0xcc6   :  { %v5802_v34 = vpack.c.bf16 %v4444_v19, %v4443_v15  ;;  %5801 = vmatprep.subr.bf16.mxu0 %v5800_v51  ;;  %v4500_v51 = vld [vmem:[#allocation12 + $0x1d8] sm:$0xff]  ;;  %v4483_v15 = vld [vmem:[#allocation12 + $0x150] sm:$0xff]  ;;  %v5818_v19 = vpack.c.bf16 %v4452_v21, %v4451_v39  ;;  %v4486_v56 = vld [vmem:[#allocation12 + $0x168] sm:$0xff]  ;;  %v4515_v39 = vunpack.c.l.s4 %v6139_v10 }
 0xcc7   :  { %4269 = vmatmul.mubr.f32.gmra.mrb[16].mxu1 %v4170_v40  ;;  %v5848_v55 = vpack.c.bf16 %v4500_v51, %v4499_v38 }
 0xcc8   :  { %5803 = vmatpush3.bf16.msra.mxu0 %v5802_v34  ;;  %5835 = vmatpush3.bf16.msra.mxu1 %v5834_v14  ;;  %v4484_v34 = vld [vmem:[#allocation12 + $0x158] sm:$0xff]  ;;  %v4501_v14 = vld [vmem:[#allocation12 + $0x1e0] sm:$0xff] }
 0xcc9   :  { %5805 = vmatprep.subr.bf16.mxu0 %v5804_v43  ;;  %v5850_v0 = vpack.c.bf16 %v4484_v34, %v4483_v15  ;;  %v5852_v43 = vpack.c.bf16 %v4502_v4, %v4501_v14  ;;  %v4674_v15 = vld [vmem:[%s7860_s15] sm:$0xff]  ;;  %v4679_v4 = vld [vmem:[%s7860_s15 + $0x28] sm:$0xff] }
 0xccc   :  { %5807 = vmatpush3.bf16.msra.mxu0 %v5806_v24 }
 0xd8a   :  { %v3925_v12 = vpop.f32.mrb[14].mxu0 }
 0xd8b   :  { %3934 = vst.msk [vmem:[#allocation7] sm:$0xff] %vm102_vm1, %v3925_v12  ;;  %v3927_v42 = vpop.f32.mrb[15].mxu0  ;;  %v5836_v12 = vpack.c.bf16 %v4494_v62, %v4493_v26  ;;  %v4471_v26 = vld [vmem:[#allocation12 + $0xf0] sm:$0xff]  ;;  %v5822_v62 = vpack.c.bf16 %v4454_v59, %v4453_v44  ;;  %v4676_v44 = vld [vmem:[%s7860_s15 + $0x10] sm:$0xff] }
 0xd8d   :  { %5837 = vmatprep.subr.bf16.mxu1 %v5836_v12 }
 0xd92   :  { %v3936_v53 = vld [vmem:[#allocation7] sm:$0x1]  ;;  %v3981_v8 = vld [vmem:[#allocation7 + $0x4] sm:$0x1]  ;;  %v3930_v1 = vpop.f32.mrb[16].mxu0 }
 0xd93   :  { %3935 = vst.msk [vmem:[#allocation7 + $0x8] sm:$0xff] %vm102_vm1, %v3930_v1  ;;  %v4931_v22 = vld.sshfl [vmem:[#allocation7 + $0x5] sm:$0x1 pattern:$0x76325410]  ;;  %v3932_v54 = vpop.f32.mrb[17].mxu0 }
 0xd94   :  { %3982 = vst.msk [vmem:[#allocation8 + $0x2] sm:$0x1] %vm3937_vm12, %v3981_v8  ;;  %3938 = vst.msk [vmem:[#allocation8] sm:$0x1] %vm3937_vm12, %v3936_v53  ;;  %3992 = vrot.lane.b32.xlu1 %v4931_v22, %s8003_s12  ;;  %v4478_v1 = vld [vmem:[#allocation12 + $0x128] sm:$0xff]  ;;  %v4463_v22 = vld [vmem:[#allocation12 + $0xb0] sm:$0xff] }
 0xd95   :  { %v4928_v6 = vld.sshfl [vmem:[#allocation7 + $0x1] sm:$0x1 pattern:$0x76325410]  ;;  %v5838_v54 = vpack.c.bf16 %v4478_v1, %v4477_v5  ;;  %v4503_v5 = vld [vmem:[#allocation12 + $0x1f0] sm:$0xff] }
 0xd96   :  { %3948 = vrot.lane.b32.xlu0 %v4928_v6, %s8003_s12  ;;  %v4932_v57 = vld.sshfl [vmem:[#allocation7 + $0x6] sm:$0x1 pattern:$0x76325410]  ;;  %v4265_v47 = vpop.f32.mrb[14].mxu1  ;;  %v4464_v6 = vld [vmem:[#allocation12 + $0xb8] sm:$0xff] }
 0xd97   :  { %v4929_v7 = vld.sshfl [vmem:[#allocation7 + $0x2] sm:$0x1 pattern:$0x76325410]  ;;  %v4267_v37 = vpop.f32.mrb[15].mxu1  ;;  %5839 = vmatpush3.bf16.msra.mxu1 %v5838_v54 }
 0xd98   :  { %v4933_v25 = vld.sshfl [vmem:[#allocation7 + $0x7] sm:$0x1 pattern:$0x76325410]  ;;  %4005 = vrot.lane.b32.xlu1 %v4932_v57, %s7947_s1  ;;  %v4447_v57 = vld [vmem:[#allocation12 + $0x30] sm:$0xff] }
 0xd99   :  { %v4930_v27 = vld.sshfl [vmem:[#allocation7 + $0x3] sm:$0x1 pattern:$0x76325410] }
 0xd9a   :  { %3962 = vrot.lane.b32.xlu0 %v4929_v7, %s7947_s1  ;;  %4274 = vst.msk [vmem:[#allocation7] sm:$0xff] %vm102_vm1, %v4265_v47  ;;  %v4022_v16 = vld [vmem:[#allocation7 + $0x8] sm:$0x1]  ;;  %v4063_v31 = vld [vmem:[#allocation7 + $0xc] sm:$0x1]  ;;  %v4270_v28 = vpop.f32.mrb[16].mxu1  ;;  %v5808_v7 = vpack.c.bf16 %v4464_v6, %v4463_v22 }
 0xd9b   :  { %v4272_v48 = vpop.f32.mrb[17].mxu1  ;;  %4023 = vst.msk [vmem:[#allocation8 + $0x4] sm:$0x1] %vm3937_vm12, %v4022_v16  ;;  %4064 = vst.msk [vmem:[#allocation8 + $0x6] sm:$0x1] %vm3937_vm12, %v4063_v31  ;;  %v4448_v47 = vld [vmem:[#allocation12 + $0x38] sm:$0xff] }
 0xd9c   :  { %4018 = vrot.lane.b32.xlu1 %v4933_v25, %s7966_s4  ;;  %v4937_v35 = vld.sshfl [vmem:[#allocation7 + $0xd] sm:$0x1 pattern:$0x76325410]  ;;  %v5810_v37 = vpack.c.bf16 %v4448_v47, %v4447_v57  ;;  %v4480_v48 = vld [vmem:[#allocation12 + $0x138] sm:$0xff]  ;;  %5809 = vmatprep.subr.bf16.mxu0 %v5808_v7 }
 0xd9d   :  { %v4934_v20 = vld.sshfl [vmem:[#allocation7 + $0x9] sm:$0x1 pattern:$0x76325410]  ;;  %v4488_v7 = vld [vmem:[#allocation12 + $0x178] sm:$0xff] }
 0xd9e   :  { %3976 = vrot.lane.b32.xlu0 %v4930_v27, %s7966_s4  ;;  %v4938_v60 = vld.sshfl [vmem:[#allocation7 + $0xe] sm:$0x1 pattern:$0x76325410]  ;;  %v4496_v27 = vld [vmem:[#allocation12 + $0x1b8] sm:$0xff]  ;;  %5811 = vmatpush3.bf16.msra.mxu0 %v5810_v37 }
 0xd9f   :  { %v4935_v29 = vld.sshfl [vmem:[#allocation7 + $0xa] sm:$0x1 pattern:$0x76325410] }
 0xda0   :  { %v4939_v17 = vld.sshfl [vmem:[#allocation7 + $0xf] sm:$0x1 pattern:$0x76325410]  ;;  %4074 = vrot.lane.b32.xlu1 %v4937_v35, %s8003_s12  ;;  %v4465_v35 = vld [vmem:[#allocation12 + $0xc0] sm:$0xff] }
 0xda1   :  { %v4936_v3 = vld.sshfl [vmem:[#allocation7 + $0xb] sm:$0x1 pattern:$0x76325410]  ;;  %v4317_v30 = vld [vmem:[#allocation7 + $0x4] sm:$0x1] }
 0xda2   :  { %4033 = vrot.lane.b32.xlu0 %v4934_v20, %s8003_s12  ;;  %4275 = vst.msk [vmem:[#allocation7 + $0x8] sm:$0xff] %vm102_vm1, %v4270_v28  ;;  %v4276_v9 = vld [vmem:[#allocation7] sm:$0x1]  ;;  %v4495_v25 = vld [vmem:[#allocation12 + $0x1b0] sm:$0xff]  ;;  %vm3951_vm1 = vcmask 516352  }
 0xda3   :  { %4318 = vst.msk [vmem:[#allocation8 + $0x3] sm:$0x1] %vm3937_vm12, %v4317_v30  ;;  %4277 = vst.msk [vmem:[#allocation8 + $0x1] sm:$0x1] %vm3937_vm12, %v4276_v9  ;;  %v4479_v16 = vld [vmem:[#allocation12 + $0x130] sm:$0xff]  ;;  %v5840_v28 = vpack.c.bf16 %v4496_v27, %v4495_v25  ;;  %v4466_v20 = vld [vmem:[#allocation12 + $0xc8] sm:$0xff] }
 0xda4   :  { %4087 = vrot.lane.b32.xlu1 %v4938_v60, %s7947_s1  ;;  %v4946_v11 = vld.sshfl [vmem:[#allocation7 + $0x5] sm:$0x1 pattern:$0x76325410]  ;;  %v5842_v60 = vpack.c.bf16 %v4480_v48, %v4479_v16  ;;  %v4497_v30 = vld [vmem:[#allocation12 + $0x1c0] sm:$0xff]  ;;  %v4487_v47 = vld [vmem:[#allocation12 + $0x170] sm:$0xff] }
 0xda5   :  { %v4943_v18 = vld.sshfl [vmem:[#allocation7 + $0x1] sm:$0x1 pattern:$0x76325410]  ;;  %5841 = vmatprep.subr.bf16.mxu1 %v5840_v28  ;;  %v5844_v33 = vpack.c.bf16 %v4498_v23, %v4497_v30  ;;  %v5858_v37 = vpack.c.bf16 %v4488_v7, %v4487_v47  ;;  %v4768_v47 = vld [vmem:[%s7862_s17 + $0x8] sm:$0xff] }
 0xda6   :  { %4046 = vrot.lane.b32.xlu0 %v4935_v29, %s7947_s1  ;;  %v4947_v40 = vld.sshfl [vmem:[#allocation7 + $0x6] sm:$0x1 pattern:$0x76325410]  ;;  %v5812_v29 = vpack.c.bf16 %v4466_v20, %v4465_v35  ;;  %5843 = vmatpush3.bf16.msra.mxu1 %v5842_v60 }
 0xda7   :  { %v4944_v53 = vld.sshfl [vmem:[#allocation7 + $0x2] sm:$0x1 pattern:$0x76325410]  ;;  %5845 = vmatprep.subr.bf16.mxu1 %v5844_v33 }
 0xda8   :  { %4100 = vrot.lane.b32.xlu1 %v4939_v17, %s7966_s4  ;;  %v4948_v31 = vld.sshfl [vmem:[#allocation7 + $0x7] sm:$0x1 pattern:$0x76325410]  ;;  %v4449_v17 = vld [vmem:[#allocation12 + $0x40] sm:$0xff]  ;;  %5813 = vmatprep.subr.bf16.mxu0 %v5812_v29 }
 0xda9   :  { %v4399_v42 = vld [vmem:[#allocation7 + $0xc] sm:$0x1]  ;;  %v4358_v8 = vld [vmem:[#allocation7 + $0x8] sm:$0x1]  ;;  %v4769_v7 = vld [vmem:[%s7862_s17 + $0x10] sm:$0xff] }
 0xdaa   :  { %4059 = vrot.lane.b32.xlu0 %v4936_v3, %s7966_s4  ;;  %4400 = vst.msk [vmem:[#allocation8 + $0x7] sm:$0x1] %vm3937_vm12, %v4399_v42  ;;  %4359 = vst.msk [vmem:[#allocation8 + $0x5] sm:$0x1] %vm3937_vm12, %v4358_v8  ;;  %v4450_v3 = vld [vmem:[#allocation12 + $0x48] sm:$0xff]  ;;  %5847 = vmatpush3.bf16.msra.mxu1 %v5846_v46  ;;  %v4456_v8 = vld [vmem:[#allocation12 + $0x78] sm:$0xff] }
 0xdab   :  { %v4945_v9 = vld.sshfl [vmem:[#allocation7 + $0x3] sm:$0x1 pattern:$0x76325410]  ;;  %v5814_v2 = vpack.c.bf16 %v4450_v3, %v4449_v17  ;;  %5849 = vmatprep.subr.bf16.mxu1 %v5848_v55 }
 0xdac   :  { %4328 = vrot.lane.b32.xlu1 %v4946_v11, %s8003_s12  ;;  %v4952_v52 = vld.sshfl [vmem:[#allocation7 + $0xd] sm:$0x1 pattern:$0x76325410]  ;;  %v4485_v11 = vld [vmem:[#allocation12 + $0x160] sm:$0xff] }
 0xdad   :  { %v4949_v61 = vld.sshfl [vmem:[#allocation7 + $0x9] sm:$0x1 pattern:$0x76325410]  ;;  %5815 = vmatpush3.bf16.msra.mxu0 %v5814_v2  ;;  %v5854_v1 = vpack.c.bf16 %v4486_v56, %v4485_v11  ;;  %v6026_v11 = vld [vmem:[#allocation5 + $0x130] sm:$0xff]  ;;  %v4680_v56 = vld [vmem:[%s7860_s15 + $0x30] sm:$0xff] }
 0xdae   :  { %4287 = vrot.lane.b32.xlu0 %v4943_v18, %s8003_s12  ;;  %5817 = vmatprep.subr.bf16.mxu0 %v5816_v49  ;;  %v4472_v18 = vld [vmem:[#allocation12 + $0xf8] sm:$0xff]  ;;  %v4953_v24 = vld.sshfl [vmem:[#allocation7 + $0xe] sm:$0x1 pattern:$0x76325410]  ;;  %v4516_v49 = vunpack.c.0.s8 %v4515_v39 }
 0xdaf   :  { %v4950_v12 = vld.sshfl [vmem:[#allocation7 + $0xa] sm:$0x1 pattern:$0x76325410]  ;;  %v5824_v42 = vpack.c.bf16 %v4472_v18, %v4471_v26  ;;  %5851 = vmatpush3.bf16.msra.mxu1 %v5850_v0  ;;  %v4678_v0 = vld [vmem:[%s7860_s15 + $0x20] sm:$0xff] }
 0xdb0   :  { %4341 = vrot.lane.b32.xlu1 %v4947_v40, %s7947_s1  ;;  %v4504_v40 = vld [vmem:[#allocation12 + $0x1f8] sm:$0xff]  ;;  %5853 = vmatprep.subr.bf16.mxu1 %v5852_v43  ;;  %v4954_v54 = vld.sshfl [vmem:[#allocation7 + $0xf] sm:$0x1 pattern:$0x76325410]  ;;  %v4519_v38 = vsub.s32 %v4516_v49, %v6792_v36  ;;  %v5867_v43 = vpack.c.bf16 %v4679_v4, %v4678_v0  ;;  %v4781_v49 = vld [vmem:[%s7862_s17 + $0x70] sm:$0xff] }
 0xdb1   :  { %5819 = vmatpush3.bf16.msra.mxu0 %v5818_v19  ;;  %v5856_v22 = vpack.c.bf16 %v4504_v40, %v4503_v5  ;;  %v4951_v57 = vld.sshfl [vmem:[#allocation7 + $0xb] sm:$0x1 pattern:$0x76325410]  ;;  %v4675_v19 = vld [vmem:[%s7860_s15 + $0x8] sm:$0xff]  ;;  %v4684_v40 = vld [vmem:[%s7860_s15 + $0x50] sm:$0xff] }
 0xdb2   :  { %4300 = vrot.lane.b32.xlu0 %v4944_v53, %s7947_s1  ;;  %5821 = vmatprep.subr.bf16.mxu0 %v5820_v50  ;;  %v4455_v53 = vld [vmem:[#allocation12 + $0x70] sm:$0xff]  ;;  %v5861_v50 = vpack.c.bf16 %v4675_v19, %v4674_v15 }
 0xdb3   :  { %v5826_v6 = vpack.c.bf16 %v4456_v8, %v4455_v53  ;;  %5855 = vmatpush3.bf16.msra.mxu1 %v5854_v1  ;;  %v4677_v36 = vld [vmem:[%s7860_s15 + $0x18] sm:$0xff]  ;;  %v4686_v53 = vld [vmem:[%s7860_s15 + $0x60] sm:$0xff]  ;;  %v4687_v8 = vld [vmem:[%s7860_s15 + $0x68] sm:$0xff] }
 0xdb4   :  { %4354 = vrot.lane.b32.xlu1 %v4948_v31, %s7966_s4  ;;  %5857 = vmatprep.subr.bf16.mxu1 %v5856_v22  ;;  %v5864_v14 = vpack.c.bf16 %v4677_v36, %v4676_v44  ;;  %v4681_v26 = vld [vmem:[%s7860_s15 + $0x38] sm:$0xff]  ;;  %v5879_v1 = vpack.c.bf16 %v4687_v8, %v4686_v53  ;;  %v4688_v22 = vld [vmem:[%s7860_s15 + $0x70] sm:$0xff] }
 0xdb5   :  { %5823 = vmatpush3.bf16.msra.mxu0 %v5822_v62  ;;  %v5870_v18 = vpack.c.bf16 %v4681_v26, %v4680_v56  ;;  %v4683_v62 = vld [vmem:[%s7860_s15 + $0x48] sm:$0xff] }
 0xdb6   :  { %4313 = vrot.lane.b32.xlu0 %v4945_v9, %s7966_s4  ;;  %5825 = vmatprep.subr.bf16.mxu0 %v5824_v42 }
 0xdb7   :  { %5859 = vmatpush3.bf16.msra.mxu1 %v5858_v37 }
 0xdb8   :  { %4410 = vrot.lane.b32.xlu1 %v4952_v52, %s8003_s12  ;;  %5884 = vmatprep.subr.bf16.mxu1 %v6126_v63 }
 0xdb9   :  { %5827 = vmatpush3.bf16.msra.mxu0 %v5826_v6 }
 0xdba   :  { %4369 = vrot.lane.b32.xlu0 %v4949_v61, %s8003_s12  ;;  %5860 = vmatprep.subr.bf16.mxu0 %v6126_v63 }
 0xdbc   :  { %4423 = vrot.lane.b32.xlu1 %v4953_v24, %s7947_s1  ;;  %v4682_v24 = vld [vmem:[%s7860_s15 + $0x40] sm:$0xff] }
 0xdbd   :  { %v5873_v5 = vpack.c.bf16 %v4683_v62, %v4682_v24 }
 0xdbe   :  { %4382 = vrot.lane.b32.xlu0 %v4950_v12, %s7947_s1  ;;  %v4685_v12 = vld [vmem:[%s7860_s15 + $0x58] sm:$0xff] }
 0xdbf   :  { %v5876_v42 = vpack.c.bf16 %v4685_v12, %v4684_v40 }
 0xdc0   :  { %4436 = vrot.lane.b32.xlu1 %v4954_v54, %s7966_s4  ;;  %v4689_v54 = vld [vmem:[%s7860_s15 + $0x78] sm:$0xff] }
 0xdc1   :  { %v5882_v6 = vpack.c.bf16 %v4689_v54, %v4688_v22 }
 0xdc2   :  { %4395 = vrot.lane.b32.xlu0 %v4951_v57, %s7966_s4  ;;  %v4767_v57 = vld [vmem:[%s7862_s17] sm:$0xff] }
 0xdc3   :  { %v5885_v37 = vpack.c.bf16 %v4768_v47, %v4767_v57 }
 0xe06   :  { %v3993_v25 = vpop.permute.xlu1 %3992 }
 0xe07   :  { %3995 = vst.msk [vmem:[#allocation8 + $0x2] sm:$0x1] %vm3951_vm1, %v3993_v25  ;;  %v4770_v25 = vld [vmem:[%s7862_s17 + $0x18] sm:$0xff] }
 0xe08   :  { %v3949_v27 = vpop.permute.xlu0 %3948 }
 0xe09   :  { %3952 = vst.msk [vmem:[#allocation8] sm:$0x1] %vm3951_vm1, %v3949_v27  ;;  %v5888_v27 = vpack.c.bf16 %v4770_v25, %v4769_v7 }
 0xe0a   :  { %v4006_v16 = vpop.permute.xlu1 %4005 }
 0xe0b   :  { %4008 = vst.msk [vmem:[#allocation8 + $0x2] sm:$0x1] %vm3965_vm7, %v4006_v16  ;;  %v4771_v16 = vld [vmem:[%s7862_s17 + $0x20] sm:$0xff] }
 0xe0c   :  { %v3963_v31 = vpop.permute.xlu0 %3962 }
 0xe0d   :  { %3966 = vst.msk [vmem:[#allocation8] sm:$0x1] %vm3965_vm7, %v3963_v31  ;;  %v4772_v31 = vld [vmem:[%s7862_s17 + $0x28] sm:$0xff] }
 0xe0e   :  { %v4019_v28 = vpop.permute.xlu1 %4018 }
 0xe0f   :  { %4021 = vst.msk [vmem:[#allocation8 + $0x2] sm:$0x1] %vm3979_vm6, %v4019_v28  ;;  %v5891_v28 = vpack.c.bf16 %v4772_v31, %v4771_v16 }
 0xe10   :  { %v3977_v48 = vpop.permute.xlu0 %3976 }
 0xe11   :  { %3980 = vst.msk [vmem:[#allocation8] sm:$0x1] %vm3979_vm6, %v3977_v48  ;;  %v4773_v48 = vld [vmem:[%s7862_s17 + $0x30] sm:$0xff] }
 0xe12   :  { %v4075_v35 = vpop.permute.xlu1 %4074 }
 0xe13   :  { %4077 = vst.msk [vmem:[#allocation8 + $0x6] sm:$0x1] %vm3951_vm1, %v4075_v35  ;;  %v4774_v35 = vld [vmem:[%s7862_s17 + $0x38] sm:$0xff] }
 0xe14   :  { %v4034_v20 = vpop.permute.xlu0 %4033 }
 0xe15   :  { %4036 = vst.msk [vmem:[#allocation8 + $0x4] sm:$0x1] %vm3951_vm1, %v4034_v20  ;;  %v5894_v20 = vpack.c.bf16 %v4774_v35, %v4773_v48 }
 0xe16   :  { %v4088_v60 = vpop.permute.xlu1 %4087 }
 0xe17   :  { %4090 = vst.msk [vmem:[#allocation8 + $0x6] sm:$0x1] %vm3965_vm7, %v4088_v60  ;;  %v4775_v60 = vld [vmem:[%s7862_s17 + $0x40] sm:$0xff] }
 0xe18   :  { %v4047_v29 = vpop.permute.xlu0 %4046 }
 0xe19   :  { %4049 = vst.msk [vmem:[#allocation8 + $0x4] sm:$0x1] %vm3965_vm7, %v4047_v29  ;;  %v4776_v29 = vld [vmem:[%s7862_s17 + $0x48] sm:$0xff] }
 0xe1a   :  { %v4101_v17 = vpop.permute.xlu1 %4100 }
 0xe1b   :  { %4103 = vst.msk [vmem:[#allocation8 + $0x6] sm:$0x1] %vm3979_vm6, %v4101_v17  ;;  %v5897_v17 = vpack.c.bf16 %v4776_v29, %v4775_v60 }
 0xe1c   :  { %v4060_v3 = vpop.permute.xlu0 %4059 }
 0xe1d   :  { %4062 = vst.msk [vmem:[#allocation8 + $0x4] sm:$0x1] %vm3979_vm6, %v4060_v3  ;;  %v4777_v3 = vld [vmem:[%s7862_s17 + $0x50] sm:$0xff] }
 0xe1e   :  { %v4329_v30 = vpop.permute.xlu1 %4328 }
 0xe1f   :  { %4331 = vst.msk [vmem:[#allocation8 + $0x3] sm:$0x1] %vm3951_vm1, %v4329_v30  ;;  %v4778_v30 = vld [vmem:[%s7862_s17 + $0x58] sm:$0xff] }
 0xe20   :  { %v4288_v9 = vpop.permute.xlu0 %4287 }
 0xe21   :  { %4290 = vst.msk [vmem:[#allocation8 + $0x1] sm:$0x1] %vm3951_vm1, %v4288_v9  ;;  %v5900_v9 = vpack.c.bf16 %v4778_v30, %v4777_v3 }
 0xe22   :  { %v4342_v2 = vpop.permute.xlu1 %4341 }
 0xe23   :  { %4344 = vst.msk [vmem:[#allocation8 + $0x3] sm:$0x1] %vm3965_vm7, %v4342_v2  ;;  %v4779_v2 = vld [vmem:[%s7862_s17 + $0x60] sm:$0xff] }
 0xe24   :  { %v4301_v23 = vpop.permute.xlu0 %4300 }
 0xe25   :  { %4303 = vst.msk [vmem:[#allocation8 + $0x1] sm:$0x1] %vm3965_vm7, %v4301_v23  ;;  %v4780_v23 = vld [vmem:[%s7862_s17 + $0x68] sm:$0xff] }
 0xe26   :  { %v4355_v33 = vpop.permute.xlu1 %4354 }
 0xe27   :  { %4357 = vst.msk [vmem:[#allocation8 + $0x3] sm:$0x1] %vm3979_vm6, %v4355_v33  ;;  %v5903_v33 = vpack.c.bf16 %v4780_v23, %v4779_v2 }
 0xe28   :  { %v4314_v13 = vpop.permute.xlu0 %4313 }
 0xe29   :  { %4316 = vst.msk [vmem:[#allocation8 + $0x1] sm:$0x1] %vm3979_vm6, %v4314_v13 }
 0xe2a   :  { %v4411_v32 = vpop.permute.xlu1 %4410 }
 0xe2b   :  { %4413 = vst.msk [vmem:[#allocation8 + $0x7] sm:$0x1] %vm3951_vm1, %v4411_v32  ;;  %v4955_v32 = vld [vmem:[%s8005_s2] ss:$0 sm:$0xff] }
 0xe2c   :  { %v4370_v45 = vpop.permute.xlu0 %4369 }
 0xe2d   :  { %4372 = vst.msk [vmem:[#allocation8 + $0x5] sm:$0x1] %vm3951_vm1, %v4370_v45 }
 0xe2e   :  { %v4424_v52 = vpop.permute.xlu1 %4423 }
 0xe2f   :  { %4426 = vst.msk [vmem:[#allocation8 + $0x7] sm:$0x1] %vm3965_vm7, %v4424_v52 }
 0xe30   :  { %v4383_v46 = vpop.permute.xlu0 %4382 }
 0xe31   :  { %4385 = vst.msk [vmem:[#allocation8 + $0x5] sm:$0x1] %vm3965_vm7, %v4383_v46 }
 0xe32   :  { %v4437_v21 = vpop.permute.xlu1 %4436 }
 0xe33   :  { %4439 = vst.msk [vmem:[#allocation8 + $0x7] sm:$0x1] %vm3979_vm6, %v4437_v21 }
 0xe34   :  { %v4396_v61 = vpop.permute.xlu0 %4395 }
 0xe35   :  { %4398 = vst.msk [vmem:[#allocation8 + $0x5] sm:$0x1] %vm3979_vm6, %v4396_v61 }
 0xe3c   :  { %v4440_v51 = vld [vmem:[#allocation8] sm:$0xff] }
 0xe3d   :  { %v4520_v55 = vrot.slane %v4440_v51, %v4519_v38  ;;  %v4513_v34 = vcombine.high %v4440_v51, %v4440_v51  ;;  %v4956_v51 = vld [vmem:[%s8006_s16] ss:$0 sm:$0xff] }
 0xe3f   :  { %v4528_v41 = vcombine.high %v4520_v55, %v4520_v55  ;;  %v4527_v58 = vrot.slane %v4513_v34, %v4519_v38  ;;  %v4957_v34 = vld [vmem:[%s8007_s27] ss:$0 sm:$0xff] }
 0xe41   :  { %4598 = vmatprep.mubr.f32.mxu0 %v4528_v41  ;;  %v4529_v59 = vcombine.high %v4527_v58, %v4527_v58 }
 0xe42   :  { %4599 = vmatmul.mubr.f32.vlgmr.msra.gmra.mrb[18].mxu0 %v4520_v55 }
 0xe43   :  { %4668 = vmatprep.mubr.f32.mxu1 %v4529_v59  ;;  %5862 = vmatpush3.bf16.msra.mxu0 %v5861_v50 }
 0xe44   :  { %4669 = vmatmul.mubr.f32.vlgmr.msra.gmra.mrb[18].mxu1 %v4527_v58  ;;  %5863 = vmatprep.subr.bf16.mxu0 %v6126_v63 }
 0xe45   :  { %5126 = vmatprep.mubr.msk.f32.mxu0 %vm8004_vm4, %v6026_v11  ;;  %5161 = vmatprep.mubr.msk.f32.mxu1 %vm8004_vm4, %v6026_v11 }
 0xe46   :  { %5886 = vmatpush3.bf16.msra.mxu1 %v5885_v37 }
 0xe47   :  { %5865 = vmatpush3.bf16.msra.mxu0 %v5864_v14  ;;  %5887 = vmatprep.subr.bf16.mxu1 %v6126_v63 }
 0xe48   :  { %5866 = vmatprep.subr.bf16.mxu0 %v6126_v63 }
 0xe4a   :  { %5889 = vmatpush3.bf16.msra.mxu1 %v5888_v27 }
 0xe4b   :  { %5868 = vmatpush3.bf16.msra.mxu0 %v5867_v43  ;;  %5890 = vmatprep.subr.bf16.mxu1 %v6126_v63 }
 0xe4c   :  { %5869 = vmatprep.subr.bf16.mxu0 %v6126_v63 }
 0xe4e   :  { %5892 = vmatpush3.bf16.msra.mxu1 %v5891_v28 }
 0xe4f   :  { %5871 = vmatpush3.bf16.msra.mxu0 %v5870_v18  ;;  %5893 = vmatprep.subr.bf16.mxu1 %v6126_v63 }
 0xe50   :  { %5872 = vmatprep.subr.bf16.mxu0 %v6126_v63 }
 0xe52   :  { %5895 = vmatpush3.bf16.msra.mxu1 %v5894_v20 }
 0xe53   :  { %5874 = vmatpush3.bf16.msra.mxu0 %v5873_v5  ;;  %5896 = vmatprep.subr.bf16.mxu1 %v6126_v63 }
 0xe54   :  { %5875 = vmatprep.subr.bf16.mxu0 %v6126_v63 }
 0xe56   :  { %5898 = vmatpush3.bf16.msra.mxu1 %v5897_v17 }
 0xe57   :  { %5877 = vmatpush3.bf16.msra.mxu0 %v5876_v42  ;;  %5899 = vmatprep.subr.bf16.mxu1 %v6126_v63 }
 0xe58   :  { %5878 = vmatprep.subr.bf16.mxu0 %v6126_v63 }
 0xe5a   :  { %5901 = vmatpush3.bf16.msra.mxu1 %v5900_v9 }
 0xe5b   :  { %5880 = vmatpush3.bf16.msra.mxu0 %v5879_v1  ;;  %5902 = vmatprep.subr.bf16.mxu1 %v6126_v63 }
 0xe5c   :  { %5881 = vmatprep.subr.bf16.mxu0 %v6126_v63 }
 0xe5e   :  { %5904 = vmatpush3.bf16.msra.mxu1 %v5903_v33 }
 0xe5f   :  { %5883 = vmatpush3.bf16.msra.mxu0 %v5882_v6  ;;  %5905 = vmatprep.subr.bf16.mxu1 %v6126_v63  ;;  %v4782_v63 = vld [vmem:[%s7862_s17 + $0x78] sm:$0xff]  ;;  %s6071_s17 = scalar_lea.vmem %s4868_s21, 32 }
 0xe60   :  { %v5906_v38 = vpack.c.bf16 %v4782_v63, %v4781_v49  ;;  %p6072_p2 = scmp.ne.s32.totalorder %s4868_s21, %s6071_s17  ;;  %p6077_p4 = scmp.lt.s32.totalorder %s6071_s17, %s6071_s17 }
 0xe62   :  { %5907 = vmatpush3.bf16.msra.mxu1 %v5906_v38  ;;  %p6078_p5 = por %p6077_p4, %p6076_p3 }
 0xe64   :  { %p6079_p6 = pnand %p6078_p5, %p6072_p2 }
 0xf15   :  { %v5000_v13 = vpop.f32.mrb[18].mxu0 }
 0xf16   :  { %v5001_v45 = vpop.f32.mrb[19].mxu0 }
 0xf17   :  { %v5002_v52 = vadd.f32 %v5001_v45, %v5000_v13  ;;  %v5035_v46 = vpop.f32.mrb[18].mxu1 }
 0xf18   :  { %v5036_v10 = vpop.f32.mrb[19].mxu1 }
 0xf19   :  { %v4601_v39 = vadd.f32 %v5002_v52, %v4955_v32  ;;  %v5037_v21 = vadd.f32 %v5036_v10, %v5035_v46 }
 0xf1b   :  { %v4671_v61 = vadd.f32 %v5037_v21, %v4601_v39 }
 0xf1d   :  { %5127 = vmatmul.mubr.f32.vlgmr.msra.gmra.mrb[20].mxu0 %v4671_v61 }
 0xff0   :  { %v4763_v15 = vpop.f32.mrb[20].mxu0 }
 0xff1   :  { %v4764_v19 = vadd.f32 %v4956_v51, %v4763_v15  ;;  %v5128_v55 = vpop.f32.mrb[21].mxu0 }
 0xff3   :  { %5162 = vmatmul.mubr.f32.vlgmr.msra.gmra.mrb[20].mxu1 %v4764_v19 }
0x10c6   :  { %v4856_v41 = vpop.f32.mrb[20].mxu1 }
0x10c7   :  { %v4857_v58 = vadd.f32 %v4957_v34, %v4856_v41  ;;  %v5163_v50 = vpop.f32.mrb[21].mxu1 }
0x10c9   :  { %4860 = vst [vmem:[#allocation14] sm:$0x3] %v4857_v58 }
0x10ca   :  { %6082 = shalt.err (!%p6079_p6)
}
0x10cb   :  { %s8008_s28 = sld [smem:[#allocation25_spill]] }
0x10d1   :  { %s6083_s3 = scalar_lea.hbm %s8008_s28, 32 }
0x10d2   :  { %p6084_p7 = scmp.ne.s32.totalorder %s8008_s28, %s6083_s3  ;;  %p6087_p8 = scmp.lt.u32.totalorder %s6083_s3, %s8008_s28 }
0x10d4   :  { %p6089_p9 = pnand %p6087_p8, %p6084_p7 }
0x10d6   :  { %6092 = shalt.err (!%p6089_p9)
}
0x10d7   :  { %4870 = dma.vmem_to_hbm [thread:$0]  %s4868_s21, 32, %s8008_s28, [#allocation11]  }
0x10d8   :  { %6097 = dma.done.wait [#allocation11], 32  }
0x10d9   :  { %6098 = vsyncadd [#allocation11], 4294967264 }
0x10da   :  { %4874 = vsyncpa [#allocation10], 1 }
0x10db   :  { %4875 = vsyncpa [#allocation13], 1 }
0x10dc   :  { %4876 = vsyncpa [#allocation11], 1 }

</bundles_post_ra>
